<compile_context>
chip_gen: v5e
topology: v5e:2x2
jax: 0.10.0
libtpu: 0.0.40
codegen_flags: <defaults>
</compile_context>

<pallas_src>
import numpy as np
import jax
import jax.numpy as jnp
from jax.experimental import pallas as pl
from jax.experimental.pallas import tpu as pltpu


def _round_up(n, m):
    return ((n + m - 1) // m) * m


# ----------------------------------------------------------------------------
# Host-side weight preprocessing (pure numpy, done once per call).
# ----------------------------------------------------------------------------
def _build_w1_banded(w1):
    # w1: (10, 1, 5, 5). Output W[kh, w, j*10 + o] = w1[o, 0, kh, w - j].
    w1 = np.asarray(w1, np.float32)
    W = np.zeros((5, 28, 240), np.float32)
    for kh in range(5):
        for j in range(24):
            for kw in range(5):
                W[kh, j + kw, j * 10:(j + 1) * 10] = w1[:, 0, kh, kw]
    return W


def _build_w2_banded(w2):
    # w2: (20, 10, 5, 5). Input cols of a pooled conv1 row are 20*j2 + ic
    # (the odd 10-lane groups are pooling garbage and get zero rows).
    # Output W[kh*240 + 20*j2 + ic, 20*j2p + oc] = w2[oc, ic, kh, j2 - j2p].
    w2 = np.asarray(w2, np.float32)
    W = np.zeros((5, 240, 160), np.float32)
    for kh in range(5):
        for j2p in range(8):
            for kw in range(5):
                j2 = j2p + kw
                W[kh, 20 * j2:20 * j2 + 10, 20 * j2p:20 * j2p + 20] = \
                    w2[:, :, kh, kw].T
    return W.reshape(5 * 240, 160)


def _build_fc_eff(fc_w):
    # fc_w: (10, 320), PyTorch flatten order (C=20, H=4, W=4).
    # Pooled conv2 rows have valid cols 40*j2f + oc (odd 20-groups are garbage).
    fc_w = np.asarray(fc_w, np.float32)
    W = np.zeros((4, 160, 10), np.float32)
    for i2f in range(4):
        for j2f in range(4):
            for oc in range(20):
                W[i2f, 40 * j2f + oc, :] = fc_w[:, oc * 16 + i2f * 4 + j2f]
    return W


# ----------------------------------------------------------------------------
# Fused kernel: conv1+pool+relu -> conv2+pool+relu -> fc -> log_softmax
# ----------------------------------------------------------------------------
def _shift_left(x, k):
    # out[..., l] = x[..., (l + k) % n]; wrapped lanes only land in columns
    # that are pooling garbage anyway.
    return jnp.concatenate([x[..., k:], x[..., :k]], axis=-1)


def net_kernel(x_ref, w1_ref, w2_ref, fc_ref, b_ref, o_ref):
    BT = x_ref.shape[0]
    x = x_ref[...]                                   # (BT, 28, 28) f32

    # ---- conv1: 5 banded matmuls over the W axis (MXU), rows = (b, i) ----
    acc1 = jnp.zeros((BT * 24, 240), jnp.float32)
    for kh in range(5):
        xs = x[:, kh:kh + 24, :].reshape(BT * 24, 28).astype(jnp.bfloat16)
        acc1 = acc1 + jnp.dot(xs, w1_ref[kh],
                              preferred_element_type=jnp.float32)
    c1 = acc1.reshape(BT, 24, 240)                   # cols = j*10 + o

    # ---- 2x2 max-pool + relu (pool commutes with relu) ----
    c1 = jnp.maximum(c1, _shift_left(c1, 10))        # width pool (j, j+1)
    h1 = []                                          # 12 pooled rows, (BT, 240)
    for i2 in range(12):
        r = jnp.maximum(c1[:, 2 * i2, :], c1[:, 2 * i2 + 1, :])   # height pool
        h1.append(jnp.maximum(r, 0.0).astype(jnp.bfloat16))

    # ---- conv2: one (BT, 1200) x (1200, 160) matmul per output row ----
    w2 = w2_ref[...]                                 # (1200, 160) bf16
    c2 = []
    for i2p in range(8):
        hcat = jnp.concatenate([h1[i2p + kh] for kh in range(5)], axis=-1)
        c2.append(jnp.dot(hcat, w2, preferred_element_type=jnp.float32))

    # ---- 2x2 max-pool + relu + fc (flatten/permutation baked into fc_ref) ----
    acc = jnp.zeros((BT, 10), jnp.float32)
    for i2f in range(4):
        t = jnp.maximum(c2[2 * i2f], c2[2 * i2f + 1])     # height pool
        t = jnp.maximum(t, _shift_left(t, 20))            # width pool
        h2 = jnp.maximum(t, 0.0)                          # valid cols: 40*j2f+oc
        acc = acc + jnp.dot(h2, fc_ref[i2f],
                            preferred_element_type=jnp.float32)
    logits = acc + b_ref[...]                             # (BT, 10)

    # ---- log_softmax (no padded logit columns -> no masking needed) ----
    m = jnp.max(logits, axis=-1, keepdims=True)
    z = logits - m
    lse = jnp.log(jnp.sum(jnp.exp(z), axis=-1, keepdims=True))
    o_ref[...] = z - lse


# ----------------------------------------------------------------------------
# Wrapper
# ----------------------------------------------------------------------------
def net_forward(x, w1, w2, fc_w, fc_b, *, block_b=128):
    B = int(x.shape[0])
    assert tuple(x.shape[1:]) == (1, 28, 28)

    bt = min(block_b, _round_up(B, 8))
    b_pad = _round_up(B, bt)

    xs = jnp.asarray(x, jnp.float32).reshape(B, 28, 28)
    if b_pad != B:
        xs = jnp.pad(xs, ((0, b_pad - B), (0, 0), (0, 0)))

    w1b = jnp.asarray(_build_w1_banded(w1), jnp.bfloat16)    # (5, 28, 240)
    w2b = jnp.asarray(_build_w2_banded(w2), jnp.bfloat16)    # (1200, 160)
    fcw = jnp.asarray(_build_fc_eff(fc_w), jnp.float32)      # (4, 160, 10)
    fcb = jnp.asarray(fc_b, jnp.float32).reshape(1, 10)

    out = pl.pallas_call(
        net_kernel,
        out_shape=jax.ShapeDtypeStruct((b_pad, 10), jnp.float32),
        grid=(b_pad // bt,),
        in_specs=[
            pl.BlockSpec((bt, 28, 28), lambda b: (b, 0, 0)),
            pl.BlockSpec((5, 28, 240), lambda b: (0, 0, 0)),
            pl.BlockSpec((1200, 160), lambda b: (0, 0)),
            pl.BlockSpec((4, 160, 10), lambda b: (0, 0, 0)),
            pl.BlockSpec((1, 10), lambda b: (0, 0)),
        ],
        out_specs=pl.BlockSpec((bt, 10), lambda b: (b, 0)),
        compiler_params=pltpu.CompilerParams(
            dimension_semantics=("parallel",),
            vmem_limit_bytes=48 * 1024 * 1024,
        ),
    )(xs, w1b, w2b, fcw, fcb)
    return out[:B]


# ----------------------------------------------------------------------------
# Pure-JAX reference (for a loose correctness check).
# ----------------------------------------------------------------------------
def _maxpool2(x):
    return jax.lax.reduce_window(x, -jnp.inf, jax.lax.max,
                                 (1, 1, 2, 2), (1, 1, 2, 2), 'VALID')


def reference_forward(x, w1, w2, fc_w, fc_b):
    dn = ('NCHW', 'OIHW', 'NCHW')
    c1 = jax.lax.conv_general_dilated(x, w1, (1, 1), 'VALID',
                                      dimension_numbers=dn)
    h1 = jax.nn.relu(_maxpool2(c1))
    c2 = jax.lax.conv_general_dilated(h1, w2, (1, 1), 'VALID',
                                      dimension_numbers=dn)
    h2 = jax.nn.relu(_maxpool2(c2))
    flat = h2.reshape(x.shape[0], -1)
    logits = flat @ fc_w.T + fc_b
    return jax.nn.log_softmax(logits, axis=-1)


if __name__ == "__main__":
    key = jax.random.PRNGKey(0)
    k_x, k_w1, k_w2, k_fw, k_fb = jax.random.split(key, 5)

    B = 2
    x = jax.random.normal(k_x, (B, 1, 28, 28), dtype=jnp.float32)

    w1 = jax.random.normal(k_w1, (10, 1, 5, 5), dtype=jnp.float32) * 0.2
    w2 = jax.random.normal(k_w2, (20, 10, 5, 5), dtype=jnp.float32) * 0.1
    fc_w = jax.random.normal(k_fw, (10, 320), dtype=jnp.float32) * 0.05
    fc_b = jax.random.normal(k_fb, (10,), dtype=jnp.float32) * 0.05

    out = net_forward(x, w1, w2, fc_w, fc_b)
    jax.block_until_ready(out)

    assert out.shape == (B, 10)
    # log_softmax rows exp-sum to ~1.
    assert bool(jnp.allclose(jnp.exp(out).sum(axis=1), 1.0, atol=1e-4))
    # Loose check vs. f32 XLA reference (kernel uses bf16 MXU operands).
    ref = reference_forward(x, w1, w2, fc_w, fc_b)
    assert float(jnp.max(jnp.abs(out - ref))) < 0.25
    print("KERNEL_OK")
</pallas_src>

<mosaic_0001>
module attributes {stable_mosaic.version = 11 : i64} {
  func.func @net_kernel(%arg0: i32, %arg1: memref<8x28x28xf32, #tpu.memory_space<vmem>>, %arg2: memref<5x28x240xbf16, #tpu.memory_space<vmem>>, %arg3: memref<1200x160xbf16, #tpu.memory_space<vmem>>, %arg4: memref<4x160x10xf32, #tpu.memory_space<vmem>>, %arg5: memref<1x10xf32, #tpu.memory_space<vmem>>, %arg6: memref<8x10xf32, #tpu.memory_space<vmem>>) attributes {dimension_semantics = [#tpu.dimension_semantics<parallel>], iteration_bounds = array<i64: 1>, scalar_prefetch = 0 : i64, scratch_operands = 0 : i64, tpu.core_type = #tpu.core_type<tc>, window_params = [{transform_indices = @transform_0, window_bounds = array<i64: 8, 28, 28>}, {pipeline_mode = #tpu.pipeline_mode<synchronous>, transform_indices = @transform_1, window_bounds = array<i64: 5, 28, 240>}, {pipeline_mode = #tpu.pipeline_mode<synchronous>, transform_indices = @transform_2, window_bounds = array<i64: 1200, 160>}, {pipeline_mode = #tpu.pipeline_mode<synchronous>, transform_indices = @transform_3, window_bounds = array<i64: 4, 160, 10>}, {pipeline_mode = #tpu.pipeline_mode<synchronous>, transform_indices = @transform_4, window_bounds = array<i64: 1, 10>}, {transform_indices = @transform_5, window_bounds = array<i64: 8, 10>}]} {
    %c0 = arith.constant 0 : index
    %c0_0 = arith.constant 0 : index
    %c0_1 = arith.constant 0 : index
    %0 = vector.load %arg1[%c0, %c0_0, %c0_1] : memref<8x28x28xf32, #tpu.memory_space<vmem>>, vector<8x28x28xf32>
    %cst = arith.constant 0.000000e+00 : f32
    %1 = vector.broadcast %cst : f32 to vector<192x240xf32>
    %2 = vector.extract_strided_slice %0 {offsets = [0, 0, 0], sizes = [8, 24, 28], strides = [1, 1, 1]} : vector<8x28x28xf32> to vector<8x24x28xf32>
    %3 = vector.shape_cast %2 : vector<8x24x28xf32> to vector<192x28xf32>
    %4 = arith.truncf %3 : vector<192x28xf32> to vector<192x28xbf16>
    %c0_2 = arith.constant 0 : index
    %c0_3 = arith.constant 0 : index
    %c0_4 = arith.constant 0 : index
    %5 = vector.load %arg2[%c0_2, %c0_3, %c0_4] : memref<5x28x240xbf16, #tpu.memory_space<vmem>>, vector<1x28x240xbf16>
    %6 = vector.shape_cast %5 : vector<1x28x240xbf16> to vector<28x240xbf16>
    %cst_5 = arith.constant dense<0.000000e+00> : vector<192x240xf32>
    %7 = tpu.matmul %4, %6, %cst_5 {dimension_numbers = #tpu.dot_dimension_numbers<[1], [0], [0], [1], [0, 0, 1, 1], [], []>} : vector<192x28xbf16>, vector<28x240xbf16>, vector<192x240xf32> -> vector<192x240xf32>
    %8 = arith.addf %1, %7 : vector<192x240xf32>
    %9 = vector.extract_strided_slice %0 {offsets = [0, 1, 0], sizes = [8, 24, 28], strides = [1, 1, 1]} : vector<8x28x28xf32> to vector<8x24x28xf32>
    %10 = vector.shape_cast %9 : vector<8x24x28xf32> to vector<192x28xf32>
    %11 = arith.truncf %10 : vector<192x28xf32> to vector<192x28xbf16>
    %c1 = arith.constant 1 : index
    %c0_6 = arith.constant 0 : index
    %c0_7 = arith.constant 0 : index
    %12 = vector.load %arg2[%c1, %c0_6, %c0_7] : memref<5x28x240xbf16, #tpu.memory_space<vmem>>, vector<1x28x240xbf16>
    %13 = vector.shape_cast %12 : vector<1x28x240xbf16> to vector<28x240xbf16>
    %cst_8 = arith.constant dense<0.000000e+00> : vector<192x240xf32>
    %14 = tpu.matmul %11, %13, %cst_8 {dimension_numbers = #tpu.dot_dimension_numbers<[1], [0], [0], [1], [0, 0, 1, 1], [], []>} : vector<192x28xbf16>, vector<28x240xbf16>, vector<192x240xf32> -> vector<192x240xf32>
    %15 = arith.addf %8, %14 : vector<192x240xf32>
    %16 = vector.extract_strided_slice %0 {offsets = [0, 2, 0], sizes = [8, 24, 28], strides = [1, 1, 1]} : vector<8x28x28xf32> to vector<8x24x28xf32>
    %17 = vector.shape_cast %16 : vector<8x24x28xf32> to vector<192x28xf32>
    %18 = arith.truncf %17 : vector<192x28xf32> to vector<192x28xbf16>
    %c2 = arith.constant 2 : index
    %c0_9 = arith.constant 0 : index
    %c0_10 = arith.constant 0 : index
    %19 = vector.load %arg2[%c2, %c0_9, %c0_10] : memref<5x28x240xbf16, #tpu.memory_space<vmem>>, vector<1x28x240xbf16>
    %20 = vector.shape_cast %19 : vector<1x28x240xbf16> to vector<28x240xbf16>
    %cst_11 = arith.constant dense<0.000000e+00> : vector<192x240xf32>
    %21 = tpu.matmul %18, %20, %cst_11 {dimension_numbers = #tpu.dot_dimension_numbers<[1], [0], [0], [1], [0, 0, 1, 1], [], []>} : vector<192x28xbf16>, vector<28x240xbf16>, vector<192x240xf32> -> vector<192x240xf32>
    %22 = arith.addf %15, %21 : vector<192x240xf32>
    %23 = vector.extract_strided_slice %0 {offsets = [0, 3, 0], sizes = [8, 24, 28], strides = [1, 1, 1]} : vector<8x28x28xf32> to vector<8x24x28xf32>
    %24 = vector.shape_cast %23 : vector<8x24x28xf32> to vector<192x28xf32>
    %25 = arith.truncf %24 : vector<192x28xf32> to vector<192x28xbf16>
    %c3 = arith.constant 3 : index
    %c0_12 = arith.constant 0 : index
    %c0_13 = arith.constant 0 : index
    %26 = vector.load %arg2[%c3, %c0_12, %c0_13] : memref<5x28x240xbf16, #tpu.memory_space<vmem>>, vector<1x28x240xbf16>
    %27 = vector.shape_cast %26 : vector<1x28x240xbf16> to vector<28x240xbf16>
    %cst_14 = arith.constant dense<0.000000e+00> : vector<192x240xf32>
    %28 = tpu.matmul %25, %27, %cst_14 {dimension_numbers = #tpu.dot_dimension_numbers<[1], [0], [0], [1], [0, 0, 1, 1], [], []>} : vector<192x28xbf16>, vector<28x240xbf16>, vector<192x240xf32> -> vector<192x240xf32>
    %29 = arith.addf %22, %28 : vector<192x240xf32>
    %30 = vector.extract_strided_slice %0 {offsets = [0, 4, 0], sizes = [8, 24, 28], strides = [1, 1, 1]} : vector<8x28x28xf32> to vector<8x24x28xf32>
    %31 = vector.shape_cast %30 : vector<8x24x28xf32> to vector<192x28xf32>
    %32 = arith.truncf %31 : vector<192x28xf32> to vector<192x28xbf16>
    %c4 = arith.constant 4 : index
    %c0_15 = arith.constant 0 : index
    %c0_16 = arith.constant 0 : index
    %33 = vector.load %arg2[%c4, %c0_15, %c0_16] : memref<5x28x240xbf16, #tpu.memory_space<vmem>>, vector<1x28x240xbf16>
    %34 = vector.shape_cast %33 : vector<1x28x240xbf16> to vector<28x240xbf16>
    %cst_17 = arith.constant dense<0.000000e+00> : vector<192x240xf32>
    %35 = tpu.matmul %32, %34, %cst_17 {dimension_numbers = #tpu.dot_dimension_numbers<[1], [0], [0], [1], [0, 0, 1, 1], [], []>} : vector<192x28xbf16>, vector<28x240xbf16>, vector<192x240xf32> -> vector<192x240xf32>
    %36 = arith.addf %29, %35 : vector<192x240xf32>
    %37 = vector.shape_cast %36 : vector<192x240xf32> to vector<8x24x240xf32>
    %38 = vector.extract_strided_slice %37 {offsets = [0, 0, 10], sizes = [8, 24, 230], strides = [1, 1, 1]} : vector<8x24x240xf32> to vector<8x24x230xf32>
    %39 = vector.extract_strided_slice %37 {offsets = [0, 0, 0], sizes = [8, 24, 10], strides = [1, 1, 1]} : vector<8x24x240xf32> to vector<8x24x10xf32>
    %40 = tpu.concatenate %38, %39 in 2 : vector<8x24x230xf32>, vector<8x24x10xf32> -> vector<8x24x240xf32>
    %41 = arith.maximumf %37, %40 : vector<8x24x240xf32>
    %42 = vector.extract_strided_slice %41 {offsets = [0, 0, 0], sizes = [8, 1, 240], strides = [1, 1, 1]} : vector<8x24x240xf32> to vector<8x1x240xf32>
    %43 = vector.shape_cast %42 : vector<8x1x240xf32> to vector<8x240xf32>
    %44 = vector.extract_strided_slice %41 {offsets = [0, 1, 0], sizes = [8, 1, 240], strides = [1, 1, 1]} : vector<8x24x240xf32> to vector<8x1x240xf32>
    %45 = vector.shape_cast %44 : vector<8x1x240xf32> to vector<8x240xf32>
    %46 = arith.maximumf %43, %45 : vector<8x240xf32>
    %cst_18 = arith.constant 0.000000e+00 : f32
    %47 = vector.broadcast %cst_18 : f32 to vector<8x240xf32>
    %48 = arith.maximumf %46, %47 : vector<8x240xf32>
    %49 = arith.truncf %48 : vector<8x240xf32> to vector<8x240xbf16>
    %50 = vector.extract_strided_slice %41 {offsets = [0, 2, 0], sizes = [8, 1, 240], strides = [1, 1, 1]} : vector<8x24x240xf32> to vector<8x1x240xf32>
    %51 = vector.shape_cast %50 : vector<8x1x240xf32> to vector<8x240xf32>
    %52 = vector.extract_strided_slice %41 {offsets = [0, 3, 0], sizes = [8, 1, 240], strides = [1, 1, 1]} : vector<8x24x240xf32> to vector<8x1x240xf32>
    %53 = vector.shape_cast %52 : vector<8x1x240xf32> to vector<8x240xf32>
    %54 = arith.maximumf %51, %53 : vector<8x240xf32>
    %cst_19 = arith.constant 0.000000e+00 : f32
    %55 = vector.broadcast %cst_19 : f32 to vector<8x240xf32>
    %56 = arith.maximumf %54, %55 : vector<8x240xf32>
    %57 = arith.truncf %56 : vector<8x240xf32> to vector<8x240xbf16>
    %58 = vector.extract_strided_slice %41 {offsets = [0, 4, 0], sizes = [8, 1, 240], strides = [1, 1, 1]} : vector<8x24x240xf32> to vector<8x1x240xf32>
    %59 = vector.shape_cast %58 : vector<8x1x240xf32> to vector<8x240xf32>
    %60 = vector.extract_strided_slice %41 {offsets = [0, 5, 0], sizes = [8, 1, 240], strides = [1, 1, 1]} : vector<8x24x240xf32> to vector<8x1x240xf32>
    %61 = vector.shape_cast %60 : vector<8x1x240xf32> to vector<8x240xf32>
    %62 = arith.maximumf %59, %61 : vector<8x240xf32>
    %cst_20 = arith.constant 0.000000e+00 : f32
    %63 = vector.broadcast %cst_20 : f32 to vector<8x240xf32>
    %64 = arith.maximumf %62, %63 : vector<8x240xf32>
    %65 = arith.truncf %64 : vector<8x240xf32> to vector<8x240xbf16>
    %66 = vector.extract_strided_slice %41 {offsets = [0, 6, 0], sizes = [8, 1, 240], strides = [1, 1, 1]} : vector<8x24x240xf32> to vector<8x1x240xf32>
    %67 = vector.shape_cast %66 : vector<8x1x240xf32> to vector<8x240xf32>
    %68 = vector.extract_strided_slice %41 {offsets = [0, 7, 0], sizes = [8, 1, 240], strides = [1, 1, 1]} : vector<8x24x240xf32> to vector<8x1x240xf32>
    %69 = vector.shape_cast %68 : vector<8x1x240xf32> to vector<8x240xf32>
    %70 = arith.maximumf %67, %69 : vector<8x240xf32>
    %cst_21 = arith.constant 0.000000e+00 : f32
    %71 = vector.broadcast %cst_21 : f32 to vector<8x240xf32>
    %72 = arith.maximumf %70, %71 : vector<8x240xf32>
    %73 = arith.truncf %72 : vector<8x240xf32> to vector<8x240xbf16>
    %74 = vector.extract_strided_slice %41 {offsets = [0, 8, 0], sizes = [8, 1, 240], strides = [1, 1, 1]} : vector<8x24x240xf32> to vector<8x1x240xf32>
    %75 = vector.shape_cast %74 : vector<8x1x240xf32> to vector<8x240xf32>
    %76 = vector.extract_strided_slice %41 {offsets = [0, 9, 0], sizes = [8, 1, 240], strides = [1, 1, 1]} : vector<8x24x240xf32> to vector<8x1x240xf32>
    %77 = vector.shape_cast %76 : vector<8x1x240xf32> to vector<8x240xf32>
    %78 = arith.maximumf %75, %77 : vector<8x240xf32>
    %cst_22 = arith.constant 0.000000e+00 : f32
    %79 = vector.broadcast %cst_22 : f32 to vector<8x240xf32>
    %80 = arith.maximumf %78, %79 : vector<8x240xf32>
    %81 = arith.truncf %80 : vector<8x240xf32> to vector<8x240xbf16>
    %82 = vector.extract_strided_slice %41 {offsets = [0, 10, 0], sizes = [8, 1, 240], strides = [1, 1, 1]} : vector<8x24x240xf32> to vector<8x1x240xf32>
    %83 = vector.shape_cast %82 : vector<8x1x240xf32> to vector<8x240xf32>
    %84 = vector.extract_strided_slice %41 {offsets = [0, 11, 0], sizes = [8, 1, 240], strides = [1, 1, 1]} : vector<8x24x240xf32> to vector<8x1x240xf32>
    %85 = vector.shape_cast %84 : vector<8x1x240xf32> to vector<8x240xf32>
    %86 = arith.maximumf %83, %85 : vector<8x240xf32>
    %cst_23 = arith.constant 0.000000e+00 : f32
    %87 = vector.broadcast %cst_23 : f32 to vector<8x240xf32>
    %88 = arith.maximumf %86, %87 : vector<8x240xf32>
    %89 = arith.truncf %88 : vector<8x240xf32> to vector<8x240xbf16>
    %90 = vector.extract_strided_slice %41 {offsets = [0, 12, 0], sizes = [8, 1, 240], strides = [1, 1, 1]} : vector<8x24x240xf32> to vector<8x1x240xf32>
    %91 = vector.shape_cast %90 : vector<8x1x240xf32> to vector<8x240xf32>
    %92 = vector.extract_strided_slice %41 {offsets = [0, 13, 0], sizes = [8, 1, 240], strides = [1, 1, 1]} : vector<8x24x240xf32> to vector<8x1x240xf32>
    %93 = vector.shape_cast %92 : vector<8x1x240xf32> to vector<8x240xf32>
    %94 = arith.maximumf %91, %93 : vector<8x240xf32>
    %cst_24 = arith.constant 0.000000e+00 : f32
    %95 = vector.broadcast %cst_24 : f32 to vector<8x240xf32>
    %96 = arith.maximumf %94, %95 : vector<8x240xf32>
    %97 = arith.truncf %96 : vector<8x240xf32> to vector<8x240xbf16>
    %98 = vector.extract_strided_slice %41 {offsets = [0, 14, 0], sizes = [8, 1, 240], strides = [1, 1, 1]} : vector<8x24x240xf32> to vector<8x1x240xf32>
    %99 = vector.shape_cast %98 : vector<8x1x240xf32> to vector<8x240xf32>
    %100 = vector.extract_strided_slice %41 {offsets = [0, 15, 0], sizes = [8, 1, 240], strides = [1, 1, 1]} : vector<8x24x240xf32> to vector<8x1x240xf32>
    %101 = vector.shape_cast %100 : vector<8x1x240xf32> to vector<8x240xf32>
    %102 = arith.maximumf %99, %101 : vector<8x240xf32>
    %cst_25 = arith.constant 0.000000e+00 : f32
    %103 = vector.broadcast %cst_25 : f32 to vector<8x240xf32>
    %104 = arith.maximumf %102, %103 : vector<8x240xf32>
    %105 = arith.truncf %104 : vector<8x240xf32> to vector<8x240xbf16>
    %106 = vector.extract_strided_slice %41 {offsets = [0, 16, 0], sizes = [8, 1, 240], strides = [1, 1, 1]} : vector<8x24x240xf32> to vector<8x1x240xf32>
    %107 = vector.shape_cast %106 : vector<8x1x240xf32> to vector<8x240xf32>
    %108 = vector.extract_strided_slice %41 {offsets = [0, 17, 0], sizes = [8, 1, 240], strides = [1, 1, 1]} : vector<8x24x240xf32> to vector<8x1x240xf32>
    %109 = vector.shape_cast %108 : vector<8x1x240xf32> to vector<8x240xf32>
    %110 = arith.maximumf %107, %109 : vector<8x240xf32>
    %cst_26 = arith.constant 0.000000e+00 : f32
    %111 = vector.broadcast %cst_26 : f32 to vector<8x240xf32>
    %112 = arith.maximumf %110, %111 : vector<8x240xf32>
    %113 = arith.truncf %112 : vector<8x240xf32> to vector<8x240xbf16>
    %114 = vector.extract_strided_slice %41 {offsets = [0, 18, 0], sizes = [8, 1, 240], strides = [1, 1, 1]} : vector<8x24x240xf32> to vector<8x1x240xf32>
    %115 = vector.shape_cast %114 : vector<8x1x240xf32> to vector<8x240xf32>
    %116 = vector.extract_strided_slice %41 {offsets = [0, 19, 0], sizes = [8, 1, 240], strides = [1, 1, 1]} : vector<8x24x240xf32> to vector<8x1x240xf32>
    %117 = vector.shape_cast %116 : vector<8x1x240xf32> to vector<8x240xf32>
    %118 = arith.maximumf %115, %117 : vector<8x240xf32>
    %cst_27 = arith.constant 0.000000e+00 : f32
    %119 = vector.broadcast %cst_27 : f32 to vector<8x240xf32>
    %120 = arith.maximumf %118, %119 : vector<8x240xf32>
    %121 = arith.truncf %120 : vector<8x240xf32> to vector<8x240xbf16>
    %122 = vector.extract_strided_slice %41 {offsets = [0, 20, 0], sizes = [8, 1, 240], strides = [1, 1, 1]} : vector<8x24x240xf32> to vector<8x1x240xf32>
    %123 = vector.shape_cast %122 : vector<8x1x240xf32> to vector<8x240xf32>
    %124 = vector.extract_strided_slice %41 {offsets = [0, 21, 0], sizes = [8, 1, 240], strides = [1, 1, 1]} : vector<8x24x240xf32> to vector<8x1x240xf32>
    %125 = vector.shape_cast %124 : vector<8x1x240xf32> to vector<8x240xf32>
    %126 = arith.maximumf %123, %125 : vector<8x240xf32>
    %cst_28 = arith.constant 0.000000e+00 : f32
    %127 = vector.broadcast %cst_28 : f32 to vector<8x240xf32>
    %128 = arith.maximumf %126, %127 : vector<8x240xf32>
    %129 = arith.truncf %128 : vector<8x240xf32> to vector<8x240xbf16>
    %130 = vector.extract_strided_slice %41 {offsets = [0, 22, 0], sizes = [8, 1, 240], strides = [1, 1, 1]} : vector<8x24x240xf32> to vector<8x1x240xf32>
    %131 = vector.shape_cast %130 : vector<8x1x240xf32> to vector<8x240xf32>
    %132 = vector.extract_strided_slice %41 {offsets = [0, 23, 0], sizes = [8, 1, 240], strides = [1, 1, 1]} : vector<8x24x240xf32> to vector<8x1x240xf32>
    %133 = vector.shape_cast %132 : vector<8x1x240xf32> to vector<8x240xf32>
    %134 = arith.maximumf %131, %133 : vector<8x240xf32>
    %cst_29 = arith.constant 0.000000e+00 : f32
    %135 = vector.broadcast %cst_29 : f32 to vector<8x240xf32>
    %136 = arith.maximumf %134, %135 : vector<8x240xf32>
    %137 = arith.truncf %136 : vector<8x240xf32> to vector<8x240xbf16>
    %c0_30 = arith.constant 0 : index
    %c0_31 = arith.constant 0 : index
    %138 = vector.load %arg3[%c0_30, %c0_31] : memref<1200x160xbf16, #tpu.memory_space<vmem>>, vector<1200x160xbf16>
    %139 = tpu.concatenate %49, %57, %65, %73, %81 in 1 : vector<8x240xbf16>, vector<8x240xbf16>, vector<8x240xbf16>, vector<8x240xbf16>, vector<8x240xbf16> -> vector<8x1200xbf16>
    %cst_32 = arith.constant dense<0.000000e+00> : vector<8x160xf32>
    %140 = tpu.matmul %139, %138, %cst_32 {dimension_numbers = #tpu.dot_dimension_numbers<[1], [0], [0], [1], [0, 0, 1, 1], [], []>} : vector<8x1200xbf16>, vector<1200x160xbf16>, vector<8x160xf32> -> vector<8x160xf32>
    %141 = tpu.concatenate %57, %65, %73, %81, %89 in 1 : vector<8x240xbf16>, vector<8x240xbf16>, vector<8x240xbf16>, vector<8x240xbf16>, vector<8x240xbf16> -> vector<8x1200xbf16>
    %cst_33 = arith.constant dense<0.000000e+00> : vector<8x160xf32>
    %142 = tpu.matmul %141, %138, %cst_33 {dimension_numbers = #tpu.dot_dimension_numbers<[1], [0], [0], [1], [0, 0, 1, 1], [], []>} : vector<8x1200xbf16>, vector<1200x160xbf16>, vector<8x160xf32> -> vector<8x160xf32>
    %143 = tpu.concatenate %65, %73, %81, %89, %97 in 1 : vector<8x240xbf16>, vector<8x240xbf16>, vector<8x240xbf16>, vector<8x240xbf16>, vector<8x240xbf16> -> vector<8x1200xbf16>
    %cst_34 = arith.constant dense<0.000000e+00> : vector<8x160xf32>
    %144 = tpu.matmul %143, %138, %cst_34 {dimension_numbers = #tpu.dot_dimension_numbers<[1], [0], [0], [1], [0, 0, 1, 1], [], []>} : vector<8x1200xbf16>, vector<1200x160xbf16>, vector<8x160xf32> -> vector<8x160xf32>
    %145 = tpu.concatenate %73, %81, %89, %97, %105 in 1 : vector<8x240xbf16>, vector<8x240xbf16>, vector<8x240xbf16>, vector<8x240xbf16>, vector<8x240xbf16> -> vector<8x1200xbf16>
    %cst_35 = arith.constant dense<0.000000e+00> : vector<8x160xf32>
    %146 = tpu.matmul %145, %138, %cst_35 {dimension_numbers = #tpu.dot_dimension_numbers<[1], [0], [0], [1], [0, 0, 1, 1], [], []>} : vector<8x1200xbf16>, vector<1200x160xbf16>, vector<8x160xf32> -> vector<8x160xf32>
    %147 = tpu.concatenate %81, %89, %97, %105, %113 in 1 : vector<8x240xbf16>, vector<8x240xbf16>, vector<8x240xbf16>, vector<8x240xbf16>, vector<8x240xbf16> -> vector<8x1200xbf16>
    %cst_36 = arith.constant dense<0.000000e+00> : vector<8x160xf32>
    %148 = tpu.matmul %147, %138, %cst_36 {dimension_numbers = #tpu.dot_dimension_numbers<[1], [0], [0], [1], [0, 0, 1, 1], [], []>} : vector<8x1200xbf16>, vector<1200x160xbf16>, vector<8x160xf32> -> vector<8x160xf32>
    %149 = tpu.concatenate %89, %97, %105, %113, %121 in 1 : vector<8x240xbf16>, vector<8x240xbf16>, vector<8x240xbf16>, vector<8x240xbf16>, vector<8x240xbf16> -> vector<8x1200xbf16>
    %cst_37 = arith.constant dense<0.000000e+00> : vector<8x160xf32>
    %150 = tpu.matmul %149, %138, %cst_37 {dimension_numbers = #tpu.dot_dimension_numbers<[1], [0], [0], [1], [0, 0, 1, 1], [], []>} : vector<8x1200xbf16>, vector<1200x160xbf16>, vector<8x160xf32> -> vector<8x160xf32>
    %151 = tpu.concatenate %97, %105, %113, %121, %129 in 1 : vector<8x240xbf16>, vector<8x240xbf16>, vector<8x240xbf16>, vector<8x240xbf16>, vector<8x240xbf16> -> vector<8x1200xbf16>
    %cst_38 = arith.constant dense<0.000000e+00> : vector<8x160xf32>
    %152 = tpu.matmul %151, %138, %cst_38 {dimension_numbers = #tpu.dot_dimension_numbers<[1], [0], [0], [1], [0, 0, 1, 1], [], []>} : vector<8x1200xbf16>, vector<1200x160xbf16>, vector<8x160xf32> -> vector<8x160xf32>
    %153 = tpu.concatenate %105, %113, %121, %129, %137 in 1 : vector<8x240xbf16>, vector<8x240xbf16>, vector<8x240xbf16>, vector<8x240xbf16>, vector<8x240xbf16> -> vector<8x1200xbf16>
    %cst_39 = arith.constant dense<0.000000e+00> : vector<8x160xf32>
    %154 = tpu.matmul %153, %138, %cst_39 {dimension_numbers = #tpu.dot_dimension_numbers<[1], [0], [0], [1], [0, 0, 1, 1], [], []>} : vector<8x1200xbf16>, vector<1200x160xbf16>, vector<8x160xf32> -> vector<8x160xf32>
    %cst_40 = arith.constant 0.000000e+00 : f32
    %155 = vector.broadcast %cst_40 : f32 to vector<8x10xf32>
    %156 = arith.maximumf %140, %142 : vector<8x160xf32>
    %157 = vector.extract_strided_slice %156 {offsets = [0, 20], sizes = [8, 140], strides = [1, 1]} : vector<8x160xf32> to vector<8x140xf32>
    %158 = vector.extract_strided_slice %156 {offsets = [0, 0], sizes = [8, 20], strides = [1, 1]} : vector<8x160xf32> to vector<8x20xf32>
    %159 = tpu.concatenate %157, %158 in 1 : vector<8x140xf32>, vector<8x20xf32> -> vector<8x160xf32>
    %160 = arith.maximumf %156, %159 : vector<8x160xf32>
    %cst_41 = arith.constant 0.000000e+00 : f32
    %161 = vector.broadcast %cst_41 : f32 to vector<8x160xf32>
    %162 = arith.maximumf %160, %161 : vector<8x160xf32>
    %c0_42 = arith.constant 0 : index
    %c0_43 = arith.constant 0 : index
    %c0_44 = arith.constant 0 : index
    %163 = vector.load %arg4[%c0_42, %c0_43, %c0_44] : memref<4x160x10xf32, #tpu.memory_space<vmem>>, vector<1x160x10xf32>
    %164 = vector.shape_cast %163 : vector<1x160x10xf32> to vector<160x10xf32>
    %cst_45 = arith.constant dense<0.000000e+00> : vector<8x10xf32>
    %165 = tpu.matmul %162, %164, %cst_45 {dimension_numbers = #tpu.dot_dimension_numbers<[1], [0], [0], [1], [0, 0, 1, 1], [], []>} : vector<8x160xf32>, vector<160x10xf32>, vector<8x10xf32> -> vector<8x10xf32>
    %166 = arith.addf %155, %165 : vector<8x10xf32>
    %167 = arith.maximumf %144, %146 : vector<8x160xf32>
    %168 = vector.extract_strided_slice %167 {offsets = [0, 20], sizes = [8, 140], strides = [1, 1]} : vector<8x160xf32> to vector<8x140xf32>
    %169 = vector.extract_strided_slice %167 {offsets = [0, 0], sizes = [8, 20], strides = [1, 1]} : vector<8x160xf32> to vector<8x20xf32>
    %170 = tpu.concatenate %168, %169 in 1 : vector<8x140xf32>, vector<8x20xf32> -> vector<8x160xf32>
    %171 = arith.maximumf %167, %170 : vector<8x160xf32>
    %cst_46 = arith.constant 0.000000e+00 : f32
    %172 = vector.broadcast %cst_46 : f32 to vector<8x160xf32>
    %173 = arith.maximumf %171, %172 : vector<8x160xf32>
    %c1_47 = arith.constant 1 : index
    %c0_48 = arith.constant 0 : index
    %c0_49 = arith.constant 0 : index
    %174 = vector.load %arg4[%c1_47, %c0_48, %c0_49] : memref<4x160x10xf32, #tpu.memory_space<vmem>>, vector<1x160x10xf32>
    %175 = vector.shape_cast %174 : vector<1x160x10xf32> to vector<160x10xf32>
    %cst_50 = arith.constant dense<0.000000e+00> : vector<8x10xf32>
    %176 = tpu.matmul %173, %175, %cst_50 {dimension_numbers = #tpu.dot_dimension_numbers<[1], [0], [0], [1], [0, 0, 1, 1], [], []>} : vector<8x160xf32>, vector<160x10xf32>, vector<8x10xf32> -> vector<8x10xf32>
    %177 = arith.addf %166, %176 : vector<8x10xf32>
    %178 = arith.maximumf %148, %150 : vector<8x160xf32>
    %179 = vector.extract_strided_slice %178 {offsets = [0, 20], sizes = [8, 140], strides = [1, 1]} : vector<8x160xf32> to vector<8x140xf32>
    %180 = vector.extract_strided_slice %178 {offsets = [0, 0], sizes = [8, 20], strides = [1, 1]} : vector<8x160xf32> to vector<8x20xf32>
    %181 = tpu.concatenate %179, %180 in 1 : vector<8x140xf32>, vector<8x20xf32> -> vector<8x160xf32>
    %182 = arith.maximumf %178, %181 : vector<8x160xf32>
    %cst_51 = arith.constant 0.000000e+00 : f32
    %183 = vector.broadcast %cst_51 : f32 to vector<8x160xf32>
    %184 = arith.maximumf %182, %183 : vector<8x160xf32>
    %c2_52 = arith.constant 2 : index
    %c0_53 = arith.constant 0 : index
    %c0_54 = arith.constant 0 : index
    %185 = vector.load %arg4[%c2_52, %c0_53, %c0_54] : memref<4x160x10xf32, #tpu.memory_space<vmem>>, vector<1x160x10xf32>
    %186 = vector.shape_cast %185 : vector<1x160x10xf32> to vector<160x10xf32>
    %cst_55 = arith.constant dense<0.000000e+00> : vector<8x10xf32>
    %187 = tpu.matmul %184, %186, %cst_55 {dimension_numbers = #tpu.dot_dimension_numbers<[1], [0], [0], [1], [0, 0, 1, 1], [], []>} : vector<8x160xf32>, vector<160x10xf32>, vector<8x10xf32> -> vector<8x10xf32>
    %188 = arith.addf %177, %187 : vector<8x10xf32>
    %189 = arith.maximumf %152, %154 : vector<8x160xf32>
    %190 = vector.extract_strided_slice %189 {offsets = [0, 20], sizes = [8, 140], strides = [1, 1]} : vector<8x160xf32> to vector<8x140xf32>
    %191 = vector.extract_strided_slice %189 {offsets = [0, 0], sizes = [8, 20], strides = [1, 1]} : vector<8x160xf32> to vector<8x20xf32>
    %192 = tpu.concatenate %190, %191 in 1 : vector<8x140xf32>, vector<8x20xf32> -> vector<8x160xf32>
    %193 = arith.maximumf %189, %192 : vector<8x160xf32>
    %cst_56 = arith.constant 0.000000e+00 : f32
    %194 = vector.broadcast %cst_56 : f32 to vector<8x160xf32>
    %195 = arith.maximumf %193, %194 : vector<8x160xf32>
    %c3_57 = arith.constant 3 : index
    %c0_58 = arith.constant 0 : index
    %c0_59 = arith.constant 0 : index
    %196 = vector.load %arg4[%c3_57, %c0_58, %c0_59] : memref<4x160x10xf32, #tpu.memory_space<vmem>>, vector<1x160x10xf32>
    %197 = vector.shape_cast %196 : vector<1x160x10xf32> to vector<160x10xf32>
    %cst_60 = arith.constant dense<0.000000e+00> : vector<8x10xf32>
    %198 = tpu.matmul %195, %197, %cst_60 {dimension_numbers = #tpu.dot_dimension_numbers<[1], [0], [0], [1], [0, 0, 1, 1], [], []>} : vector<8x160xf32>, vector<160x10xf32>, vector<8x10xf32> -> vector<8x10xf32>
    %199 = arith.addf %188, %198 : vector<8x10xf32>
    %c0_61 = arith.constant 0 : index
    %c0_62 = arith.constant 0 : index
    %200 = vector.load %arg5[%c0_61, %c0_62] : memref<1x10xf32, #tpu.memory_space<vmem>>, vector<1x10xf32>
    %201 = vector.broadcast %200 : vector<1x10xf32> to vector<8x10xf32>
    %202 = arith.addf %199, %201 : vector<8x10xf32>
    %cst_63 = arith.constant dense<0xFF800000> : vector<8xf32>
    %203 = vector.multi_reduction <maximumf>, %202, %cst_63 [1] : vector<8x10xf32> to vector<8xf32>
    %204 = vector.shape_cast %203 : vector<8xf32> to vector<8x1xf32>
    %205 = vector.broadcast %204 : vector<8x1xf32> to vector<8x10xf32>
    %206 = arith.subf %202, %205 : vector<8x10xf32>
    %207 = math.exp %206 : vector<8x10xf32>
    %cst_64 = arith.constant dense<0.000000e+00> : vector<8xf32>
    %208 = vector.multi_reduction <add>, %207, %cst_64 [1] : vector<8x10xf32> to vector<8xf32>
    %209 = vector.shape_cast %208 : vector<8xf32> to vector<8x1xf32>
    %210 = math.log %209 : vector<8x1xf32>
    %211 = vector.broadcast %210 : vector<8x1xf32> to vector<8x10xf32>
    %212 = arith.subf %206, %211 : vector<8x10xf32>
    %c0_65 = arith.constant 0 : index
    %c0_66 = arith.constant 0 : index
    %213 = vector.load %arg6[%c0_65, %c0_66] : memref<8x10xf32, #tpu.memory_space<vmem>>, vector<8x10xf32>
    tpu.vector_store %arg6[%c0_65, %c0_66], %212 {strides = array<i32>} : memref<8x10xf32, #tpu.memory_space<vmem>>, vector<8x10xf32>,
    return
  }
  func.func @transform_0(%arg0: i32) -> (i32, i32, i32) {
    %c0_i32 = arith.constant 0 : i32
    %c0_i32_0 = arith.constant 0 : i32
    %c0_i32_1 = arith.constant 0 : i32
    return %arg0, %c0_i32, %c0_i32_0 : i32, i32, i32
  }
  func.func @transform_1(%arg0: i32) -> (i32, i32, i32) {
    %c0_i32 = arith.constant 0 : i32
    %c0_i32_0 = arith.constant 0 : i32
    %c0_i32_1 = arith.constant 0 : i32
    %c0_i32_2 = arith.constant 0 : i32
    return %c0_i32, %c0_i32_0, %c0_i32_1 : i32, i32, i32
  }
  func.func @transform_2(%arg0: i32) -> (i32, i32) {
    %c0_i32 = arith.constant 0 : i32
    %c0_i32_0 = arith.constant 0 : i32
    %c0_i32_1 = arith.constant 0 : i32
    return %c0_i32, %c0_i32_0 : i32, i32
  }
  func.func @transform_3(%arg0: i32) -> (i32, i32, i32) {
    %c0_i32 = arith.constant 0 : i32
    %c0_i32_0 = arith.constant 0 : i32
    %c0_i32_1 = arith.constant 0 : i32
    %c0_i32_2 = arith.constant 0 : i32
    return %c0_i32, %c0_i32_0, %c0_i32_1 : i32, i32, i32
  }
  func.func @transform_4(%arg0: i32) -> (i32, i32) {
    %c0_i32 = arith.constant 0 : i32
    %c0_i32_0 = arith.constant 0 : i32
    %c0_i32_1 = arith.constant 0 : i32
    return %c0_i32, %c0_i32_0 : i32, i32
  }
  func.func @transform_5(%arg0: i32) -> (i32, i32) {
    %c0_i32 = arith.constant 0 : i32
    %c0_i32_0 = arith.constant 0 : i32
    return %arg0, %c0_i32 : i32, i32
  }
}

</mosaic_0001>

<bundles_post_ra>
// kernel: tpu_custom_call.1
= control target key start
LH: loop header
LB: loop body
LE: loop exit
PB: predicated region body
PF: predicated region fallthrough
CT: control target
= control target key end

     0   :  { %vm255_vm0 = vcmask 1045504   ;;  %vm102_vm1 = vcmask 1046528   ;;  %vm218_vm2 = vcmask 228352   ;;  %s15315_s0 = inlined_call_operand.vmem [shape: f32[8,28,28], index: 0, kind: input, shape index: {}]   ;;  %s15316_s1 = inlined_call_operand.vmem [shape: bf16[5,28,240], index: 1, kind: input, shape index: {}]   ;;  %s15317_s2 = inlined_call_operand.vmem [shape: bf16[1200,160], index: 2, kind: input, shape index: {}]   ;;  %s15318_s3 = inlined_call_operand.vmem [shape: f32[4,160,10], index: 3, kind: input, shape index: {}]   ;;  %s15319_s4 = inlined_call_operand.vmem [shape: f32[1,10], index: 4, kind: input, shape index: {}]   ;;  %s15320_s5 = inlined_call_operand.hbm [shape: f32[8,10], index: 5, kind: output, shape index: {}]  }
   0x1   :  { %v6930_v0 = vld [vmem:[%s15316_s1 + $0x30] sm:$0xf]  ;;  %v7867_v1 = vld [vmem:[%s15316_s1 + $0x34] sm:$0x30]  ;;  %v7866_v3 = vld [vmem:[%s15316_s1 + $0x34] sm:$0xf] }
   0x2   :  { %v6931_v2 = vor.u32 %v7867_v1, %v6930_v0  ;;  %v6932_v4 = vld [vmem:[%s15316_s1 + $0x38] sm:$0x30]  ;;  %v6970_v5 = vld [vmem:[%s15316_s1 + $0x10] sm:$0xf]  ;;  %v8344_v6 = vld [vmem:[%s15315_s0] sm:$0xff] }
   0x3   :  { %v6935_v7 = vor.u32 %v7866_v3, %v6932_v4  ;;  %v7863_v8 = vld [vmem:[%s15316_s1 + $0x14] sm:$0x30]  ;;  %v7862_v9 = vld [vmem:[%s15316_s1 + $0x14] sm:$0xf]  ;;  %v6972_v10 = vld [vmem:[%s15316_s1 + $0x18] sm:$0x30] }
   0x4   :  { %v257_v11 = vsel %vm255_vm0, %v6931_v2, 0  ;;  %v6971_v12 = vor.u32 %v7863_v8, %v6970_v5  ;;  %v6975_v13 = vor.u32 %v7862_v9, %v6972_v10  ;;  %v6922_v14 = vld [vmem:[%s15316_s1 + $0x20] sm:$0xf]  ;;  %v7865_v15 = vld [vmem:[%s15316_s1 + $0x24] sm:$0xf0]  ;;  %v8377_v21 = vld [vmem:[%s15315_s0 + $0x10] sm:$0xff] }
   0x5   :  { %v8365_v16 = vld [vmem:[%s15315_s0 + $0x8] sm:$0xff]  ;;  %268 = vmatpush.bf16.msra.mxu0 %v257_v11  ;;  %v260_v17 = vsel %vm255_vm0, %v6935_v7, 0  ;;  %v6923_v18 = vor.u32 %v7865_v15, %v6922_v14  ;;  %v7864_v19 = vld [vmem:[%s15316_s1 + $0x24] sm:$0xf]  ;;  %v6962_v25 = vld [vmem:[%s15316_s1] sm:$0xf] }
   0x6   :  { %v6924_v20 = vld [vmem:[%s15316_s1 + $0x28] sm:$0xf0]  ;;  %337 = vmatpush.bf16.msra.mxu1 %v260_v17  ;;  %v455_v22 = vsel %vm255_vm0, %v6971_v12, 0  ;;  %v458_v23 = vsel %vm255_vm0, %v6975_v13, 0  ;;  %v7861_v26 = vld [vmem:[%s15316_s1 + $0x4] sm:$0xf0]  ;;  %v54_v36 = vpack.c.bf16 %v8365_v16, %v8344_v6 }
   0x7   :  { %v6927_v24 = vor.u32 %v7864_v19, %v6924_v20  ;;  %466 = vmatpush.bf16.msra.mxu2 %v455_v22  ;;  %535 = vmatpush.bf16.msra.mxu3 %v458_v23  ;;  %v6963_v27 = vor.u32 %v7861_v26, %v6962_v25  ;;  %v7860_v28 = vld [vmem:[%s15316_s1 + $0x4] sm:$0xf]  ;;  %v6964_v29 = vld [vmem:[%s15316_s1 + $0x8] sm:$0xf0]  ;;  %v103_v30 = vrot.slane %v8344_v6, 1  ;;  %v104_v32 = vrot.slane %v8365_v16, 1 }
   0x8   :  { %v6967_v31 = vor.u32 %v7860_v28, %v6964_v29  ;;  %v106_v33 = vrot.slane %v8377_v21, 1 }
   0x9   :  { %269 = vmatpush.bf16.msra.mxu0 %v6923_v18  ;;  %v105_v34 = vsel %vm102_vm1, %v103_v30, %v104_v32 }
   0xa   :  { %338 = vmatpush.bf16.msra.mxu1 %v6927_v24  ;;  %v107_v35 = vsel %vm102_vm1, %v104_v32, %v106_v33 }
   0xb   :  { %467 = vmatpush.bf16.msra.mxu2 %v6963_v27  ;;  %536 = vmatpush.bf16.msra.mxu3 %v6967_v31  ;;  %v183_v37 = vpack.c.bf16 %v107_v35, %v105_v34 }
   0xc   :  { %10 = vsyncpa [#allocation3], 0  ;;  %v8407_v38 = vld [vmem:[%s15315_s0 + $0x18] sm:$0xf]  ;;  %v8412_v39 = vld [vmem:[%s15315_s0 + $0x20] sm:$0xff]  ;;  %vm941_vm3 = vcmask 1044480  }
   0xd   :  { %6936 = vmatmul.msk.bf16.vlgmr.msra.gmra.mxu0 %vm218_vm2, %v183_v37  ;;  %6948 = vmatmul.msk.bf16.vlgmr.msra.gmra.mxu1 %vm218_vm2, %v183_v37  ;;  %v8417_v40 = vld [vmem:[%s15315_s0 + $0x28] sm:$0xff]  ;;  %v108_v41 = vrot.slane %v8407_v38, 1  ;;  %v110_v42 = vrot.slane %v8412_v39, 1  ;;  %v55_v47 = vpack.c.bf16 %v8412_v39, %v8377_v21  ;;  %v8433_v48 = vld [vmem:[%s15315_s0 + $0x30] sm:$0xff]  ;;  %v8438_v49 = vld [vmem:[%s15315_s0 + $0x38] sm:$0xf] }
   0xe   :  { %6976 = vmatmul.msk.bf16.vlgmr.msra.gmra.mxu2 %vm218_vm2, %v54_v36  ;;  %6988 = vmatmul.msk.bf16.vlgmr.msra.gmra.mxu3 %vm218_vm2, %v54_v36  ;;  %v111_v43 = vrot.slane %v8417_v40, 1  ;;  %v113_v50 = vrot.slane %v8433_v48, 1  ;;  %v115_v51 = vrot.slane %v8438_v49, 1  ;;  %v56_v55 = vpack.c.bf16 %v8433_v48, %v8417_v40  ;;  %v8453_v56 = vld [vmem:[%s15315_s0 + $0x40] sm:$0xff]  ;;  %v8458_v57 = vld [vmem:[%s15315_s0 + $0x48] sm:$0xff]  ;;  %v8463_v58 = vld [vmem:[%s15315_s0 + $0x50] sm:$0xff] }
   0xf   :  { %v109_v44 = vsel %vm102_vm1, %v106_v33, %v108_v41  ;;  %v117_v59 = vrot.slane %v8453_v56, 1  ;;  %v118_v60 = vrot.slane %v8458_v57, 1  ;;  %v120_v61 = vrot.slane %v8463_v58, 1  ;;  %v8479_v2 = vld [vmem:[%s15315_s0 + $0x58] sm:$0xf]  ;;  %v8484_v3 = vld [vmem:[%s15315_s0 + $0x60] sm:$0xff] }
  0x10   :  { %v112_v45 = vsel %vm102_vm1, %v110_v42, %v111_v43  ;;  %v114_v52 = vsel %vm102_vm1, %v111_v43, %v113_v50  ;;  %v116_v53 = vsel %vm102_vm1, %v113_v50, %v115_v51  ;;  %v57_v1 = vpack.c.bf16 %v8458_v57, %v8453_v56  ;;  %v8489_v4 = vld [vmem:[%s15315_s0 + $0x68] sm:$0xff]  ;;  %v8505_v13 = vld [vmem:[%s15315_s0 + $0x70] sm:$0xff]  ;;  %v8510_v14 = vld [vmem:[%s15315_s0 + $0x78] sm:$0xf]  ;;  %s8287_s8 = smov 118   ;;  %s8288_s20 = smov 102  }
  0x11   :  { %v184_v46 = vpack.c.bf16 %v112_v45, %v109_v44  ;;  %v185_v54 = vpack.c.bf16 %v116_v53, %v114_v52  ;;  %v119_v62 = vsel %vm102_vm1, %v117_v59, %v118_v60  ;;  %v121_v63 = vsel %vm102_vm1, %v118_v60, %v120_v61  ;;  %v8525_v23 = vld [vmem:[%s15315_s0 + $0x80] sm:$0xff]  ;;  %v8530_v24 = vld [vmem:[%s15315_s0 + $0x88] sm:$0xff]  ;;  %v8535_v25 = vld [vmem:[%s15315_s0 + $0x90] sm:$0xff]  ;;  %s8289_s6 = smov 112   ;;  %s8290_s7 = smov 96  }
  0x12   :  { %v186_v0 = vpack.c.bf16 %v121_v63, %v119_v62  ;;  %v122_v5 = vrot.slane %v8479_v2, 1  ;;  %v124_v7 = vrot.slane %v8484_v3, 1  ;;  %v125_v8 = vrot.slane %v8489_v4, 1  ;;  %v8551_v33 = vld [vmem:[%s15315_s0 + $0x98] sm:$0xf]  ;;  %v8556_v34 = vld [vmem:[%s15315_s0 + $0xa0] sm:$0xff] }
  0x13   :  { %v58_v12 = vpack.c.bf16 %v8484_v3, %v8463_v58  ;;  %v127_v15 = vrot.slane %v8505_v13, 1  ;;  %v129_v17 = vrot.slane %v8510_v14, 1  ;;  %v59_v22 = vpack.c.bf16 %v8505_v13, %v8489_v4  ;;  %v8561_v35 = vld [vmem:[%s15315_s0 + $0xa8] sm:$0xff]  ;;  %v8607_v63 = vld [vmem:[%s15315_s0 + $0xd0] sm:$0xff]  ;;  %s8291_s9 = smov 80   ;;  %s8292_s10 = smov 64  }
  0x14   :  { %v123_v9 = vsel %vm102_vm1, %v120_v61, %v122_v5  ;;  %v126_v10 = vsel %vm102_vm1, %v124_v7, %v125_v8  ;;  %v131_v26 = vrot.slane %v8525_v23, 1  ;;  %v132_v27 = vrot.slane %v8530_v24, 1  ;;  %v8597_v61 = vld [vmem:[%s15315_s0 + $0xc0] sm:$0xff]  ;;  %v8602_v62 = vld [vmem:[%s15315_s0 + $0xc8] sm:$0xff]  ;;  %s6907_s27 = sshll.u32 %s15320_s5, 4  ;;  %s6908_s27 = int_to_ptr.hbm [resolvable:$true] %s6907_s27 }
  0x15   :  { %v187_v11 = vpack.c.bf16 %v126_v10, %v123_v9  ;;  %v128_v18 = vsel %vm102_vm1, %v125_v8, %v127_v15  ;;  %v130_v19 = vsel %vm102_vm1, %v127_v15, %v129_v17  ;;  %v134_v28 = vrot.slane %v8535_v25, 1 }
  0x16   :  { %v188_v20 = vpack.c.bf16 %v130_v19, %v128_v18  ;;  %v133_v29 = vsel %vm102_vm1, %v131_v26, %v132_v27  ;;  %v60_v32 = vpack.c.bf16 %v8530_v24, %v8525_v23  ;;  %v136_v36 = vrot.slane %v8551_v33, 1 }
  0x17   :  { %v135_v30 = vsel %vm102_vm1, %v132_v27, %v134_v28  ;;  %v138_v37 = vrot.slane %v8556_v34, 1  ;;  %v139_v41 = vrot.slane %v8561_v35, 1  ;;  %v61_v45 = vpack.c.bf16 %v8556_v34, %v8535_v25 }
  0x18   :  { %v189_v31 = vpack.c.bf16 %v135_v30, %v133_v29  ;;  %v137_v42 = vsel %vm102_vm1, %v134_v28, %v136_v36  ;;  %v145_v5 = vrot.slane %v8597_v61, 1  ;;  %v63_v29 = vpack.c.bf16 %v8602_v62, %v8597_v61  ;;  %v8631_v30 = vld [vmem:[%s15315_s0 + $0xd8] sm:$0xf] }
  0x19   :  { %v140_v43 = vsel %vm102_vm1, %v138_v37, %v139_v41  ;;  %vm1285_vm4 = vcmask 1043456   ;;  %vm1918_vm5 = vcmask 834560   ;;  %vm1773_vm6 = vcmask 965632  }
  0x1a   :  { %v190_v44 = vpack.c.bf16 %v140_v43, %v137_v42  ;;  %vm2462_vm7 = vcmask 1041409   ;;  %vm2468_vm8 = vcmask 1043459   ;;  %vm2474_vm9 = vcmask 1045509  }
  0x1b   :  { %vm2465_vm10 = vcmask 1042434   ;;  %vm2471_vm11 = vcmask 1044484   ;;  %vm2477_vm12 = vcmask 1046534   ;;  %vm2480_vm13 = vcmask 1047559  }
  0x1c   :  { %vm2570_vm14 = vcmask 785408   ;;  %vm2533_vm15 = vcmask 916480  }
  0x1d   :  { %6937 = vmatmul.msk.bf16.gmra.mxu0 %vm218_vm2, %v184_v46  ;;  %6949 = vmatmul.msk.bf16.gmra.mxu1 %vm218_vm2, %v184_v46  ;;  %v8577_v46 = vld [vmem:[%s15315_s0 + $0xb0] sm:$0xff] }
  0x1e   :  { %6977 = vmatmul.msk.bf16.gmra.mxu2 %vm218_vm2, %v55_v47  ;;  %6989 = vmatmul.msk.bf16.gmra.mxu3 %vm218_vm2, %v55_v47  ;;  %v8582_v47 = vld [vmem:[%s15315_s0 + $0xb8] sm:$0xf]  ;;  %v141_v50 = vrot.slane %v8577_v46, 1  ;;  %v62_v60 = vpack.c.bf16 %v8577_v46, %v8561_v35 }
  0x1f   :  { %v143_v51 = vrot.slane %v8582_v47, 1 }
  0x20   :  { %v142_v52 = vsel %vm102_vm1, %v139_v41, %v141_v50  ;;  %v150_v41 = vrot.slane %v8631_v30, 1 }
  0x21   :  { %v144_v53 = vsel %vm102_vm1, %v141_v50, %v143_v51 }
  0x2d   :  { %6938 = vmatmul.msk.bf16.gmra.mxu0 %vm218_vm2, %v185_v54  ;;  %6950 = vmatmul.msk.bf16.gmra.mxu1 %vm218_vm2, %v185_v54  ;;  %v191_v54 = vpack.c.bf16 %v144_v53, %v142_v52  ;;  %v7014_v52 = vld [vmem:[%s15316_s1 + $0x50] sm:$0xf]  ;;  %v7871_v53 = vld [vmem:[%s15316_s1 + $0x54] sm:$0x30] }
  0x2e   :  { %6978 = vmatmul.msk.bf16.gmra.mxu2 %vm218_vm2, %v56_v55  ;;  %6990 = vmatmul.msk.bf16.gmra.mxu3 %vm218_vm2, %v56_v55 }
  0x3d   :  { %6939 = vmatmul.msk.bf16.gmra.mxu0 %vm218_vm2, %v186_v0  ;;  %6951 = vmatmul.msk.bf16.gmra.mxu1 %vm218_vm2, %v186_v0 }
  0x3e   :  { %6979 = vmatmul.msk.bf16.gmra.mxu2 %vm218_vm2, %v57_v1  ;;  %6991 = vmatmul.msk.bf16.gmra.mxu3 %vm218_vm2, %v57_v1 }
  0x4d   :  { %6940 = vmatmul.msk.bf16.gmra.mxu0 %vm218_vm2, %v187_v11  ;;  %6952 = vmatmul.msk.bf16.gmra.mxu1 %vm218_vm2, %v187_v11  ;;  %v146_v11 = vrot.slane %v8602_v62, 1 }
  0x4e   :  { %6980 = vmatmul.msk.bf16.gmra.mxu2 %vm218_vm2, %v58_v12  ;;  %6992 = vmatmul.msk.bf16.gmra.mxu3 %vm218_vm2, %v58_v12  ;;  %v148_v12 = vrot.slane %v8607_v63, 1 }
  0x4f   :  { %v147_v15 = vsel %vm102_vm1, %v145_v5, %v146_v11 }
  0x50   :  { %v149_v17 = vsel %vm102_vm1, %v146_v11, %v148_v12 }
  0x5d   :  { %6941 = vmatmul.msk.bf16.gmra.mxu0 %vm218_vm2, %v188_v20  ;;  %6953 = vmatmul.msk.bf16.gmra.mxu1 %vm218_vm2, %v188_v20  ;;  %v192_v20 = vpack.c.bf16 %v149_v17, %v147_v15  ;;  %v151_v17 = vsel %vm102_vm1, %v148_v12, %v150_v41  ;;  %v7869_v12 = vld [vmem:[%s15316_s1 + $0x44] sm:$0xf0] }
  0x5e   :  { %6981 = vmatmul.msk.bf16.gmra.mxu2 %vm218_vm2, %v59_v22  ;;  %6993 = vmatmul.msk.bf16.gmra.mxu3 %vm218_vm2, %v59_v22 }
  0x6d   :  { %6942 = vmatmul.msk.bf16.gmra.mxu0 %vm218_vm2, %v189_v31  ;;  %6954 = vmatmul.msk.bf16.gmra.mxu1 %vm218_vm2, %v189_v31  ;;  %v8636_v31 = vld [vmem:[%s15315_s0 + $0xe0] sm:$0xff] }
  0x6e   :  { %6982 = vmatmul.msk.bf16.gmra.mxu2 %vm218_vm2, %v60_v32  ;;  %6994 = vmatmul.msk.bf16.gmra.mxu3 %vm218_vm2, %v60_v32  ;;  %v8641_v32 = vld [vmem:[%s15315_s0 + $0xe8] sm:$0xff]  ;;  %v152_v42 = vrot.slane %v8636_v31, 1 }
  0x6f   :  { %v153_v43 = vrot.slane %v8641_v32, 1 }
  0x7d   :  { %6943 = vmatmul.msk.bf16.gmra.mxu0 %vm218_vm2, %v190_v44  ;;  %6955 = vmatmul.msk.bf16.gmra.mxu1 %vm218_vm2, %v190_v44 }
  0x7e   :  { %6983 = vmatmul.msk.bf16.gmra.mxu2 %vm218_vm2, %v61_v45  ;;  %6995 = vmatmul.msk.bf16.gmra.mxu3 %vm218_vm2, %v61_v45 }
  0x8a   :  { %v271_v55 = vpop.f32.mrf.mxu0  ;;  %v340_v59 = vpop.f32.mrf.mxu1 }
  0x8d   :  { %6944 = vmatmul.msk.bf16.gmra.mxu0 %vm218_vm2, %v191_v54  ;;  %6956 = vmatmul.msk.bf16.gmra.mxu1 %vm218_vm2, %v191_v54  ;;  %v7870_v54 = vld [vmem:[%s15316_s1 + $0x54] sm:$0xf] }
  0x8e   :  { %6984 = vmatmul.msk.bf16.gmra.mxu2 %vm218_vm2, %v62_v60  ;;  %6996 = vmatmul.msk.bf16.gmra.mxu3 %vm218_vm2, %v62_v60  ;;  %v7058_v60 = vld [vmem:[%s15316_s1 + $0x70] sm:$0xf] }
  0x91   :  { %v469_v0 = vpop.f32.mrf.mxu2  ;;  %v538_v1 = vpop.f32.mrf.mxu3 }
  0x92   :  { %v8610_v7 = vadd.f32 %v469_v0, %v271_v55  ;;  %v8612_v8 = vadd.f32 %v538_v1, %v340_v59  ;;  %v273_v9 = vpop.f32.mrf.mxu0  ;;  %v342_v10 = vpop.f32.mrf.mxu1  ;;  %v7015_v55 = vor.u32 %v7871_v53, %v7014_v52  ;;  %v7016_v59 = vld [vmem:[%s15316_s1 + $0x58] sm:$0x30]  ;;  %v7875_v0 = vld [vmem:[%s15316_s1 + $0x74] sm:$0x30]  ;;  %v7008_v53 = vld [vmem:[%s15316_s1 + $0x48] sm:$0xf0] }
  0x93   :  { %v7019_v1 = vor.u32 %v7870_v54, %v7016_v59  ;;  %v7059_v5 = vor.u32 %v7875_v0, %v7058_v60  ;;  %v7050_v54 = vld [vmem:[%s15316_s1 + $0x60] sm:$0xf] }
  0x94   :  { %v750_v11 = vsel %vm255_vm0, %v7015_v55, 0  ;;  %v7873_v55 = vld [vmem:[%s15316_s1 + $0x64] sm:$0xf0] }
  0x95   :  { %761 = vmatpush.bf16.msrb.mxu0 %v750_v11  ;;  %v7052_v11 = vld [vmem:[%s15316_s1 + $0x68] sm:$0xf0] }
  0x99   :  { %v471_v18 = vpop.f32.mrf.mxu2  ;;  %v540_v19 = vpop.f32.mrf.mxu3 }
  0x9a   :  { %v8618_v22 = vadd.f32 %v471_v18, %v273_v9  ;;  %v8620_v26 = vadd.f32 %v540_v19, %v342_v10  ;;  %v276_v27 = vpop.f32.mrf.mxu0  ;;  %v345_v28 = vpop.f32.mrf.mxu1  ;;  %v7874_v9 = vld [vmem:[%s15316_s1 + $0x74] sm:$0xf]  ;;  %v7060_v10 = vld [vmem:[%s15316_s1 + $0x78] sm:$0x30]  ;;  %v154_v18 = vsel %vm102_vm1, %v152_v42, %v153_v43  ;;  %v753_v19 = vsel %vm255_vm0, %v7019_v1, 0 }
  0x9b   :  { %v7063_v15 = vor.u32 %v7874_v9, %v7060_v10  ;;  %830 = vmatpush.bf16.msrb.mxu1 %v753_v19  ;;  %v193_v41 = vpack.c.bf16 %v154_v18, %v151_v17  ;;  %v64_v42 = vpack.c.bf16 %v8636_v31, %v8607_v63  ;;  %v7051_v9 = vor.u32 %v7873_v55, %v7050_v54  ;;  %v7872_v10 = vld [vmem:[%s15316_s1 + $0x64] sm:$0xf] }
  0x9d   :  { %6945 = vmatmul.msk.bf16.gmra.mxu0 %vm218_vm2, %v192_v20  ;;  %6957 = vmatmul.msk.bf16.gmra.mxu1 %vm218_vm2, %v192_v20  ;;  %v1094_v20 = vsel %vm255_vm0, %v7059_v5, 0 }
  0x9e   :  { %6985 = vmatmul.msk.bf16.gmra.mxu2 %vm218_vm2, %v63_v29  ;;  %6997 = vmatmul.msk.bf16.gmra.mxu3 %vm218_vm2, %v63_v29  ;;  %v7868_v29 = vld [vmem:[%s15316_s1 + $0x44] sm:$0xf] }
  0x9f   :  { %1105 = vmatpush.bf16.msrb.mxu2 %v1094_v20  ;;  %v7011_v5 = vor.u32 %v7868_v29, %v7008_v53 }
  0xa1   :  { %v474_v36 = vpop.f32.mrf.mxu2  ;;  %v543_v37 = vpop.f32.mrf.mxu3  ;;  %831 = vmatpush.bf16.msrb.mxu1 %v7011_v5 }
  0xa2   :  { %v8646_v44 = vadd.f32 %v474_v36, %v276_v27  ;;  %v8648_v45 = vadd.f32 %v543_v37, %v345_v28  ;;  %v278_v50 = vpop.f32.mrf.mxu0  ;;  %v347_v51 = vpop.f32.mrf.mxu1  ;;  %v1097_v27 = vsel %vm255_vm0, %v7063_v15, 0  ;;  %v7006_v28 = vld [vmem:[%s15316_s1 + $0x40] sm:$0xf]  ;;  %v7055_v15 = vor.u32 %v7872_v10, %v7052_v11 }
  0xa3   :  { %1174 = vmatpush.bf16.msrb.mxu3 %v1097_v27  ;;  %v7007_v52 = vor.u32 %v7869_v12, %v7006_v28  ;;  %1106 = vmatpush.bf16.msrb.mxu2 %v7051_v9  ;;  %v598_v9 = vrot.slane %v8344_v6, 2 }
  0xa5   :  { %762 = vmatpush.bf16.msrb.mxu0 %v7007_v52 }
  0xa7   :  { %1175 = vmatpush.bf16.msrb.mxu3 %v7055_v15 }
  0xa9   :  { %v476_v36 = vpop.f32.mrf.mxu2  ;;  %v545_v37 = vpop.f32.mrf.mxu3 }
  0xaa   :  { %v8702_v59 = vadd.f32 %v476_v36, %v278_v50  ;;  %v8704_v60 = vadd.f32 %v545_v37, %v347_v51  ;;  %v281_v0 = vpop.f32.mrf.mxu0  ;;  %v350_v1 = vpop.f32.mrf.mxu1  ;;  %v8719_v50 = vld [vmem:[%s15315_s0 + $0xf0] sm:$0xff]  ;;  %v8724_v51 = vld [vmem:[%s15315_s0 + $0xf8] sm:$0xf] }
  0xab   :  { %v155_v12 = vrot.slane %v8719_v50, 1  ;;  %v157_v29 = vrot.slane %v8724_v51, 1 }
  0xad   :  { %6946 = vmatmul.msk.bf16.gmra.mxu0 %vm218_vm2, %v193_v41  ;;  %6958 = vmatmul.msk.bf16.gmra.mxu1 %vm218_vm2, %v193_v41  ;;  %v156_v36 = vsel %vm102_vm1, %v153_v43, %v155_v12  ;;  %v158_v37 = vsel %vm102_vm1, %v155_v12, %v157_v29  ;;  %v943_v12 = vrot.slane %v8365_v16, 3  ;;  %v945_v29 = vrot.slane %v8377_v21, 3 }
  0xae   :  { %6986 = vmatmul.msk.bf16.gmra.mxu2 %vm218_vm2, %v64_v42  ;;  %6998 = vmatmul.msk.bf16.gmra.mxu3 %vm218_vm2, %v64_v42  ;;  %v194_v52 = vpack.c.bf16 %v158_v37, %v156_v36  ;;  %vm2607_vm1 = vcmask 654336  }
  0xb1   :  { %v479_v17 = vpop.f32.mrf.mxu2  ;;  %v548_v18 = vpop.f32.mrf.mxu3 }
  0xb2   :  { %v8726_v19 = vadd.f32 %v479_v17, %v281_v0  ;;  %v8728_v20 = vadd.f32 %v548_v18, %v350_v1  ;;  %v283_v27 = vpop.f32.mrf.mxu0  ;;  %v352_v28 = vpop.f32.mrf.mxu1  ;;  %v65_v1 = vpack.c.bf16 %v8719_v50, %v8641_v32  ;;  %v599_v18 = vrot.slane %v8365_v16, 2 }
  0xb4   :  { %v600_v36 = vsel %vm255_vm0, %v598_v9, %v599_v18 }
  0xb9   :  { %v481_v41 = vpop.f32.mrf.mxu2  ;;  %v550_v42 = vpop.f32.mrf.mxu3 }
  0xba   :  { %v8736_v53 = vadd.f32 %v481_v41, %v283_v27  ;;  %v8738_v54 = vadd.f32 %v550_v42, %v352_v28  ;;  %v286_v55 = vpop.f32.mrf.mxu0  ;;  %v355_v0 = vpop.f32.mrf.mxu1  ;;  %v601_v27 = vrot.slane %v8377_v21, 2  ;;  %v942_v28 = vrot.slane %v8344_v6, 3 }
  0xbb   :  { %v946_v42 = vsel %vm941_vm3, %v943_v12, %v945_v29 }
  0xbc   :  { %v602_v37 = vsel %vm255_vm0, %v599_v18, %v601_v27  ;;  %v944_v41 = vsel %vm941_vm3, %v942_v28, %v943_v12  ;;  %v603_v18 = vrot.slane %v8407_v38, 2 }
  0xbd   :  { %6947 = vmatmul.msk.bf16.gmra.mxu0 %vm218_vm2, %v194_v52  ;;  %6959 = vmatmul.msk.bf16.gmra.mxu1 %vm218_vm2, %v194_v52 }
  0xbe   :  { %6987 = vmatmul.msk.bf16.gmra.mxu2 %vm218_vm2, %v65_v1  ;;  %6999 = vmatmul.msk.bf16.gmra.mxu3 %vm218_vm2, %v65_v1 }
  0xc1   :  { %v484_v43 = vpop.f32.mrf.mxu2  ;;  %v553_v5 = vpop.f32.mrf.mxu3 }
  0xc2   :  { %v8747_v10 = vadd.f32 %v484_v43, %v286_v55  ;;  %v8749_v11 = vadd.f32 %v553_v5, %v355_v0  ;;  %v288_v15 = vpop.f32.mrf.mxu0  ;;  %v357_v17 = vpop.f32.mrf.mxu1  ;;  %v678_v0 = vpack.c.bf16 %v602_v37, %v600_v36  ;;  %v1022_v5 = vpack.c.bf16 %v946_v42, %v944_v41 }
  0xc3   :  { %v605_v36 = vrot.slane %v8412_v39, 2  ;;  %v606_v37 = vrot.slane %v8417_v40, 2  ;;  %v947_v41 = vrot.slane %v8407_v38, 3  ;;  %v949_v42 = vrot.slane %v8412_v39, 3 }
  0xc9   :  { %v486_v52 = vpop.f32.mrf.mxu2  ;;  %v555_v55 = vpop.f32.mrf.mxu3 }
  0xca   :  { %v8760_v1 = vadd.f32 %v486_v52, %v288_v15  ;;  %v8762_v43 = vadd.f32 %v555_v55, %v357_v17  ;;  %v291_v6 = vpop.f32.mrf.mxu0  ;;  %v360_v16 = vpop.f32.mrf.mxu1  ;;  %v950_v52 = vrot.slane %v8417_v40, 3  ;;  %v604_v55 = vsel %vm255_vm0, %v601_v27, %v603_v18 }
  0xcc   :  { %16173 = vst [vmem:[#allocation5_spill] sm:$0xff] %v8762_v43 }
  0xcd   :  { %7020 = vmatmul.msk.bf16.vlgmr.msrb.gmra.mxu0 %vm218_vm2, %v678_v0  ;;  %7032 = vmatmul.msk.bf16.vlgmr.msrb.gmra.mxu1 %vm218_vm2, %v678_v0  ;;  %v607_v0 = vsel %vm255_vm0, %v605_v36, %v606_v37  ;;  %v608_v36 = vrot.slane %v8433_v48, 2 }
  0xce   :  { %7064 = vmatmul.msk.bf16.vlgmr.msrb.gmra.mxu2 %vm218_vm2, %v1022_v5  ;;  %7076 = vmatmul.msk.bf16.vlgmr.msrb.gmra.mxu3 %vm218_vm2, %v1022_v5 }
  0xd1   :  { %v489_v21 = vpop.f32.mrf.mxu2  ;;  %v558_v9 = vpop.f32.mrf.mxu3 }
  0xd2   :  { %v8769_v28 = vadd.f32 %v489_v21, %v291_v6  ;;  %v8771_v15 = vadd.f32 %v558_v9, %v360_v16  ;;  %v293_v17 = vpop.f32.mrf.mxu0  ;;  %v362_v12 = vpop.f32.mrf.mxu1  ;;  %v948_v6 = vsel %vm941_vm3, %v945_v29, %v947_v41  ;;  %v951_v16 = vsel %vm941_vm3, %v949_v42, %v950_v52 }
  0xd3   :  { %v679_v9 = vpack.c.bf16 %v607_v0, %v604_v55  ;;  %v1023_v39 = vpack.c.bf16 %v951_v16, %v948_v6  ;;  %v610_v41 = vrot.slane %v8438_v49, 2  ;;  %v952_v42 = vrot.slane %v8433_v48, 3 }
  0xd4   :  { %16174 = vst [vmem:[#allocation6_spill] sm:$0xff] %v8769_v28  ;;  %v954_v55 = vrot.slane %v8438_v49, 3  ;;  %v609_v0 = vsel %vm255_vm0, %v606_v37, %v608_v36 }
  0xd5   :  { %16175 = vst [vmem:[#allocation7_spill] sm:$0xff] %v8771_v15  ;;  %v611_v6 = vsel %vm255_vm0, %v608_v36, %v610_v41  ;;  %v953_v16 = vsel %vm941_vm3, %v950_v52, %v952_v42  ;;  %v612_v52 = vrot.slane %v8453_v56, 2 }
  0xd9   :  { %v491_v5 = vpop.f32.mrf.mxu2  ;;  %v560_v21 = vpop.f32.mrf.mxu3 }
  0xda   :  { %v8782_v15 = vadd.f32 %v491_v5, %v293_v17  ;;  %v8784_v28 = vadd.f32 %v560_v21, %v362_v12  ;;  %v296_v38 = vpop.f32.mrf.mxu0  ;;  %v365_v43 = vpop.f32.mrf.mxu1  ;;  %v955_v5 = vsel %vm941_vm3, %v952_v42, %v954_v55  ;;  %v613_v42 = vrot.slane %v8458_v57, 2 }
  0xdb   :  { %v1024_v48 = vpack.c.bf16 %v955_v5, %v953_v16  ;;  %v615_v55 = vrot.slane %v8463_v58, 2  ;;  %v959_v16 = vrot.slane %v8463_v58, 3 }
  0xdc   :  { %v614_v5 = vsel %vm255_vm0, %v612_v52, %v613_v42 }
  0xdd   :  { %7021 = vmatmul.msk.bf16.gmra.mxu0 %vm218_vm2, %v679_v9  ;;  %7033 = vmatmul.msk.bf16.gmra.mxu1 %vm218_vm2, %v679_v9  ;;  %v680_v9 = vpack.c.bf16 %v611_v6, %v609_v0  ;;  %v956_v0 = vrot.slane %v8453_v56, 3  ;;  %v957_v6 = vrot.slane %v8458_v57, 3 }
  0xde   :  { %7065 = vmatmul.msk.bf16.gmra.mxu2 %vm218_vm2, %v1023_v39  ;;  %7077 = vmatmul.msk.bf16.gmra.mxu3 %vm218_vm2, %v1023_v39 }
  0xe1   :  { %v494_v40 = vpop.f32.mrf.mxu2  ;;  %v563_v27 = vpop.f32.mrf.mxu3 }
  0xe2   :  { %v8790_v29 = vadd.f32 %v494_v40, %v296_v38  ;;  %v8792_v18 = vadd.f32 %v563_v27, %v365_v43  ;;  %v298_v17 = vpop.f32.mrf.mxu0  ;;  %v367_v12 = vpop.f32.mrf.mxu1 }
  0xe9   :  { %v496_v43 = vpop.f32.mrf.mxu2  ;;  %v565_v21 = vpop.f32.mrf.mxu3 }
  0xea   :  { %v8802_v38 = vadd.f32 %v496_v43, %v298_v17  ;;  %v8804_v39 = vadd.f32 %v565_v21, %v367_v12  ;;  %v301_v40 = vpop.f32.mrf.mxu0  ;;  %v370_v27 = vpop.f32.mrf.mxu1  ;;  %v616_v43 = vsel %vm255_vm0, %v613_v42, %v615_v55  ;;  %v958_v21 = vsel %vm941_vm3, %v956_v0, %v957_v6 }
  0xeb   :  { %v617_v42 = vrot.slane %v8479_v2, 2 }
  0xed   :  { %7022 = vmatmul.msk.bf16.gmra.mxu0 %vm218_vm2, %v680_v9  ;;  %7034 = vmatmul.msk.bf16.gmra.mxu1 %vm218_vm2, %v680_v9  ;;  %v960_v9 = vsel %vm941_vm3, %v957_v6, %v959_v16 }
  0xee   :  { %7066 = vmatmul.msk.bf16.gmra.mxu2 %vm218_vm2, %v1024_v48  ;;  %7078 = vmatmul.msk.bf16.gmra.mxu3 %vm218_vm2, %v1024_v48  ;;  %v681_v48 = vpack.c.bf16 %v616_v43, %v614_v5  ;;  %v1025_v57 = vpack.c.bf16 %v960_v9, %v958_v21  ;;  %v619_v5 = vrot.slane %v8484_v3, 2  ;;  %v620_v43 = vrot.slane %v8489_v4, 2 }
  0xef   :  { %v961_v21 = vrot.slane %v8479_v2, 3  ;;  %v963_v9 = vrot.slane %v8484_v3, 3 }
  0xf1   :  { %v499_v49 = vpop.f32.mrf.mxu2  ;;  %v568_v37 = vpop.f32.mrf.mxu3 }
  0xf2   :  { %v8811_v36 = vadd.f32 %v499_v49, %v301_v40  ;;  %v8813_v17 = vadd.f32 %v568_v37, %v370_v27  ;;  %v303_v12 = vpop.f32.mrf.mxu0  ;;  %v372_v41 = vpop.f32.mrf.mxu1 }
  0xf4   :  { %16176 = vst [vmem:[#allocation8_spill] sm:$0xff] %v8813_v17 }
  0xf9   :  { %v501_v40 = vpop.f32.mrf.mxu2  ;;  %v570_v27 = vpop.f32.mrf.mxu3 }
  0xfa   :  { %v8824_v49 = vadd.f32 %v501_v40, %v303_v12  ;;  %v8826_v37 = vadd.f32 %v570_v27, %v372_v41  ;;  %v306_v56 = vpop.f32.mrf.mxu0  ;;  %v375_v17 = vpop.f32.mrf.mxu1  ;;  %v964_v40 = vrot.slane %v8489_v4, 3  ;;  %v618_v27 = vsel %vm255_vm0, %v615_v55, %v617_v42 }
  0xfc   :  { %16177 = vst [vmem:[#allocation9_spill] sm:$0xff] %v8826_v37 }
  0xfd   :  { %7023 = vmatmul.msk.bf16.gmra.mxu0 %vm218_vm2, %v681_v48  ;;  %7035 = vmatmul.msk.bf16.gmra.mxu1 %vm218_vm2, %v681_v48  ;;  %v621_v48 = vsel %vm255_vm0, %v619_v5, %v620_v43  ;;  %v622_v5 = vrot.slane %v8505_v13, 2 }
  0xfe   :  { %7067 = vmatmul.msk.bf16.gmra.mxu2 %vm218_vm2, %v1025_v57  ;;  %7079 = vmatmul.msk.bf16.gmra.mxu3 %vm218_vm2, %v1025_v57 }
 0x101   :  { %v504_v58 = vpop.f32.mrf.mxu2  ;;  %v573_v52 = vpop.f32.mrf.mxu3 }
 0x102   :  { %v8833_v0 = vadd.f32 %v504_v58, %v306_v56  ;;  %v8835_v12 = vadd.f32 %v573_v52, %v375_v17  ;;  %v308_v41 = vpop.f32.mrf.mxu0  ;;  %v377_v6 = vpop.f32.mrf.mxu1  ;;  %v962_v56 = vsel %vm941_vm3, %v959_v16, %v961_v21  ;;  %v965_v17 = vsel %vm941_vm3, %v963_v9, %v964_v40 }
 0x103   :  { %v682_v52 = vpack.c.bf16 %v621_v48, %v618_v27  ;;  %v1026_v3 = vpack.c.bf16 %v965_v17, %v962_v56  ;;  %v624_v21 = vrot.slane %v8510_v14, 2  ;;  %v966_v9 = vrot.slane %v8505_v13, 3 }
 0x104   :  { %16178 = vst [vmem:[#allocation10_spill] sm:$0xff] %v8833_v0  ;;  %v968_v27 = vrot.slane %v8510_v14, 3  ;;  %v623_v48 = vsel %vm255_vm0, %v620_v43, %v622_v5 }
 0x105   :  { %16179 = vst [vmem:[#allocation11_spill] sm:$0xff] %v8835_v12  ;;  %v625_v56 = vsel %vm255_vm0, %v622_v5, %v624_v21  ;;  %v967_v17 = vsel %vm941_vm3, %v964_v40, %v966_v9  ;;  %v626_v40 = vrot.slane %v8525_v23, 2 }
 0x109   :  { %v506_v57 = vpop.f32.mrf.mxu2  ;;  %v575_v58 = vpop.f32.mrf.mxu3 }
 0x10a   :  { %v8846_v12 = vadd.f32 %v506_v57, %v308_v41  ;;  %v8848_v0 = vadd.f32 %v575_v58, %v377_v6  ;;  %v311_v2 = vpop.f32.mrf.mxu0  ;;  %v380_v37 = vpop.f32.mrf.mxu1  ;;  %v969_v57 = vsel %vm941_vm3, %v966_v9, %v968_v27  ;;  %v627_v9 = vrot.slane %v8530_v24, 2 }
 0x10b   :  { %v1027_v13 = vpack.c.bf16 %v969_v57, %v967_v17  ;;  %v629_v27 = vrot.slane %v8535_v25, 2  ;;  %v973_v17 = vrot.slane %v8535_v25, 3 }
 0x10c   :  { %v628_v57 = vsel %vm255_vm0, %v626_v40, %v627_v9 }
 0x10d   :  { %7024 = vmatmul.msk.bf16.gmra.mxu0 %vm218_vm2, %v682_v52  ;;  %7036 = vmatmul.msk.bf16.gmra.mxu1 %vm218_vm2, %v682_v52  ;;  %v683_v52 = vpack.c.bf16 %v625_v56, %v623_v48  ;;  %v970_v48 = vrot.slane %v8525_v23, 3  ;;  %v971_v56 = vrot.slane %v8530_v24, 3 }
 0x10e   :  { %7068 = vmatmul.msk.bf16.gmra.mxu2 %vm218_vm2, %v1026_v3  ;;  %7080 = vmatmul.msk.bf16.gmra.mxu3 %vm218_vm2, %v1026_v3 }
 0x111   :  { %v509_v4 = vpop.f32.mrf.mxu2  ;;  %v578_v55 = vpop.f32.mrf.mxu3 }
 0x112   :  { %v8854_v16 = vadd.f32 %v509_v4, %v311_v2  ;;  %v8856_v42 = vadd.f32 %v578_v55, %v380_v37  ;;  %v313_v41 = vpop.f32.mrf.mxu0  ;;  %v382_v6 = vpop.f32.mrf.mxu1 }
 0x119   :  { %v511_v37 = vpop.f32.mrf.mxu2  ;;  %v580_v58 = vpop.f32.mrf.mxu3 }
 0x11a   :  { %v8866_v2 = vadd.f32 %v511_v37, %v313_v41  ;;  %v8868_v3 = vadd.f32 %v580_v58, %v382_v6  ;;  %v316_v4 = vpop.f32.mrf.mxu0  ;;  %v385_v55 = vpop.f32.mrf.mxu1  ;;  %v630_v37 = vsel %vm255_vm0, %v627_v9, %v629_v27  ;;  %v972_v58 = vsel %vm941_vm3, %v970_v48, %v971_v56 }
 0x11b   :  { %v631_v9 = vrot.slane %v8551_v33, 2 }
 0x11d   :  { %7025 = vmatmul.msk.bf16.gmra.mxu0 %vm218_vm2, %v683_v52  ;;  %7037 = vmatmul.msk.bf16.gmra.mxu1 %vm218_vm2, %v683_v52  ;;  %v974_v52 = vsel %vm941_vm3, %v971_v56, %v973_v17 }
 0x11e   :  { %7069 = vmatmul.msk.bf16.gmra.mxu2 %vm218_vm2, %v1027_v13  ;;  %7081 = vmatmul.msk.bf16.gmra.mxu3 %vm218_vm2, %v1027_v13  ;;  %v684_v13 = vpack.c.bf16 %v630_v37, %v628_v57  ;;  %v1028_v24 = vpack.c.bf16 %v974_v52, %v972_v58  ;;  %v633_v57 = vrot.slane %v8556_v34, 2  ;;  %v634_v37 = vrot.slane %v8561_v35, 2 }
 0x11f   :  { %v975_v58 = vrot.slane %v8551_v33, 3  ;;  %v977_v52 = vrot.slane %v8556_v34, 3 }
 0x121   :  { %v514_v14 = vpop.f32.mrf.mxu2  ;;  %v583_v43 = vpop.f32.mrf.mxu3 }
 0x122   :  { %v8875_v5 = vadd.f32 %v514_v14, %v316_v4  ;;  %v8877_v41 = vadd.f32 %v583_v43, %v385_v55  ;;  %v318_v6 = vpop.f32.mrf.mxu0  ;;  %v387_v21 = vpop.f32.mrf.mxu1 }
 0x124   :  { %16180 = vst [vmem:[#allocation12_spill] sm:$0xff] %v8877_v41 }
 0x129   :  { %v516_v4 = vpop.f32.mrf.mxu2  ;;  %v585_v55 = vpop.f32.mrf.mxu3 }
 0x12a   :  { %v8888_v14 = vadd.f32 %v516_v4, %v318_v6  ;;  %v8890_v43 = vadd.f32 %v585_v55, %v387_v21  ;;  %v321_v23 = vpop.f32.mrf.mxu0  ;;  %v390_v41 = vpop.f32.mrf.mxu1  ;;  %v978_v4 = vrot.slane %v8561_v35, 3  ;;  %v632_v55 = vsel %vm255_vm0, %v629_v27, %v631_v9 }
 0x12c   :  { %16181 = vst [vmem:[#allocation13_spill] sm:$0xff] %v8890_v43 }
 0x12d   :  { %7026 = vmatmul.msk.bf16.gmra.mxu0 %vm218_vm2, %v684_v13  ;;  %7038 = vmatmul.msk.bf16.gmra.mxu1 %vm218_vm2, %v684_v13  ;;  %v635_v13 = vsel %vm255_vm0, %v633_v57, %v634_v37  ;;  %v636_v57 = vrot.slane %v8577_v46, 2 }
 0x12e   :  { %7070 = vmatmul.msk.bf16.gmra.mxu2 %vm218_vm2, %v1028_v24  ;;  %7082 = vmatmul.msk.bf16.gmra.mxu3 %vm218_vm2, %v1028_v24 }
 0x131   :  { %v519_v25 = vpop.f32.mrf.mxu2  ;;  %v588_v40 = vpop.f32.mrf.mxu3 }
 0x132   :  { %v8897_v48 = vadd.f32 %v519_v25, %v321_v23  ;;  %v8899_v6 = vadd.f32 %v588_v40, %v390_v41  ;;  %v323_v21 = vpop.f32.mrf.mxu0  ;;  %v392_v56 = vpop.f32.mrf.mxu1  ;;  %v976_v23 = vsel %vm941_vm3, %v973_v17, %v975_v58  ;;  %v979_v41 = vsel %vm941_vm3, %v977_v52, %v978_v4 }
 0x133   :  { %v685_v40 = vpack.c.bf16 %v635_v13, %v632_v55  ;;  %v1029_v34 = vpack.c.bf16 %v979_v41, %v976_v23  ;;  %v638_v58 = vrot.slane %v8582_v47, 2  ;;  %v980_v52 = vrot.slane %v8577_v46, 3 }
 0x134   :  { %16182 = vst [vmem:[#allocation14_spill] sm:$0xff] %v8897_v48  ;;  %v982_v55 = vrot.slane %v8582_v47, 3  ;;  %v637_v13 = vsel %vm255_vm0, %v634_v37, %v636_v57 }
 0x135   :  { %16183 = vst [vmem:[#allocation15_spill] sm:$0xff] %v8899_v6  ;;  %v639_v23 = vsel %vm255_vm0, %v636_v57, %v638_v58  ;;  %v981_v41 = vsel %vm941_vm3, %v978_v4, %v980_v52  ;;  %v641_v58 = vrot.slane %v8602_v62, 2 }
 0x139   :  { %v521_v24 = vpop.f32.mrf.mxu2  ;;  %v590_v25 = vpop.f32.mrf.mxu3 }
 0x13a   :  { %v8910_v6 = vadd.f32 %v521_v24, %v323_v21  ;;  %v8912_v48 = vadd.f32 %v590_v25, %v392_v56  ;;  %v326_v33 = vpop.f32.mrf.mxu0  ;;  %v395_v43 = vpop.f32.mrf.mxu1  ;;  %v983_v24 = vsel %vm941_vm3, %v980_v52, %v982_v55  ;;  %v984_v52 = vrot.slane %v8597_v61, 3 }
 0x13b   :  { %v1030_v46 = vpack.c.bf16 %v983_v24, %v981_v41  ;;  %v987_v41 = vrot.slane %v8607_v63, 3 }
 0x13d   :  { %7027 = vmatmul.msk.bf16.gmra.mxu0 %vm218_vm2, %v685_v40  ;;  %7039 = vmatmul.msk.bf16.gmra.mxu1 %vm218_vm2, %v685_v40  ;;  %v686_v40 = vpack.c.bf16 %v639_v23, %v637_v13  ;;  %v985_v23 = vrot.slane %v8602_v62, 3 }
 0x13e   :  { %7071 = vmatmul.msk.bf16.gmra.mxu2 %vm218_vm2, %v1029_v34  ;;  %7083 = vmatmul.msk.bf16.gmra.mxu3 %vm218_vm2, %v1029_v34 }
 0x141   :  { %v524_v35 = vpop.f32.mrf.mxu2  ;;  %v593_v27 = vpop.f32.mrf.mxu3 }
 0x142   :  { %v8918_v17 = vadd.f32 %v524_v35, %v326_v33  ;;  %v8920_v9 = vadd.f32 %v593_v27, %v395_v43  ;;  %v328_v21 = vpop.f32.mrf.mxu0  ;;  %v397_v56 = vpop.f32.mrf.mxu1 }
 0x149   :  { %v526_v43 = vpop.f32.mrf.mxu2  ;;  %v595_v25 = vpop.f32.mrf.mxu3 }
 0x14a   :  { %v8930_v33 = vadd.f32 %v526_v43, %v328_v21  ;;  %v8932_v34 = vadd.f32 %v595_v25, %v397_v56  ;;  %v764_v35 = vpop.f32.mrf.mxu0  ;;  %v833_v27 = vpop.f32.mrf.mxu1  ;;  %v986_v25 = vsel %vm941_vm3, %v984_v52, %v985_v23  ;;  %v648_v52 = vrot.slane %v8641_v32, 2 }
 0x14b   :  { %v8935_v47 = vadd.f32 %v764_v35, %v8610_v7  ;;  %v8938_v37 = vadd.f32 %v833_v27, %v8612_v8  ;;  %v640_v7 = vrot.slane %v8597_v61, 2  ;;  %v643_v8 = vrot.slane %v8607_v63, 2 }
 0x14d   :  { %7028 = vmatmul.msk.bf16.gmra.mxu0 %vm218_vm2, %v686_v40  ;;  %7040 = vmatmul.msk.bf16.gmra.mxu1 %vm218_vm2, %v686_v40  ;;  %v642_v24 = vsel %vm255_vm0, %v640_v7, %v641_v58  ;;  %v644_v43 = vsel %vm255_vm0, %v641_v58, %v643_v8  ;;  %v988_v40 = vsel %vm941_vm3, %v985_v23, %v987_v41  ;;  %v645_v7 = vrot.slane %v8631_v30, 2 }
 0x14e   :  { %7072 = vmatmul.msk.bf16.gmra.mxu2 %vm218_vm2, %v1030_v46  ;;  %7084 = vmatmul.msk.bf16.gmra.mxu3 %vm218_vm2, %v1030_v46  ;;  %v1031_v46 = vpack.c.bf16 %v988_v40, %v986_v25  ;;  %v647_v58 = vrot.slane %v8636_v31, 2  ;;  %v991_v25 = vrot.slane %v8636_v31, 3  ;;  %v992_v40 = vrot.slane %v8641_v32, 3  ;;  %v7878_v31 = vld [vmem:[%s15316_s1 + $0x94] sm:$0xf] }
 0x14f   :  { %v7104_v32 = vld [vmem:[%s15316_s1 + $0x98] sm:$0x30] }
 0x151   :  { %v8944_v4 = vpop.f32.mrf.mxu2  ;;  %v8946_v21 = vpop.f32.mrf.mxu3 }
 0x152   :  { %v766_v56 = vpop.f32.mrf.mxu0  ;;  %v835_v57 = vpop.f32.mrf.mxu1 }
 0x153   :  { %v8953_v55 = vadd.f32 %v766_v56, %v8618_v22  ;;  %v8956_v13 = vadd.f32 %v835_v57, %v8620_v26  ;;  %v687_v22 = vpack.c.bf16 %v644_v43, %v642_v24 }
 0x155   :  { %16184 = vst [vmem:[#allocation16_spill] sm:$0xff] %v8953_v55  ;;  %v16221_v55 = vld [vmem:[#allocation14_spill] sm:$0xff] }
 0x156   :  { %16185 = vst [vmem:[#allocation17_spill] sm:$0xff] %v8956_v13 }
 0x159   :  { %v8964_v35 = vpop.f32.mrf.mxu2  ;;  %v8966_v61 = vpop.f32.mrf.mxu3 }
 0x15a   :  { %16186 = vst [vmem:[#allocation18_spill] sm:$0xff] %v8964_v35  ;;  %v769_v27 = vpop.f32.mrf.mxu0  ;;  %v838_v26 = vpop.f32.mrf.mxu1 }
 0x15b   :  { %16187 = vst [vmem:[#allocation19_spill] sm:$0xff] %v8966_v61  ;;  %v897_v62 = vadd.f32 %v769_v27, %v8646_v44  ;;  %v898_v63 = vadd.f32 %v838_v26, %v8648_v45  ;;  %v989_v44 = vrot.slane %v8631_v30, 3  ;;  %v7102_v30 = vld [vmem:[%s15316_s1 + $0x90] sm:$0xf]  ;;  %v7879_v26 = vld [vmem:[%s15316_s1 + $0x94] sm:$0x30] }
 0x15d   :  { %7029 = vmatmul.msk.bf16.gmra.mxu0 %vm218_vm2, %v687_v22  ;;  %7041 = vmatmul.msk.bf16.gmra.mxu1 %vm218_vm2, %v687_v22 }
 0x15e   :  { %7073 = vmatmul.msk.bf16.gmra.mxu2 %vm218_vm2, %v1031_v46  ;;  %7085 = vmatmul.msk.bf16.gmra.mxu3 %vm218_vm2, %v1031_v46  ;;  %v7103_v46 = vor.u32 %v7879_v26, %v7102_v30  ;;  %v7096_v30 = vld [vmem:[%s15316_s1 + $0x88] sm:$0xf0] }
 0x161   :  { %v1113_v56 = vpop.f32.mrf.mxu2  ;;  %v1182_v57 = vpop.f32.mrf.mxu3 }
 0x162   :  { %v8978_v23 = vadd.f32 %v1113_v56, %v897_v62  ;;  %v8980_v45 = vadd.f32 %v1182_v57, %v898_v63  ;;  %v771_v24 = vpop.f32.mrf.mxu0  ;;  %v840_v43 = vpop.f32.mrf.mxu1  ;;  %v649_v62 = vsel %vm255_vm0, %v647_v58, %v648_v52  ;;  %v1438_v63 = vsel %vm255_vm0, %v7103_v46, 0 }
 0x163   :  { %v8985_v22 = vadd.f32 %v771_v24, %v8702_v59  ;;  %v8988_v27 = vadd.f32 %v840_v43, %v8704_v60  ;;  %v7107_v59 = vor.u32 %v7878_v31, %v7104_v32  ;;  %v646_v60 = vsel %vm255_vm0, %v643_v8, %v645_v7  ;;  %1449 = vmatpush.bf16.msra.mxu0 %v1438_v63  ;;  %v7094_v43 = vld [vmem:[%s15316_s1 + $0x80] sm:$0xf]  ;;  %v7877_v8 = vld [vmem:[%s15316_s1 + $0x84] sm:$0xf0]  ;;  %v7876_v7 = vld [vmem:[%s15316_s1 + $0x84] sm:$0xf] }
 0x164   :  { %v990_v56 = vsel %vm941_vm3, %v987_v41, %v989_v44  ;;  %v993_v57 = vsel %vm941_vm3, %v991_v25, %v992_v40  ;;  %v688_v44 = vpack.c.bf16 %v649_v62, %v646_v60  ;;  %v7095_v25 = vor.u32 %v7877_v8, %v7094_v43 }
 0x165   :  { %v1441_v24 = vsel %vm255_vm0, %v7107_v59, 0  ;;  %v1032_v46 = vpack.c.bf16 %v993_v57, %v990_v56  ;;  %v7099_v32 = vor.u32 %v7876_v7, %v7096_v30  ;;  %v652_v43 = vrot.slane %v8724_v51, 2 }
 0x166   :  { %1518 = vmatpush.bf16.msra.mxu1 %v1441_v24 }
 0x167   :  { %1450 = vmatpush.bf16.msra.mxu0 %v7095_v25  ;;  %v996_v25 = vrot.slane %v8724_v51, 3 }
 0x169   :  { %v9017_v58 = vpop.f32.mrf.mxu2  ;;  %v9019_v41 = vpop.f32.mrf.mxu3 }
 0x16a   :  { %v774_v26 = vpop.f32.mrf.mxu0  ;;  %v843_v31 = vpop.f32.mrf.mxu1  ;;  %1519 = vmatpush.bf16.msra.mxu1 %v7099_v32 }
 0x16b   :  { %v901_v59 = vadd.f32 %v774_v26, %v8726_v19  ;;  %v902_v63 = vadd.f32 %v843_v31, %v8728_v20  ;;  %v650_v20 = vrot.slane %v8719_v50, 2 }
 0x16d   :  { %7030 = vmatmul.msk.bf16.gmra.mxu0 %vm218_vm2, %v688_v44  ;;  %7042 = vmatmul.msk.bf16.gmra.mxu1 %vm218_vm2, %v688_v44  ;;  %v994_v44 = vrot.slane %v8719_v50, 3  ;;  %v651_v30 = vsel %vm255_vm0, %v648_v52, %v650_v20  ;;  %v653_v26 = vsel %vm255_vm0, %v650_v20, %v652_v43  ;;  %vm2700_vm0 = vcmask 523264  }
 0x16e   :  { %7074 = vmatmul.msk.bf16.gmra.mxu2 %vm218_vm2, %v1032_v46  ;;  %7086 = vmatmul.msk.bf16.gmra.mxu3 %vm218_vm2, %v1032_v46 }
 0x16f   :  { %v995_v31 = vsel %vm941_vm3, %v992_v40, %v994_v44  ;;  %v997_v46 = vsel %vm941_vm3, %v994_v44, %v996_v25  ;;  %vm6560_vm3 = vcmask 97280  }
 0x171   :  { %v1118_v60 = vpop.f32.mrf.mxu2  ;;  %v1187_v62 = vpop.f32.mrf.mxu3 }
 0x172   :  { %v9030_v24 = vadd.f32 %v1118_v60, %v901_v59  ;;  %v9032_v56 = vadd.f32 %v1187_v62, %v902_v63  ;;  %v776_v57 = vpop.f32.mrf.mxu0  ;;  %v845_v19 = vpop.f32.mrf.mxu1  ;;  %v1033_v60 = vpack.c.bf16 %v997_v46, %v995_v31 }
 0x173   :  { %v9037_v8 = vadd.f32 %v776_v57, %v8736_v53  ;;  %v9040_v7 = vadd.f32 %v845_v19, %v8738_v54  ;;  %v689_v53 = vpack.c.bf16 %v653_v26, %v651_v30  ;;  %v8231_v19 = vld [vmem:[%s15315_s0 + $0x10] sm:$0xff]  ;;  %v16193_v30 = vld [vmem:[#allocation5_spill] sm:$0xff] }
 0x174   :  { %v1289_v20 = vrot.slane %v8231_v19, 4 }
 0x175   :  { %16188 = vst [vmem:[#allocation20_spill] sm:$0xff] %v9037_v8 }
 0x176   :  { %16189 = vst [vmem:[#allocation21_spill] sm:$0xff] %v9040_v7 }
 0x179   :  { %v9048_v32 = vpop.f32.mrf.mxu2  ;;  %v9050_v59 = vpop.f32.mrf.mxu3 }
 0x17a   :  { %16190 = vst [vmem:[#allocation22_spill] sm:$0xff] %v9048_v32  ;;  %v779_v63 = vpop.f32.mrf.mxu0  ;;  %v848_v54 = vpop.f32.mrf.mxu1 }
 0x17b   :  { %16191 = vst [vmem:[#allocation23_spill] sm:$0xff] %v9050_v59  ;;  %v9053_v50 = vadd.f32 %v779_v63, %v8747_v10  ;;  %v9056_v51 = vadd.f32 %v848_v54, %v8749_v11  ;;  %v8229_v10 = vld [vmem:[%s15315_s0] sm:$0xff]  ;;  %v8230_v11 = vld [vmem:[%s15315_s0 + $0x8] sm:$0xff]  ;;  %v16198_v59 = vld [vmem:[#allocation7_spill] sm:$0xff] }
 0x17c   :  { %v1286_v62 = vrot.slane %v8229_v10, 4  ;;  %v1287_v57 = vrot.slane %v8230_v11, 4  ;;  %v16197_v11 = vld [vmem:[#allocation6_spill] sm:$0xff] }
 0x17d   :  { %7031 = vmatmul.msk.bf16.gmra.mxu0 %vm218_vm2, %v689_v53  ;;  %7043 = vmatmul.msk.bf16.gmra.mxu1 %vm218_vm2, %v689_v53 }
 0x17e   :  { %7075 = vmatmul.msk.bf16.gmra.mxu2 %vm218_vm2, %v1033_v60  ;;  %7087 = vmatmul.msk.bf16.gmra.mxu3 %vm218_vm2, %v1033_v60  ;;  %v1288_v31 = vsel %vm1285_vm4, %v1286_v62, %v1287_v57  ;;  %v1290_v46 = vsel %vm1285_vm4, %v1287_v57, %v1289_v20  ;;  %v8232_v62 = vld [vmem:[%s15315_s0 + $0x18] sm:$0xf] }
 0x17f   :  { %v1366_v54 = vpack.c.bf16 %v1290_v46, %v1288_v31  ;;  %v1291_v57 = vrot.slane %v8232_v62, 4 }
 0x181   :  { %v9062_v52 = vpop.f32.mrf.mxu2  ;;  %v9064_v40 = vpop.f32.mrf.mxu3 }
 0x182   :  { %v781_v43 = vpop.f32.mrf.mxu0  ;;  %v850_v44 = vpop.f32.mrf.mxu1 }
 0x183   :  { %v9076_v25 = vadd.f32 %v781_v43, %v8760_v1  ;;  %v9079_v26 = vadd.f32 %v850_v44, %v16193_v30 }
 0x185   :  { %16192 = vst [vmem:[#allocation24_spill] sm:$0xff] %v9076_v25  ;;  %v16209_v25 = vld [vmem:[#allocation10_spill] sm:$0xff] }
 0x186   :  { %16194 = vst [vmem:[#allocation5_spill] sm:$0xff] %v9079_v26 }
 0x189   :  { %v9083_v53 = vpop.f32.mrf.mxu2  ;;  %v9085_v63 = vpop.f32.mrf.mxu3 }
 0x18a   :  { %16195 = vst [vmem:[#allocation25_spill] sm:$0xff] %v9083_v53  ;;  %v784_v60 = vpop.f32.mrf.mxu0  ;;  %v853_v10 = vpop.f32.mrf.mxu1 }
 0x18b   :  { %16196 = vst [vmem:[#allocation26_spill] sm:$0xff] %v9085_v63  ;;  %v909_v19 = vadd.f32 %v784_v60, %v16197_v11  ;;  %v910_v1 = vadd.f32 %v853_v10, %v16198_v59  ;;  %v8233_v59 = vld [vmem:[%s15315_s0 + $0x20] sm:$0xff] }
 0x18c   :  { %v1293_v60 = vrot.slane %v8233_v59, 4 }
 0x18d   :  { %7108 = vmatmul.msk.bf16.vlgmr.msra.gmra.mxu0 %vm218_vm2, %v1366_v54  ;;  %7120 = vmatmul.msk.bf16.vlgmr.msra.gmra.mxu1 %vm218_vm2, %v1366_v54  ;;  %v8234_v54 = vld [vmem:[%s15315_s0 + $0x28] sm:$0xff] }
 0x18e   :  { %v1294_v10 = vrot.slane %v8234_v54, 4 }
 0x191   :  { %v1128_v43 = vpop.f32.mrf.mxu2  ;;  %v1197_v44 = vpop.f32.mrf.mxu3 }
 0x192   :  { %v9094_v30 = vadd.f32 %v1128_v43, %v909_v19  ;;  %v9096_v31 = vadd.f32 %v1197_v44, %v910_v1  ;;  %v786_v46 = vpop.f32.mrf.mxu0  ;;  %v855_v7 = vpop.f32.mrf.mxu1  ;;  %v1292_v1 = vsel %vm1285_vm4, %v1289_v20, %v1291_v57  ;;  %v1295_v43 = vsel %vm1285_vm4, %v1293_v60, %v1294_v10  ;;  %v8235_v60 = vld [vmem:[%s15315_s0 + $0x30] sm:$0xff] }
 0x193   :  { %v9105_v11 = vadd.f32 %v786_v46, %v8782_v15  ;;  %v9108_v19 = vadd.f32 %v855_v7, %v8784_v28  ;;  %v1367_v59 = vpack.c.bf16 %v1295_v43, %v1292_v1  ;;  %v1296_v1 = vrot.slane %v8235_v60, 4 }
 0x199   :  { %v9112_v44 = vpop.f32.mrf.mxu2  ;;  %v9114_v62 = vpop.f32.mrf.mxu3 }
 0x19a   :  { %v789_v32 = vpop.f32.mrf.mxu0  ;;  %v858_v8 = vpop.f32.mrf.mxu1 }
 0x19b   :  { %v913_v63 = vadd.f32 %v789_v32, %v8790_v29  ;;  %v914_v54 = vadd.f32 %v858_v8, %v8792_v18  ;;  %v8236_v29 = vld [vmem:[%s15315_s0 + $0x38] sm:$0xf] }
 0x19c   :  { %v1298_v18 = vrot.slane %v8236_v29, 4  ;;  %v16203_v29 = vld [vmem:[#allocation8_spill] sm:$0xff] }
 0x19d   :  { %7109 = vmatmul.msk.bf16.gmra.mxu0 %vm218_vm2, %v1367_v59  ;;  %7121 = vmatmul.msk.bf16.gmra.mxu1 %vm218_vm2, %v1367_v59 }
 0x19e   :  { %v1299_v43 = vsel %vm1285_vm4, %v1296_v1, %v1298_v18 }
 0x1a1   :  { %v1133_v28 = vpop.f32.mrf.mxu2  ;;  %v1202_v15 = vpop.f32.mrf.mxu3 }
 0x1a2   :  { %v9120_v7 = vadd.f32 %v1133_v28, %v913_v63  ;;  %v9122_v20 = vadd.f32 %v1202_v15, %v914_v54  ;;  %v791_v57 = vpop.f32.mrf.mxu0  ;;  %v860_v46 = vpop.f32.mrf.mxu1  ;;  %v1297_v63 = vsel %vm1285_vm4, %v1294_v10, %v1296_v1  ;;  %v8237_v1 = vld [vmem:[%s15315_s0 + $0x40] sm:$0xff] }
 0x1a3   :  { %v9131_v8 = vadd.f32 %v791_v57, %v8802_v38  ;;  %v9134_v32 = vadd.f32 %v860_v46, %v8804_v39  ;;  %v1368_v28 = vpack.c.bf16 %v1299_v43, %v1297_v63  ;;  %v1300_v18 = vrot.slane %v8237_v1, 4  ;;  %v8239_v43 = vld [vmem:[%s15315_s0 + $0x50] sm:$0xff] }
 0x1a5   :  { %16199 = vst [vmem:[#allocation6_spill] sm:$0xff] %v9131_v8 }
 0x1a6   :  { %16200 = vst [vmem:[#allocation7_spill] sm:$0xff] %v9134_v32 }
 0x1a9   :  { %v9138_v59 = vpop.f32.mrf.mxu2  ;;  %v9140_v54 = vpop.f32.mrf.mxu3 }
 0x1aa   :  { %16201 = vst [vmem:[#allocation27_spill] sm:$0xff] %v9138_v59  ;;  %v794_v15 = vpop.f32.mrf.mxu0  ;;  %v863_v60 = vpop.f32.mrf.mxu1 }
 0x1ab   :  { %16202 = vst [vmem:[#allocation28_spill] sm:$0xff] %v9140_v54  ;;  %v9143_v26 = vadd.f32 %v794_v15, %v8811_v36  ;;  %v9146_v38 = vadd.f32 %v863_v60, %v16203_v29  ;;  %v8238_v36 = vld [vmem:[%s15315_s0 + $0x48] sm:$0xff] }
 0x1ac   :  { %v1301_v63 = vrot.slane %v8238_v36, 4  ;;  %v16205_v60 = vld [vmem:[#allocation9_spill] sm:$0xff] }
 0x1ad   :  { %7110 = vmatmul.msk.bf16.gmra.mxu0 %vm218_vm2, %v1368_v28  ;;  %7122 = vmatmul.msk.bf16.gmra.mxu1 %vm218_vm2, %v1368_v28  ;;  %v1303_v28 = vrot.slane %v8239_v43, 4  ;;  %v16210_v43 = vld [vmem:[#allocation11_spill] sm:$0xff] }
 0x1ae   :  { %v1302_v54 = vsel %vm1285_vm4, %v1300_v18, %v1301_v63 }
 0x1af   :  { %v1304_v1 = vsel %vm1285_vm4, %v1301_v63, %v1303_v28 }
 0x1b0   :  { %v1369_v36 = vpack.c.bf16 %v1304_v1, %v1302_v54 }
 0x1b1   :  { %v9150_v39 = vpop.f32.mrf.mxu2  ;;  %v9152_v10 = vpop.f32.mrf.mxu3 }
 0x1b2   :  { %v796_v57 = vpop.f32.mrf.mxu0  ;;  %v865_v46 = vpop.f32.mrf.mxu1 }
 0x1b3   :  { %v9164_v15 = vadd.f32 %v796_v57, %v8824_v49  ;;  %v9167_v29 = vadd.f32 %v865_v46, %v16205_v60  ;;  %v8240_v46 = vld [vmem:[%s15315_s0 + $0x58] sm:$0xf] }
 0x1b4   :  { %v1305_v18 = vrot.slane %v8240_v46, 4 }
 0x1b5   :  { %16204 = vst [vmem:[#allocation8_spill] sm:$0xff] %v9164_v15 }
 0x1b6   :  { %16206 = vst [vmem:[#allocation9_spill] sm:$0xff] %v9167_v29 }
 0x1b9   :  { %v9171_v32 = vpop.f32.mrf.mxu2  ;;  %v9173_v59 = vpop.f32.mrf.mxu3 }
 0x1ba   :  { %16207 = vst [vmem:[#allocation29_spill] sm:$0xff] %v9171_v32  ;;  %v799_v8 = vpop.f32.mrf.mxu0  ;;  %v868_v53 = vpop.f32.mrf.mxu1 }
 0x1bb   :  { %16208 = vst [vmem:[#allocation30_spill] sm:$0xff] %v9173_v59  ;;  %v921_v61 = vadd.f32 %v799_v8, %v16209_v25  ;;  %v922_v13 = vadd.f32 %v868_v53, %v16210_v43  ;;  %v8241_v25 = vld [vmem:[%s15315_s0 + $0x60] sm:$0xff]  ;;  %v8242_v8 = vld [vmem:[%s15315_s0 + $0x68] sm:$0xff] }
 0x1bc   :  { %v1307_v53 = vrot.slane %v8241_v25, 4 }
 0x1bd   :  { %7111 = vmatmul.msk.bf16.gmra.mxu0 %vm218_vm2, %v1369_v36  ;;  %7123 = vmatmul.msk.bf16.gmra.mxu1 %vm218_vm2, %v1369_v36  ;;  %v1308_v36 = vrot.slane %v8242_v8, 4 }
 0x1c1   :  { %v1143_v49 = vpop.f32.mrf.mxu2  ;;  %v1212_v57 = vpop.f32.mrf.mxu3 }
 0x1c2   :  { %v9182_v63 = vadd.f32 %v1143_v49, %v921_v61  ;;  %v9184_v54 = vadd.f32 %v1212_v57, %v922_v13  ;;  %v801_v60 = vpop.f32.mrf.mxu0  ;;  %v870_v1 = vpop.f32.mrf.mxu1  ;;  %v1306_v13 = vsel %vm1285_vm4, %v1303_v28, %v1305_v18  ;;  %v1309_v49 = vsel %vm1285_vm4, %v1307_v53, %v1308_v36  ;;  %v8243_v53 = vld [vmem:[%s15315_s0 + $0x70] sm:$0xff] }
 0x1c3   :  { %v9193_v43 = vadd.f32 %v801_v60, %v8846_v12  ;;  %v9196_v61 = vadd.f32 %v870_v1, %v8848_v0  ;;  %v1370_v25 = vpack.c.bf16 %v1309_v49, %v1306_v13  ;;  %v1310_v13 = vrot.slane %v8243_v53, 4 }
 0x1c9   :  { %v9200_v57 = vpop.f32.mrf.mxu2  ;;  %v9202_v46 = vpop.f32.mrf.mxu3 }
 0x1ca   :  { %v804_v59 = vpop.f32.mrf.mxu0  ;;  %v873_v29 = vpop.f32.mrf.mxu1 }
 0x1cb   :  { %v925_v32 = vadd.f32 %v804_v59, %v8854_v16  ;;  %v926_v8 = vadd.f32 %v873_v29, %v8856_v42  ;;  %v8244_v16 = vld [vmem:[%s15315_s0 + $0x78] sm:$0xf]  ;;  %v1311_v29 = vsel %vm1285_vm4, %v1308_v36, %v1310_v13 }
 0x1cc   :  { %v1312_v42 = vrot.slane %v8244_v16, 4  ;;  %v16215_v16 = vld [vmem:[#allocation12_spill] sm:$0xff] }
 0x1cd   :  { %7112 = vmatmul.msk.bf16.gmra.mxu0 %vm218_vm2, %v1370_v25  ;;  %7124 = vmatmul.msk.bf16.gmra.mxu1 %vm218_vm2, %v1370_v25 }
 0x1ce   :  { %v1313_v49 = vsel %vm1285_vm4, %v1310_v13, %v1312_v42  ;;  %v8245_v13 = vld [vmem:[%s15315_s0 + $0x80] sm:$0xff] }
 0x1cf   :  { %v1314_v42 = vrot.slane %v8245_v13, 4 }
 0x1d1   :  { %v1148_v0 = vpop.f32.mrf.mxu2  ;;  %v1217_v12 = vpop.f32.mrf.mxu3 }
 0x1d2   :  { %v9208_v28 = vadd.f32 %v1148_v0, %v925_v32  ;;  %v9210_v18 = vadd.f32 %v1217_v12, %v926_v8  ;;  %v806_v60 = vpop.f32.mrf.mxu0  ;;  %v875_v1 = vpop.f32.mrf.mxu1  ;;  %v1371_v0 = vpack.c.bf16 %v1313_v49, %v1311_v29  ;;  %v8247_v49 = vld [vmem:[%s15315_s0 + $0x90] sm:$0xff] }
 0x1d3   :  { %v9219_v59 = vadd.f32 %v806_v60, %v8866_v2  ;;  %v9222_v32 = vadd.f32 %v875_v1, %v8868_v3 }
 0x1d5   :  { %16211 = vst [vmem:[#allocation10_spill] sm:$0xff] %v9219_v59 }
 0x1d6   :  { %16212 = vst [vmem:[#allocation11_spill] sm:$0xff] %v9222_v32 }
 0x1d9   :  { %v9226_v25 = vpop.f32.mrf.mxu2  ;;  %v9228_v8 = vpop.f32.mrf.mxu3 }
 0x1da   :  { %16213 = vst [vmem:[#allocation31_spill] sm:$0xff] %v9226_v25  ;;  %v809_v12 = vpop.f32.mrf.mxu0  ;;  %v878_v53 = vpop.f32.mrf.mxu1 }
 0x1db   :  { %16214 = vst [vmem:[#allocation32_spill] sm:$0xff] %v9228_v8  ;;  %v9231_v15 = vadd.f32 %v809_v12, %v8875_v5  ;;  %v9234_v2 = vadd.f32 %v878_v53, %v16215_v16  ;;  %v8246_v5 = vld [vmem:[%s15315_s0 + $0x88] sm:$0xff] }
 0x1dc   :  { %v1315_v29 = vrot.slane %v8246_v5, 4  ;;  %v16218_v53 = vld [vmem:[#allocation13_spill] sm:$0xff] }
 0x1dd   :  { %16216 = vst [vmem:[#allocation12_spill] sm:$0xff] %v9234_v2  ;;  %7113 = vmatmul.msk.bf16.gmra.mxu0 %vm218_vm2, %v1371_v0  ;;  %7125 = vmatmul.msk.bf16.gmra.mxu1 %vm218_vm2, %v1371_v0  ;;  %v1317_v0 = vrot.slane %v8247_v49, 4  ;;  %v16222_v49 = vld [vmem:[#allocation15_spill] sm:$0xff] }
 0x1de   :  { %v1316_v8 = vsel %vm1285_vm4, %v1314_v42, %v1315_v29 }
 0x1df   :  { %v1318_v13 = vsel %vm1285_vm4, %v1315_v29, %v1317_v0 }
 0x1e0   :  { %v1372_v5 = vpack.c.bf16 %v1318_v13, %v1316_v8 }
 0x1e1   :  { %v9238_v3 = vpop.f32.mrf.mxu2  ;;  %v9240_v36 = vpop.f32.mrf.mxu3 }
 0x1e2   :  { %16217 = vst [vmem:[#allocation33_spill] sm:$0xff] %v9240_v36  ;;  %v811_v60 = vpop.f32.mrf.mxu0  ;;  %v880_v1 = vpop.f32.mrf.mxu1 }
 0x1e3   :  { %v9252_v12 = vadd.f32 %v811_v60, %v8888_v14  ;;  %v9255_v16 = vadd.f32 %v880_v1, %v16218_v53  ;;  %v8248_v1 = vld [vmem:[%s15315_s0 + $0x98] sm:$0xf] }
 0x1e4   :  { %v1319_v42 = vrot.slane %v8248_v1, 4 }
 0x1e5   :  { %16219 = vst [vmem:[#allocation13_spill] sm:$0xff] %v9255_v16 }
 0x1e9   :  { %v9259_v32 = vpop.f32.mrf.mxu2  ;;  %v9261_v25 = vpop.f32.mrf.mxu3 }
 0x1ea   :  { %16220 = vst [vmem:[#allocation34_spill] sm:$0xff] %v9261_v25  ;;  %v814_v59 = vpop.f32.mrf.mxu0  ;;  %v883_v35 = vpop.f32.mrf.mxu1 }
 0x1eb   :  { %v933_v36 = vadd.f32 %v814_v59, %v16221_v55  ;;  %v934_v2 = vadd.f32 %v883_v35, %v16222_v49  ;;  %v8249_v55 = vld [vmem:[%s15315_s0 + $0xa0] sm:$0xff]  ;;  %v8250_v59 = vld [vmem:[%s15315_s0 + $0xa8] sm:$0xff] }
 0x1ec   :  { %v1321_v35 = vrot.slane %v8249_v55, 4 }
 0x1ed   :  { %7114 = vmatmul.msk.bf16.gmra.mxu0 %vm218_vm2, %v1372_v5  ;;  %7126 = vmatmul.msk.bf16.gmra.mxu1 %vm218_vm2, %v1372_v5  ;;  %v1322_v5 = vrot.slane %v8250_v59, 4  ;;  %v1237_v59 = vadd.f32 %v8944_v4, %v8935_v47  ;;  %v8253_v4 = vld [vmem:[%s15315_s0 + $0xc0] sm:$0xff] }
 0x1f1   :  { %v1158_v14 = vpop.f32.mrf.mxu2  ;;  %v1227_v60 = vpop.f32.mrf.mxu3 }
 0x1f2   :  { %v9270_v29 = vadd.f32 %v1158_v14, %v933_v36  ;;  %v9272_v8 = vadd.f32 %v1227_v60, %v934_v2  ;;  %v816_v53 = vpop.f32.mrf.mxu0  ;;  %v885_v13 = vpop.f32.mrf.mxu1  ;;  %v1320_v2 = vsel %vm1285_vm4, %v1317_v0, %v1319_v42  ;;  %v1323_v14 = vsel %vm1285_vm4, %v1321_v35, %v1322_v5  ;;  %v8251_v0 = vld [vmem:[%s15315_s0 + $0xb0] sm:$0xff] }
 0x1f3   :  { %v9281_v49 = vadd.f32 %v816_v53, %v8910_v6  ;;  %v9284_v36 = vadd.f32 %v885_v13, %v8912_v48  ;;  %v1373_v60 = vpack.c.bf16 %v1323_v14, %v1320_v2  ;;  %v1324_v42 = vrot.slane %v8251_v0, 4  ;;  %v8252_v53 = vld [vmem:[%s15315_s0 + $0xb8] sm:$0xf] }
 0x1f4   :  { %v1238_v2 = vadd.f32 %v8946_v21, %v8938_v37  ;;  %v1328_v21 = vrot.slane %v8253_v4, 4 }
 0x1fa   :  { %v819_v1 = vpop.f32.mrf.mxu0  ;;  %v888_v25 = vpop.f32.mrf.mxu1 }
 0x1fb   :  { %v9289_v55 = vadd.f32 %v819_v1, %v8918_v17  ;;  %v9292_v16 = vadd.f32 %v888_v25, %v8920_v9  ;;  %v1326_v17 = vrot.slane %v8252_v53, 4  ;;  %v1325_v25 = vsel %vm1285_vm4, %v1322_v5, %v1324_v42  ;;  %v8254_v5 = vld [vmem:[%s15315_s0 + $0xc8] sm:$0xff] }
 0x1fd   :  { %7115 = vmatmul.msk.bf16.gmra.mxu0 %vm218_vm2, %v1373_v60  ;;  %7127 = vmatmul.msk.bf16.gmra.mxu1 %vm218_vm2, %v1373_v60  ;;  %v1327_v35 = vsel %vm1285_vm4, %v1324_v42, %v1326_v17 }
 0x1fe   :  { %v1374_v14 = vpack.c.bf16 %v1327_v35, %v1325_v25 }
 0x202   :  { %v821_v6 = vpop.f32.mrf.mxu0  ;;  %v890_v48 = vpop.f32.mrf.mxu1 }
 0x203   :  { %v9303_v13 = vadd.f32 %v821_v6, %v8930_v33  ;;  %v9306_v9 = vadd.f32 %v890_v48, %v8932_v34  ;;  %v1329_v6 = vrot.slane %v8254_v5, 4  ;;  %v8255_v48 = vld [vmem:[%s15315_s0 + $0xd0] sm:$0xff] }
 0x204   :  { %v1331_v42 = vrot.slane %v8255_v48, 4 }
 0x205   :  { %16223 = vst [vmem:[#allocation14_spill] sm:$0xff] %v9303_v13  ;;  %v1330_v53 = vsel %vm1285_vm4, %v1328_v21, %v1329_v6 }
 0x206   :  { %16224 = vst [vmem:[#allocation15_spill] sm:$0xff] %v9306_v9  ;;  %v1332_v17 = vsel %vm1285_vm4, %v1329_v6, %v1331_v42  ;;  %v8258_v6 = vld [vmem:[%s15315_s0 + $0xe8] sm:$0xff] }
 0x207   :  { %v1375_v25 = vpack.c.bf16 %v1332_v17, %v1330_v53 }
 0x20a   :  { %v1452_v60 = vpop.f32.mrf.mxu0  ;;  %v1521_v1 = vpop.f32.mrf.mxu1 }
 0x20b   :  { %v9314_v0 = vadd.f32 %v1452_v60, %v1237_v59  ;;  %v9316_v33 = vadd.f32 %v1521_v1, %v1238_v2  ;;  %v1243_v60 = vadd.f32 %v9017_v58, %v8985_v22  ;;  %v1244_v1 = vadd.f32 %v9019_v41, %v8988_v27 }
 0x20c   :  { %v1336_v22 = vrot.slane %v8258_v6, 4  ;;  %v1250_v6 = vadd.f32 %v9064_v40, %v9056_v51 }
 0x20d   :  { %7116 = vmatmul.msk.bf16.gmra.mxu0 %vm218_vm2, %v1374_v14  ;;  %7128 = vmatmul.msk.bf16.gmra.mxu1 %vm218_vm2, %v1374_v14  ;;  %v8039_v34 = vpack.i.bf16 %v9316_v33, %v9314_v0 }
 0x20f   :  { %8040 = vrot.lane.b32.xlu0 %v8039_v34, %s8287_s8 }
 0x212   :  { %v9323_v47 = vpop.f32.mrf.mxu0  ;;  %v9325_v37 = vpop.f32.mrf.mxu1 }
 0x21a   :  { %v1457_v35 = vpop.f32.mrf.mxu0  ;;  %v1526_v59 = vpop.f32.mrf.mxu1 }
 0x21b   :  { %v9339_v2 = vadd.f32 %v1457_v35, %v8978_v23  ;;  %v9342_v14 = vadd.f32 %v1526_v59, %v8980_v45  ;;  %v8256_v23 = vld [vmem:[%s15315_s0 + $0xd8] sm:$0xf]  ;;  %v8257_v45 = vld [vmem:[%s15315_s0 + $0xe0] sm:$0xff] }
 0x21c   :  { %v1333_v21 = vrot.slane %v8256_v23, 4  ;;  %v1335_v5 = vrot.slane %v8257_v45, 4 }
 0x21d   :  { %16225 = vst [vmem:[#allocation35_spill] sm:$0xff] %v9339_v2  ;;  %7117 = vmatmul.msk.bf16.gmra.mxu0 %vm218_vm2, %v1375_v25  ;;  %7129 = vmatmul.msk.bf16.gmra.mxu1 %vm218_vm2, %v1375_v25 }
 0x21e   :  { %16226 = vst [vmem:[#allocation36_spill] sm:$0xff] %v9342_v14  ;;  %v1334_v53 = vsel %vm1285_vm4, %v1331_v42, %v1333_v21  ;;  %v1337_v17 = vsel %vm1285_vm4, %v1335_v5, %v1336_v22  ;;  %v1249_v5 = vadd.f32 %v9062_v52, %v9053_v50 }
 0x21f   :  { %v1376_v25 = vpack.c.bf16 %v1337_v17, %v1334_v53 }
 0x222   :  { %v1459_v34 = vpop.f32.mrf.mxu0  ;;  %v1528_v4 = vpop.f32.mrf.mxu1 }
 0x223   :  { %v9359_v58 = vadd.f32 %v1459_v34, %v1243_v60  ;;  %v9361_v27 = vadd.f32 %v1528_v4, %v1244_v1  ;;  %v8259_v4 = vld [vmem:[%s15315_s0 + $0xf0] sm:$0xff] }
 0x224   :  { %v1338_v23 = vrot.slane %v8259_v4, 4  ;;  %v1255_v4 = vadd.f32 %v9112_v44, %v9105_v11 }
 0x225   :  { %v8044_v41 = vpack.i.bf16 %v9361_v27, %v9359_v58  ;;  %v8049_v48 = vpack.i.bf16 %v9359_v58, %v9314_v0 }
 0x227   :  { %8050 = vrot.lane.b32.xlu1 %v8049_v48, %s8288_s20  ;;  %8045 = vrot.lane.b32.xlu0 %v8044_v41, %s8287_s8 }
 0x22a   :  { %v1462_v35 = vpop.f32.mrf.mxu0  ;;  %v1531_v59 = vpop.f32.mrf.mxu1 }
 0x22b   :  { %v9372_v60 = vadd.f32 %v1462_v35, %v9030_v24  ;;  %v9375_v1 = vadd.f32 %v1531_v59, %v9032_v56  ;;  %v8260_v24 = vld [vmem:[%s15315_s0 + $0xf8] sm:$0xf]  ;;  %v1339_v56 = vsel %vm1285_vm4, %v1336_v22, %v1338_v23 }
 0x22c   :  { %v1340_v21 = vrot.slane %v8260_v24, 4 }
 0x22d   :  { %7118 = vmatmul.msk.bf16.gmra.mxu0 %vm218_vm2, %v1376_v25  ;;  %7130 = vmatmul.msk.bf16.gmra.mxu1 %vm218_vm2, %v1376_v25 }
 0x22e   :  { %v1341_v45 = vsel %vm1285_vm4, %v1338_v23, %v1340_v21  ;;  %v1256_v23 = vadd.f32 %v9114_v62, %v9108_v19  ;;  %vm6626_vm4 = vcmask 261120  }
 0x22f   :  { %v1377_v41 = vpack.c.bf16 %v1341_v45, %v1339_v56 }
 0x232   :  { %v9379_v42 = vpop.f32.mrf.mxu0  ;;  %v9381_v34 = vpop.f32.mrf.mxu1 }
 0x233   :  { %16227 = vst [vmem:[#allocation37_spill] sm:$0xff] %v9379_v42 }
 0x234   :  { %16228 = vst [vmem:[#allocation38_spill] sm:$0xff] %v9381_v34 }
 0x23a   :  { %v1467_v48 = vpop.f32.mrf.mxu0  ;;  %v1536_v53 = vpop.f32.mrf.mxu1 }
 0x23b   :  { %v9395_v17 = vadd.f32 %v1467_v48, %v1249_v5  ;;  %v9397_v25 = vadd.f32 %v1536_v53, %v1250_v6  ;;  %v1262_v48 = vadd.f32 %v9152_v10, %v9146_v38  ;;  %v1268_v10 = vadd.f32 %v9202_v46, %v9196_v61 }
 0x23d   :  { %7119 = vmatmul.msk.bf16.gmra.mxu0 %vm218_vm2, %v1377_v41  ;;  %7131 = vmatmul.msk.bf16.gmra.mxu1 %vm218_vm2, %v1377_v41  ;;  %v8054_v22 = vpack.i.bf16 %v9397_v25, %v9395_v17  ;;  %v1261_v41 = vadd.f32 %v9150_v39, %v9143_v26  ;;  %v1267_v39 = vadd.f32 %v9200_v57, %v9193_v43  ;;  %vm3473_vm2 = vcmask 392192  }
 0x23f   :  { %8055 = vrot.lane.b32.xlu2 %v8054_v22, %s8287_s8 }
 0x242   :  { %v9404_v50 = vpop.f32.mrf.mxu0  ;;  %v9406_v52 = vpop.f32.mrf.mxu1 }
 0x24a   :  { %v1472_v51 = vpop.f32.mrf.mxu0  ;;  %v1541_v40 = vpop.f32.mrf.mxu1 }
 0x24b   :  { %v9409_v35 = vadd.f32 %v1472_v51, %v9094_v30  ;;  %v9412_v59 = vadd.f32 %v1541_v40, %v9096_v31 }
 0x24d   :  { %16229 = vst [vmem:[#allocation39_spill] sm:$0xff] %v9409_v35 }
 0x24e   :  { %16230 = vst [vmem:[#allocation40_spill] sm:$0xff] %v9412_v59 }
 0x252   :  { %v1474_v24 = vpop.f32.mrf.mxu0  ;;  %v1543_v21 = vpop.f32.mrf.mxu1 }
 0x253   :  { %v9418_v56 = vadd.f32 %v1474_v24, %v1255_v4  ;;  %v9420_v45 = vadd.f32 %v1543_v21, %v1256_v23 }
 0x255   :  { %v8059_v5 = vpack.i.bf16 %v9420_v45, %v9418_v56  ;;  %v8064_v30 = vpack.i.bf16 %v9395_v17, %v9418_v56 }
 0x257   :  { %8065 = vrot.lane.b32.xlu2 %v8064_v30, %s8288_s20  ;;  %8060 = vrot.lane.b32.xlu1 %v8059_v5, %s8287_s8 }
 0x25a   :  { %v1477_v31 = vpop.f32.mrf.mxu0  ;;  %v1546_v11 = vpop.f32.mrf.mxu1 }
 0x25b   :  { %v9429_v19 = vadd.f32 %v1477_v31, %v9120_v7  ;;  %v9432_v44 = vadd.f32 %v1546_v11, %v9122_v20 }
 0x262   :  { %v9434_v62 = vpop.f32.mrf.mxu0  ;;  %v9436_v6 = vpop.f32.mrf.mxu1 }
 0x263   :  { %16231 = vst [vmem:[#allocation41_spill] sm:$0xff] %v9434_v62 }
 0x264   :  { %16232 = vst [vmem:[#allocation42_spill] sm:$0xff] %v9436_v6 }
 0x26a   :  { %v1482_v53 = vpop.f32.mrf.mxu0  ;;  %v1551_v22 = vpop.f32.mrf.mxu1 }
 0x26b   :  { %v9442_v51 = vadd.f32 %v1482_v53, %v1261_v41  ;;  %v9444_v40 = vadd.f32 %v1551_v22, %v1262_v48  ;;  %v1273_v48 = vadd.f32 %v9238_v3, %v9231_v15  ;;  %v16237_v53 = vld [vmem:[#allocation12_spill] sm:$0xff]  ;;  %v16238_v22 = vld [vmem:[#allocation33_spill] sm:$0xff]  ;;  %v16240_v3 = vld [vmem:[#allocation18_spill] sm:$0xff] }
 0x26c   :  { %v16239_v15 = vld [vmem:[#allocation16_spill] sm:$0xff] }
 0x26d   :  { %v8069_v7 = vpack.i.bf16 %v9444_v40, %v9442_v51 }
 0x26f   :  { %8070 = vrot.lane.b32.xlu0 %v8069_v7, %s8287_s8  ;;  %v1274_v7 = vadd.f32 %v16238_v22, %v16237_v53 }
 0x272   :  { %v1484_v20 = vpop.f32.mrf.mxu0  ;;  %v1553_v4 = vpop.f32.mrf.mxu1 }
 0x27a   :  { %v1487_v23 = vpop.f32.mrf.mxu0  ;;  %v1556_v24 = vpop.f32.mrf.mxu1 }
 0x27b   :  { %v9450_v26 = vadd.f32 %v1487_v23, %v9182_v63  ;;  %v9453_v38 = vadd.f32 %v1556_v24, %v9184_v54 }
 0x27d   :  { %16233 = vst [vmem:[#allocation43_spill] sm:$0xff] %v9450_v26 }
 0x27e   :  { %16234 = vst [vmem:[#allocation44_spill] sm:$0xff] %v9453_v38 }
 0x282   :  { %v1489_v21 = vpop.f32.mrf.mxu0  ;;  %v1558_v5 = vpop.f32.mrf.mxu1 }
 0x283   :  { %v9459_v30 = vadd.f32 %v1489_v21, %v1267_v39  ;;  %v9461_v31 = vadd.f32 %v1558_v5, %v1268_v10  ;;  %v8099_v5 = vpack.i.bf16 %v9375_v1, %v9372_v60 }
 0x285   :  { %v8079_v11 = vpack.i.bf16 %v9461_v31, %v9459_v30  ;;  %v8074_v63 = vpack.i.bf16 %v9459_v30, %v9442_v51 }
 0x287   :  { %8080 = vrot.lane.b32.xlu2 %v8079_v11, %s8287_s8  ;;  %8075 = vrot.lane.b32.xlu1 %v8074_v63, %s8288_s20  ;;  %v1239_v11 = vadd.f32 %v16240_v3, %v16239_v15  ;;  %v16241_v63 = vld [vmem:[#allocation17_spill] sm:$0xff]  ;;  %v1229_v3 = vpop.f32.mrf.mxu3 }
 0x28a   :  { %v1492_v54 = vpop.f32.mrf.mxu0  ;;  %v1561_v43 = vpop.f32.mrf.mxu1 }
 0x28b   :  { %v9470_v61 = vadd.f32 %v1492_v54, %v9208_v28  ;;  %v9473_v57 = vadd.f32 %v1561_v43, %v9210_v18  ;;  %v16242_v54 = vld [vmem:[#allocation19_spill] sm:$0xff] }
 0x28c   :  { %v1240_v43 = vadd.f32 %v16242_v54, %v16241_v63  ;;  %v16246_v63 = vld [vmem:[#allocation29_spill] sm:$0xff]  ;;  %v16248_v54 = vld [vmem:[#allocation30_spill] sm:$0xff] }
 0x28e   :  { %v9501_v53 = vadd.f32 %v9325_v37, %v1240_v43  ;;  %v1280_v43 = vadd.f32 %v1229_v3, %v9284_v36  ;;  %v16249_v36 = vld [vmem:[#allocation24_spill] sm:$0xff]  ;;  %v16252_v3 = vld [vmem:[#allocation26_spill] sm:$0xff] }
 0x292   :  { %v9475_v46 = vpop.f32.mrf.mxu0  ;;  %v9477_v41 = vpop.f32.mrf.mxu1 }
 0x293   :  { %16235 = vst [vmem:[#allocation45_spill] sm:$0xff] %v9475_v46 }
 0x294   :  { %16236 = vst [vmem:[#allocation46_spill] sm:$0xff] %v9477_v41 }
 0x29a   :  { %v1497_v23 = vpop.f32.mrf.mxu0  ;;  %v1566_v39 = vpop.f32.mrf.mxu1 }
 0x29b   :  { %v9483_v24 = vadd.f32 %v1497_v23, %v1273_v48  ;;  %v9485_v10 = vadd.f32 %v1566_v39, %v1274_v7  ;;  %v9498_v48 = vadd.f32 %v9323_v47, %v1239_v11  ;;  %v16247_v11 = vld [vmem:[#allocation9_spill] sm:$0xff] }
 0x29c   :  { %v1264_v37 = vadd.f32 %v16248_v54, %v16247_v11  ;;  %v16254_v11 = vld [vmem:[#allocation34_spill] sm:$0xff] }
 0x29d   :  { %v8084_v28 = vpack.i.bf16 %v9485_v10, %v9483_v24  ;;  %v8114_v15 = vpack.i.bf16 %v9501_v53, %v9498_v48 }
 0x29f   :  { %8085 = vrot.lane.b32.xlu0 %v8084_v28, %s8287_s8  ;;  %v1160_v28 = vpop.f32.mrf.mxu2 }
 0x2a2   :  { %v1499_v18 = vpop.f32.mrf.mxu0  ;;  %v1568_v21 = vpop.f32.mrf.mxu1 }
 0x2a7   :  { %8100 = vrot.lane.b32.xlu0 %v8099_v5, %s8287_s8  ;;  %v16245_v5 = vld [vmem:[#allocation8_spill] sm:$0xff] }
 0x2a8   :  { %v1263_v47 = vadd.f32 %v16246_v63, %v16245_v5 }
 0x2aa   :  { %v1502_v22 = vpop.f32.mrf.mxu0  ;;  %v1571_v23 = vpop.f32.mrf.mxu1 }
 0x2ab   :  { %v9504_v7 = vadd.f32 %v1502_v22, %v9270_v29  ;;  %v9507_v39 = vadd.f32 %v1571_v23, %v9272_v8  ;;  %v1279_v29 = vadd.f32 %v1160_v28, %v9281_v49  ;;  %v9518_v22 = vadd.f32 %v1484_v20, %v1263_v47  ;;  %v16250_v20 = vld [vmem:[#allocation25_spill] sm:$0xff] }
 0x2ac   :  { %v9520_v8 = vadd.f32 %v1553_v4, %v1264_v37  ;;  %v1251_v28 = vadd.f32 %v16250_v20, %v16249_v36  ;;  %v16251_v4 = vld [vmem:[#allocation5_spill] sm:$0xff] }
 0x2ad   :  { %16243 = vst [vmem:[#allocation12_spill] sm:$0xff] %v9504_v7  ;;  %v1252_v63 = vadd.f32 %v16252_v3, %v16251_v4  ;;  %v16253_v47 = vld [vmem:[#allocation13_spill] sm:$0xff] }
 0x2ae   :  { %16244 = vst [vmem:[#allocation33_spill] sm:$0xff] %v9507_v39  ;;  %v1276_v54 = vadd.f32 %v16254_v11, %v16253_v47  ;;  %v9544_v37 = vadd.f32 %v9404_v50, %v1251_v28  ;;  %v8119_v50 = vpack.i.bf16 %v9432_v44, %v9429_v19 }
 0x2af   :  { %8115 = vrot.lane.b32.xlu0 %v8114_v15, %s8287_s8  ;;  %v8129_v15 = vpack.i.bf16 %v9520_v8, %v9518_v22 }
 0x2b2   :  { %v1504_v23 = vpop.f32.mrf.mxu0  ;;  %v1573_v13 = vpop.f32.mrf.mxu1 }
 0x2b3   :  { %v9522_v9 = vadd.f32 %v1504_v23, %v1279_v29  ;;  %v9524_v41 = vadd.f32 %v1573_v13, %v1280_v43  ;;  %v1275_v13 = vadd.f32 %v9259_v32, %v9252_v12  ;;  %v9547_v29 = vadd.f32 %v9406_v52, %v1252_v63  ;;  %v8041_v63 = vpop.permute.xlu0 %8040 }
 0x2b4   :  { %v9551_v23 = vadd.f32 %v1568_v21, %v1276_v54  ;;  %v8104_v32 = vpack.i.bf16 %v9544_v37, %v9372_v60  ;;  %v8124_v52 = vpack.i.bf16 %v9429_v19, %v9498_v48  ;;  %v1232_v21 = vpop.f32.mrf.mxu3 }
 0x2b5   :  { %v8089_v5 = vpack.i.bf16 %v9522_v9, %v9483_v24  ;;  %v8094_v49 = vpack.i.bf16 %v9524_v41, %v9522_v9  ;;  %v9549_v43 = vadd.f32 %v1499_v18, %v1275_v13  ;;  %v8109_v12 = vpack.i.bf16 %v9547_v29, %v9544_v37  ;;  %v1163_v18 = vpop.f32.mrf.mxu2 }
 0x2b6   :  { %v1281_v20 = vadd.f32 %v1163_v18, %v9289_v55  ;;  %v1282_v4 = vadd.f32 %v1232_v21, %v9292_v16  ;;  %v8051_v55 = vpop.permute.xlu1 %8050 }
 0x2b7   :  { %8090 = vrot.lane.b32.xlu1 %v8089_v5, %s8288_s20  ;;  %8095 = vrot.lane.b32.xlu2 %v8094_v49, %s8287_s8  ;;  %v8144_v5 = vpack.i.bf16 %v9551_v23, %v9549_v43  ;;  %v8139_v49 = vpack.i.bf16 %v9473_v57, %v9470_v61  ;;  %v8052_v16 = vunpack.i.l.bf16 %v8051_v55 }
 0x2b8   :  { %8130 = vrot.lane.b32.xlu0 %v8129_v15, %s8287_s8  ;;  %v8134_v15 = vpack.i.bf16 %v9470_v61, %v9518_v22 }
 0x2ba   :  { %v1507_v36 = vpop.f32.mrf.mxu0  ;;  %v1576_v28 = vpop.f32.mrf.mxu1 }
 0x2bb   :  { %v9576_v3 = vadd.f32 %v1507_v36, %v1281_v20  ;;  %v9578_v13 = vadd.f32 %v1576_v28, %v1282_v4  ;;  %v8046_v54 = vpop.permute.xlu0 %8045 }
 0x2bc   :  { %v8047_v18 = vunpack.i.l.bf16 %v8046_v54 }
 0x2bd   :  { %v8149_v47 = vpack.i.bf16 %v9576_v3, %v9549_v43  ;;  %v8154_v11 = vpack.i.bf16 %v9578_v13, %v9576_v3 }
 0x2bf   :  { %8105 = vrot.lane.b32.xlu1 %v8104_v32, %s8288_s20  ;;  %8110 = vrot.lane.b32.xlu2 %v8109_v12, %s8287_s8  ;;  %v8043_v32 = vunpack.i.h.bf16 %v8041_v63  ;;  %v8042_v12 = vunpack.i.l.bf16 %v8041_v63 }
 0x2c0   :  { %8145 = vrot.lane.b32.xlu0 %v8144_v5, %s8287_s8  ;;  %v8056_v5 = vpop.permute.xlu2 %8055 }
 0x2c1   :  { %v1919_v21 = vsel %vm1918_vm5, %v8043_v32, %v8052_v16  ;;  %v8058_v39 = vunpack.i.h.bf16 %v8056_v5 }
 0x2c2   :  { %v1944_v20 = vmax.f32 %v9316_v33, %v1919_v21 }
 0x2c7   :  { %8120 = vrot.lane.b32.xlu1 %v8119_v50, %s8287_s8  ;;  %8125 = vrot.lane.b32.xlu2 %v8124_v52, %s8288_s20  ;;  %v8053_v50 = vunpack.i.h.bf16 %v8051_v55  ;;  %v8048_v52 = vunpack.i.h.bf16 %v8046_v54 }
 0x2c9   :  { %v1777_v36 = vsel %vm1773_vm6, %v8047_v18, %v8048_v52  ;;  %v8061_v7 = vpop.permute.xlu1 %8060 }
 0x2ca   :  { %v1949_v63 = vmax.f32 %v9359_v58, %v1777_v36  ;;  %v8063_v21 = vunpack.i.h.bf16 %v8061_v7  ;;  %v8062_v58 = vunpack.i.l.bf16 %v8061_v7 }
 0x2cc   :  { %v2009_v46 = vrot.slane %v1949_v63, 1 }
 0x2ce   :  { %v2041_v18 = vmax.f32 %v1949_v63, %v2009_v46  ;;  %v1783_v46 = vsel %vm1773_vm6, %v8062_v58, %v8063_v21 }
 0x2cf   :  { %8135 = vrot.lane.b32.xlu1 %v8134_v15, %s8288_s20  ;;  %8140 = vrot.lane.b32.xlu2 %v8139_v49, %s8287_s8  ;;  %v1774_v15 = vsel %vm1773_vm6, %v8042_v12, %v8043_v32  ;;  %v1922_v49 = vsel %vm1918_vm5, %v8048_v52, %v8053_v50  ;;  %v8057_v32 = vunpack.i.l.bf16 %v8056_v5  ;;  %v1961_v7 = vmax.f32 %v9418_v56, %v1783_v46 }
 0x2d0   :  { %v1943_v28 = vmax.f32 %v9314_v0, %v1774_v15  ;;  %v1950_v4 = vmax.f32 %v9361_v27, %v1922_v49  ;;  %v2057_v38 = vmax.f32 %v2041_v18, 0.0 }
 0x2d1   :  { %v1780_v0 = vsel %vm1773_vm6, %v8057_v32, %v8058_v39 }
 0x2d2   :  { %v2007_v55 = vrot.slane %v1943_v28, 1  ;;  %v2010_v54 = vrot.slane %v1950_v4, 1  ;;  %v1955_v36 = vmax.f32 %v9395_v17, %v1780_v0 }
 0x2d4   :  { %v2039_v50 = vmax.f32 %v1943_v28, %v2007_v55  ;;  %v2042_v52 = vmax.f32 %v1950_v4, %v2010_v54  ;;  %v2011_v63 = vrot.slane %v1955_v36, 1 }
 0x2d6   :  { %v2055_v15 = vmax.f32 %v2039_v50, 0.0  ;;  %v2058_v6 = vmax.f32 %v2042_v52, 0.0  ;;  %v2043_v17 = vmax.f32 %v1955_v36, %v2011_v63  ;;  %v2013_v52 = vrot.slane %v1961_v7, 1  ;;  %v16258_v63 = vld [vmem:[#allocation20_spill] sm:$0xff] }
 0x2d7   :  { %8150 = vrot.lane.b32.xlu1 %v8149_v47, %s8288_s20  ;;  %8155 = vrot.lane.b32.xlu2 %v8154_v11, %s8287_s8  ;;  %v8066_v47 = vpop.permute.xlu2 %8065  ;;  %v2008_v11 = vrot.slane %v1944_v20, 1 }
 0x2d8   :  { %v8068_v16 = vunpack.i.h.bf16 %v8066_v47  ;;  %v8067_v5 = vunpack.i.l.bf16 %v8066_v47 }
 0x2d9   :  { %v2040_v12 = vmax.f32 %v1944_v20, %v2008_v11  ;;  %v2072_v11 = vpack.c.bf16 %v2058_v6, %v2057_v38 }
 0x2da   :  { %v1925_v33 = vsel %vm1918_vm5, %v8058_v39, %v8068_v16  ;;  %v1928_v28 = vsel %vm1918_vm5, %v8063_v21, %v8067_v5 }
 0x2db   :  { %v2056_v27 = vmax.f32 %v2040_v12, 0.0  ;;  %v1956_v49 = vmax.f32 %v9397_v25, %v1925_v33  ;;  %v1962_v39 = vmax.f32 %v9420_v45, %v1928_v28  ;;  %v2415_v32 = vunpack.c.l.b16 %v2072_v11 }
 0x2dc   :  { %v2416_v12 = vunpack.c.h.b16 %v2072_v11  ;;  %v2045_v28 = vmax.f32 %v1961_v7, %v2013_v52  ;;  %v16259_v11 = vld [vmem:[#allocation22_spill] sm:$0xff] }
 0x2dd   :  { %v2071_v20 = vpack.c.bf16 %v2056_v27, %v2055_v15  ;;  %v2012_v4 = vrot.slane %v1956_v49, 1  ;;  %v2014_v50 = vrot.slane %v1962_v39, 1  ;;  %v2059_v15 = vmax.f32 %v2043_v17, 0.0 }
 0x2de   :  { %v9608_v36 = vunpack.i.l.s16 %v2416_v12  ;;  %v7222_v12 = vld [vmem:[%s15317_s2 + $0x70] sm:$0xf] }
 0x2df   :  { %v2413_v55 = vunpack.c.l.b16 %v2071_v20  ;;  %v2414_v25 = vunpack.c.h.b16 %v2071_v20  ;;  %v2044_v16 = vmax.f32 %v1956_v49, %v2012_v4  ;;  %v9606_v49 = vunpack.i.l.s16 %v2415_v32 }
 0x2e0   :  { %16257 = vst [vmem:[#allocation17_spill] sm:$0xff] %v9608_v36  ;;  %v2046_v20 = vmax.f32 %v1962_v39, %v2014_v50 }
 0x2e1   :  { %v8071_v54 = vpop.permute.xlu0 %8070  ;;  %v8081_v47 = vpop.permute.xlu2 %8080  ;;  %v9602_v27 = vunpack.i.l.s16 %v2413_v55  ;;  %v9604_v45 = vunpack.i.l.s16 %v2414_v25  ;;  %v2060_v56 = vmax.f32 %v2044_v16, 0.0  ;;  %v9615_v55 = vadd.f32 %v16259_v11, %v16258_v63  ;;  %v7893_v63 = vld [vmem:[%s15317_s2 + $0x64] sm:$0xf0] }
 0x2e2   :  { %v8073_v18 = vunpack.i.h.bf16 %v8071_v54  ;;  %v8072_v33 = vunpack.i.l.bf16 %v8071_v54  ;;  %v8083_v21 = vunpack.i.h.bf16 %v8081_v47  ;;  %v8082_v58 = vunpack.i.l.bf16 %v8081_v47 }
 0x2e3   :  { %16255 = vst [vmem:[#allocation16_spill] sm:$0xff] %v9602_v27  ;;  %v2073_v25 = vpack.c.bf16 %v2060_v56, %v2059_v15  ;;  %v2513_v17 = vrot.slane %v9604_v45, 2  ;;  %v15327_v39 = vrot.slane %v9602_v27, 4  ;;  %v2514_v47 = vrot.slane %v9608_v36, 1 }
 0x2e4   :  { %16256 = vst [vmem:[#allocation18_spill] sm:$0xff] %v9604_v45  ;;  %v1786_v46 = vsel %vm1773_vm6, %v8072_v33, %v8073_v18  ;;  %v1789_v16 = vsel %vm1773_vm6, %v8082_v58, %v8083_v21  ;;  %v9631_v50 = vrot.slane %v9602_v27, 2  ;;  %v9634_v52 = vrot.slane %v9606_v49, 7 }
 0x2e5   :  { %16260 = vst [vmem:[#allocation19_spill] sm:$0xff] %v9615_v55  ;;  %v1967_v7 = vmax.f32 %v9442_v51, %v1786_v46  ;;  %v2062_v51 = vmax.f32 %v2046_v20, 0.0  ;;  %v1973_v33 = vmax.f32 %v9459_v30, %v1789_v16  ;;  %v2417_v56 = vunpack.c.l.b16 %v2073_v25  ;;  %v16264_v20 = vld [vmem:[#allocation23_spill] sm:$0xff] }
 0x2e6   :  { %16261 = vst [vmem:[#allocation8_spill] sm:$0xff] %v9634_v52  ;;  %v2574_v58 = vrot.slane %v9606_v49, 5  ;;  %v2587_v15 = vrot.slane %v9604_v45, 6  ;;  %v2515_v11 = vsel %vm2462_vm7, %v2514_v47, %v2513_v17  ;;  %v2463_v26 = vsel %vm2462_vm7, %v9634_v52, %v9602_v27 }
 0x2e7   :  { %v2015_v30 = vrot.slane %v1967_v7, 1  ;;  %v9667_v62 = vunpack.i.l.s16 %v2417_v56  ;;  %v7891_v56 = vld [vmem:[%s15317_s2 + $0x54] sm:$0xf0] }
 0x2e9   :  { %v2576_v14 = vrot.slane %v9667_v62, 4 }
 0x2f9   :  { %v8076_v0 = vpop.permute.xlu1 %8075 }
 0x2fa   :  { %v8078_v6 = vunpack.i.h.bf16 %v8076_v0  ;;  %v8077_v38 = vunpack.i.l.bf16 %v8076_v0 }
 0x2fc   :  { %v1931_v5 = vsel %vm1918_vm5, %v8073_v18, %v8077_v38  ;;  %v1934_v4 = vsel %vm1918_vm5, %v8083_v21, %v8078_v6  ;;  %v2061_v18 = vmax.f32 %v2045_v28, 0.0  ;;  %v2537_v6 = vrot.slane %v9606_v49, 3 }
 0x2fd   :  { %v1968_v54 = vmax.f32 %v9444_v40, %v1931_v5  ;;  %v1974_v32 = vmax.f32 %v9461_v31, %v1934_v4  ;;  %v7895_v40 = vld [vmem:[%s15317_s2 + $0x74] sm:$0xf0]  ;;  %v9641_v38 = vrot.slane %v9606_v49, 1  ;;  %v2573_v21 = vrot.slane %v9602_v27, 6  ;;  %v16263_v5 = vld [vmem:[#allocation21_spill] sm:$0xff] }
 0x2fe   :  { %v9636_v31 = vor.u32 %v7895_v40, %v7222_v12  ;;  %v9649_v28 = vadd.f32 %v16264_v20, %v16263_v5  ;;  %v7214_v4 = vld [vmem:[%s15317_s2 + $0x60] sm:$0xf]  ;;  %v2418_v49 = vunpack.c.h.b16 %v2073_v25  ;;  %v2074_v16 = vpack.c.bf16 %v2062_v51, %v2061_v18 }
 0x2ff   :  { %v2016_v0 = vrot.slane %v1968_v54, 1  ;;  %v2018_v46 = vrot.slane %v1974_v32, 1  ;;  %v9658_v12 = vor.u32 %v7893_v63, %v7214_v4  ;;  %v2588_v40 = vrot.slane %v9608_v36, 5  ;;  %v7206_v4 = vld [vmem:[%s15317_s2 + $0x50] sm:$0xf] }
 0x300   :  { %16262 = vst [vmem:[#allocation29_spill] sm:$0xff] %v9636_v31  ;;  %3477 = vmatpush.bf16.msra.mxu2 %v9636_v31  ;;  %v2017_v5 = vrot.slane %v1973_v33, 1  ;;  %v2538_v31 = vsel %vm2462_vm7, %v2537_v6, %v15327_v39  ;;  %v2501_v25 = vsel %vm2462_vm7, %v9641_v38, %v9631_v50  ;;  %v2575_v51 = vsel %vm2462_vm7, %v2574_v58, %v2573_v21 }
 0x301   :  { %16265 = vst [vmem:[#allocation9_spill] sm:$0xff] %v9649_v28  ;;  %v2048_v20 = vmax.f32 %v1968_v54, %v2016_v0  ;;  %v2550_v54 = vrot.slane %v9604_v45, 4  ;;  %v2047_v18 = vmax.f32 %v1967_v7, %v2015_v30  ;;  %v2050_v0 = vmax.f32 %v1974_v32, %v2018_v46 }
 0x302   :  { %16266 = vst [vmem:[#allocation30_spill] sm:$0xff] %v9658_v12  ;;  %v2551_v63 = vrot.slane %v9608_v36, 3  ;;  %v3751_v39 = vsel %vm2468_vm8, %v9641_v38, %v9631_v50  ;;  %v2420_v21 = vunpack.c.h.b16 %v2074_v16  ;;  %v2589_v7 = vsel %vm2462_vm7, %v2588_v40, %v2587_v15  ;;  %v7889_v15 = vld [vmem:[%s15317_s2 + $0x44] sm:$0xf0] }
 0x303   :  { %v3756_v32 = vsel %vm2468_vm8, %v2514_v47, %v2513_v17  ;;  %v2419_v58 = vunpack.c.l.b16 %v2074_v16  ;;  %v2049_v30 = vmax.f32 %v1973_v33, %v2017_v5  ;;  %v2064_v46 = vmax.f32 %v2048_v20, 0.0  ;;  %v7198_v33 = vld [vmem:[%s15317_s2 + $0x40] sm:$0xf] }
 0x304   :  { %3478 = vmatpush.bf16.msra.mxu2 %v9658_v12  ;;  %v9685_v12 = vunpack.i.l.s16 %v2418_v49  ;;  %v9689_v52 = vor.u32 %v7891_v56, %v7206_v4  ;;  %v2539_v45 = vrot.slane %v9667_v62, 2  ;;  %v9693_v36 = vrot.slane %v9667_v62, 6 }
 0x305   :  { %v4156_v49 = vsel %vm2474_vm9, %v2514_v47, %v2513_v17  ;;  %v2063_v2 = vmax.f32 %v2047_v18, 0.0  ;;  %v2066_v59 = vmax.f32 %v2050_v0, 0.0  ;;  %v2552_v16 = vsel %vm2462_vm7, %v2551_v63, %v2550_v54 }
 0x306   :  { %16267 = vst [vmem:[#allocation24_spill] sm:$0xff] %v9685_v12  ;;  %v16270_v40 = vrot.slane %v9602_v27, 4  ;;  %v9708_v20 = vunpack.i.l.s16 %v2420_v21  ;;  %v9710_v17 = vor.u32 %v7889_v15, %v7198_v33  ;;  %v2590_v47 = vrot.slane %v9685_v12, 4 }
 0x307   :  { %16268 = vst [vmem:[#allocation25_spill] sm:$0xff] %v9689_v52  ;;  %v2553_v18 = vrot.slane %v9685_v12, 2  ;;  %v9714_v0 = vunpack.i.l.s16 %v2419_v58  ;;  %v2065_v4 = vmax.f32 %v2049_v30, 0.0  ;;  %v2075_v56 = vpack.c.bf16 %v2064_v46, %v2063_v2 }
 0x308   :  { %16269 = vst [vmem:[#allocation5_spill] sm:$0xff] %v9693_v36  ;;  %3479 = vmatpush.bf16.msra.mxu2 %v9689_v52  ;;  %v3770_v5 = vsel %vm2468_vm8, %v2537_v6, %v16270_v40  ;;  %v3775_v52 = vsel %vm2468_vm8, %v2551_v63, %v2550_v54  ;;  %v2516_v35 = vsel %vm2465_vm10, %v9685_v12, %v2515_v11  ;;  %v7887_v40 = vld [vmem:[%s15317_s2 + $0x34] sm:$0xf0] }
 0x309   :  { %16271 = vst [vmem:[#allocation26_spill] sm:$0xff] %v9708_v20  ;;  %v2540_v27 = vsel %vm2465_vm10, %v2539_v45, %v2538_v31  ;;  %v2502_v6 = vsel %vm2465_vm10, %v9667_v62, %v2501_v25  ;;  %v4153_v21 = vsel %vm2474_vm9, %v9641_v38, %v9631_v50  ;;  %v2076_v33 = vpack.c.bf16 %v2066_v59, %v2065_v4 }
 0x30a   :  { %16272 = vst [vmem:[#allocation13_spill] sm:$0xff] %v9710_v17  ;;  %v2466_v2 = vsel %vm2465_vm10, %v9693_v36, %v2463_v26  ;;  %v3752_v54 = vsel %vm2471_vm11, %v9667_v62, %v3751_v39  ;;  %v3757_v11 = vsel %vm2471_vm11, %v9685_v12, %v3756_v32  ;;  %v2517_v31 = vrot.slane %v9708_v20, 7 }
 0x30b   :  { %v2577_v25 = vsel %vm2465_vm10, %v2576_v14, %v2575_v51  ;;  %v2591_v63 = vsel %vm2465_vm10, %v2590_v47, %v2589_v7  ;;  %v2554_v59 = vsel %vm2465_vm10, %v2553_v18, %v2552_v16  ;;  %v9737_v50 = vrot.slane %v9714_v0, 5  ;;  %v7190_v16 = vld [vmem:[%s15317_s2 + $0x30] sm:$0xf] }
 0x30c   :  { %3480 = vmatpush.bf16.msra.mxu2 %v9710_v17  ;;  %v2422_v38 = vunpack.c.h.b16 %v2075_v56  ;;  %v2541_v39 = vrot.slane %v9714_v0, 1  ;;  %v2503_v32 = vrot.slane %v9714_v0, 7  ;;  %v2421_v30 = vunpack.c.l.b16 %v2075_v56 }
 0x30d   :  { %16273 = vst [vmem:[#allocation34_spill] sm:$0xff] %v9737_v50  ;;  %v2578_v46 = vrot.slane %v9714_v0, 3  ;;  %v2592_v14 = vrot.slane %v9708_v20, 3  ;;  %v2555_v51 = vrot.slane %v9708_v20, 1  ;;  %v2423_v7 = vunpack.c.l.b16 %v2076_v33 }
 0x30e   :  { %v2424_v15 = vunpack.c.h.b16 %v2076_v33  ;;  %v3776_v47 = vsel %vm2471_vm11, %v2553_v18, %v3775_v52  ;;  %v4157_v4 = vsel %vm2477_vm12, %v9685_v12, %v4156_v49  ;;  %v9757_v0 = vor.u32 %v7887_v40, %v7190_v16 }
 0x30f   :  { %v2518_v56 = vsel %vm2468_vm8, %v2517_v31, %v2516_v35  ;;  %v3771_v17 = vsel %vm2471_vm11, %v2539_v45, %v3770_v5  ;;  %v4154_v33 = vsel %vm2477_vm12, %v9667_v62, %v4153_v21  ;;  %v9763_v36 = vunpack.i.l.s16 %v2422_v38  ;;  %v7885_v21 = vld [vmem:[%s15317_s2 + $0x24] sm:$0xf0] }
 0x310   :  { %16274 = vst [vmem:[#allocation20_spill] sm:$0xff] %v9757_v0  ;;  %v2542_v20 = vsel %vm2468_vm8, %v2541_v39, %v2540_v27  ;;  %v2504_v34 = vsel %vm2468_vm8, %v2503_v32, %v2502_v6  ;;  %v2469_v52 = vsel %vm2468_vm8, %v9737_v50, %v2466_v2  ;;  %v9769_v18 = vunpack.i.l.s16 %v2421_v30  ;;  %3481 = vmatpush.bf16.msra.mxu2 %v9757_v0  ;;  %v7182_v6 = vld [vmem:[%s15317_s2 + $0x20] sm:$0xf] }
 0x311   :  { %v9739_v26 = vpop.permute.xlu2 %8095  ;;  %v9741_v58 = vpop.permute.xlu0 %8085  ;;  %16275 = vst [vmem:[#allocation22_spill] sm:$0xff] %v9763_v36  ;;  %v9773_v35 = vsel %vm2468_vm8, %v2578_v46, %v2577_v25  ;;  %v9776_v45 = vsel %vm2468_vm8, %v2592_v14, %v2591_v63  ;;  %v2556_v62 = vsel %vm2468_vm8, %v2555_v51, %v2554_v59  ;;  %v9779_v49 = vunpack.i.l.s16 %v2423_v7 }
 0x312   :  { %v9781_v27 = vunpack.i.l.s16 %v2424_v15  ;;  %v15355_v5 = vunpack.i.h.bf16 %v9739_v26  ;;  %v3753_v2 = vsel %vm2474_vm9, %v2503_v32, %v3752_v54  ;;  %v8097_v25 = vunpack.i.l.bf16 %v9739_v26 }
 0x313   :  { %v15354_v63 = vunpack.i.h.bf16 %v9741_v58  ;;  %v8087_v59 = vunpack.i.l.bf16 %v9741_v58  ;;  %v9794_v38 = vor.u32 %v7885_v21, %v7182_v6  ;;  %v9801_v14 = vrot.slane %v9763_v36, 6 }
 0x314   :  { %16276 = vst [vmem:[#allocation21_spill] sm:$0xff] %v9781_v27  ;;  %v3758_v7 = vsel %vm2474_vm9, %v2517_v31, %v3757_v11  ;;  %v9805_v15 = vsel %vm2474_vm9, %v2555_v51, %v3776_v47  ;;  %v9808_v54 = vsel %vm2480_vm13, %v2517_v31, %v4157_v4  ;;  %v9811_v16 = vrot.slane %v9769_v18, 4  ;;  %v7174_v31 = vld [vmem:[%s15317_s2 + $0x10] sm:$0xf]  ;;  %v7883_v51 = vld [vmem:[%s15317_s2 + $0x14] sm:$0xf0] }
 0x315   :  { %16277 = vst [vmem:[#allocation23_spill] sm:$0xff] %v9794_v38  ;;  %3482 = vmatpush.bf16.msra.mxu2 %v9794_v38  ;;  %v9817_v21 = vsel %vm2474_vm9, %v2541_v39, %v3771_v17  ;;  %v9820_v11 = vrot.slane %v9779_v49, 3  ;;  %v9829_v47 = vrot.slane %v9781_v27, 5  ;;  %v2543_v4 = vsel %vm2471_vm11, %v9769_v18, %v2542_v20 }
 0x316   :  { %16278 = vst [vmem:[#allocation47_spill] sm:$0xff] %v9808_v54  ;;  %v9834_v17 = vsel %vm2480_vm13, %v2503_v32, %v4154_v33  ;;  %v1795_v39 = vsel %vm1773_vm6, %v8097_v25, %v15355_v5  ;;  %v1792_v40 = vsel %vm1773_vm6, %v8087_v59, %v15354_v63  ;;  %v9842_v38 = vor.u32 %v7883_v51, %v7174_v31  ;;  %v7881_v5 = vld [vmem:[%s15317_s2 + $0x4] sm:$0xf0] }
 0x317   :  { %16279 = vst [vmem:[#allocation48_spill] sm:$0xff] %v9811_v16  ;;  %v9845_v0 = vrot.slane %v9769_v18, 6  ;;  %v2520_v25 = vsel %vm2471_vm11, %v9801_v14, %v2518_v56  ;;  %v9857_v31 = vrot.slane %v9779_v49, 5  ;;  %v2472_v51 = vsel %vm2471_vm11, %v9811_v16, %v2469_v52  ;;  %v7166_v56 = vld [vmem:[%s15317_s2] sm:$0xf] }
 0x318   :  { %16280 = vst [vmem:[#allocation49_spill] sm:$0xff] %v9820_v11  ;;  %v1979_v63 = vmax.f32 %v9483_v24, %v1792_v40  ;;  %v2580_v59 = vrot.slane %v9769_v18, 2  ;;  %v2594_v52 = vrot.slane %v9763_v36, 2  ;;  %v2582_v12 = vrot.slane %v9779_v49, 1 }
 0x319   :  { %v9796_v30 = vpop.permute.xlu2 %8110  ;;  %v9798_v46 = vpop.permute.xlu0 %8100  ;;  %16281 = vst [vmem:[#allocation50_spill] sm:$0xff] %v9834_v17  ;;  %3483 = vmatpush.bf16.msra.mxu2 %v9842_v38  ;;  %v2506_v24 = vsel %vm2471_vm11, %v9845_v0, %v2504_v34  ;;  %v3759_v34 = vsel %vm2477_vm12, %v9801_v14, %v3758_v7  ;;  %v16287_v7 = vrot.slane %v9779_v49, 7 }
 0x31a   :  { %v8112_v6 = vunpack.i.l.bf16 %v9796_v30  ;;  %16282 = vst [vmem:[#allocation51_spill] sm:$0xff] %v9842_v38  ;;  %v16284_v50 = vunpack.i.h.bf16 %v9796_v30  ;;  %v8102_v33 = vunpack.i.l.bf16 %v9798_v46  ;;  %v16286_v40 = vunpack.i.h.bf16 %v9798_v46 }
 0x31b   :  { %16283 = vst [vmem:[#allocation52_spill] sm:$0xff] %v9845_v0  ;;  %v2581_v28 = vsel %vm2471_vm11, %v2580_v59, %v9773_v35  ;;  %v2595_v42 = vsel %vm2471_vm11, %v2594_v52, %v9776_v45  ;;  %v9913_v35 = vsel %vm2474_vm9, %v9820_v11, %v2472_v51 }
 0x31c   :  { %v1781_v20 = vsel %vm1773_vm6, %v8112_v6, %v16284_v50  ;;  %v9863_v50 = vsel %vm2471_vm11, %v9763_v36, %v2556_v62  ;;  %v1985_v6 = vmax.f32 %v9522_v9, %v1795_v39  ;;  %v9876_v62 = vor.u32 %v7881_v5, %v7166_v56 }
 0x31d   :  { %v1957_v32 = vmax.f32 %v9544_v37, %v1781_v20  ;;  %v9880_v9 = vsel %vm2474_vm9, %v9829_v47, %v2520_v25  ;;  %v1778_v39 = vsel %vm1773_vm6, %v8102_v33, %v16286_v40  ;;  %v2596_v37 = vrot.slane %v9781_v27, 1 }
 0x31e   :  { %16285 = vst [vmem:[#allocation53_spill] sm:$0xff] %v9876_v62  ;;  %v3754_v5 = vsel %vm2477_vm12, %v9845_v0, %v3753_v2  ;;  %3484 = vmatpush.bf16.msra.mxu2 %v9876_v62  ;;  %v2021_v33 = vrot.slane %v1985_v6, 1  ;;  %v2019_v40 = vrot.slane %v1979_v63, 1  ;;  %v1951_v2 = vmax.f32 %v9372_v60, %v1778_v39 }
 0x31f   :  { %v2099_v55 = vrot.slane %v1957_v32, 1  ;;  %v9909_v0 = vsel %vm2474_vm9, %v16287_v7, %v2543_v4  ;;  %v9917_v60 = vsel %vm2474_vm9, %v9857_v31, %v2506_v24  ;;  %v9929_v59 = vsel %vm2474_vm9, %v2582_v12, %v2581_v28 }
 0x320   :  { %v9932_v51 = vsel %vm2474_vm9, %v2596_v37, %v2595_v42  ;;  %v2053_v52 = vmax.f32 %v1985_v6, %v2021_v33  ;;  %v2051_v24 = vmax.f32 %v1979_v63, %v2019_v40  ;;  %v16288_v6 = vunpack.i.h.bf16 %v9739_v26 }
 0x321   :  { %v9887_v38 = vpop.permute.xlu2 %8125  ;;  %v8116_v16 = vpop.permute.xlu0 %8115  ;;  %v9934_v39 = vmax.f32 %v1957_v32, %v2099_v55 }
 0x322   :  { %v8127_v20 = vunpack.i.l.bf16 %v9887_v38  ;;  %v8118_v25 = vunpack.i.h.bf16 %v8116_v16  ;;  %v8117_v56 = vunpack.i.l.bf16 %v8116_v16 }
 0x324   :  { %v1920_v17 = vsel %vm1918_vm5, %v8118_v25, %v8127_v20  ;;  %v1775_v16 = vsel %vm1773_vm6, %v8117_v56, %v8118_v25  ;;  %v2097_v20 = vrot.slane %v1951_v2, 1 }
 0x325   :  { %v1946_v62 = vmax.f32 %v9501_v53, %v1920_v17  ;;  %v1945_v54 = vmax.f32 %v9498_v48, %v1775_v16  ;;  %v9922_v53 = vsel %vm2480_vm13, %v9857_v31, %v3754_v5  ;;  %v9926_v48 = vsel %vm2480_vm13, %v9829_v47, %v3759_v34 }
 0x327   :  { %v2096_v4 = vrot.slane %v1946_v62, 1  ;;  %v2095_v17 = vrot.slane %v1945_v54, 1 }
 0x329   :  { %v8091_v25 = vpop.permute.xlu1 %8090  ;;  %v2128_v5 = vmax.f32 %v1946_v62, %v2096_v4  ;;  %v2127_v56 = vmax.f32 %v1945_v54, %v2095_v17  ;;  %v9936_v16 = vpop.permute.xlu2 %8140  ;;  %v16289_v62 = vunpack.i.h.bf16 %v9741_v58 }
 0x32a   :  { %v8093_v34 = vunpack.i.h.bf16 %v8091_v25  ;;  %v8092_v7 = vunpack.i.l.bf16 %v8091_v25  ;;  %v9938_v45 = vpop.permute.xlu0 %8130  ;;  %v8143_v28 = vunpack.i.h.bf16 %v9936_v16  ;;  %v8142_v12 = vunpack.i.l.bf16 %v9936_v16 }
 0x32b   :  { %v8133_v42 = vunpack.i.h.bf16 %v9938_v45  ;;  %v8132_v63 = vunpack.i.l.bf16 %v9938_v45  ;;  %v2144_v55 = vmax.f32 %v2128_v5, 0.0  ;;  %v2143_v32 = vmax.f32 %v2127_v56, 0.0 }
 0x32c   :  { %v1940_v54 = vsel %vm1918_vm5, %v16288_v6, %v8093_v34  ;;  %v1937_v37 = vsel %vm1918_vm5, %v16289_v62, %v8092_v7  ;;  %v1790_v33 = vsel %vm1773_vm6, %v8142_v12, %v8143_v28  ;;  %v9958_v25 = vmax.f32 %v1951_v2, %v2097_v20 }
 0x32d   :  { %v1986_v40 = vmax.f32 %v9524_v41, %v1940_v54  ;;  %v1980_v4 = vmax.f32 %v9485_v10, %v1937_v37  ;;  %v1787_v17 = vsel %vm1773_vm6, %v8132_v63, %v8133_v42  ;;  %v2159_v26 = vpack.c.bf16 %v2144_v55, %v2143_v32 }
 0x32e   :  { %v1975_v5 = vmax.f32 %v9470_v61, %v1790_v33  ;;  %v1969_v58 = vmax.f32 %v9518_v22, %v1787_v17  ;;  %v16290_v7 = vrot.slane %v9781_v27, 7  ;;  %v9971_v10 = vsel %vm2477_vm12, %v9763_v36, %v9805_v15  ;;  %v7342_v36 = vld [vmem:[%s15317_s2 + $0x160] sm:$0xf] }
 0x32f   :  { %v2022_v56 = vrot.slane %v1986_v40, 1  ;;  %v2020_v34 = vrot.slane %v1980_v4, 1  ;;  %v2069_v2 = vmax.f32 %v2053_v52, 0.0  ;;  %v2618_v20 = vunpack.c.l.b16 %v2159_v26 }
 0x330   :  { %v9966_v41 = vsel %vm2474_vm9, %v16290_v7, %v9863_v50  ;;  %v2105_v12 = vrot.slane %v1975_v5, 1  ;;  %v9976_v61 = vsel %vm2477_vm12, %v9769_v18, %v9817_v21  ;;  %v2067_v22 = vmax.f32 %v2051_v24, 0.0 }
 0x331   :  { %v8128_v63 = vunpack.i.h.bf16 %v9887_v38  ;;  %v2054_v55 = vmax.f32 %v1986_v40, %v2022_v56  ;;  %v2052_v32 = vmax.f32 %v1980_v4, %v2020_v34  ;;  %v8106_v50 = vpop.permute.xlu1 %8105  ;;  %v2147_v6 = vmax.f32 %v9934_v39, 0.0  ;;  %v9981_v52 = vpop.permute.xlu2 %8155 }
 0x332   :  { %v2145_v54 = vmax.f32 %v9958_v25, 0.0  ;;  %v2619_v15 = vunpack.c.h.b16 %v2159_v26  ;;  %v2103_v62 = vrot.slane %v1969_v58, 1  ;;  %v9983_v37 = vpop.permute.xlu0 %8145  ;;  %v8158_v18 = vunpack.i.h.bf16 %v9981_v52 }
 0x333   :  { %v2070_v33 = vmax.f32 %v2054_v55, 0.0  ;;  %v2068_v17 = vmax.f32 %v2052_v32, 0.0  ;;  %v8157_v21 = vunpack.i.l.bf16 %v9981_v52  ;;  %v9987_v38 = vunpack.i.l.s16 %v2618_v20 }
 0x334   :  { %v9989_v24 = vmax.f32 %v1975_v5, %v2105_v12  ;;  %v8108_v40 = vunpack.i.h.bf16 %v8106_v50  ;;  %v8107_v39 = vunpack.i.l.bf16 %v8106_v50  ;;  %v15366_v56 = vunpack.i.h.bf16 %v9983_v37 }
 0x335   :  { %v2078_v4 = vpack.c.bf16 %v2070_v33, %v2069_v2  ;;  %v2077_v25 = vpack.c.bf16 %v2068_v17, %v2067_v22  ;;  %v1796_v26 = vsel %vm1773_vm6, %v8157_v21, %v8158_v18  ;;  %v16291_v7 = vunpack.i.h.bf16 %v9796_v30 }
 0x336   :  { %v1987_v34 = vmax.f32 %v9576_v3, %v1796_v26  ;;  %v16292_v20 = vunpack.i.h.bf16 %v9798_v46  ;;  %v8147_v12 = vunpack.i.l.bf16 %v9983_v37  ;;  %v10003_v2 = vunpack.i.l.s16 %v2619_v15 }
 0x337   :  { %v1926_v55 = vsel %vm1918_vm5, %v16291_v7, %v8108_v40  ;;  %v2428_v22 = vunpack.c.h.b16 %v2078_v4  ;;  %v2425_v32 = vunpack.c.l.b16 %v2077_v25  ;;  %v2426_v50 = vunpack.c.h.b16 %v2077_v25 }
 0x338   :  { %v1923_v5 = vsel %vm1918_vm5, %v16292_v20, %v8107_v39  ;;  %v2109_v33 = vrot.slane %v1987_v34, 1  ;;  %v1958_v17 = vmax.f32 %v9547_v29, %v1926_v55  ;;  %v1793_v30 = vsel %vm1773_vm6, %v8147_v12, %v15366_v56 }
 0x339   :  { %v1952_v3 = vmax.f32 %v9375_v1, %v1923_v5  ;;  %v10011_v21 = vunpack.i.l.s16 %v2428_v22  ;;  %v10013_v40 = vunpack.i.l.s16 %v2426_v50  ;;  %v10015_v15 = vmax.f32 %v1969_v58, %v2103_v62  ;;  %v8121_v39 = vpop.permute.xlu1 %8120 }
 0x33a   :  { %v2427_v26 = vunpack.c.l.b16 %v2078_v4  ;;  %v2100_v25 = vrot.slane %v1958_v17, 1  ;;  %v1981_v29 = vmax.f32 %v9549_v43, %v1793_v30  ;;  %v10018_v55 = vunpack.i.l.s16 %v2425_v32 }
 0x33b   :  { %16293 = vst [vmem:[#allocation54_spill] sm:$0xff] %v10011_v21  ;;  %v2098_v7 = vrot.slane %v1952_v3, 1  ;;  %v8123_v1 = vunpack.i.h.bf16 %v8121_v39  ;;  %v8122_v20 = vunpack.i.l.bf16 %v8121_v39  ;;  %v10021_v5 = vrot.slane %v10013_v40, 4 }
 0x33c   :  { %16294 = vst [vmem:[#allocation55_spill] sm:$0xff] %v10013_v40  ;;  %v10023_v12 = vmax.f32 %v1987_v34, %v2109_v33  ;;  %v2132_v22 = vmax.f32 %v1958_v17, %v2100_v25  ;;  %v2107_v46 = vrot.slane %v1981_v29, 1  ;;  %v10031_v4 = vrot.slane %v10011_v21, 3 }
 0x33d   :  { %v2130_v50 = vmax.f32 %v1952_v3, %v2098_v7  ;;  %v1929_v58 = vsel %vm1918_vm5, %v8123_v1, %v8128_v63  ;;  %v1784_v62 = vsel %vm1773_vm6, %v8122_v20, %v8123_v1  ;;  %v2524_v43 = vsel %vm2477_vm12, %v10021_v5, %v9880_v9 }
 0x33e   :  { %v10033_v32 = vunpack.i.l.s16 %v2427_v26  ;;  %v2148_v30 = vmax.f32 %v2132_v22, 0.0  ;;  %v1964_v34 = vmax.f32 %v9432_v44, %v1929_v58  ;;  %v10037_v17 = vmax.f32 %v1981_v29, %v2107_v46 }
 0x33f   :  { %v2146_v39 = vmax.f32 %v2130_v50, 0.0  ;;  %v1963_v63 = vmax.f32 %v9429_v19, %v1784_v62  ;;  %v2526_v3 = vsel %vm2480_vm13, %v10031_v4, %v2524_v43  ;;  %v15368_v26 = vrot.slane %v10018_v55, 6 }
 0x340   :  { %v10042_v25 = vpack.c.bf16 %v2148_v30, %v2147_v6  ;;  %v2102_v7 = vrot.slane %v1964_v34, 1  ;;  %v10046_v1 = vrot.slane %v10018_v55, 2  ;;  %v2528_v46 = vpack.c.b16 %v2526_v3, %v2526_v3 }
 0x341   :  { %v2160_v9 = vpack.c.bf16 %v2146_v39, %v2145_v54  ;;  %v2101_v20 = vrot.slane %v1963_v63, 1  ;;  %v8136_v22 = vpop.permute.xlu1 %8135  ;;  %v15367_v50 = vrot.slane %v10033_v32, 5  ;;  %v10052_v6 = vrot.slane %v10018_v55, 4 }
 0x342   :  { %16295 = vst [vmem:[#allocation56_spill] sm:$0xff] %v10046_v1  ;;  %v2622_v29 = vunpack.c.l.b16 %v10042_v25  ;;  %v2134_v54 = vmax.f32 %v1964_v34, %v2102_v7  ;;  %v8138_v62 = vunpack.i.h.bf16 %v8136_v22  ;;  %v8137_v43 = vunpack.i.l.bf16 %v8136_v22  ;;  %2531 = vrot.lane.b32.xlu1 %v2528_v46, %s8289_s6 }
 0x343   :  { %v2621_v19 = vunpack.c.h.b16 %v2160_v9  ;;  %v2133_v58 = vmax.f32 %v1963_v63, %v2101_v20  ;;  %v2620_v30 = vunpack.c.l.b16 %v2160_v9  ;;  %v2155_v3 = vmax.f32 %v10037_v17, 0.0 }
 0x344   :  { %v2547_v44 = vsel %vm2477_vm12, %v15368_v26, %v9909_v0  ;;  %v2150_v33 = vmax.f32 %v2134_v54, 0.0  ;;  %v1935_v34 = vsel %vm1918_vm5, %v8143_v28, %v8138_v62  ;;  %v1932_v63 = vsel %vm1918_vm5, %v8133_v42, %v8137_v43 }
 0x345   :  { %v10055_v39 = vunpack.i.l.s16 %v2621_v19  ;;  %v2149_v56 = vmax.f32 %v2133_v58, 0.0  ;;  %v2623_v9 = vunpack.c.h.b16 %v10042_v25  ;;  %v10069_v7 = vunpack.i.l.s16 %v2622_v29 }
 0x346   :  { %v1976_v20 = vmax.f32 %v9473_v57, %v1935_v34  ;;  %v1970_v22 = vmax.f32 %v9520_v8, %v1932_v63  ;;  %v2549_v0 = vsel %vm2480_vm13, %v15367_v50, %v2547_v44  ;;  %v2510_v16 = vsel %vm2477_vm12, %v10052_v6, %v9917_v60 }
 0x347   :  { %16296 = vst [vmem:[#allocation57_spill] sm:$0xff] %v10069_v7  ;;  %v2162_v46 = vpack.c.bf16 %v2150_v33, %v2149_v56  ;;  %v10080_v45 = vrot.slane %v10033_v32, 3  ;;  %v2564_v25 = vpack.c.b16 %v2549_v0, %v2549_v0  ;;  %v2478_v57 = vsel %vm2477_vm12, %v10046_v1, %v9913_v35 }
 0x348   :  { %v2106_v28 = vrot.slane %v1976_v20, 1  ;;  %v2104_v42 = vrot.slane %v1970_v22, 1  ;;  %v10085_v8 = vunpack.i.l.s16 %v2620_v30  ;;  %v10088_v56 = vrot.slane %v10055_v39, 7 }
 0x349   :  { %v2512_v33 = vsel %vm2480_vm13, %v10080_v45, %v2510_v16  ;;  %v10093_v60 = vrot.slane %v10033_v32, 1  ;;  %v8151_v44 = vpop.permute.xlu1 %8150  ;;  %2566 = vrot.lane.b32.xlu2 %v2564_v25, %s8290_s7  ;;  %v2624_v35 = vunpack.c.l.b16 %v2162_v46  ;;  %v2625_v62 = vunpack.c.h.b16 %v2162_v46 }
 0x34a   :  { %16297 = vst [vmem:[#allocation58_spill] sm:$0xff] %v10085_v8  ;;  %v2138_v29 = vmax.f32 %v1976_v20, %v2106_v28  ;;  %v2136_v19 = vmax.f32 %v1970_v22, %v2104_v42  ;;  %v2527_v54 = vpack.c.b16 %v2512_v33, %v2512_v33  ;;  %v8153_v58 = vunpack.i.h.bf16 %v8151_v44 }
 0x34b   :  { %16298 = vst [vmem:[#allocation59_spill] sm:$0xff] %v10088_v56  ;;  %v2481_v43 = vsel %vm2480_vm13, %v10093_v60, %v2478_v57  ;;  %v8152_v30 = vunpack.i.l.bf16 %v8151_v44  ;;  %v16301_v16 = vunpack.i.h.bf16 %v9983_v37  ;;  %v2584_v28 = vsel %vm2477_vm12, %v10018_v55, %v9929_v59 }
 0x34c   :  { %16299 = vst [vmem:[#allocation60_spill] sm:$0xff] %v10093_v60  ;;  %v2154_v34 = vmax.f32 %v2138_v29, 0.0  ;;  %v2152_v63 = vmax.f32 %v2136_v19, 0.0  ;;  %2529 = vrot.lane.b32.xlu0 %v2527_v54, %s8289_s6  ;;  %v10099_v0 = vpack.c.b16 %v2481_v43, %v2481_v43  ;;  %v1941_v20 = vsel %vm1918_vm5, %v8158_v18, %v8153_v58 }
 0x34d   :  { %v1988_v22 = vmax.f32 %v9578_v13, %v1941_v20  ;;  %v1938_v46 = vsel %vm1918_vm5, %v16301_v16, %v8152_v30  ;;  %v2585_v42 = vrot.slane %v10033_v32, 7  ;;  %v16302_v25 = vmax.f32 %v9989_v24, 0.0 }
 0x34e   :  { %16300 = vst [vmem:[#allocation61_spill] sm:$0xff] %v10099_v0  ;;  %v16303_v33 = vmax.f32 %v10015_v15, 0.0  ;;  %3485 = vmatmul.bf16.vlgmr.msra.gmra.mxu2 %v10099_v0  ;;  %v1982_v13 = vmax.f32 %v9551_v23, %v1938_v46  ;;  %v2598_v37 = vsel %vm2477_vm12, %v10013_v40, %v9932_v51  ;;  %v2599_v59 = vrot.slane %v10011_v21, 7 }
 0x34f   :  { %v2164_v57 = vpack.c.bf16 %v2154_v34, %v16302_v25  ;;  %v2110_v18 = vrot.slane %v1988_v22, 1  ;;  %v2586_v44 = vsel %vm2480_vm13, %v2585_v42, %v2584_v28  ;;  %v15370_v29 = vrot.slane %v10013_v40, 6 }
 0x350   :  { %v2163_v52 = vpack.c.bf16 %v2152_v63, %v16303_v33  ;;  %v2108_v43 = vrot.slane %v1982_v13, 1  ;;  %v2601_v30 = vpack.c.b16 %v2586_v44, %v2586_v44  ;;  %v2600_v23 = vsel %vm2480_vm13, %v2599_v59, %v2598_v37 }
 0x351   :  { %v2628_v24 = vunpack.c.l.b16 %v2164_v57  ;;  %v2629_v19 = vunpack.c.h.b16 %v2164_v57  ;;  %v2142_v58 = vmax.f32 %v1988_v22, %v2110_v18  ;;  %v10125_v34 = vunpack.i.l.s16 %v2623_v9 }
 0x352   :  { %v2626_v54 = vunpack.c.l.b16 %v2163_v52  ;;  %v2627_v15 = vunpack.c.h.b16 %v2163_v52  ;;  %v10128_v51 = vrot.slane %v10085_v8, 7  ;;  %v10130_v63 = vunpack.i.l.s16 %v2625_v62  ;;  %2603 = vrot.lane.b32.xlu1 %v2601_v30, %s8291_s9 }
 0x353   :  { %16304 = vst [vmem:[#allocation62_spill] sm:$0xff] %v10125_v34  ;;  %v2158_v16 = vmax.f32 %v2142_v58, 0.0  ;;  %v2140_v46 = vmax.f32 %v1982_v13, %v2108_v43  ;;  %v2602_v28 = vpack.c.b16 %v2600_v23, %v2600_v23  ;;  %v2561_v22 = vsel %vm2477_vm12, %v15370_v29, %v9966_v41 }
 0x354   :  { %v10132_v20 = vunpack.i.l.s16 %v2627_v15  ;;  %v10139_v9 = vunpack.i.l.s16 %v2624_v35  ;;  %v10141_v42 = vunpack.i.l.s16 %v2628_v24  ;;  %v10143_v25 = vunpack.i.l.s16 %v2629_v19 }
 0x355   :  { %v15369_v62 = vrot.slane %v10011_v21, 5  ;;  %v10146_v57 = vunpack.i.l.s16 %v2626_v54  ;;  %v16306_v33 = vmax.f32 %v10023_v12, 0.0  ;;  %v2156_v13 = vmax.f32 %v2140_v46, 0.0  ;;  %2605 = vrot.lane.b32.xlu2 %v2602_v28, %s8291_s9 }
 0x356   :  { %v2681_v41 = vsel %vm2462_vm7, %v10088_v56, %v10003_v2  ;;  %v10158_v37 = vrot.slane %v10125_v34, 6  ;;  %v10161_v18 = vrot.slane %v10130_v63, 5  ;;  %v10164_v12 = vrot.slane %v10132_v20, 4 }
 0x357   :  { %16305 = vst [vmem:[#allocation63_spill] sm:$0xff] %v10146_v57  ;;  %v2166_v52 = vpack.c.bf16 %v2158_v16, %v16306_v33  ;;  %v2563_v35 = vsel %vm2480_vm13, %v15369_v62, %v2561_v22  ;;  %v2165_v24 = vpack.c.bf16 %v2156_v13, %v2155_v3  ;;  %v3761_v54 = vsel %vm2462_vm7, %v10080_v45, %v10052_v6 }
 0x358   :  { %16307 = vst [vmem:[#allocation64_spill] sm:$0xff] %v10158_v37  ;;  %v2565_v19 = vpack.c.b16 %v2563_v35, %v2563_v35  ;;  %v2683_v15 = vsel %vm2465_vm10, %v10158_v37, %v2681_v41  ;;  %v10174_v58 = vrot.slane %v10143_v25, 3  ;;  %v3827_v43 = vsel %vm2468_vm8, %v10088_v56, %v10003_v2 }
 0x359   :  { %16308 = vst [vmem:[#allocation65_spill] sm:$0xff] %v10161_v18  ;;  %v2632_v44 = vunpack.c.l.b16 %v2166_v52  ;;  %v2633_v59 = vunpack.c.h.b16 %v2166_v52  ;;  %v2630_v23 = vunpack.c.l.b16 %v2165_v24  ;;  %v2631_v17 = vunpack.c.h.b16 %v2165_v24 }
 0x35a   :  { %16309 = vst [vmem:[#allocation66_spill] sm:$0xff] %v10164_v12  ;;  %2568 = vrot.lane.b32.xlu0 %v2565_v19, %s8290_s7  ;;  %v2667_v3 = vsel %vm2462_vm7, %v10128_v51, %v9987_v38  ;;  %v2685_v46 = vsel %vm2468_vm8, %v10161_v18, %v2683_v15  ;;  %v10190_v28 = vrot.slane %v10069_v7, 6  ;;  %v10193_v22 = vrot.slane %v10139_v9, 5 }
 0x35b   :  { %16310 = vst [vmem:[#allocation67_spill] sm:$0xff] %v10174_v58  ;;  %v10179_v30 = vunpack.i.l.s16 %v2633_v59  ;;  %v10185_v16 = vunpack.i.l.s16 %v2632_v44  ;;  %v10195_v33 = vunpack.i.l.s16 %v2630_v23  ;;  %v10197_v52 = vunpack.i.l.s16 %v2631_v17 }
 0x35c   :  { %v3763_v13 = vpack.c.b16 %v3761_v54, %v9922_v53  ;;  %v2687_v41 = vsel %vm2471_vm11, %v10164_v12, %v2685_v46  ;;  %v3828_v44 = vsel %vm2471_vm11, %v10158_v37, %v3827_v43  ;;  %v2669_v59 = vsel %vm2465_vm10, %v10190_v28, %v2667_v3 }
 0x35d   :  { %16311 = vst [vmem:[#allocation68_spill] sm:$0xff] %v10179_v30  ;;  %v10203_v35 = vrot.slane %v10179_v30, 1  ;;  %v10210_v24 = vrot.slane %v10146_v57, 4  ;;  %v2689_v53 = vsel %vm2474_vm9, %v10174_v58, %v2687_v41  ;;  %v10216_v19 = vrot.slane %v10197_v52, 2 }
 0x35e   :  { %16312 = vst [vmem:[#allocation69_spill] sm:$0xff] %v10185_v16  ;;  %3765 = vrot.lane.b32.xlu2 %v3763_v13, %s8289_s6  ;;  %v2671_v54 = vsel %vm2468_vm8, %v10193_v22, %v2669_v59  ;;  %v10221_v15 = vrot.slane %v10141_v42, 3  ;;  %v3829_v43 = vsel %vm2474_vm9, %v10161_v18, %v3828_v44  ;;  %v10228_v17 = vrot.slane %v10195_v33, 2 }
 0x35f   :  { %16313 = vst [vmem:[#allocation70_spill] sm:$0xff] %v10195_v33  ;;  %v2673_v23 = vsel %vm2471_vm11, %v10210_v24, %v2671_v54  ;;  %v10231_v3 = vrot.slane %v10185_v16, 1  ;;  %v3762_v46 = vsel %vm2462_vm7, %v10031_v4, %v10021_v5  ;;  %v2691_v13 = vsel %vm2477_vm12, %v10216_v19, %v2689_v53 }
 0x360   :  { %16314 = vst [vmem:[#allocation71_spill] sm:$0xff] %v10197_v52  ;;  %v3830_v41 = vsel %vm2477_vm12, %v10164_v12, %v3829_v43  ;;  %v2675_v44 = vsel %vm2474_vm9, %v10221_v15, %v2673_v23  ;;  %v2693_v59 = vsel %vm2480_vm13, %v10203_v35, %v2691_v13  ;;  %v16317_v50 = vrot.slane %v9781_v27, 7  ;;  %v7278_v27 = vld [vmem:[%s15317_s2 + $0xe0] sm:$0xf] }
 0x361   :  { %16315 = vst [vmem:[#allocation72_spill] sm:$0xff] %v10203_v35  ;;  %v2677_v54 = vsel %vm2477_vm12, %v10228_v17, %v2675_v44  ;;  %v4162_v53 = vsel %vm2462_vm7, %v9829_v47, %v9801_v14  ;;  %v10253_v62 = vpack.c.b16 %v2693_v59, %v2693_v59  ;;  %v16319_v23 = vrot.slane %v9779_v49, 7  ;;  %v16320_v44 = vld [vmem:[#allocation52_spill] sm:$0xff] }
 0x362   :  { %16316 = vst [vmem:[#allocation73_spill] sm:$0xff] %v10216_v19  ;;  %v3779_v26 = vsel %vm2480_vm13, %v16317_v50, %v9971_v10  ;;  %v2679_v43 = vsel %vm2480_vm13, %v10231_v3, %v2677_v54  ;;  %v4159_v29 = vsel %vm2462_vm7, %v9857_v31, %v16320_v44  ;;  %v3764_v10 = vpack.c.b16 %v3762_v46, %v9926_v48 }
 0x363   :  { %16318 = vst [vmem:[#allocation74_spill] sm:$0xff] %v10253_v62  ;;  %v3774_v13 = vsel %vm2480_vm13, %v16319_v23, %v9976_v61  ;;  %v3831_v50 = vsel %vm2480_vm13, %v10174_v58, %v3830_v41  ;;  %v10267_v14 = vpack.c.b16 %v2679_v43, %v2679_v43  ;;  %v3822_v47 = vsel %vm2468_vm8, %v10128_v51, %v9987_v38 }
 0x364   :  { %2698 = vrot.lane.b32.xlu1 %v10253_v62, %s8292_s10  ;;  %v3833_v49 = vsel %vm2462_vm7, %v10203_v35, %v10216_v19  ;;  %v16322_v31 = vrot.slane %v10013_v40, 6  ;;  %v16323_v48 = vrot.slane %v10011_v21, 5  ;;  %v4163_v46 = vsel %vm2465_vm10, %v10021_v5, %v4162_v53  ;;  %v16334_v62 = vld [vmem:[#allocation47_spill] sm:$0xff]  ;;  %v16339_v21 = vld [vmem:[#allocation50_spill] sm:$0xff] }
 0x365   :  { %16321 = vst [vmem:[#allocation52_spill] sm:$0xff] %v10267_v14  ;;  %v16324_v41 = vrot.slane %v10018_v55, 6  ;;  %v16325_v59 = vrot.slane %v10033_v32, 5  ;;  %2696 = vrot.lane.b32.xlu0 %v10267_v14, %s8292_s10  ;;  %v3823_v43 = vsel %vm2471_vm11, %v10190_v28, %v3822_v47  ;;  %v10294_v23 = vrot.slane %v9987_v38, 6 }
 0x366   :  { %v3781_v61 = vsel %vm2462_vm7, %v16323_v48, %v16322_v31  ;;  %v10297_v44 = vrot.slane %v10085_v8, 5  ;;  %v10300_v5 = vrot.slane %v10069_v7, 4  ;;  %3767 = vrot.lane.b32.xlu2 %v3764_v10, %s8289_s6  ;;  %v3824_v55 = vsel %vm2474_vm9, %v10193_v22, %v3823_v43 }
 0x367   :  { %v3780_v54 = vsel %vm2462_vm7, %v16325_v59, %v16324_v41  ;;  %16326 = vst [vmem:[#allocation75_spill] sm:$0xff] %v10294_v23  ;;  %v10306_v32 = vrot.slane %v10139_v9, 3  ;;  %v10309_v53 = vrot.slane %v10146_v57, 2  ;;  %v10312_v47 = vrot.slane %v10141_v42, 1 }
 0x368   :  { %16327 = vst [vmem:[#allocation76_spill] sm:$0xff] %v10297_v44  ;;  %v10316_v31 = vsel %vm2468_vm8, %v10031_v4, %v4163_v46  ;;  %v3825_v48 = vsel %vm2477_vm12, %v10210_v24, %v3824_v55  ;;  %v10321_v10 = vrot.slane %v10185_v16, 7  ;;  %v3791_v41 = vsel %vm2468_vm8, %v10297_v44, %v10294_v23 }
 0x369   :  { %16328 = vst [vmem:[#allocation77_spill] sm:$0xff] %v10300_v5  ;;  %v10326_v59 = vpack.c.b16 %v3833_v49, %v3831_v50  ;;  %v3832_v43 = vsel %vm2462_vm7, %v10231_v3, %v10228_v17  ;;  %v4205_v4 = vsel %vm2474_vm9, %v10297_v44, %v10294_v23  ;;  %v4211_v46 = vsel %vm2462_vm7, %v10312_v47, %v10309_v53 }
 0x36a   :  { %16329 = vst [vmem:[#allocation78_spill] sm:$0xff] %v10306_v32  ;;  %v3783_v55 = vpack.c.b16 %v3781_v61, %v3779_v26  ;;  %v4212_v14 = vsel %vm2465_vm10, %v10195_v33, %v4211_v46  ;;  %v3793_v50 = vsel %vm2471_vm11, %v10300_v5, %v3791_v41  ;;  %v4160_v49 = vsel %vm2465_vm10, %v10052_v6, %v4159_v29  ;;  %v7286_v29 = vld [vmem:[%s15317_s2 + $0xf0] sm:$0xf] }
 0x36b   :  { %16330 = vst [vmem:[#allocation79_spill] sm:$0xff] %v10309_v53  ;;  %v3782_v11 = vpack.c.b16 %v3780_v54, %v3774_v13  ;;  %v3826_v60 = vsel %vm2480_vm13, %v10221_v15, %v3825_v48  ;;  %v3795_v1 = vsel %vm2474_vm9, %v10306_v32, %v3793_v50  ;;  %v4206_v61 = vsel %vm2477_vm12, %v10300_v5, %v4205_v4  ;;  %v7911_v13 = vld [vmem:[%s15317_s2 + $0xf4] sm:$0xf0]  ;;  %v7350_v48 = vld [vmem:[%s15317_s2 + $0x170] sm:$0xf] }
 0x36c   :  { %16331 = vst [vmem:[#allocation80_spill] sm:$0xff] %v10312_v47  ;;  %v10349_v26 = vpack.c.b16 %v3832_v43, %v3826_v60  ;;  %v10355_v41 = vsel %vm2468_vm8, %v10321_v10, %v4212_v14  ;;  %v3797_v6 = vsel %vm2477_vm12, %v10309_v53, %v3795_v1  ;;  %3786 = vrot.lane.b32.xlu1 %v3783_v55, %s8290_s7  ;;  %v7927_v43 = vld [vmem:[%s15317_s2 + $0x174] sm:$0xf0]  ;;  %v7942_v4 = vld [vmem:[%s15317_s2 + $0x1f4] sm:$0xf]  ;;  %v10393_v46 = vrot.slane %v10003_v2, 6 }
 0x36d   :  { %16332 = vst [vmem:[#allocation81_spill] sm:$0xff] %v10321_v10  ;;  %v10368_v60 = vsel %vm2480_vm13, %v10306_v32, %v4206_v61  ;;  %v3812_v14 = vsel %vm2462_vm7, %v10321_v10, %v10195_v33  ;;  %v10375_v1 = vsel %vm2468_vm8, %v10080_v45, %v4160_v49  ;;  %v4233_v54 = vsel %vm2462_vm7, %v10174_v58, %v10164_v12  ;;  %v7416_v49 = vld [vmem:[%s15317_s2 + $0x1f8] sm:$0xf0]  ;;  %v7938_v32 = vld [vmem:[%s15317_s2 + $0x1d4] sm:$0xf] }
 0x36e   :  { %16333 = vst [vmem:[#allocation82_spill] sm:$0xff] %v10326_v59  ;;  %3784 = vrot.lane.b32.xlu0 %v3782_v11, %s8290_s7  ;;  %v4234_v45 = vsel %vm2465_vm10, %v10216_v19, %v4233_v54  ;;  %v10396_v55 = vrot.slane %v10055_v39, 5  ;;  %v10399_v50 = vrot.slane %v10125_v34, 4  ;;  %3838 = vrot.lane.b32.xlu2 %v10326_v59, %s8292_s10  ;;  %v3799_v61 = vsel %vm2480_vm13, %v10312_v47, %v3797_v6  ;;  %v7909_v59 = vld [vmem:[%s15317_s2 + $0xe4] sm:$0xf0] }
 0x36f   :  { %16335 = vst [vmem:[#allocation47_spill] sm:$0xff] %v10349_v26  ;;  %v4227_v54 = vsel %vm2474_vm9, %v10088_v56, %v10003_v2  ;;  %v10414_v0 = vrot.slane %v10130_v63, 3  ;;  %v10428_v56 = vrot.slane %v10132_v20, 2  ;;  %v10430_v40 = vor.u32 %v7911_v13, %v7286_v29  ;;  %v7925_v19 = vld [vmem:[%s15317_s2 + $0x164] sm:$0xf0] }
 0x370   :  { %16336 = vst [vmem:[#allocation83_spill] sm:$0xff] %v10396_v55  ;;  %v3802_v6 = vsel %vm2468_vm8, %v10396_v55, %v10393_v46  ;;  %v4235_v11 = vsel %vm2468_vm8, %v10203_v35, %v4234_v45  ;;  %v10441_v58 = vrot.slane %v10179_v30, 7  ;;  %v10443_v12 = vor.u32 %v7927_v43, %v7350_v48  ;;  %v7480_v53 = vld [vmem:[%s15317_s2 + $0x278] sm:$0xf0]  ;;  %v7262_v5 = vld [vmem:[%s15317_s2 + $0xc0] sm:$0xf] }
 0x371   :  { %16337 = vst [vmem:[#allocation84_spill] sm:$0xff] %v10399_v50  ;;  %v10445_v44 = vor.u32 %v7942_v4, %v7416_v49  ;;  %v3815_v29 = vpack.c.b16 %v3812_v14, %v3799_v61  ;;  %v4228_v13 = vsel %vm2477_vm12, %v10158_v37, %v4227_v54  ;;  %v3804_v23 = vsel %vm2471_vm11, %v10399_v50, %v3802_v6  ;;  %v7940_v61 = vld [vmem:[%s15317_s2 + $0x1e4] sm:$0xf]  ;;  %v7408_v54 = vld [vmem:[%s15317_s2 + $0x1e8] sm:$0xf0] }
 0x372   :  { %16338 = vst [vmem:[#allocation85_spill] sm:$0xff] %v10414_v0  ;;  %3490 = vmatpush.bf16.msra.mxu3 %v10430_v40  ;;  %v10452_v10 = vor.u32 %v7909_v59, %v7278_v27  ;;  %v4229_v45 = vsel %vm2480_vm13, %v10161_v18, %v4228_v13  ;;  %v3806_v48 = vsel %vm2474_vm9, %v10414_v0, %v3804_v23  ;;  %v10459_v43 = vrot.slane %v10143_v25, 1  ;;  %v7334_v18 = vld [vmem:[%s15317_s2 + $0x150] sm:$0xf]  ;;  %v7958_v37 = vld [vmem:[%s15317_s2 + $0x274] sm:$0xf] }
 0x373   :  { %16340 = vst [vmem:[#allocation50_spill] sm:$0xff] %v10428_v56  ;;  %3503 = vmatpush.bf16.msrb.mxu2 %v10443_v12  ;;  %3646 = vmatpush.bf16.msrb.mxu0 %v10445_v44  ;;  %v10463_v14 = vor.u32 %v7925_v19, %v7342_v36  ;;  %v10465_v4 = vpack.c.b16 %v4235_v11, %v4229_v45  ;;  %v10470_v59 = vrot.slane %v10055_v39, 3  ;;  %v10473_v49 = vrot.slane %v10143_v25, 7 }
 0x374   :  { %16341 = vst [vmem:[#allocation86_spill] sm:$0xff] %v10430_v40  ;;  %v3808_v27 = vsel %vm2477_vm12, %v10428_v56, %v3806_v48  ;;  %3836 = vrot.lane.b32.xlu1 %v10349_v26, %s8292_s10  ;;  %v3814_v23 = vsel %vm2462_vm7, %v10441_v58, %v10197_v52  ;;  %v10481_v36 = vrot.slane %v10003_v2, 4  ;;  %v10484_v19 = vrot.slane %v10125_v34, 2  ;;  %v7270_v26 = vld [vmem:[%s15317_s2 + $0xd0] sm:$0xf] }
 0x375   :  { %16342 = vst [vmem:[#allocation87_spill] sm:$0xff] %v10441_v58  ;;  %v10487_v11 = vrot.slane %v10197_v52, 6  ;;  %v10498_v6 = vrot.slane %v10130_v63, 1  ;;  %v10501_v13 = vrot.slane %v10085_v8, 3  ;;  %v10504_v45 = vrot.slane %v10069_v7, 2 }
 0x376   :  { %16343 = vst [vmem:[#allocation88_spill] sm:$0xff] %v10443_v12  ;;  %3817 = vrot.lane.b32.xlu0 %v3815_v29, %s8291_s9  ;;  %3491 = vmatpush.bf16.msra.mxu3 %v10452_v10  ;;  %v10507_v48 = vrot.slane %v10139_v9, 1  ;;  %v7907_v29 = vld [vmem:[%s15317_s2 + $0xd4] sm:$0xf0]  ;;  %v10523_v40 = vrot.slane %v10179_v30, 5  ;;  %v10526_v12 = vrot.slane %v10141_v42, 7 }
 0x377   :  { %16344 = vst [vmem:[#allocation89_spill] sm:$0xff] %v10445_v44  ;;  %v16354_v44 = vpack.c.b16 %v10316_v31, %v16334_v62  ;;  %3504 = vmatpush.bf16.msrb.mxu2 %v10463_v14  ;;  %v10529_v35 = vrot.slane %v10195_v33, 6  ;;  %v4181_v62 = vsel %vm2474_vm9, %v10470_v59, %v10481_v36  ;;  %v10541_v31 = vrot.slane %v9987_v38, 4  ;;  %v7921_v30 = vld [vmem:[%s15317_s2 + $0x144] sm:$0xf0] }
 0x378   :  { %16345 = vst [vmem:[#allocation90_spill] sm:$0xff] %v10452_v10  ;;  %v3810_v10 = vsel %vm2480_vm13, %v10459_v43, %v3808_v27  ;;  %v4590_v27 = vsel %vm2462_vm7, %v10507_v48, %v10504_v45  ;;  %v4183_v8 = vsel %vm2477_vm12, %v10484_v19, %v4181_v62 }
 0x379   :  { %16346 = vst [vmem:[#allocation91_spill] sm:$0xff] %v10459_v43  ;;  %4169 = vrot.lane.b32.xlu2 %v16354_v44, %s8289_s6  ;;  %v4193_v44 = vsel %vm2462_vm7, %v10473_v49, %v10132_v20  ;;  %v4591_v47 = vsel %vm2465_vm10, %v10146_v57, %v4590_v27  ;;  %v10573_v27 = vor.u32 %v7940_v61, %v7408_v54 }
 0x37a   :  { %16347 = vst [vmem:[#allocation92_spill] sm:$0xff] %v10463_v14  ;;  %v7923_v14 = vld [vmem:[%s15317_s2 + $0x154] sm:$0xf0]  ;;  %v10590_v54 = vor.u32 %v7907_v29, %v7270_v26  ;;  %v4185_v33 = vsel %vm2480_vm13, %v10498_v6, %v4183_v8  ;;  %v10605_v26 = vor.u32 %v7958_v37, %v7480_v53  ;;  %v7956_v29 = vld [vmem:[%s15317_s2 + $0x264] sm:$0xf]  ;;  %v16362_v8 = vpack.c.b16 %v10375_v1, %v16339_v21 }
 0x37b   :  { %16348 = vst [vmem:[#allocation93_spill] sm:$0xff] %v10465_v4  ;;  %3647 = vmatpush.bf16.msrb.mxu0 %v10573_v27  ;;  %v4230_v1 = vsel %vm2462_vm7, %v10221_v15, %v10210_v24 }
 0x37c   :  { %16349 = vst [vmem:[#allocation94_spill] sm:$0xff] %v10470_v59  ;;  %v3816_v59 = vpack.c.b16 %v3814_v23, %v3810_v10  ;;  %v4592_v10 = vsel %vm2468_vm8, %v10526_v12, %v4591_v47  ;;  %v4174_v23 = vsel %vm2474_vm9, %v10501_v13, %v10541_v31  ;;  %v7905_v47 = vld [vmem:[%s15317_s2 + $0xc4] sm:$0xf0]  ;;  %4167 = vrot.lane.b32.xlu1 %v16362_v8, %s8289_s6  ;;  %v10682_v8 = vrot.slane %v10003_v2, 2 }
 0x37d   :  { %16350 = vst [vmem:[#allocation95_spill] sm:$0xff] %v10473_v49  ;;  %v10555_v49 = vrot.slane %v10185_v16, 5  ;;  %v7326_v16 = vld [vmem:[%s15317_s2 + $0x140] sm:$0xf]  ;;  %3492 = vmatpush.bf16.msra.mxu3 %v10590_v54  ;;  %3659 = vmatpush.bf16.msrb.mxu1 %v10605_v26 }
 0x37e   :  { %16351 = vst [vmem:[#allocation96_spill] sm:$0xff] %v10481_v36  ;;  %v4195_v36 = vsel %vm2465_vm10, %v10487_v11, %v4193_v44  ;;  %v4187_v44 = vsel %vm2462_vm7, %v10526_v12, %v10146_v57  ;;  %3819 = vrot.lane.b32.xlu0 %v3816_v59, %s8291_s9  ;;  %v10632_v21 = vor.u32 %v7921_v30, %v7326_v16  ;;  %v7936_v30 = vld [vmem:[%s15317_s2 + $0x1c4] sm:$0xf]  ;;  %v7392_v16 = vld [vmem:[%s15317_s2 + $0x1c8] sm:$0xf0] }
 0x37f   :  { %16352 = vst [vmem:[#allocation97_spill] sm:$0xff] %v10487_v11  ;;  %v7400_v11 = vld [vmem:[%s15317_s2 + $0x1d8] sm:$0xf0]  ;;  %v4189_v61 = vsel %vm2465_vm10, %v10529_v35, %v4187_v44  ;;  %v4197_v62 = vsel %vm2468_vm8, %v10523_v40, %v4195_v36  ;;  %v7472_v44 = vld [vmem:[%s15317_s2 + $0x268] sm:$0xf0]  ;;  %v4176_v36 = vsel %vm2477_vm12, %v10504_v45, %v4174_v23 }
 0x380   :  { %16353 = vst [vmem:[#allocation98_spill] sm:$0xff] %v10507_v48  ;;  %v10620_v37 = vor.u32 %v7938_v32, %v7400_v11  ;;  %v16366_v32 = vpack.c.b16 %v10355_v41, %v10368_v60  ;;  %v4199_v41 = vpack.c.b16 %v4197_v62, %v4185_v33  ;;  %v10656_v60 = vsel %vm2480_vm13, %v10501_v13, %v10541_v31  ;;  %v7254_v23 = vld [vmem:[%s15317_s2 + $0xb0] sm:$0xf]  ;;  %v7903_v33 = vld [vmem:[%s15317_s2 + $0xb4] sm:$0xf0] }
 0x381   :  { %16355 = vst [vmem:[#allocation99_spill] sm:$0xff] %v10526_v12  ;;  %v4593_v12 = vsel %vm2471_vm11, %v10529_v35, %v4592_v10  ;;  %v10603_v10 = vor.u32 %v7923_v14, %v7334_v18  ;;  %v10622_v18 = vor.u32 %v7905_v47, %v7262_v5  ;;  %v4191_v14 = vsel %vm2468_vm8, %v10555_v49, %v4189_v61  ;;  %v7318_v47 = vld [vmem:[%s15317_s2 + $0x130] sm:$0xf]  ;;  %v7384_v61 = vld [vmem:[%s15317_s2 + $0x1b8] sm:$0xf0] }
 0x382   :  { %16356 = vst [vmem:[#allocation100_spill] sm:$0xff] %v10529_v35  ;;  %v10627_v53 = vsel %vm2474_vm9, %v10555_v49, %v4593_v12  ;;  %4219 = vrot.lane.b32.xlu2 %v16366_v32, %s8291_s9  ;;  %v10639_v5 = vor.u32 %v7956_v29, %v7472_v44  ;;  %v4224_v12 = vsel %vm2474_vm9, %v10128_v51, %v9987_v38  ;;  %v7919_v29 = vld [vmem:[%s15317_s2 + $0x134] sm:$0xf0]  ;;  %v7954_v44 = vld [vmem:[%s15317_s2 + $0x254] sm:$0xf] }
 0x383   :  { %16357 = vst [vmem:[#allocation101_spill] sm:$0xff] %v10555_v49  ;;  %3505 = vmatpush.bf16.msrb.mxu2 %v10603_v10  ;;  %v4178_v59 = vsel %vm2480_vm13, %v10507_v48, %v4176_v36  ;;  %3648 = vmatpush.bf16.msrb.mxu0 %v10620_v37  ;;  %v4231_v11 = vsel %vm2465_vm10, %v10228_v17, %v4230_v1  ;;  %v10685_v36 = vrot.slane %v10055_v39, 1  ;;  %v7464_v39 = vld [vmem:[%s15317_s2 + $0x258] sm:$0xf0]  ;;  %v7901_v49 = vld [vmem:[%s15317_s2 + $0xa4] sm:$0xf0] }
 0x384   :  { %16358 = vst [vmem:[#allocation102_spill] sm:$0xff] %v10573_v27  ;;  %v4198_v62 = vpack.c.b16 %v4191_v14, %v4178_v59  ;;  %3493 = vmatpush.bf16.msra.mxu3 %v10622_v18  ;;  %v4225_v14 = vsel %vm2477_vm12, %v10190_v28, %v4224_v12  ;;  %v10693_v32 = vsel %vm2480_vm13, %v10396_v55, %v10393_v46  ;;  %v7934_v12 = vld [vmem:[%s15317_s2 + $0x1b4] sm:$0xf]  ;;  %v7913_v35 = vld [vmem:[%s15317_s2 + $0x104] sm:$0xf0] }
 0x385   :  { %16359 = vst [vmem:[#allocation103_spill] sm:$0xff] %v10590_v54  ;;  %v4614_v1 = vsel %vm2462_vm7, %v10414_v0, %v10399_v50  ;;  %v4208_v59 = vsel %vm2474_vm9, %v10396_v55, %v10393_v46  ;;  %3660 = vmatpush.bf16.msrb.mxu1 %v10639_v5  ;;  %v4214_v27 = vsel %vm2462_vm7, %v10459_v43, %v10428_v56  ;;  %v7948_v55 = vld [vmem:[%s15317_s2 + $0x224] sm:$0xf] }
 0x386   :  { %16360 = vst [vmem:[#allocation104_spill] sm:$0xff] %v10603_v10  ;;  %v10718_v54 = vor.u32 %v7903_v33, %v7254_v23  ;;  %v10739_v23 = vrot.slane %v10130_v63, 7  ;;  %4202 = vrot.lane.b32.xlu1 %v4199_v41, %s8290_s7  ;;  %v4226_v33 = vsel %vm2480_vm13, %v10193_v22, %v4225_v14  ;;  %v7456_v63 = vld [vmem:[%s15317_s2 + $0x248] sm:$0xf0]  ;;  %4200 = vrot.lane.b32.xlu0 %v4198_v62, %s8290_s7  ;;  %v7932_v14 = vld [vmem:[%s15317_s2 + $0x1a4] sm:$0xf] }
 0x387   :  { %16361 = vst [vmem:[#allocation105_spill] sm:$0xff] %v10605_v26  ;;  %3506 = vmatpush.bf16.msrb.mxu2 %v10632_v21  ;;  %v7246_v26 = vld [vmem:[%s15317_s2 + $0xa0] sm:$0xf]  ;;  %v7899_v62 = vld [vmem:[%s15317_s2 + $0x94] sm:$0xf0] }
 0x388   :  { %16363 = vst [vmem:[#allocation106_spill] sm:$0xff] %v10620_v37  ;;  %v4232_v37 = vsel %vm2468_vm8, %v10231_v3, %v4231_v11  ;;  %v4215_v11 = vsel %vm2465_vm10, %v10197_v52, %v4214_v27  ;;  %v10745_v27 = vor.u32 %v7954_v44, %v7464_v39  ;;  %v4209_v44 = vsel %vm2477_vm12, %v10399_v50, %v4208_v59  ;;  %v7376_v39 = vld [vmem:[%s15317_s2 + $0x1a8] sm:$0xf0] }
 0x389   :  { %16364 = vst [vmem:[#allocation107_spill] sm:$0xff] %v10622_v18  ;;  %v10716_v18 = vor.u32 %v7936_v30, %v7392_v16  ;;  %v7310_v30 = vld [vmem:[%s15317_s2 + $0x120] sm:$0xf]  ;;  %v7917_v16 = vld [vmem:[%s15317_s2 + $0x124] sm:$0xf0]  ;;  %v10759_v41 = vpack.c.b16 %v4232_v37, %v4226_v33  ;;  %3494 = vmatpush.bf16.msra.mxu3 %v10718_v54 }
 0x38a   :  { %16365 = vst [vmem:[#allocation108_spill] sm:$0xff] %v10632_v21  ;;  %v10730_v21 = vor.u32 %v7919_v29, %v7318_v47  ;;  %v10747_v47 = vor.u32 %v7934_v12, %v7384_v61  ;;  %v7952_v29 = vld [vmem:[%s15317_s2 + $0x244] sm:$0xf]  ;;  %v10764_v61 = vor.u32 %v7901_v49, %v7246_v26  ;;  %v7238_v37 = vld [vmem:[%s15317_s2 + $0x90] sm:$0xf]  ;;  %4240 = vrot.lane.b32.xlu2 %v10465_v4, %s8292_s10 }
 0x38b   :  { %16367 = vst [vmem:[#allocation109_spill] sm:$0xff] %v10639_v5  ;;  %v4615_v5 = vsel %vm2465_vm10, %v10428_v56, %v4614_v1  ;;  %3649 = vmatpush.bf16.msrb.mxu0 %v10716_v18  ;;  %v10756_v1 = vrot.slane %v10132_v20, 6  ;;  %v4216_v26 = vsel %vm2468_vm8, %v10441_v58, %v4215_v11  ;;  %v10785_v59 = vor.u32 %v7917_v16, %v7310_v30  ;;  %v7302_v12 = vld [vmem:[%s15317_s2 + $0x110] sm:$0xf]  ;;  %v7915_v33 = vld [vmem:[%s15317_s2 + $0x114] sm:$0xf0] }
 0x38c   :  { %16368 = vst [vmem:[#allocation110_spill] sm:$0xff] %v10716_v18  ;;  %v4616_v49 = vsel %vm2468_vm8, %v10459_v43, %v4615_v5  ;;  %3507 = vmatpush.bf16.msrb.mxu2 %v10730_v21  ;;  %v7950_v4 = vld [vmem:[%s15317_s2 + $0x234] sm:$0xf]  ;;  %v7448_v5 = vld [vmem:[%s15317_s2 + $0x238] sm:$0xf0]  ;;  %3661 = vmatpush.bf16.msrb.mxu1 %v10745_v27  ;;  %v10800_v11 = vor.u32 %v7952_v29, %v7456_v63  ;;  %v10806_v16 = vrot.slane %v10143_v25, 5 }
 0x38d   :  { %16369 = vst [vmem:[#allocation111_spill] sm:$0xff] %v10718_v54  ;;  %v4572_v30 = vsel %vm2462_vm7, %v10739_v23, %v10125_v34  ;;  %v10809_v18 = vrot.slane %v10139_v9, 7  ;;  %v7930_v54 = vld [vmem:[%s15317_s2 + $0x194] sm:$0xf]  ;;  %v10821_v63 = vrot.slane %v10197_v52, 4  ;;  %v10824_v25 = vrot.slane %v10146_v57, 6  ;;  %3495 = vmatpush.bf16.msra.mxu3 %v10764_v61 }
 0x38e   :  { %16370 = vst [vmem:[#allocation112_spill] sm:$0xff] %v10730_v21  ;;  %v4574_v29 = vsel %vm2465_vm10, %v10756_v1, %v4572_v30  ;;  %v10827_v9 = vrot.slane %v10141_v42, 5  ;;  %v7230_v43 = vld [vmem:[%s15317_s2 + $0x80] sm:$0xf]  ;;  %v4617_v21 = vsel %vm2471_vm11, %v10197_v52, %v4616_v49  ;;  %v16382_v56 = vld [vmem:[#allocation70_spill] sm:$0xff]  ;;  %4238 = vrot.lane.b32.xlu1 %v10759_v41, %s8292_s10 }
 0x38f   :  { %16371 = vst [vmem:[#allocation113_spill] sm:$0xff] %v10739_v23  ;;  %3650 = vmatpush.bf16.msrb.mxu0 %v10747_v47  ;;  %v4562_v30 = vsel %vm2462_vm7, %v10809_v18, %v10069_v7  ;;  %v10841_v50 = vrot.slane %v16382_v56, 4  ;;  %v7897_v42 = vld [vmem:[%s15317_s2 + $0x84] sm:$0xf0]  ;;  %v7294_v49 = vld [vmem:[%s15317_s2 + $0x100] sm:$0xf] }
 0x390   :  { %16372 = vst [vmem:[#allocation114_spill] sm:$0xff] %v10745_v27  ;;  %v7368_v27 = vld [vmem:[%s15317_s2 + $0x198] sm:$0xf0]  ;;  %3508 = vmatpush.bf16.msrb.mxu2 %v10785_v59  ;;  %3662 = vmatpush.bf16.msrb.mxu1 %v10800_v11 }
 0x391   :  { %16373 = vst [vmem:[#allocation115_spill] sm:$0xff] %v10747_v47  ;;  %v4210_v47 = vsel %vm2480_vm13, %v10414_v0, %v4209_v44  ;;  %v4564_v44 = vsel %vm2465_vm10, %v10824_v25, %v4562_v30  ;;  %v10854_v0 = vor.u32 %v7899_v62, %v7238_v37  ;;  %v10871_v62 = vor.u32 %v7915_v33, %v7302_v12  ;;  %v7414_v30 = vld [vmem:[%s15317_s2 + $0x1f0] sm:$0xf]  ;;  %v16390_v33 = vld [vmem:[#allocation69_spill] sm:$0xff] }
 0x392   :  { %16374 = vst [vmem:[#allocation116_spill] sm:$0xff] %v10759_v41  ;;  %v4218_v52 = vpack.c.b16 %v4216_v26, %v4210_v47  ;;  %v7440_v47 = vld [vmem:[%s15317_s2 + $0x228] sm:$0xf0]  ;;  %v10873_v26 = vor.u32 %v7950_v4, %v7448_v5  ;;  %v4566_v12 = vsel %vm2468_vm8, %v10827_v9, %v4564_v44  ;;  %v10888_v4 = vrot.slane %v16390_v33, 3  ;;  %v7959_v41 = vld [vmem:[%s15317_s2 + $0x274] sm:$0xf0] }
 0x393   :  { %16375 = vst [vmem:[#allocation117_spill] sm:$0xff] %v10764_v61  ;;  %v10852_v61 = vor.u32 %v7932_v14, %v7376_v39  ;;  %v4576_v14 = vsel %vm2468_vm8, %v10806_v16, %v4574_v29  ;;  %v16386_v39 = vld [vmem:[#allocation68_spill] sm:$0xff]  ;;  %v10891_v5 = vor.u32 %v7930_v54, %v7368_v27  ;;  %v16393_v44 = vld [vmem:[#allocation58_spill] sm:$0xff]  ;;  %v4568_v54 = vsel %vm2471_vm11, %v10841_v50, %v4566_v12 }
 0x394   :  { %16376 = vst [vmem:[#allocation118_spill] sm:$0xff] %v10785_v59  ;;  %v10869_v37 = vrot.slane %v16386_v39, 3  ;;  %v7943_v59 = vld [vmem:[%s15317_s2 + $0x1f4] sm:$0xf0]  ;;  %v4578_v29 = vsel %vm2471_vm11, %v10821_v63, %v4576_v14  ;;  %v7478_v39 = vld [vmem:[%s15317_s2 + $0x270] sm:$0xf]  ;;  %v10901_v14 = vsel %vm2474_vm9, %v10441_v58, %v4617_v21  ;;  %4221 = vrot.lane.b32.xlu0 %v4218_v52, %s8291_s9  ;;  %3496 = vmatpush.bf16.msra.mxu3 %v10854_v0 }
 0x395   :  { %16377 = vst [vmem:[#allocation119_spill] sm:$0xff] %v10800_v11  ;;  %3651 = vmatpush.bf16.msrb.mxu0 %v10852_v61  ;;  %v10905_v33 = vrot.slane %v16393_v44, 1  ;;  %v10910_v27 = vor.u32 %v7897_v42, %v7230_v43  ;;  %v7360_v21 = vld [vmem:[%s15317_s2 + $0x188] sm:$0xf0]  ;;  %v16396_v52 = vpack.c.b16 %v10627_v53, %v10656_v60  ;;  %v4560_v12 = vsel %vm2480_vm13, %v10685_v36, %v10682_v8  ;;  %v7672_v53 = vld [vmem:[%s15317_s2 + $0x3f8] sm:$0xf0] }
 0x396   :  { %16378 = vst [vmem:[#allocation120_spill] sm:$0xff] %v10809_v18  ;;  %v10926_v43 = vrot.slane %v9987_v38, 2  ;;  %3509 = vmatpush.bf16.msrb.mxu2 %v10871_v62  ;;  %v10929_v42 = vor.u32 %v7913_v35, %v7294_v49  ;;  %v10931_v44 = vor.u32 %v7943_v59, %v7414_v30  ;;  %v4580_v60 = vsel %vm2474_vm9, %v10869_v37, %v4578_v29  ;;  %v16402_v35 = vld [vmem:[#allocation77_spill] sm:$0xff]  ;;  %v16403_v59 = vld [vmem:[#allocation78_spill] sm:$0xff]  ;;  %v7432_v58 = vld [vmem:[%s15317_s2 + $0x218] sm:$0xf0] }
 0x397   :  { %16379 = vst [vmem:[#allocation121_spill] sm:$0xff] %v10821_v63  ;;  %4602 = vrot.lane.b32.xlu2 %v16396_v52, %s8290_s7  ;;  %3663 = vmatpush.bf16.msrb.mxu1 %v10873_v26  ;;  %v10942_v52 = vor.u32 %v7948_v55, %v7440_v47  ;;  %v10944_v11 = vor.u32 %v7959_v41, %v7478_v39  ;;  %v7946_v30 = vld [vmem:[%s15317_s2 + $0x214] sm:$0xf]  ;;  %v7941_v29 = vld [vmem:[%s15317_s2 + $0x1e4] sm:$0xf0]  ;;  %v16404_v41 = vld [vmem:[#allocation79_spill] sm:$0xff] }
 0x398   :  { %16380 = vst [vmem:[#allocation122_spill] sm:$0xff] %v10824_v25  ;;  %v4609_v49 = vsel %vm2462_vm7, %v16403_v59, %v16402_v35  ;;  %v4570_v55 = vsel %vm2474_vm9, %v10888_v4, %v4568_v54  ;;  %v4595_v39 = vsel %vm2462_vm7, %v10498_v6, %v10484_v19  ;;  %v7470_v59 = vld [vmem:[%s15317_s2 + $0x260] sm:$0xf]  ;;  %v7957_v54 = vld [vmem:[%s15317_s2 + $0x264] sm:$0xf0]  ;;  %3497 = vmatpush.bf16.msra.mxu3 %v10910_v27 }
 0x399   :  { %16381 = vst [vmem:[#allocation123_spill] sm:$0xff] %v10827_v9  ;;  %3652 = vmatpush.bf16.msrb.mxu0 %v10891_v5  ;;  %v4610_v47 = vsel %vm2465_vm10, %v16404_v41, %v4609_v49  ;;  %v4557_v49 = vsel %vm2480_vm13, %v10905_v33, %v10926_v43 }
 0x39a   :  { %16383 = vst [vmem:[#allocation70_spill] sm:$0xff] %v10841_v50  ;;  %3510 = vmatpush.bf16.msrb.mxu2 %v10929_v42 }
 0x39b   :  { %16384 = vst [vmem:[#allocation124_spill] sm:$0xff] %v10852_v61  ;;  %v7928_v61 = vld [vmem:[%s15317_s2 + $0x184] sm:$0xf]  ;;  %3664 = vmatpush.bf16.msrb.mxu1 %v10942_v52 }
 0x39c   :  { %16385 = vst [vmem:[#allocation125_spill] sm:$0xff] %v10854_v0  ;;  %v8006_v0 = vld [vmem:[%s15317_s2 + $0x3f4] sm:$0xf]  ;;  %3516 = vmatpush.bf16.msrb.mxu3 %v10931_v44 }
 0x39d   :  { %16387 = vst [vmem:[#allocation68_spill] sm:$0xff] %v10869_v37  ;;  %v10985_v41 = vor.u32 %v8006_v0, %v7672_v53  ;;  %v4582_v37 = vpack.c.b16 %v4580_v60, %v4560_v12  ;;  %v4581_v0 = vpack.c.b16 %v4570_v55, %v4557_v49  ;;  %v11001_v12 = vor.u32 %v7946_v30, %v7432_v58  ;;  %v7398_v60 = vld [vmem:[%s15317_s2 + $0x1d0] sm:$0xf]  ;;  %v16411_v55 = vld [vmem:[#allocation19_spill] sm:$0xff] }
 0x39e   :  { %16388 = vst [vmem:[#allocation126_spill] sm:$0xff] %v10871_v62  ;;  %v7406_v62 = vld [vmem:[%s15317_s2 + $0x1e0] sm:$0xf]  ;;  %3529 = vmatpush.bf16.msra.mxu2 %v10944_v11  ;;  %v11003_v53 = vor.u32 %v7957_v54, %v7470_v59  ;;  %v4620_v58 = vpack.c.b16 %v10901_v14, %v10693_v32  ;;  %v16414_v59 = vld [vmem:[#allocation95_spill] sm:$0xff]  ;;  %v7424_v54 = vld [vmem:[%s15317_s2 + $0x208] sm:$0xf0] }
 0x39f   :  { %16389 = vst [vmem:[#allocation127_spill] sm:$0xff] %v10873_v26  ;;  %v10966_v26 = vor.u32 %v7928_v61, %v7360_v21  ;;  %v16406_v61 = vld [vmem:[#allocation80_spill] sm:$0xff]  ;;  %v10991_v63 = vor.u32 %v7941_v29, %v7406_v62  ;;  %v7939_v29 = vld [vmem:[%s15317_s2 + $0x1d4] sm:$0xf0]  ;;  %4585 = vrot.lane.b32.xlu1 %v4582_v37, %s8289_s6  ;;  %4583 = vrot.lane.b32.xlu0 %v4581_v0, %s8289_s6  ;;  %v16415_v32 = vld [vmem:[#allocation81_spill] sm:$0xff] }
 0x3a0   :  { %16391 = vst [vmem:[#allocation69_spill] sm:$0xff] %v10888_v4  ;;  %v4611_v21 = vsel %vm2468_vm8, %v16406_v61, %v4610_v47  ;;  %v7664_v47 = vld [vmem:[%s15317_s2 + $0x3e8] sm:$0xf0]  ;;  %v7944_v62 = vld [vmem:[%s15317_s2 + $0x204] sm:$0xf]  ;;  %4623 = vrot.lane.b32.xlu2 %v4620_v58, %s8291_s9  ;;  %v4626_v0 = vsel %vm2480_vm13, %v10128_v51, %v9987_v38  ;;  %3665 = vmatpush.bf16.msrb.mxu1 %v11001_v12 }
 0x3a1   :  { %16392 = vst [vmem:[#allocation128_spill] sm:$0xff] %v10891_v5  ;;  %v4596_v5 = vsel %vm2465_vm10, %v10132_v20, %v4595_v39  ;;  %v4612_v35 = vsel %vm2471_vm11, %v16382_v56, %v4611_v21  ;;  %v16412_v39 = vld [vmem:[#allocation37_spill] sm:$0xff]  ;;  %3653 = vmatpush.bf16.msrb.mxu0 %v10966_v26  ;;  %v7462_v21 = vld [vmem:[%s15317_s2 + $0x250] sm:$0xf]  ;;  %3517 = vmatpush.bf16.msrb.mxu3 %v10991_v63  ;;  %v7656_v58 = vld [vmem:[%s15317_s2 + $0x3d8] sm:$0xf0] }
 0x3a2   :  { %16394 = vst [vmem:[#allocation58_spill] sm:$0xff] %v10905_v33  ;;  %v11016_v49 = vadd.f32 %v16412_v39, %v16411_v55  ;;  %v4597_v30 = vsel %vm2468_vm8, %v16414_v59, %v4596_v5  ;;  %v7955_v55 = vld [vmem:[%s15317_s2 + $0x254] sm:$0xf0]  ;;  %v4613_v37 = vsel %vm2474_vm9, %v16415_v32, %v4612_v35  ;;  %v16416_v5 = vld [vmem:[#allocation97_spill] sm:$0xff]  ;;  %v11049_v35 = vor.u32 %v7939_v29, %v7398_v60  ;;  %v7390_v51 = vld [vmem:[%s15317_s2 + $0x1c0] sm:$0xf] }
 0x3a3   :  { %16395 = vst [vmem:[#allocation129_spill] sm:$0xff] %v10910_v27  ;;  %v8004_v27 = vld [vmem:[%s15317_s2 + $0x3e4] sm:$0xf]  ;;  %v4598_v14 = vsel %vm2471_vm11, %v16416_v5, %v4597_v30  ;;  %3530 = vmatpush.bf16.msra.mxu2 %v11003_v53  ;;  %v11065_v60 = vor.u32 %v7944_v62, %v7424_v54  ;;  %v11067_v29 = vor.u32 %v7955_v55, %v7462_v21  ;;  %v16422_v30 = vld [vmem:[#allocation38_spill] sm:$0xff]  ;;  %v7454_v21 = vld [vmem:[%s15317_s2 + $0x240] sm:$0xf] }
 0x3a4   :  { %16397 = vst [vmem:[#allocation130_spill] sm:$0xff] %v10926_v43  ;;  %v11039_v39 = vor.u32 %v8004_v27, %v7664_v47  ;;  %v4628_v27 = vsel %vm2462_vm7, %v10193_v22, %v10190_v28  ;;  %v8002_v47 = vld [vmem:[%s15317_s2 + $0x3d4] sm:$0xf]  ;;  %v7937_v28 = vld [vmem:[%s15317_s2 + $0x1c4] sm:$0xf0]  ;;  %v4599_v62 = vsel %vm2474_vm9, %v10523_v40, %v4598_v14 }
 0x3a5   :  { %16398 = vst [vmem:[#allocation131_spill] sm:$0xff] %v10929_v42  ;;  %3698 = vmatpush.bf16.msra.mxu0 %v10985_v41  ;;  %v4629_v38 = vsel %vm2465_vm10, %v10210_v24, %v4628_v27  ;;  %v16421_v22 = vld [vmem:[#allocation9_spill] sm:$0xff]  ;;  %v16425_v27 = vld [vmem:[#allocation75_spill] sm:$0xff]  ;;  %3518 = vmatpush.bf16.msrb.mxu3 %v11049_v35 }
 0x3a6   :  { %16399 = vst [vmem:[#allocation132_spill] sm:$0xff] %v10931_v44  ;;  %v4630_v24 = vsel %vm2468_vm8, %v10221_v15, %v4629_v38  ;;  %v7953_v55 = vld [vmem:[%s15317_s2 + $0x244] sm:$0xf0]  ;;  %v8020_v15 = vld [vmem:[%s15317_s2 + $0x464] sm:$0xf]  ;;  %3666 = vmatpush.bf16.msrb.mxu1 %v11065_v60 }
 0x3a7   :  { %16400 = vst [vmem:[#allocation133_spill] sm:$0xff] %v10942_v52  ;;  %v7728_v14 = vld [vmem:[%s15317_s2 + $0x468] sm:$0xf0]  ;;  %3531 = vmatpush.bf16.msra.mxu2 %v11067_v29 }
 0x3a8   :  { %16401 = vst [vmem:[#allocation134_spill] sm:$0xff] %v10944_v11  ;;  %v7736_v11 = vld [vmem:[%s15317_s2 + $0x478] sm:$0xf0] }
 0x3a9   :  { %16405 = vst [vmem:[#allocation135_spill] sm:$0xff] %v10966_v26  ;;  %v8022_v26 = vld [vmem:[%s15317_s2 + $0x474] sm:$0xf]  ;;  %3699 = vmatpush.bf16.msra.mxu0 %v11039_v39 }
 0x3aa   :  { %16407 = vst [vmem:[#allocation80_spill] sm:$0xff] %v10985_v41  ;;  %v11079_v41 = vadd.f32 %v16422_v30, %v16421_v22  ;;  %v11083_v54 = vor.u32 %v8022_v26, %v7736_v11  ;;  %v4631_v11 = vsel %vm2471_vm11, %v10228_v17, %v4630_v24  ;;  %v11099_v26 = vor.u32 %v8002_v47, %v7656_v58  ;;  %v16428_v30 = vld [vmem:[#allocation96_spill] sm:$0xff]  ;;  %v7648_v24 = vld [vmem:[%s15317_s2 + $0x3c8] sm:$0xf0] }
 0x3ab   :  { %16408 = vst [vmem:[#allocation136_spill] sm:$0xff] %v10991_v63  ;;  %v4632_v17 = vsel %vm2474_vm9, %v10231_v3, %v4631_v11  ;;  %v11113_v47 = vor.u32 %v7937_v28, %v7390_v51  ;;  %v8000_v58 = vld [vmem:[%s15317_s2 + $0x3c4] sm:$0xf]  ;;  %v7382_v3 = vld [vmem:[%s15317_s2 + $0x1b0] sm:$0xf] }
 0x3ac   :  { %16409 = vst [vmem:[#allocation137_spill] sm:$0xff] %v11001_v12  ;;  %v16429_v12 = vld [vmem:[#allocation94_spill] sm:$0xff]  ;;  %v7935_v51 = vld [vmem:[%s15317_s2 + $0x1b4] sm:$0xf0]  ;;  %v8159_v28 = vpack.i.bf16 %v11079_v41, %v11016_v49  ;;  %3711 = vmatpush.bf16.msra.mxu1 %v11083_v54  ;;  %v7720_v11 = vld [vmem:[%s15317_s2 + $0x458] sm:$0xf0] }
 0x3ad   :  { %16410 = vst [vmem:[#allocation138_spill] sm:$0xff] %v11003_v53  ;;  %v16426_v53 = vld [vmem:[#allocation76_spill] sm:$0xff]  ;;  %v4589_v52 = vsel %vm2480_vm13, %v16429_v12, %v16428_v30  ;;  %3700 = vmatpush.bf16.msra.mxu0 %v11099_v26  ;;  %3519 = vmatpush.bf16.msrb.mxu3 %v11113_v47 }
 0x3ae   :  { %16413 = vst [vmem:[#allocation19_spill] sm:$0xff] %v11016_v49  ;;  %v4607_v22 = vsel %vm2480_vm13, %v16426_v53, %v16425_v27  ;;  %8160 = vrot.lane.b32.xlu2 %v8159_v28, %s8287_s8  ;;  %v16470_v63 = vld [vmem:[#allocation28_spill] sm:$0xff] }
 0x3af   :  { %16417 = vst [vmem:[#allocation37_spill] sm:$0xff] %v11039_v39  ;;  %v4619_v38 = vpack.c.b16 %v4613_v37, %v4607_v22  ;;  %v4601_v37 = vpack.c.b16 %v4599_v62, %v4589_v52  ;;  %v11123_v22 = vpack.c.b16 %v4632_v17, %v4626_v0  ;;  %v11125_v39 = vor.u32 %v7953_v55, %v7454_v21  ;;  %v7446_v0 = vld [vmem:[%s15317_s2 + $0x230] sm:$0xf]  ;;  %v7951_v62 = vld [vmem:[%s15317_s2 + $0x234] sm:$0xf0] }
 0x3b0   :  { %16418 = vst [vmem:[#allocation95_spill] sm:$0xff] %v11049_v35  ;;  %v11137_v52 = vor.u32 %v8020_v15, %v7728_v14  ;;  %v11147_v21 = vor.u32 %v8000_v58, %v7648_v24  ;;  %v8018_v55 = vld [vmem:[%s15317_s2 + $0x454] sm:$0xf]  ;;  %v11157_v15 = vor.u32 %v7935_v51, %v7382_v3  ;;  %v11166_v17 = vor.u32 %v7951_v62, %v7446_v0  ;;  %v7374_v58 = vld [vmem:[%s15317_s2 + $0x1a0] sm:$0xf]  ;;  %v16467_v35 = vld [vmem:[#allocation73_spill] sm:$0xff] }
 0x3b1   :  { %16419 = vst [vmem:[#allocation81_spill] sm:$0xff] %v11065_v60  ;;  %4621 = vrot.lane.b32.xlu1 %v4619_v38, %s8291_s9  ;;  %4604 = vrot.lane.b32.xlu0 %v4601_v37, %s8290_s7  ;;  %v7998_v14 = vld [vmem:[%s15317_s2 + $0x3b4] sm:$0xf]  ;;  %v7640_v38 = vld [vmem:[%s15317_s2 + $0x3b8] sm:$0xf0]  ;;  %v11175_v37 = vor.u32 %v8018_v55, %v7720_v11  ;;  %v16440_v11 = vld [vmem:[#allocation40_spill] sm:$0xff] }
 0x3b2   :  { %16420 = vst [vmem:[#allocation97_spill] sm:$0xff] %v11067_v29  ;;  %3532 = vmatpush.bf16.msra.mxu2 %v11125_v39  ;;  %v7933_v24 = vld [vmem:[%s15317_s2 + $0x1a4] sm:$0xf0]  ;;  %3712 = vmatpush.bf16.msra.mxu1 %v11137_v52  ;;  %v7438_v3 = vld [vmem:[%s15317_s2 + $0x220] sm:$0xf]  ;;  %v11184_v28 = vor.u32 %v7998_v14, %v7640_v38  ;;  %v16439_v55 = vld [vmem:[#allocation39_spill] sm:$0xff] }
 0x3b3   :  { %16423 = vst [vmem:[#allocation9_spill] sm:$0xff] %v11079_v41  ;;  %v7949_v51 = vld [vmem:[%s15317_s2 + $0x224] sm:$0xf0]  ;;  %3701 = vmatpush.bf16.msra.mxu0 %v11147_v21  ;;  %v8016_v0 = vld [vmem:[%s15317_s2 + $0x444] sm:$0xf]  ;;  %3520 = vmatpush.bf16.msrb.mxu3 %v11157_v15  ;;  %v16445_v60 = vld [vmem:[#allocation35_spill] sm:$0xff] }
 0x3b4   :  { %16424 = vst [vmem:[#allocation38_spill] sm:$0xff] %v11083_v54  ;;  %v7712_v62 = vld [vmem:[%s15317_s2 + $0x448] sm:$0xf0]  ;;  %v7996_v14 = vld [vmem:[%s15317_s2 + $0x3a4] sm:$0xf] }
 0x3b5   :  { %16427 = vst [vmem:[#allocation75_spill] sm:$0xff] %v11099_v26  ;;  %v8169_v26 = vpack.i.bf16 %v16440_v11, %v16439_v55  ;;  %v7632_v38 = vld [vmem:[%s15317_s2 + $0x3a8] sm:$0xf0]  ;;  %v7366_v29 = vld [vmem:[%s15317_s2 + $0x190] sm:$0xf]  ;;  %v16446_v41 = vld [vmem:[#allocation36_spill] sm:$0xff] }
 0x3b6   :  { %16430 = vst [vmem:[#allocation76_spill] sm:$0xff] %v11113_v47  ;;  %3533 = vmatpush.bf16.msra.mxu2 %v11166_v17  ;;  %v8174_v11 = vpack.i.bf16 %v16446_v41, %v16445_v60  ;;  %3713 = vmatpush.bf16.msra.mxu1 %v11175_v37  ;;  %v16466_v47 = vld [vmem:[#allocation44_spill] sm:$0xff] }
 0x3b7   :  { %16431 = vst [vmem:[#allocation96_spill] sm:$0xff] %v11123_v22  ;;  %3702 = vmatpush.bf16.msra.mxu0 %v11184_v28 }
 0x3b8   :  { %16432 = vst [vmem:[#allocation94_spill] sm:$0xff] %v11125_v39  ;;  %v11195_v39 = vor.u32 %v7933_v24, %v7374_v58  ;;  %v7931_v58 = vld [vmem:[%s15317_s2 + $0x194] sm:$0xf0]  ;;  %v16443_v24 = vld [vmem:[#allocation6_spill] sm:$0xff]  ;;  %8175 = vrot.lane.b32.xlu2 %v8174_v11, %s8287_s8  ;;  %v16454_v11 = vld [vmem:[#allocation65_spill] sm:$0xff] }
 0x3b9   :  { %16433 = vst [vmem:[#allocation139_spill] sm:$0xff] %v11137_v52  ;;  %v16444_v52 = vld [vmem:[#allocation27_spill] sm:$0xff]  ;;  %8170 = vrot.lane.b32.xlu1 %v8169_v26, %s8287_s8  ;;  %4640 = vrot.lane.b32.xlu0 %v11123_v22, %s8292_s10  ;;  %v8014_v26 = vld [vmem:[%s15317_s2 + $0x434] sm:$0xf]  ;;  %v11244_v22 = vor.u32 %v7931_v58, %v7366_v29  ;;  %v7358_v29 = vld [vmem:[%s15317_s2 + $0x180] sm:$0xf] }
 0x3ba   :  { %16434 = vst [vmem:[#allocation140_spill] sm:$0xff] %v11147_v21  ;;  %v11204_v21 = vor.u32 %v7949_v51, %v7438_v3  ;;  %v1259_v54 = vadd.f32 %v16444_v52, %v16443_v24  ;;  %v11218_v3 = vor.u32 %v8016_v0, %v7712_v62  ;;  %v7430_v51 = vld [vmem:[%s15317_s2 + $0x210] sm:$0xf]  ;;  %v11229_v52 = vor.u32 %v7996_v14, %v7632_v38  ;;  %v7704_v0 = vld [vmem:[%s15317_s2 + $0x438] sm:$0xf0]  ;;  %v16449_v62 = vld [vmem:[#allocation41_spill] sm:$0xff] }
 0x3bb   :  { %16435 = vst [vmem:[#allocation141_spill] sm:$0xff] %v11157_v15  ;;  %3521 = vmatpush.bf16.msrb.mxu3 %v11195_v39  ;;  %v7994_v14 = vld [vmem:[%s15317_s2 + $0x394] sm:$0xf]  ;;  %v7624_v38 = vld [vmem:[%s15317_s2 + $0x398] sm:$0xf0]  ;;  %v11265_v41 = vor.u32 %v8014_v26, %v7704_v0 }
 0x3bc   :  { %16436 = vst [vmem:[#allocation142_spill] sm:$0xff] %v11166_v17  ;;  %v7947_v17 = vld [vmem:[%s15317_s2 + $0x214] sm:$0xf0]  ;;  %v11238_v24 = vadd.f32 %v16449_v62, %v1259_v54  ;;  %3534 = vmatpush.bf16.msra.mxu2 %v11204_v21  ;;  %v16453_v62 = vld [vmem:[#allocation64_spill] sm:$0xff]  ;;  %v7929_v58 = vld [vmem:[%s15317_s2 + $0x184] sm:$0xf0]  ;;  %3714 = vmatpush.bf16.msra.mxu1 %v11218_v3 }
 0x3bd   :  { %16437 = vst [vmem:[#allocation143_spill] sm:$0xff] %v11175_v37  ;;  %v11241_v37 = vpop.permute.xlu2 %2566  ;;  %v11253_v54 = vor.u32 %v7947_v17, %v7430_v51  ;;  %v7422_v51 = vld [vmem:[%s15317_s2 + $0x200] sm:$0xf]  ;;  %3703 = vmatpush.bf16.msra.mxu0 %v11229_v52  ;;  %v8012_v26 = vld [vmem:[%s15317_s2 + $0x424] sm:$0xf] }
 0x3be   :  { %16438 = vst [vmem:[#allocation144_spill] sm:$0xff] %v11184_v28  ;;  %v4633_v28 = vsel %vm2462_vm7, %v16454_v11, %v16453_v62  ;;  %v7945_v62 = vld [vmem:[%s15317_s2 + $0x204] sm:$0xf0]  ;;  %v11276_v11 = vor.u32 %v7994_v14, %v7624_v38  ;;  %v7992_v14 = vld [vmem:[%s15317_s2 + $0x384] sm:$0xf] }
 0x3bf   :  { %16441 = vst [vmem:[#allocation145_spill] sm:$0xff] %v11195_v39  ;;  %v16456_v39 = vld [vmem:[#allocation66_spill] sm:$0xff]  ;;  %3522 = vmatpush.bf16.msrb.mxu3 %v11244_v22  ;;  %v7616_v38 = vld [vmem:[%s15317_s2 + $0x388] sm:$0xf0] }
 0x3c0   :  { %16442 = vst [vmem:[#allocation146_spill] sm:$0xff] %v11204_v21  ;;  %v4634_v17 = vsel %vm2465_vm10, %v16456_v39, %v4633_v28  ;;  %v7696_v39 = vld [vmem:[%s15317_s2 + $0x428] sm:$0xf0]  ;;  %v8184_v21 = vpack.i.bf16 %v11238_v24, %v16445_v60  ;;  %3535 = vmatpush.bf16.msra.mxu2 %v11253_v54  ;;  %v16463_v60 = vld [vmem:[#allocation67_spill] sm:$0xff]  ;;  %3715 = vmatpush.bf16.msra.mxu1 %v11265_v41 }
 0x3c1   :  { %16447 = vst [vmem:[#allocation6_spill] sm:$0xff] %v11218_v3  ;;  %v16458_v28 = vld [vmem:[#allocation17_spill] sm:$0xff]  ;;  %v11290_v3 = vor.u32 %v7929_v58, %v7358_v29  ;;  %v4635_v29 = vsel %vm2468_vm8, %v16463_v60, %v4634_v17  ;;  %v11306_v58 = vor.u32 %v7945_v62, %v7422_v51  ;;  %v4944_v60 = vsel %vm2462_vm7, %v10905_v33, %v10926_v43  ;;  %v16472_v51 = vld [vmem:[#allocation10_spill] sm:$0xff] }
 0x3c2   :  { %16448 = vst [vmem:[#allocation27_spill] sm:$0xff] %v11229_v52  ;;  %v11285_v0 = vrot.slane %v16458_v28, 7  ;;  %v8164_v52 = vpack.i.bf16 %v16439_v55, %v11016_v49  ;;  %v16461_v28 = vld [vmem:[#allocation24_spill] sm:$0xff]  ;;  %8185 = vrot.lane.b32.xlu1 %v8184_v21, %s8288_s20  ;;  %v4636_v55 = vsel %vm2471_vm11, %v16467_v35, %v4635_v29  ;;  %v11314_v49 = vor.u32 %v8012_v26, %v7696_v39  ;;  %v8010_v21 = vld [vmem:[%s15317_s2 + $0x414] sm:$0xf] }
 0x3c3   :  { %16450 = vst [vmem:[#allocation41_spill] sm:$0xff] %v11238_v24  ;;  %v11301_v15 = vrot.slane %v16461_v28, 6  ;;  %v16469_v28 = vld [vmem:[#allocation7_spill] sm:$0xff]  ;;  %3704 = vmatpush.bf16.msra.mxu0 %v11276_v11  ;;  %v11323_v17 = vor.u32 %v7992_v14, %v7616_v38  ;;  %v16475_v26 = vld [vmem:[#allocation32_spill] sm:$0xff]  ;;  %v16476_v29 = vld [vmem:[#allocation26_spill] sm:$0xff]  ;;  %3523 = vmatpush.bf16.msrb.mxu3 %v11290_v3 }
 0x3c4   :  { %16451 = vst [vmem:[#allocation147_spill] sm:$0xff] %v11244_v22  ;;  %v16465_v22 = vld [vmem:[#allocation43_spill] sm:$0xff]  ;;  %8165 = vrot.lane.b32.xlu0 %v8164_v52, %s8288_s20  ;;  %v16478_v14 = vld [vmem:[#allocation18_spill] sm:$0xff]  ;;  %3536 = vmatpush.bf16.msra.mxu2 %v11306_v58 }
 0x3c5   :  { %16452 = vst [vmem:[#allocation148_spill] sm:$0xff] %v11253_v54  ;;  %v8189_v42 = vpack.i.bf16 %v16466_v47, %v16465_v22  ;;  %v1260_v54 = vadd.f32 %v16470_v63, %v16469_v28  ;;  %v7688_v35 = vld [vmem:[%s15317_s2 + $0x418] sm:$0xf0]  ;;  %v11337_v28 = vrot.slane %v16476_v29, 5  ;;  %v3742_v38 = vsel %vm2468_vm8, %v11285_v0, %v16478_v14  ;;  %v16481_v47 = vld [vmem:[#allocation22_spill] sm:$0xff]  ;;  %3716 = vmatpush.bf16.msra.mxu1 %v11314_v49 }
 0x3c6   :  { %16455 = vst [vmem:[#allocation64_spill] sm:$0xff] %v11265_v41  ;;  %v16473_v63 = vld [vmem:[#allocation31_spill] sm:$0xff]  ;;  %v11347_v33 = vrot.slane %v16481_v47, 4  ;;  %v4945_v47 = vsel %vm2465_vm10, %v10069_v7, %v4944_v60  ;;  %v8008_v60 = vld [vmem:[%s15317_s2 + $0x404] sm:$0xf] }
 0x3c7   :  { %16457 = vst [vmem:[#allocation65_spill] sm:$0xff] %v11276_v11  ;;  %v1271_v62 = vadd.f32 %v16473_v63, %v16472_v51  ;;  %v16474_v52 = vld [vmem:[#allocation11_spill] sm:$0xff]  ;;  %8190 = vrot.lane.b32.xlu2 %v8189_v42, %s8287_s8  ;;  %v16479_v11 = vld [vmem:[#allocation42_spill] sm:$0xff]  ;;  %v3743_v51 = vsel %vm2471_vm11, %v11301_v15, %v3742_v38  ;;  %v16482_v63 = vld [vmem:[#allocation72_spill] sm:$0xff]  ;;  %3705 = vmatpush.bf16.msra.mxu0 %v11323_v17 }
 0x3c8   :  { %16459 = vst [vmem:[#allocation66_spill] sm:$0xff] %v11285_v0  ;;  %v1272_v39 = vadd.f32 %v16475_v26, %v16474_v52  ;;  %v11344_v41 = vadd.f32 %v16479_v11, %v1260_v54  ;;  %v4637_v42 = vsel %vm2474_vm9, %v16482_v63, %v4636_v55  ;;  %v11354_v52 = vpop.permute.xlu2 %2605  ;;  %v16483_v26 = vld [vmem:[#allocation55_spill] sm:$0xff]  ;;  %v11365_v54 = vor.u32 %v8010_v21, %v7688_v35  ;;  %v16487_v11 = vld [vmem:[#allocation21_spill] sm:$0xff] }
 0x3c9   :  { %16460 = vst [vmem:[#allocation17_spill] sm:$0xff] %v11290_v3  ;;  %v11357_v29 = vrot.slane %v16483_v26, 2  ;;  %v16484_v3 = vld [vmem:[#allocation54_spill] sm:$0xff]  ;;  %v11368_v38 = vrot.slane %v16487_v11, 3  ;;  %v16488_v55 = vld [vmem:[#allocation59_spill] sm:$0xff]  ;;  %v4946_v26 = vsel %vm2468_vm8, %v10809_v18, %v4945_v47 }
 0x3ca   :  { %16462 = vst [vmem:[#allocation24_spill] sm:$0xff] %v11301_v15  ;;  %v11360_v43 = vrot.slane %v16484_v3, 1  ;;  %v4627_v63 = vsel %vm2480_vm13, %v16488_v55, %v10003_v2  ;;  %v2483_v3 = vsel %vm2462_vm7, %v11285_v0, %v16478_v14  ;;  %v7680_v21 = vld [vmem:[%s15317_s2 + $0x408] sm:$0xf0]  ;;  %v3744_v2 = vsel %vm2474_vm9, %v11337_v28, %v3743_v51  ;;  %3717 = vmatpush.bf16.msra.mxu1 %v11365_v54 }
 0x3cb   :  { %16464 = vst [vmem:[#allocation67_spill] sm:$0xff] %v11306_v58  ;;  %v11387_v35 = vpack.c.b16 %v4637_v42, %v4627_v63  ;;  %v4947_v47 = vsel %vm2471_vm11, %v10824_v25, %v4946_v26  ;;  %v2485_v11 = vsel %vm2465_vm10, %v11301_v15, %v2483_v3  ;;  %v8179_v55 = vpack.i.bf16 %v11344_v41, %v11238_v24  ;;  %v16491_v58 = vld [vmem:[#allocation33_spill] sm:$0xff] }
 0x3cc   :  { %16468 = vst [vmem:[#allocation73_spill] sm:$0xff] %v11314_v49  ;;  %v3745_v0 = vsel %vm2477_vm12, %v11347_v33, %v3744_v2  ;;  %v2487_v51 = vsel %vm2468_vm8, %v11337_v28, %v2485_v11  ;;  %v3748_v42 = vsel %vm2462_vm7, %v11360_v43, %v11357_v29  ;;  %v11409_v26 = vor.u32 %v8008_v60, %v7680_v21  ;;  %v16493_v3 = vld [vmem:[#allocation45_spill] sm:$0xff]  ;;  %v2532_v21 = vpop.permute.xlu1 %2531 }
 0x3cd   :  { %16471 = vst [vmem:[#allocation7_spill] sm:$0xff] %v11323_v17  ;;  %v16490_v17 = vld [vmem:[#allocation12_spill] sm:$0xff]  ;;  %4642 = vrot.lane.b32.xlu1 %v11387_v35, %s8292_s10  ;;  %v2489_v63 = vsel %vm2471_vm11, %v11347_v33, %v2487_v51  ;;  %v11412_v2 = vadd.f32 %v16493_v3, %v1271_v62  ;;  %v4948_v11 = vsel %vm2474_vm9, %v10827_v9, %v4947_v47  ;;  %v1165_v47 = vpop.f32.mrf.mxu2 }
 0x3ce   :  { %16477 = vst [vmem:[#allocation28_spill] sm:$0xff] %v11337_v28  ;;  %v8204_v49 = vpack.i.bf16 %v16491_v58, %v16490_v17  ;;  %8180 = vrot.lane.b32.xlu0 %v8179_v55, %s8287_s8  ;;  %v16495_v58 = vld [vmem:[#allocation46_spill] sm:$0xff]  ;;  %v3746_v60 = vsel %vm2480_vm13, %v11368_v38, %v3745_v0  ;;  %v4949_v62 = vsel %vm2477_vm12, %v10841_v50, %v4948_v11  ;;  %v1578_v28 = vpop.f32.mrf.mxu1 }
 0x3cf   :  { %16480 = vst [vmem:[#allocation10_spill] sm:$0xff] %v11344_v41  ;;  %v11421_v24 = vadd.f32 %v16495_v58, %v1272_v39  ;;  %v3750_v51 = vpack.c.b16 %v3748_v42, %v3746_v60  ;;  %v11430_v55 = vsel %vm2570_vm14, %v2532_v21, %v11241_v37  ;;  %v2491_v58 = vsel %vm2474_vm9, %v11368_v38, %v2489_v63  ;;  %v1234_v39 = vpop.f32.mrf.mxu3  ;;  %v1509_v42 = vpop.f32.mrf.mxu0  ;;  %v16498_v60 = vld [vmem:[#allocation88_spill] sm:$0xff] }
 0x3d0   :  { %16485 = vst [vmem:[#allocation31_spill] sm:$0xff] %v11360_v43  ;;  %8205 = vrot.lane.b32.xlu2 %v8204_v49, %s8287_s8  ;;  %v11434_v3 = vpop.permute.xlu2 %3765  ;;  %v2493_v49 = vsel %vm2477_vm12, %v11357_v29, %v2491_v58  ;;  %3654 = vmatmul.bf16.vlgmr.msrb.gmra.mxu0 %v11430_v55  ;;  %v4950_v63 = vsel %vm2480_vm13, %v10888_v4, %v4949_v62 }
 0x3d1   :  { %16486 = vst [vmem:[#allocation11_spill] sm:$0xff] %v11365_v54  ;;  %3718 = vmatpush.bf16.msra.mxu1 %v11409_v26  ;;  %v11444_v11 = vsel %vm2533_vm15, %v3750_v51, %v11434_v3  ;;  %3905 = vmatpush.bf16.msrb.mxu0 %v16498_v60  ;;  %v16499_v54 = vld [vmem:[#allocation14_spill] sm:$0xff]  ;;  %v7975_v51 = vld [vmem:[%s15317_s2 + $0x2f4] sm:$0xf0] }
 0x3d2   :  { %16489 = vst [vmem:[#allocation32_spill] sm:$0xff] %v11387_v35  ;;  %v4973_v35 = vsel %vm2462_vm7, %v16429_v12, %v16428_v30  ;;  %v1283_v41 = vadd.f32 %v1165_v47, %v16499_v54  ;;  %v16500_v60 = vld [vmem:[#allocation15_spill] sm:$0xff]  ;;  %v2495_v54 = vsel %vm2480_vm13, %v11360_v43, %v2493_v49  ;;  %v7606_v47 = vld [vmem:[%s15317_s2 + $0x370] sm:$0xf]  ;;  %v4951_v49 = vsel %vm2462_vm7, %v10685_v36, %v10682_v8 }
 0x3d3   :  { %16492 = vst [vmem:[#allocation26_spill] sm:$0xff] %v11409_v26  ;;  %v4974_v0 = vsel %vm2465_vm10, %v10484_v19, %v4973_v35  ;;  %v8199_v35 = vpack.i.bf16 %v11421_v24, %v11412_v2  ;;  %v7542_v26 = vld [vmem:[%s15317_s2 + $0x2f0] sm:$0xf] }
 0x3d4   :  { %16494 = vst [vmem:[#allocation18_spill] sm:$0xff] %v11412_v2  ;;  %v4975_v58 = vsel %vm2468_vm8, %v10498_v6, %v4974_v0  ;;  %v7991_v0 = vld [vmem:[%s15317_s2 + $0x374] sm:$0xf0]  ;;  %v11476_v15 = vadd.f32 %v1509_v42, %v1283_v41  ;;  %v11484_v43 = vor.u32 %v7975_v51, %v7542_v26  ;;  %v2497_v41 = vpack.c.b16 %v2495_v54, %v2495_v54  ;;  %v2530_v26 = vpop.permute.xlu0 %2529 }
 0x3d5   :  { %16496 = vst [vmem:[#allocation42_spill] sm:$0xff] %v11421_v24  ;;  %v4976_v62 = vsel %vm2471_vm11, %v10132_v20, %v4975_v58  ;;  %v8194_v24 = vpack.i.bf16 %v11412_v2, %v16465_v22  ;;  %v4966_v58 = vsel %vm2462_vm7, %v10501_v13, %v10541_v31  ;;  %8200 = vrot.lane.b32.xlu1 %v8199_v35, %s8287_s8  ;;  %v16502_v22 = vld [vmem:[#allocation92_spill] sm:$0xff] }
 0x3d6   :  { %16497 = vst [vmem:[#allocation22_spill] sm:$0xff] %v11444_v11  ;;  %v1284_v11 = vadd.f32 %v1234_v39, %v16500_v60  ;;  %v4958_v39 = vpack.c.b16 %v4950_v63, %v4950_v63  ;;  %v4977_v2 = vsel %vm2474_vm9, %v16414_v59, %v4976_v62  ;;  %3906 = vmatpush.bf16.msrb.mxu0 %v16502_v22 }
 0x3d7   :  { %16501 = vst [vmem:[#allocation72_spill] sm:$0xff] %v11484_v43  ;;  %8195 = vrot.lane.b32.xlu0 %v8194_v24, %s8288_s20  ;;  %v11491_v42 = vor.u32 %v7991_v0, %v7606_v47  ;;  %v4978_v63 = vsel %vm2477_vm12, %v16416_v5, %v4977_v2  ;;  %v7973_v24 = vld [vmem:[%s15317_s2 + $0x2e4] sm:$0xf0]  ;;  %v4952_v51 = vsel %vm2465_vm10, %v10125_v34, %v4951_v49  ;;  %v7598_v47 = vld [vmem:[%s15317_s2 + $0x360] sm:$0xf] }
 0x3d8   :  { %v11482_v60 = vadd.f32 %v1578_v28, %v1284_v11  ;;  %4960 = vrot.lane.b32.xlu2 %v4958_v39, %s8289_s6  ;;  %v4967_v28 = vsel %vm2465_vm10, %v10504_v45, %v4966_v58  ;;  %v7534_v11 = vld [vmem:[%s15317_s2 + $0x2e0] sm:$0xf]  ;;  %v11507_v62 = vpop.permute.xlu2 %3767  ;;  %v11510_v2 = vsel %vm2533_vm15, %v2530_v26, %v2532_v21  ;;  %v11513_v54 = vsel %vm2533_vm15, %v2497_v41, %v2530_v26  ;;  %v7989_v0 = vld [vmem:[%s15317_s2 + $0x364] sm:$0xf0]  ;;  %v7526_v26 = vld [vmem:[%s15317_s2 + $0x2d0] sm:$0xf] }
 0x3d9   :  { %16503 = vst [vmem:[#allocation55_spill] sm:$0xff] %v11491_v42  ;;  %v4968_v35 = vsel %vm2468_vm8, %v10507_v48, %v4967_v28  ;;  %v4953_v39 = vsel %vm2468_vm8, %v10739_v23, %v4952_v51  ;;  %3498 = vmatmul.bf16.vlgmr.msra.gmra.mxu3 %v11513_v54  ;;  %3511 = vmatmul.bf16.vlgmr.msrb.gmra.mxu2 %v11510_v2  ;;  %v7590_v51 = vld [vmem:[%s15317_s2 + $0x350] sm:$0xf] }
 0x3da   :  { %v4969_v58 = vsel %vm2471_vm11, %v10146_v57, %v4968_v35  ;;  %v4979_v21 = vsel %vm2480_vm13, %v10523_v40, %v4978_v63  ;;  %v4954_v49 = vsel %vm2471_vm11, %v10756_v1, %v4953_v39  ;;  %v8214_v41 = vpack.i.bf16 %v11482_v60, %v11476_v15  ;;  %3542 = vmatpush.bf16.msra.mxu3 %v11484_v43  ;;  %v7971_v63 = vld [vmem:[%s15317_s2 + $0x2d4] sm:$0xf0]  ;;  %v16508_v57 = vld [vmem:[#allocation100_spill] sm:$0xff] }
 0x3db   :  { %3555 = vmatpush.bf16.msrb.mxu2 %v11491_v42  ;;  %v11535_v28 = vor.u32 %v7973_v24, %v7534_v11  ;;  %v11540_v35 = vor.u32 %v7989_v0, %v7598_v47  ;;  %v7987_v39 = vld [vmem:[%s15317_s2 + $0x354] sm:$0xf0]  ;;  %3907 = vmatpush.bf16.msrb.mxu0 %v10603_v10  ;;  %v8209_v11 = vpack.i.bf16 %v11476_v15, %v16490_v17 }
 0x3dc   :  { %v16506_v24 = vld [vmem:[#allocation99_spill] sm:$0xff]  ;;  %v4981_v43 = vpack.c.b16 %v4979_v21, %v4979_v21  ;;  %v4955_v48 = vsel %vm2474_vm9, %v10806_v16, %v4954_v49  ;;  %v4988_v10 = vsel %vm2462_vm7, %v16426_v53, %v16425_v27  ;;  %v11574_v21 = vor.u32 %v7987_v39, %v7590_v51  ;;  %v7518_v53 = vld [vmem:[%s15317_s2 + $0x2c0] sm:$0xf]  ;;  %v16514_v27 = vld [vmem:[#allocation101_spill] sm:$0xff] }
 0x3dd   :  { %16504 = vst [vmem:[#allocation54_spill] sm:$0xff] %v11535_v28  ;;  %v4970_v47 = vsel %vm2474_vm9, %v16506_v24, %v4969_v58  ;;  %v16507_v0 = vld [vmem:[#allocation83_spill] sm:$0xff]  ;;  %8215 = vrot.lane.b32.xlu1 %v8214_v41, %s8287_s8  ;;  %v16509_v58 = vld [vmem:[#allocation121_spill] sm:$0xff]  ;;  %v16512_v41 = vld [vmem:[#allocation84_spill] sm:$0xff] }
 0x3de   :  { %16505 = vst [vmem:[#allocation21_spill] sm:$0xff] %v11540_v35  ;;  %v4995_v22 = vsel %vm2462_vm7, %v16507_v0, %v10393_v46  ;;  %v4971_v23 = vsel %vm2477_vm12, %v16508_v57, %v4970_v47  ;;  %v4956_v24 = vsel %vm2477_vm12, %v16509_v58, %v4955_v48  ;;  %3543 = vmatpush.bf16.msra.mxu3 %v11535_v28  ;;  %v7969_v48 = vld [vmem:[%s15317_s2 + $0x2c4] sm:$0xf0]  ;;  %v7582_v47 = vld [vmem:[%s15317_s2 + $0x340] sm:$0xf] }
 0x3df   :  { %8210 = vrot.lane.b32.xlu0 %v8209_v11, %s8288_s20  ;;  %v11572_v46 = vor.u32 %v7971_v63, %v7526_v26  ;;  %16511 = vst [vmem:[#allocation12_spill] sm:$0xff] %v11574_v21  ;;  %v4996_v49 = vsel %vm2465_vm10, %v16512_v41, %v4995_v22  ;;  %3556 = vmatpush.bf16.msrb.mxu2 %v11540_v35  ;;  %v16515_v63 = vld [vmem:[#allocation85_spill] sm:$0xff]  ;;  %v16518_v41 = vld [vmem:[#allocation68_spill] sm:$0xff] }
 0x3e0   :  { %4984 = vrot.lane.b32.xlu2 %v4981_v43, %s8290_s7  ;;  %v16513_v43 = vld [vmem:[#allocation108_spill] sm:$0xff]  ;;  %v4972_v26 = vsel %vm2480_vm13, %v16514_v27, %v4971_v23  ;;  %v4997_v51 = vsel %vm2468_vm8, %v16515_v63, %v4996_v49  ;;  %v16516_v39 = vld [vmem:[#allocation77_spill] sm:$0xff]  ;;  %v11592_v11 = vpop.permute.xlu2 %3838  ;;  %v16519_v23 = vld [vmem:[#allocation50_spill] sm:$0xff]  ;;  %v11609_v27 = vor.u32 %v7969_v48, %v7518_v53  ;;  %v11623_v48 = vpop.permute.xlu0 %2568 }
 0x3e1   :  { %16510 = vst [vmem:[#allocation59_spill] sm:$0xff] %v11572_v46  ;;  %3908 = vmatpush.bf16.msrb.mxu0 %v16513_v43  ;;  %v4989_v22 = vsel %vm2465_vm10, %v16516_v39, %v4988_v10  ;;  %v7985_v0 = vld [vmem:[%s15317_s2 + $0x344] sm:$0xf0]  ;;  %v4957_v43 = vsel %vm2480_vm13, %v16518_v41, %v4956_v24  ;;  %v4998_v28 = vsel %vm2471_vm11, %v16519_v23, %v4997_v51  ;;  %v16520_v49 = vld [vmem:[#allocation78_spill] sm:$0xff]  ;;  %v16521_v10 = vld [vmem:[#allocation79_spill] sm:$0xff] }
 0x3e2   :  { %16517 = vst [vmem:[#allocation45_spill] sm:$0xff] %v11592_v11  ;;  %v4990_v63 = vsel %vm2468_vm8, %v16520_v49, %v4989_v22  ;;  %3544 = vmatpush.bf16.msra.mxu3 %v11572_v46  ;;  %v4980_v57 = vpack.c.b16 %v4972_v26, %v4972_v26  ;;  %v11612_v34 = vor.u32 %v7985_v0, %v7582_v47  ;;  %v7510_v24 = vld [vmem:[%s15317_s2 + $0x2b0] sm:$0xf]  ;;  %v7967_v51 = vld [vmem:[%s15317_s2 + $0x2b4] sm:$0xf0]  ;;  %v16524_v22 = vld [vmem:[#allocation112_spill] sm:$0xff] }
 0x3e3   :  { %v4991_v39 = vsel %vm2471_vm11, %v16521_v10, %v4990_v63  ;;  %16522 = vst [vmem:[#allocation46_spill] sm:$0xff] %v11609_v27  ;;  %3557 = vmatpush.bf16.msrb.mxu2 %v11574_v21  ;;  %v4959_v23 = vpack.c.b16 %v4957_v43, %v4957_v43  ;;  %v16525_v49 = vld [vmem:[#allocation91_spill] sm:$0xff]  ;;  %v7574_v26 = vld [vmem:[%s15317_s2 + $0x330] sm:$0xf]  ;;  %v16534_v46 = vld [vmem:[#allocation136_spill] sm:$0xff] }
 0x3e4   :  { %16523 = vst [vmem:[#allocation14_spill] sm:$0xff] %v11612_v34  ;;  %v4999_v53 = vsel %vm2474_vm9, %v16525_v49, %v4998_v28  ;;  %v7983_v47 = vld [vmem:[%s15317_s2 + $0x334] sm:$0xf0]  ;;  %v4992_v43 = vsel %vm2474_vm9, %v16406_v61, %v4991_v39  ;;  %v2571_v28 = vsel %vm2570_vm14, %v11241_v37, %v11623_v48  ;;  %v11642_v49 = vpop.permute.xlu1 %2603  ;;  %v7502_v37 = vld [vmem:[%s15317_s2 + $0x2a0] sm:$0xf] }
 0x3e5   :  { %3909 = vmatpush.bf16.msrb.mxu0 %v16524_v22  ;;  %4982 = vrot.lane.b32.xlu1 %v4980_v57, %s8290_s7  ;;  %v16526_v0 = vld [vmem:[#allocation71_spill] sm:$0xff]  ;;  %v4993_v10 = vsel %vm2477_vm12, %v16382_v56, %v4992_v43  ;;  %v11645_v57 = vor.u32 %v7967_v51, %v7510_v24  ;;  %v11649_v61 = vor.u32 %v7983_v47, %v7574_v26  ;;  %v7965_v56 = vld [vmem:[%s15317_s2 + $0x2a4] sm:$0xf0]  ;;  %v7566_v24 = vld [vmem:[%s15317_s2 + $0x320] sm:$0xf] }
 0x3e6   :  { %v5000_v63 = vsel %vm2477_vm12, %v16526_v0, %v4999_v53  ;;  %3667 = vmatmul.bf16.vlgmr.msrb.gmra.mxu1 %v2571_v28  ;;  %3545 = vmatpush.bf16.msra.mxu3 %v11609_v27  ;;  %v16529_v39 = vld [vmem:[#allocation87_spill] sm:$0xff]  ;;  %v7981_v51 = vld [vmem:[%s15317_s2 + $0x324] sm:$0xf0]  ;;  %v16530_v26 = vld [vmem:[#allocation118_spill] sm:$0xff]  ;;  %v4994_v47 = vsel %vm2480_vm13, %v16415_v32, %v4993_v10  ;;  %v11677_v22 = vor.u32 %v7965_v56, %v7502_v37 }
 0x3e7   :  { %4962 = vrot.lane.b32.xlu0 %v4959_v23, %s8289_s6  ;;  %16527 = vst [vmem:[#allocation15_spill] sm:$0xff] %v11645_v57  ;;  %3918 = vmatpush.bf16.msrb.mxu1 %v10931_v44  ;;  %v5001_v23 = vsel %vm2480_vm13, %v16529_v39, %v5000_v63  ;;  %v16531_v0 = vld [vmem:[#allocation130_spill] sm:$0xff]  ;;  %v11674_v39 = vpop.f32.mrf.mxu2  ;;  %v7979_v37 = vld [vmem:[%s15317_s2 + $0x314] sm:$0xf0] }
 0x3e8   :  { %3558 = vmatpush.bf16.msrb.mxu2 %v11612_v34  ;;  %16528 = vst [vmem:[#allocation83_spill] sm:$0xff] %v11649_v61  ;;  %v11659_v53 = vpop.permute.xlu2 %4169  ;;  %v16532_v63 = vld [vmem:[#allocation58_spill] sm:$0xff]  ;;  %v5003_v27 = vpack.c.b16 %v5001_v23, %v5001_v23 }
 0x3e9   :  { %3910 = vmatpush.bf16.msrb.mxu0 %v16530_v26  ;;  %3524 = vmatmul.bf16.vlgmr.msrb.gmra.mxu3 %v11430_v55  ;;  %v5381_v43 = vsel %vm2468_vm8, %v16532_v63, %v16531_v0  ;;  %16533 = vst [vmem:[#allocation121_spill] sm:$0xff] %v11677_v22  ;;  %v11681_v26 = vor.u32 %v7981_v51, %v7566_v24  ;;  %v7494_v32 = vld [vmem:[%s15317_s2 + $0x290] sm:$0xf]  ;;  %v7963_v55 = vld [vmem:[%s15317_s2 + $0x294] sm:$0xf0] }
 0x3ea   :  { %3537 = vmatmul.bf16.vlgmr.msra.gmra.mxu2 %v2571_v28  ;;  %3546 = vmatpush.bf16.msra.mxu3 %v11645_v57  ;;  %v5002_v28 = vpack.c.b16 %v4994_v47, %v4994_v47  ;;  %v7558_v10 = vld [vmem:[%s15317_s2 + $0x310] sm:$0xf]  ;;  %v5382_v23 = vsel %vm2471_vm11, %v10069_v7, %v5381_v43  ;;  %v11703_v51 = vor.u32 %v7963_v55, %v7494_v32  ;;  %v16538_v57 = vld [vmem:[#allocation95_spill] sm:$0xff]  ;;  %v7486_v43 = vld [vmem:[%s15317_s2 + $0x280] sm:$0xf]  ;;  %v2697_v55 = vpop.permute.xlu0 %2696 }
 0x3eb   :  { %3919 = vmatpush.bf16.msrb.mxu1 %v16534_v46  ;;  %16535 = vst [vmem:[#allocation84_spill] sm:$0xff] %v11681_v26  ;;  %v16536_v56 = vld [vmem:[#allocation126_spill] sm:$0xff]  ;;  %v5383_v24 = vsel %vm2474_vm9, %v10809_v18, %v5382_v23  ;;  %v7961_v32 = vld [vmem:[%s15317_s2 + $0x284] sm:$0xf0]  ;;  %v16540_v18 = vld [vmem:[#allocation131_spill] sm:$0xff] }
 0x3ec   :  { %3559 = vmatpush.bf16.msrb.mxu2 %v11649_v61  ;;  %16537 = vst [vmem:[#allocation85_spill] sm:$0xff] %v11703_v51  ;;  %v11705_v47 = vpop.permute.xlu1 %2698  ;;  %v7734_v7 = vld [vmem:[%s15317_s2 + $0x470] sm:$0xf]  ;;  %v16542_v46 = vld [vmem:[#allocation76_spill] sm:$0xff] }
 0x3ed   :  { %3911 = vmatpush.bf16.msrb.mxu0 %v16536_v56  ;;  %5006 = vrot.lane.b32.xlu1 %v5003_v27, %s8291_s9  ;;  %v5384_v56 = vsel %vm2477_vm12, %v10824_v25, %v5383_v24  ;;  %v11711_v27 = vor.u32 %v7979_v37, %v7558_v10  ;;  %v7550_v10 = vld [vmem:[%s15317_s2 + $0x300] sm:$0xf]  ;;  %v7977_v37 = vld [vmem:[%s15317_s2 + $0x304] sm:$0xf0]  ;;  %v7670_v24 = vld [vmem:[%s15317_s2 + $0x3f0] sm:$0xf] }
 0x3ee   :  { %3547 = vmatpush.bf16.msra.mxu3 %v11677_v22  ;;  %v11735_v22 = vsel %vm2700_vm0, %v11354_v52, %v2697_v55  ;;  %v5385_v25 = vsel %vm2480_vm13, %v10827_v9, %v5384_v56  ;;  %v11759_v44 = vor.u32 %v7977_v37, %v7550_v10  ;;  %v7662_v56 = vld [vmem:[%s15317_s2 + $0x3e0] sm:$0xf]  ;;  %v7654_v37 = vld [vmem:[%s15317_s2 + $0x3d0] sm:$0xf] }
 0x3ef   :  { %5004 = vrot.lane.b32.xlu0 %v5002_v28, %s8291_s9  ;;  %3920 = vmatpush.bf16.msrb.mxu1 %v16538_v57  ;;  %16539 = vst [vmem:[#allocation77_spill] sm:$0xff] %v11711_v27  ;;  %v5391_v28 = vsel %vm2462_vm7, %v10888_v4, %v10841_v50  ;;  %v8007_v4 = vld [vmem:[%s15317_s2 + $0x3f4] sm:$0xf0]  ;;  %v3488_v63 = vpop.f32.mrf.mxu2  ;;  %v5405_v57 = vsel %vm2468_vm8, %v16429_v12, %v16428_v30  ;;  %v8005_v12 = vld [vmem:[%s15317_s2 + $0x3e4] sm:$0xf0] }
 0x3f0   :  { %3560 = vmatpush.bf16.msrb.mxu2 %v11681_v26  ;;  %v11722_v23 = vpop.permute.xlu2 %4219  ;;  %v8023_v50 = vld [vmem:[%s15317_s2 + $0x474] sm:$0xf0]  ;;  %3706 = vmatmul.bf16.vlgmr.msra.gmra.mxu0 %v11735_v22  ;;  %v5393_v0 = vpack.c.b16 %v5391_v28, %v5385_v25  ;;  %16543 = vst [vmem:[#allocation50_spill] sm:$0xff] %v11759_v44  ;;  %v11763_v63 = vsel %vm2700_vm0, %v2697_v55, %v11705_v47  ;;  %v7726_v30 = vld [vmem:[%s15317_s2 + $0x460] sm:$0xf]  ;;  %v16546_v55 = vld [vmem:[#allocation141_spill] sm:$0xff] }
 0x3f1   :  { %3912 = vmatpush.bf16.msrb.mxu0 %v16540_v18  ;;  %v11751_v18 = vor.u32 %v7961_v32, %v7486_v43  ;;  %v11768_v43 = vor.u32 %v8007_v4, %v7670_v24  ;;  %v11770_v25 = vor.u32 %v8023_v50, %v7734_v7  ;;  %v8021_v32 = vld [vmem:[%s15317_s2 + $0x464] sm:$0xf0]  ;;  %v5406_v4 = vsel %vm2471_vm11, %v10484_v19, %v5405_v57 }
 0x3f2   :  { %3548 = vmatpush.bf16.msra.mxu3 %v11703_v51  ;;  %v5407_v50 = vsel %vm2474_vm9, %v10498_v6, %v5406_v4  ;;  %v11790_v28 = vor.u32 %v8005_v12, %v7662_v56  ;;  %v11792_v10 = vor.u32 %v8021_v32, %v7726_v30  ;;  %v11799_v57 = vsel %vm2607_vm1, %v11623_v48, %v11642_v49  ;;  %v8003_v56 = vld [vmem:[%s15317_s2 + $0x3d4] sm:$0xf0]  ;;  %v7718_v12 = vld [vmem:[%s15317_s2 + $0x450] sm:$0xf] }
 0x3f3   :  { %16541 = vst [vmem:[#allocation68_spill] sm:$0xff] %v11751_v18  ;;  %3921 = vmatpush.bf16.msrb.mxu1 %v16542_v46  ;;  %v5408_v19 = vsel %vm2477_vm12, %v10132_v20, %v5407_v50  ;;  %v5411_v20 = vsel %vm2462_vm7, %v10523_v40, %v16416_v5  ;;  %v11817_v48 = vsel %vm2607_vm1, %v11642_v49, %v11354_v52  ;;  %v8019_v40 = vld [vmem:[%s15317_s2 + $0x454] sm:$0xf0]  ;;  %v16551_v52 = vld [vmem:[#allocation145_spill] sm:$0xff] }
 0x3f4   :  { %3561 = vmatpush.bf16.msrb.mxu2 %v11711_v27  ;;  %16544 = vst [vmem:[#allocation78_spill] sm:$0xff] %v11768_v43  ;;  %v3787_v7 = vpop.permute.xlu1 %3786  ;;  %v5409_v5 = vsel %vm2480_vm13, %v16414_v59, %v5408_v19  ;;  %v11836_v30 = vor.u32 %v8003_v56, %v7654_v37  ;;  %v11838_v32 = vor.u32 %v8019_v40, %v7718_v12  ;;  %v7646_v59 = vld [vmem:[%s15317_s2 + $0x3c0] sm:$0xf]  ;;  %v8001_v50 = vld [vmem:[%s15317_s2 + $0x3c4] sm:$0xf0]  ;;  %v16555_v56 = vld [vmem:[#allocation147_spill] sm:$0xff] }
 0x3f5   :  { %3957 = vmatpush.bf16.msra.mxu0 %v11491_v42  ;;  %16545 = vst [vmem:[#allocation79_spill] sm:$0xff] %v11770_v25  ;;  %5395 = vrot.lane.b32.xlu1 %v5393_v0, %s8289_s6  ;;  %v3785_v0 = vpop.permute.xlu0 %3784  ;;  %v5413_v49 = vpack.c.b16 %v5411_v20, %v5409_v5  ;;  %v11843_v4 = vsel %vm2533_vm15, %v11434_v3, %v11507_v62  ;;  %v7710_v19 = vld [vmem:[%s15317_s2 + $0x440] sm:$0xf]  ;;  %v8017_v3 = vld [vmem:[%s15317_s2 + $0x444] sm:$0xf0] }
 0x3f6   :  { %3549 = vmatpush.bf16.msra.mxu3 %v11751_v18  ;;  %3719 = vmatmul.bf16.vlgmr.msra.gmra.mxu1 %v11763_v63  ;;  %16547 = vst [vmem:[#allocation91_spill] sm:$0xff] %v11790_v28  ;;  %v11809_v24 = vsel %vm2570_vm14, %v3785_v0, %v3787_v7  ;;  %v4148_v20 = vsel %vm2462_vm7, %v11368_v38, %v11347_v33 }
 0x3f7   :  { %3922 = vmatpush.bf16.msrb.mxu1 %v16546_v55  ;;  %16548 = vst [vmem:[#allocation71_spill] sm:$0xff] %v11792_v10  ;;  %v4149_v5 = vsel %vm2465_vm10, %v11357_v29, %v4148_v20  ;;  %v7638_v20 = vld [vmem:[%s15317_s2 + $0x3b0] sm:$0xf]  ;;  %v7892_v55 = vld [vmem:[%s15317_s2 + $0x64] sm:$0xf] }
 0x3f8   :  { %3562 = vmatpush.bf16.msrb.mxu2 %v11759_v44  ;;  %v11803_v6 = vpop.permute.xlu2 %4240  ;;  %16550 = vst [vmem:[#allocation149_spill] sm:$0xff] %v11809_v24 }
 0x3f9   :  { %16549 = vst [vmem:[#allocation87_spill] sm:$0xff] %v11803_v6  ;;  %3550 = vmatmul.bf16.vlgmr.msra.gmra.mxu3 %v11799_v57  ;;  %3958 = vmatpush.bf16.msra.mxu0 %v11540_v35  ;;  %v11879_v35 = vor.u32 %v8001_v50, %v7646_v59  ;;  %v7999_v59 = vld [vmem:[%s15317_s2 + $0x3b4] sm:$0xf0] }
 0x3fa   :  { %3568 = vmatpush.bf16.msrb.mxu3 %v11768_v43  ;;  %16552 = vst [vmem:[#allocation150_spill] sm:$0xff] %v11836_v30 }
 0x3fb   :  { %3563 = vmatmul.bf16.vlgmr.msrb.gmra.mxu2 %v11817_v48  ;;  %3923 = vmatpush.bf16.msrb.mxu1 %v16551_v52  ;;  %16553 = vst [vmem:[#allocation151_spill] sm:$0xff] %v11838_v32 }
 0x3fc   :  { %3581 = vmatpush.bf16.msra.mxu2 %v11770_v25  ;;  %16554 = vst [vmem:[#allocation152_spill] sm:$0xff] %v11843_v4  ;;  %v11859_v37 = vpop.permute.xlu1 %3836 }
 0x3fd   :  { %3959 = vmatpush.bf16.msra.mxu0 %v11574_v21  ;;  %5416 = vrot.lane.b32.xlu1 %v5413_v49, %s8290_s7  ;;  %v11868_v12 = vsel %vm2700_vm0, %v11859_v37, %v11592_v11  ;;  %v11870_v40 = vpop.permute.xlu0 %3817  ;;  %v15637_v49 = vrot.slane %v11843_v4, 1  ;;  %16557 = vst [vmem:[#allocation154_spill] sm:$0xff] %v11879_v35  ;;  %v11887_v11 = vsel %vm2570_vm14, %v11507_v62, %v3785_v0  ;;  %v8015_v62 = vld [vmem:[%s15317_s2 + $0x434] sm:$0xf0]  ;;  %v16561_v0 = vld [vmem:[#allocation66_spill] sm:$0xff] }
 0x3fe   :  { %3569 = vmatpush.bf16.msrb.mxu3 %v11790_v28  ;;  %16556 = vst [vmem:[#allocation153_spill] sm:$0xff] %v11868_v12  ;;  %v11883_v42 = vsel %vm2607_vm1, %v3787_v7, %v11870_v40  ;;  %v7702_v7 = vld [vmem:[%s15317_s2 + $0x430] sm:$0xf]  ;;  %v4142_v50 = vsel %vm2474_vm9, %v16561_v0, %v16478_v14  ;;  %v11917_v4 = vor.u32 %v7999_v59, %v7638_v20  ;;  %v16568_v20 = vrot.slane %v11887_v11, 1  ;;  %v8013_v59 = vld [vmem:[%s15317_s2 + $0x424] sm:$0xf0] }
 0x3ff   :  { %3924 = vmatpush.bf16.msrb.mxu1 %v16555_v56  ;;  %16558 = vst [vmem:[#allocation155_spill] sm:$0xff] %v11883_v42  ;;  %v11922_v56 = vor.u32 %v8015_v62, %v7702_v7 }
 0x400   :  { %3582 = vmatpush.bf16.msra.mxu2 %v11792_v10  ;;  %v11877_v21 = vpop.permute.xlu2 %4602  ;;  %16559 = vst [vmem:[#allocation156_spill] sm:$0xff] %v11887_v11  ;;  %v11889_v10 = vor.u32 %v8017_v3, %v7710_v19  ;;  %3913 = vmatmul.bf16.vlgmr.msrb.gmra.mxu0 %v15637_v49  ;;  %v16562_v19 = vld [vmem:[#allocation31_spill] sm:$0xff]  ;;  %v16566_v49 = vld [vmem:[#allocation28_spill] sm:$0xff] }
 0x401   :  { %3960 = vmatpush.bf16.msra.mxu0 %v11612_v34  ;;  %v4150_v3 = vsel %vm2468_vm8, %v16562_v19, %v4149_v5  ;;  %v16563_v34 = vld [vmem:[#allocation17_spill] sm:$0xff]  ;;  %16565 = vst [vmem:[#allocation66_spill] sm:$0xff] %v11917_v4  ;;  %v7630_v5 = vld [vmem:[%s15317_s2 + $0x3a0] sm:$0xf] }
 0x402   :  { %3570 = vmatpush.bf16.msrb.mxu3 %v11836_v30  ;;  %16560 = vst [vmem:[#allocation157_spill] sm:$0xff] %v11889_v10 }
 0x403   :  { %3925 = vmatpush.bf16.msrb.mxu1 %v16563_v34  ;;  %16567 = vst [vmem:[#allocation31_spill] sm:$0xff] %v11922_v56 }
 0x404   :  { %3583 = vmatpush.bf16.msra.mxu2 %v11838_v32  ;;  %v16564_v32 = vld [vmem:[#allocation24_spill] sm:$0xff]  ;;  %v4168_v7 = vpop.permute.xlu1 %4167 }
 0x405   :  { %v4143_v18 = vsel %vm2477_vm12, %v16564_v32, %v4142_v50  ;;  %3961 = vmatpush.bf16.msra.mxu0 %v11649_v61  ;;  %v7997_v50 = vld [vmem:[%s15317_s2 + $0x3a4] sm:$0xf0]  ;;  %v11941_v62 = vsel %vm2533_vm15, %v4168_v7, %v11659_v53 }
 0x406   :  { %3571 = vmatpush.bf16.msrb.mxu3 %v11879_v35  ;;  %v4144_v51 = vsel %vm2480_vm13, %v16566_v49, %v4143_v18  ;;  %3926 = vmatmul.bf16.vlgmr.msrb.gmra.mxu1 %v16568_v20  ;;  %v7694_v18 = vld [vmem:[%s15317_s2 + $0x420] sm:$0xf]  ;;  %16569 = vst [vmem:[#allocation24_spill] sm:$0xff] %v11941_v62  ;;  %v11952_v20 = vor.u32 %v7997_v50, %v7630_v5  ;;  %v7686_v62 = vld [vmem:[%s15317_s2 + $0x410] sm:$0xf] }
 0x407   :  { %3970 = vmatpush.bf16.msra.mxu1 %v11768_v43  ;;  %v4152_v25 = vpack.c.b16 %v4150_v3, %v4144_v51  ;;  %v11946_v51 = vpop.permute.xlu0 %3819  ;;  %v11955_v11 = vor.u32 %v8013_v59, %v7694_v18  ;;  %v8011_v5 = vld [vmem:[%s15317_s2 + $0x414] sm:$0xf0]  ;;  %v7894_v50 = vld [vmem:[%s15317_s2 + $0x74] sm:$0xf]  ;;  %v7224_v18 = vld [vmem:[%s15317_s2 + $0x78] sm:$0xf0] }
 0x408   :  { %3584 = vmatpush.bf16.msra.mxu2 %v11889_v10  ;;  %v11950_v3 = vpop.permute.xlu2 %4623  ;;  %16571 = vst [vmem:[#allocation158_spill] sm:$0xff] %v11952_v20  ;;  %v7993_v10 = vld [vmem:[%s15317_s2 + $0x384] sm:$0xf0] }
 0x409   :  { %v11944_v61 = vsel %vm2533_vm15, %v4152_v25, %v4168_v7  ;;  %16572 = vst [vmem:[#allocation159_spill] sm:$0xff] %v11955_v11  ;;  %3962 = vmatpush.bf16.msra.mxu0 %v11681_v26  ;;  %v7622_v25 = vld [vmem:[%s15317_s2 + $0x390] sm:$0xf]  ;;  %v7995_v7 = vld [vmem:[%s15317_s2 + $0x394] sm:$0xf0]  ;;  %v11981_v26 = vor.u32 %v8011_v5, %v7686_v62  ;;  %v12002_v5 = vor.u32 %v7894_v50, %v7224_v18 }
 0x40a   :  { %16570 = vst [vmem:[#allocation28_spill] sm:$0xff] %v11944_v61  ;;  %3572 = vmatpush.bf16.msrb.mxu3 %v11917_v4  ;;  %v11978_v59 = vor.u32 %v7995_v7, %v7622_v25  ;;  %v8009_v25 = vld [vmem:[%s15317_s2 + $0x404] sm:$0xf0]  ;;  %v7758_v62 = vld [vmem:[%s15317_s2 + $0x4a0] sm:$0xf] }
 0x40b   :  { %3971 = vmatpush.bf16.msra.mxu1 %v11790_v28  ;;  %16574 = vst [vmem:[#allocation161_spill] sm:$0xff] %v11981_v26  ;;  %v8029_v7 = vld [vmem:[%s15317_s2 + $0x4a4] sm:$0xf0]  ;;  %v7288_v28 = vld [vmem:[%s15317_s2 + $0xf8] sm:$0xf0] }
 0x40c   :  { %3585 = vmatpush.bf16.msra.mxu2 %v11922_v56  ;;  %16573 = vst [vmem:[#allocation160_spill] sm:$0xff] %v11978_v59  ;;  %v7614_v56 = vld [vmem:[%s15317_s2 + $0x380] sm:$0xf] }
 0x40d   :  { %3963 = vmatpush.bf16.msra.mxu0 %v11711_v27  ;;  %16575 = vst [vmem:[#allocation162_spill] sm:$0xff] %v12002_v5  ;;  %v4203_v27 = vpop.permute.xlu1 %4202  ;;  %v12016_v50 = vor.u32 %v7993_v10, %v7614_v56  ;;  %v7750_v56 = vld [vmem:[%s15317_s2 + $0x490] sm:$0xf] }
 0x40e   :  { %3573 = vmatpush.bf16.msrb.mxu3 %v11952_v20  ;;  %v12012_v43 = vsel %vm2607_vm1, %v4203_v27, %v11722_v23 }
 0x40f   :  { %3972 = vmatpush.bf16.msra.mxu1 %v11836_v30  ;;  %v7678_v30 = vld [vmem:[%s15317_s2 + $0x400] sm:$0xf]  ;;  %16576 = vst [vmem:[#allocation163_spill] sm:$0xff] %v12012_v43  ;;  %v4201_v34 = vpop.permute.xlu0 %4200  ;;  %v7216_v43 = vld [vmem:[%s15317_s2 + $0x68] sm:$0xf0] }
 0x410   :  { %3586 = vmatpush.bf16.msra.mxu2 %v11955_v11  ;;  %v7910_v11 = vld [vmem:[%s15317_s2 + $0xf4] sm:$0xf]  ;;  %16577 = vst [vmem:[#allocation164_spill] sm:$0xff] %v12016_v50  ;;  %v12019_v18 = vsel %vm2570_vm14, %v4201_v34, %v4203_v27  ;;  %v12023_v52 = vsel %vm2570_vm14, %v11659_v53, %v4201_v34  ;;  %v12037_v27 = vsel %vm2607_vm1, %v11870_v40, %v11946_v51  ;;  %v7280_v40 = vld [vmem:[%s15317_s2 + $0xe8] sm:$0xf0] }
 0x411   :  { %16578 = vst [vmem:[#allocation165_spill] sm:$0xff] %v12019_v18  ;;  %v12039_v10 = vor.u32 %v8009_v25, %v7678_v30  ;;  %v12041_v34 = vor.u32 %v8029_v7, %v7758_v62  ;;  %3964 = vmatpush.bf16.msra.mxu0 %v11759_v44  ;;  %v12044_v53 = vor.u32 %v7910_v11, %v7288_v28  ;;  %v8027_v18 = vld [vmem:[%s15317_s2 + $0x494] sm:$0xf0]  ;;  %v7908_v30 = vld [vmem:[%s15317_s2 + $0xe4] sm:$0xf]  ;;  %v15664_v25 = vrot.slane %v12037_v27, 1 }
 0x412   :  { %3574 = vmatpush.bf16.msrb.mxu3 %v11978_v59  ;;  %16579 = vst [vmem:[#allocation166_spill] sm:$0xff] %v12023_v52  ;;  %v12059_v11 = vor.u32 %v7892_v55, %v7216_v43  ;;  %v4548_v28 = vsel %vm2462_vm7, %v16566_v49, %v16564_v32  ;;  %v7890_v62 = vld [vmem:[%s15317_s2 + $0x54] sm:$0xf]  ;;  %v7208_v7 = vld [vmem:[%s15317_s2 + $0x58] sm:$0xf0]  ;;  %v12077_v55 = vor.u32 %v8027_v18, %v7750_v56 }
 0x413   :  { %3973 = vmatpush.bf16.msra.mxu1 %v11879_v35  ;;  %v12032_v35 = vpop.permute.xlu2 %8160  ;;  %16580 = vst [vmem:[#allocation167_spill] sm:$0xff] %v12037_v27  ;;  %v4549_v43 = vsel %vm2465_vm10, %v11347_v33, %v4548_v28  ;;  %v12080_v32 = vor.u32 %v7908_v30, %v7280_v40  ;;  %v7742_v49 = vld [vmem:[%s15317_s2 + $0x480] sm:$0xf]  ;;  %v8025_v33 = vld [vmem:[%s15317_s2 + $0x484] sm:$0xf0]  ;;  %v12098_v30 = vor.u32 %v7890_v62, %v7208_v7 }
 0x414   :  { %3587 = vmatpush.bf16.msra.mxu2 %v11981_v26  ;;  %16581 = vst [vmem:[#allocation168_spill] sm:$0xff] %v12039_v10  ;;  %3965 = vmatmul.bf16.vlgmr.msra.gmra.mxu0 %v15664_v25  ;;  %v7906_v18 = vld [vmem:[%s15317_s2 + $0xd4] sm:$0xf]  ;;  %v7272_v56 = vld [vmem:[%s15317_s2 + $0xd8] sm:$0xf0] }
 0x415   :  { %16582 = vst [vmem:[#allocation169_spill] sm:$0xff] %v12041_v34  ;;  %4009 = vmatpush.bf16.msrb.mxu0 %v12002_v5  ;;  %v4239_v28 = vpop.permute.xlu1 %4238  ;;  %v7888_v62 = vld [vmem:[%s15317_s2 + $0x44] sm:$0xf]  ;;  %v7200_v7 = vld [vmem:[%s15317_s2 + $0x48] sm:$0xf0] }
 0x416   :  { %16583 = vst [vmem:[#allocation170_spill] sm:$0xff] %v12044_v53  ;;  %3575 = vmatpush.bf16.msrb.mxu3 %v12016_v50  ;;  %v12102_v40 = vsel %vm2700_vm0, %v4239_v28, %v11803_v6 }
 0x417   :  { %16584 = vst [vmem:[#allocation171_spill] sm:$0xff] %v12059_v11  ;;  %3974 = vmatpush.bf16.msra.mxu1 %v11917_v4  ;;  %v4222_v25 = vpop.permute.xlu0 %4221 }
 0x418   :  { %3588 = vmatpush.bf16.msra.mxu2 %v12039_v10  ;;  %16585 = vst [vmem:[#allocation172_spill] sm:$0xff] %v12077_v55  ;;  %v12110_v44 = vsel %vm2607_vm1, %v11722_v23, %v4222_v25  ;;  %v12113_v27 = vsel %vm2700_vm0, %v4222_v25, %v4239_v28  ;;  %v12127_v23 = vor.u32 %v7906_v18, %v7272_v56  ;;  %v7192_v18 = vld [vmem:[%s15317_s2 + $0x38] sm:$0xf0] }
 0x419   :  { %16586 = vst [vmem:[#allocation173_spill] sm:$0xff] %v12080_v32  ;;  %3576 = vmatmul.bf16.vlgmr.msrb.gmra.mxu3 %v11735_v22  ;;  %4010 = vmatpush.bf16.msrb.mxu0 %v12059_v11  ;;  %v4550_v22 = vsel %vm2468_vm8, %v11368_v38, %v4549_v43  ;;  %v7904_v43 = vld [vmem:[%s15317_s2 + $0xc4] sm:$0xf]  ;;  %v12138_v28 = vor.u32 %v7888_v62, %v7200_v7 }
 0x41a   :  { %3599 = vmatpush.bf16.msra.mxu3 %v12041_v34  ;;  %16587 = vst [vmem:[#allocation174_spill] sm:$0xff] %v12098_v30  ;;  %v4551_v38 = vsel %vm2471_vm11, %v11357_v29, %v4550_v22  ;;  %v7264_v29 = vld [vmem:[%s15317_s2 + $0xc8] sm:$0xf0]  ;;  %v4542_v56 = vsel %vm2480_vm13, %v16561_v0, %v16478_v14  ;;  %v7256_v14 = vld [vmem:[%s15317_s2 + $0xb8] sm:$0xf0] }
 0x41b   :  { %16588 = vst [vmem:[#allocation175_spill] sm:$0xff] %v12102_v40  ;;  %3975 = vmatpush.bf16.msra.mxu1 %v11952_v20  ;;  %3589 = vmatmul.bf16.vlgmr.msra.gmra.mxu2 %v11763_v63  ;;  %v12124_v63 = vor.u32 %v8025_v33, %v7742_v49  ;;  %v12129_v25 = vpop.permute.xlu2 %8175  ;;  %v4552_v49 = vsel %vm2474_vm9, %v16562_v19, %v4551_v38  ;;  %v7886_v33 = vld [vmem:[%s15317_s2 + $0x34] sm:$0xf]  ;;  %v16603_v40 = vld [vmem:[#allocation16_spill] sm:$0xff] }
 0x41c   :  { %3620 = vmatpush.bf16.msrb.mxu2 %v12044_v53  ;;  %16589 = vst [vmem:[#allocation176_spill] sm:$0xff] %v12110_v44  ;;  %v12156_v19 = vsel %vm2700_vm0, %v11946_v51, %v11859_v37  ;;  %v12160_v22 = vor.u32 %v7904_v43, %v7264_v29  ;;  %v4554_v7 = vpack.c.b16 %v4552_v49, %v4542_v56  ;;  %v7902_v38 = vld [vmem:[%s15317_s2 + $0xb4] sm:$0xf]  ;;  %v7884_v49 = vld [vmem:[%s15317_s2 + $0x24] sm:$0xf] }
 0x41d   :  { %16590 = vst [vmem:[#allocation177_spill] sm:$0xff] %v12113_v27  ;;  %4011 = vmatpush.bf16.msrb.mxu0 %v12098_v30  ;;  %v4586_v62 = vpop.permute.xlu1 %4585  ;;  %v12169_v37 = vor.u32 %v7886_v33, %v7192_v18  ;;  %v7184_v33 = vld [vmem:[%s15317_s2 + $0x28] sm:$0xf0]  ;;  %v15668_v18 = vrot.slane %v12156_v19, 1  ;;  %v12192_v56 = vor.u32 %v7902_v38, %v7256_v14  ;;  %v7882_v38 = vld [vmem:[%s15317_s2 + $0x14] sm:$0xf] }
 0x41e   :  { %3600 = vmatpush.bf16.msra.mxu3 %v12077_v55  ;;  %16591 = vst [vmem:[#allocation178_spill] sm:$0xff] %v12124_v63  ;;  %v12173_v0 = vsel %vm2570_vm14, %v4586_v62, %v11877_v21  ;;  %v7176_v14 = vld [vmem:[%s15317_s2 + $0x18] sm:$0xf0]  ;;  %v16638_v20 = vld [vmem:[#allocation36_spill] sm:$0xff]  ;;  %v7914_v34 = vld [vmem:[%s15317_s2 + $0x114] sm:$0xf] }
 0x41f   :  { %16592 = vst [vmem:[#allocation179_spill] sm:$0xff] %v12127_v23  ;;  %3976 = vmatpush.bf16.msra.mxu1 %v11978_v59  ;;  %v4584_v51 = vpop.permute.xlu0 %4583  ;;  %v7924_v59 = vld [vmem:[%s15317_s2 + $0x164] sm:$0xf] }
 0x420   :  { %3621 = vmatpush.bf16.msrb.mxu2 %v12080_v32  ;;  %16593 = vst [vmem:[#allocation180_spill] sm:$0xff] %v12138_v28  ;;  %v12177_v43 = vsel %vm2533_vm15, %v4584_v51, %v4586_v62  ;;  %v12180_v29 = vsel %vm2533_vm15, %v4554_v7, %v4584_v51  ;;  %v7900_v62 = vld [vmem:[%s15317_s2 + $0xa4] sm:$0xf]  ;;  %v7248_v7 = vld [vmem:[%s15317_s2 + $0xa8] sm:$0xf0]  ;;  %v12203_v51 = vor.u32 %v7884_v49, %v7184_v33 }
 0x421   :  { %16594 = vst [vmem:[#allocation181_spill] sm:$0xff] %v12156_v19  ;;  %4012 = vmatpush.bf16.msrb.mxu0 %v12138_v28  ;;  %v12218_v49 = vor.u32 %v7900_v62, %v7248_v7  ;;  %v12232_v62 = vor.u32 %v7882_v38, %v7176_v14  ;;  %v7880_v38 = vld [vmem:[%s15317_s2 + $0x4] sm:$0xf]  ;;  %v7168_v14 = vld [vmem:[%s15317_s2 + $0x8] sm:$0xf0] }
 0x422   :  { %3601 = vmatpush.bf16.msra.mxu3 %v12124_v63  ;;  %16595 = vst [vmem:[#allocation182_spill] sm:$0xff] %v12160_v22 }
 0x423   :  { %16596 = vst [vmem:[#allocation183_spill] sm:$0xff] %v12169_v37  ;;  %3977 = vmatpush.bf16.msra.mxu1 %v12016_v50  ;;  %v16632_v50 = vld [vmem:[#allocation39_spill] sm:$0xff] }
 0x424   :  { %3622 = vmatpush.bf16.msrb.mxu2 %v12127_v23  ;;  %16597 = vst [vmem:[#allocation184_spill] sm:$0xff] %v12173_v0  ;;  %v12213_v0 = vpop.permute.xlu2 %8190 }
 0x425   :  { %16598 = vst [vmem:[#allocation185_spill] sm:$0xff] %v12177_v43  ;;  %4013 = vmatpush.bf16.msrb.mxu0 %v12169_v37  ;;  %v4622_v33 = vpop.permute.xlu1 %4621 }
 0x426   :  { %3607 = vmatpush.bf16.msrb.mxu3 %v12002_v5  ;;  %16599 = vst [vmem:[#allocation186_spill] sm:$0xff] %v12180_v29  ;;  %3978 = vmatmul.bf16.vlgmr.msra.gmra.mxu1 %v15668_v18  ;;  %v8162_v29 = vunpack.i.l.bf16 %v12032_v35  ;;  %v7898_v18 = vld [vmem:[%s15317_s2 + $0x94] sm:$0xf]  ;;  %v12236_v7 = vsel %vm2607_vm1, %v4622_v33, %v11950_v3 }
 0x427   :  { %4022 = vmatpush.bf16.msrb.mxu1 %v12044_v53  ;;  %16600 = vst [vmem:[#allocation187_spill] sm:$0xff] %v12192_v56  ;;  %v4605_v43 = vpop.permute.xlu0 %4604  ;;  %v16630_v53 = vld [vmem:[#allocation22_spill] sm:$0xff] }
 0x428   :  { %3623 = vmatpush.bf16.msrb.mxu2 %v12160_v22  ;;  %16601 = vst [vmem:[#allocation188_spill] sm:$0xff] %v12203_v51  ;;  %v12242_v19 = vsel %vm2570_vm14, %v11877_v21, %v4605_v43  ;;  %v12245_v44 = vsel %vm2607_vm1, %v4605_v43, %v4622_v33  ;;  %v8177_v43 = vunpack.i.l.bf16 %v12129_v25  ;;  %v16612_v33 = vld [vmem:[#allocation48_spill] sm:$0xff]  ;;  %v16617_v21 = vld [vmem:[#allocation19_spill] sm:$0xff] }
 0x429   :  { %16602 = vst [vmem:[#allocation189_spill] sm:$0xff] %v12218_v49  ;;  %7764 = vmatmul.msk.bf16.vlgmr.msra.gmra.mxu3 %vm3473_vm2, %v11705_v47  ;;  %4014 = vmatpush.bf16.msrb.mxu0 %v12203_v51 }
 0x42a   :  { %3608 = vmatpush.bf16.msrb.mxu3 %v12059_v11  ;;  %v16604_v11 = vld [vmem:[#allocation8_spill] sm:$0xff]  ;;  %16605 = vst [vmem:[#allocation190_spill] sm:$0xff] %v12232_v62 }
 0x42b   :  { %4023 = vmatpush.bf16.msrb.mxu1 %v12080_v32  ;;  %v3737_v5 = vsel %vm2468_vm8, %v16604_v11, %v16603_v40  ;;  %16606 = vst [vmem:[#allocation191_spill] sm:$0xff] %v12236_v7  ;;  %v16607_v11 = vld [vmem:[#allocation5_spill] sm:$0xff]  ;;  %v16610_v7 = vld [vmem:[#allocation34_spill] sm:$0xff] }
 0x42c   :  { %3624 = vmatpush.bf16.msrb.mxu2 %v12192_v56  ;;  %v3738_v40 = vsel %vm2471_vm11, %v16607_v11, %v3737_v5  ;;  %16608 = vst [vmem:[#allocation192_spill] sm:$0xff] %v12242_v19  ;;  %v16611_v5 = vunpack.i.h.bf16 %v12032_v35 }
 0x42d   :  { %16609 = vst [vmem:[#allocation193_spill] sm:$0xff] %v12245_v44  ;;  %v3739_v10 = vsel %vm2474_vm9, %v16610_v7, %v3738_v40  ;;  %v16614_v40 = vld [vmem:[#allocation56_spill] sm:$0xff]  ;;  %4015 = vmatpush.bf16.msrb.mxu0 %v12232_v62  ;;  %v12298_v26 = vpop.permute.xlu1 %8170 }
 0x42e   :  { %3609 = vmatpush.bf16.msrb.mxu3 %v12098_v30  ;;  %v7240_v30 = vld [vmem:[%s15317_s2 + $0x98] sm:$0xf0]  ;;  %v1779_v11 = vsel %vm1773_vm6, %v8162_v29, %v16611_v5  ;;  %v3740_v44 = vsel %vm2477_vm12, %v16612_v33, %v3739_v10  ;;  %v16615_v7 = vld [vmem:[#allocation60_spill] sm:$0xff]  ;;  %v7232_v10 = vld [vmem:[%s15317_s2 + $0x88] sm:$0xf0]  ;;  %v12277_v5 = vor.u32 %v7880_v38, %v7168_v14  ;;  %v16619_v33 = vunpack.i.h.bf16 %v12129_v25 }
 0x42f   :  { %4024 = vmatpush.bf16.msrb.mxu1 %v12127_v23  ;;  %v12265_v19 = vor.u32 %v7898_v18, %v7240_v30  ;;  %v3747_v32 = vsel %vm2462_vm7, %v16615_v7, %v16614_v40  ;;  %v7896_v29 = vld [vmem:[%s15317_s2 + $0x84] sm:$0xf]  ;;  %v7974_v30 = vld [vmem:[%s15317_s2 + $0x2f4] sm:$0xf]  ;;  %v7544_v18 = vld [vmem:[%s15317_s2 + $0x2f8] sm:$0xf0]  ;;  %v8192_v14 = vunpack.i.l.bf16 %v12213_v0 }
 0x430   :  { %3625 = vmatpush.bf16.msrb.mxu2 %v12218_v49  ;;  %16616 = vst [vmem:[#allocation195_spill] sm:$0xff] %v12277_v5  ;;  %v16618_v7 = vld [vmem:[#allocation49_spill] sm:$0xff]  ;;  %v1776_v23 = vsel %vm1773_vm6, %v8177_v43, %v16619_v33  ;;  %v8172_v43 = vunpack.i.l.bf16 %v12298_v26  ;;  %v12307_v33 = vpop.permute.xlu0 %4640 }
 0x431   :  { %16613 = vst [vmem:[#allocation194_spill] sm:$0xff] %v12265_v19  ;;  %v3741_v40 = vsel %vm2480_vm13, %v16618_v7, %v3740_v44  ;;  %v12300_v44 = vpop.permute.xlu2 %8205  ;;  %v12302_v7 = vor.u32 %v7974_v30, %v7544_v18  ;;  %4016 = vmatpush.bf16.msrb.mxu0 %v12277_v5  ;;  %v12320_v30 = vsel %vm2700_vm0, %v11950_v3, %v12307_v33 }
 0x432   :  { %3610 = vmatpush.bf16.msrb.mxu3 %v12138_v28  ;;  %v1953_v28 = vmax.f32 %v16617_v21, %v1779_v11  ;;  %v3749_v38 = vpack.c.b16 %v3747_v32, %v3741_v40  ;;  %v12296_v21 = vor.u32 %v7896_v29, %v7232_v10  ;;  %v8173_v32 = vunpack.i.h.bf16 %v12298_v26  ;;  %v16622_v11 = vld [vmem:[#allocation35_spill] sm:$0xff]  ;;  %v7972_v29 = vld [vmem:[%s15317_s2 + $0x2e4] sm:$0xf]  ;;  %v7536_v10 = vld [vmem:[%s15317_s2 + $0x2e8] sm:$0xf0] }
 0x433   :  { %4025 = vmatpush.bf16.msrb.mxu1 %v12160_v22  ;;  %16621 = vst [vmem:[#allocation196_spill] sm:$0xff] %v12302_v7  ;;  %v1947_v22 = vmax.f32 %v16622_v11, %v1776_v23  ;;  %v16626_v23 = vunpack.i.h.bf16 %v12213_v0  ;;  %v12333_v3 = vor.u32 %v7972_v29, %v7536_v10  ;;  %v7926_v29 = vld [vmem:[%s15317_s2 + $0x174] sm:$0xf]  ;;  %v16629_v10 = vld [vmem:[#allocation43_spill] sm:$0xff] }
 0x434   :  { %3626 = vmatpush.bf16.msrb.mxu2 %v12265_v19  ;;  %16620 = vst [vmem:[#allocation19_spill] sm:$0xff] %v12296_v21  ;;  %v2185_v40 = vrot.slane %v1953_v28, 1  ;;  %v12323_v26 = vrot.slane %v3749_v38, 1  ;;  %v1782_v38 = vsel %vm1773_vm6, %v8172_v43, %v8173_v32  ;;  %v7352_v43 = vld [vmem:[%s15317_s2 + $0x178] sm:$0xf0] }
 0x435   :  { %16624 = vst [vmem:[#allocation35_spill] sm:$0xff] %v12320_v30  ;;  %v1788_v18 = vsel %vm1773_vm6, %v8192_v14, %v16626_v23  ;;  %v7970_v14 = vld [vmem:[%s15317_s2 + $0x2d4] sm:$0xf]  ;;  %v7528_v23 = vld [vmem:[%s15317_s2 + $0x2d8] sm:$0xf0]  ;;  %v2183_v30 = vrot.slane %v1947_v22, 1  ;;  %v1959_v6 = vmax.f32 %v16632_v50, %v1782_v38 }
 0x436   :  { %3611 = vmatpush.bf16.msrb.mxu3 %v12169_v37  ;;  %v16623_v37 = vld [vmem:[#allocation105_spill] sm:$0xff]  ;;  %16625 = vst [vmem:[#allocation197_spill] sm:$0xff] %v12323_v26  ;;  %4017 = vmatmul.bf16.vlgmr.msrb.gmra.mxu0 %v12323_v26  ;;  %v12343_v11 = vmax.f32 %v1953_v28, %v2185_v40  ;;  %v12372_v28 = vor.u32 %v7970_v14, %v7528_v23 }
 0x437   :  { %4061 = vmatpush.bf16.msra.mxu0 %v16623_v37  ;;  %4026 = vmatpush.bf16.msrb.mxu1 %v12192_v56  ;;  %v8207_v37 = vunpack.i.l.bf16 %v12300_v44  ;;  %16627 = vst [vmem:[#allocation198_spill] sm:$0xff] %v12333_v3  ;;  %v1971_v56 = vmax.f32 %v16629_v10, %v1788_v18  ;;  %v7968_v18 = vld [vmem:[%s15317_s2 + $0x2c4] sm:$0xf]  ;;  %v12368_v10 = vpop.permute.xlu1 %8185  ;;  %v7344_v14 = vld [vmem:[%s15317_s2 + $0x168] sm:$0xf0] }
 0x438   :  { %3627 = vmatpush.bf16.msrb.mxu2 %v12296_v21  ;;  %16633 = vst [vmem:[#allocation43_spill] sm:$0xff] %v12372_v28  ;;  %v8187_v50 = vunpack.i.l.bf16 %v12368_v10 }
 0x43a   :  { %3612 = vmatpush.bf16.msrb.mxu3 %v12203_v51  ;;  %v16628_v51 = vld [vmem:[#allocation109_spill] sm:$0xff] }
 0x43b   :  { %4062 = vmatpush.bf16.msra.mxu0 %v16628_v51  ;;  %4027 = vmatpush.bf16.msrb.mxu1 %v12218_v49  ;;  %v16631_v51 = vunpack.i.h.bf16 %v12300_v44  ;;  %v16635_v49 = vld [vmem:[#allocation114_spill] sm:$0xff] }
 0x43c   :  { %3672 = vmatpush.bf16.msra.mxu2 %v12302_v7 }
 0x43d   :  { %3628 = vmatmul.bf16.vlgmr.msrb.gmra.mxu2 %v11513_v54  ;;  %v1794_v27 = vsel %vm1773_vm6, %v8207_v37, %v16631_v51  ;;  %v7520_v54 = vld [vmem:[%s15317_s2 + $0x2c8] sm:$0xf0]  ;;  %v12374_v37 = vor.u32 %v7926_v29, %v7352_v43  ;;  %v8166_v51 = vpop.permute.xlu0 %8165  ;;  %v2191_v43 = vrot.slane %v1971_v56, 1 }
 0x43e   :  { %3613 = vmatpush.bf16.msrb.mxu3 %v12232_v62  ;;  %v12378_v62 = vmax.f32 %v1947_v22, %v2183_v30  ;;  %v8168_v23 = vunpack.i.h.bf16 %v8166_v51  ;;  %v8167_v29 = vunpack.i.l.bf16 %v8166_v51  ;;  %v1983_v40 = vmax.f32 %v16490_v17, %v1794_v27  ;;  %v7966_v17 = vld [vmem:[%s15317_s2 + $0x2b4] sm:$0xf]  ;;  %v7512_v27 = vld [vmem:[%s15317_s2 + $0x2b8] sm:$0xf0] }
 0x43f   :  { %16634 = vst [vmem:[#allocation39_spill] sm:$0xff] %v12374_v37  ;;  %4063 = vmatpush.bf16.msra.mxu0 %v16635_v49  ;;  %4028 = vmatpush.bf16.msrb.mxu1 %v12265_v19  ;;  %v12389_v38 = vor.u32 %v7968_v18, %v7520_v54  ;;  %v16637_v22 = vunpack.i.h.bf16 %v12129_v25  ;;  %v2187_v49 = vrot.slane %v1959_v6, 1  ;;  %v16639_v51 = vunpack.i.h.bf16 %v12032_v35  ;;  %v16642_v18 = vld [vmem:[#allocation9_spill] sm:$0xff]  ;;  %v7922_v54 = vld [vmem:[%s15317_s2 + $0x154] sm:$0xf] }
 0x440   :  { %3673 = vmatpush.bf16.msra.mxu2 %v12333_v3  ;;  %v1927_v4 = vsel %vm1918_vm5, %v8173_v32, %v8168_v23  ;;  %v12408_v25 = vor.u32 %v7924_v59, %v7344_v14  ;;  %v7964_v23 = vld [vmem:[%s15317_s2 + $0x2a4] sm:$0xf]  ;;  %v16643_v14 = vld [vmem:[#allocation119_spill] sm:$0xff]  ;;  %v12437_v19 = vor.u32 %v7966_v17, %v7512_v27 }
 0x441   :  { %16636 = vst [vmem:[#allocation199_spill] sm:$0xff] %v12389_v38  ;;  %v1921_v30 = vsel %vm1918_vm5, %v16637_v22, %v8187_v50  ;;  %v1924_v55 = vsel %vm1918_vm5, %v16639_v51, %v8167_v29  ;;  %v7336_v50 = vld [vmem:[%s15317_s2 + $0x158] sm:$0xf0]  ;;  %v12429_v22 = vmax.f32 %v1971_v56, %v2191_v43  ;;  %v16644_v51 = vld [vmem:[#allocation61_spill] sm:$0xff]  ;;  %v12441_v56 = vpop.permute.xlu1 %4642  ;;  %v7962_v43 = vld [vmem:[%s15317_s2 + $0x294] sm:$0xf] }
 0x442   :  { %3614 = vmatpush.bf16.msrb.mxu3 %v12277_v5  ;;  %v1948_v63 = vmax.f32 %v16638_v20, %v1921_v30  ;;  %16640 = vst [vmem:[#allocation36_spill] sm:$0xff] %v12408_v25  ;;  %v16641_v20 = vld [vmem:[#allocation40_spill] sm:$0xff]  ;;  %v1954_v35 = vmax.f32 %v16642_v18, %v1924_v55  ;;  %v2195_v30 = vrot.slane %v1983_v40, 1  ;;  %v7328_v29 = vld [vmem:[%s15317_s2 + $0x148] sm:$0xf0]  ;;  %v12460_v27 = vsel %vm2700_vm0, %v12307_v33, %v12441_v56 }
 0x443   :  { %v1960_v32 = vmax.f32 %v16641_v20, %v1927_v4  ;;  %4064 = vmatpush.bf16.msra.mxu0 %v16643_v14  ;;  %v7504_v4 = vld [vmem:[%s15317_s2 + $0x2a8] sm:$0xf0]  ;;  %v7920_v55 = vld [vmem:[%s15317_s2 + $0x144] sm:$0xf]  ;;  %4029 = vmatpush.bf16.msrb.mxu1 %v12296_v21  ;;  %v2219_v14 = vmax.f32 %v1959_v6, %v2187_v49  ;;  %16645 = vst [vmem:[#allocation40_spill] sm:$0xff] %v12437_v19 }
 0x444   :  { %3674 = vmatpush.bf16.msra.mxu2 %v12372_v28  ;;  %v2184_v59 = vrot.slane %v1948_v63, 1  ;;  %v2186_v18 = vrot.slane %v1954_v35, 1  ;;  %16647 = vst [vmem:[#allocation61_spill] sm:$0xff] %v12441_v56  ;;  %v7918_v6 = vld [vmem:[%s15317_s2 + $0x134] sm:$0xf]  ;;  %v12481_v56 = vor.u32 %v7964_v23, %v7504_v4  ;;  %v12494_v23 = vor.u32 %v7920_v55, %v7328_v29 }
 0x445   :  { %3615 = vmatmul.bf16.vlgmr.msrb.gmra.mxu3 %v16644_v51  ;;  %v2188_v20 = vrot.slane %v1960_v32, 1  ;;  %v7496_v51 = vld [vmem:[%s15317_s2 + $0x298] sm:$0xf0]  ;;  %16648 = vst [vmem:[#allocation200_spill] sm:$0xff] %v12460_v27  ;;  %v8028_v33 = vld [vmem:[%s15317_s2 + $0x4a4] sm:$0xf] }
 0x446   :  { %3633 = vmatpush.bf16.msra.mxu3 %v12374_v37  ;;  %v2216_v5 = vmax.f32 %v1948_v63, %v2184_v59  ;;  %v12439_v37 = vor.u32 %v7922_v54, %v7336_v50  ;;  %v7320_v63 = vld [vmem:[%s15317_s2 + $0x138] sm:$0xf0]  ;;  %v2218_v17 = vmax.f32 %v1954_v35, %v2186_v18  ;;  %v8181_v54 = vpop.permute.xlu0 %8180  ;;  %v7960_v50 = vld [vmem:[%s15317_s2 + $0x284] sm:$0xf]  ;;  %v7488_v59 = vld [vmem:[%s15317_s2 + $0x288] sm:$0xf0] }
 0x447   :  { %4074 = vmatpush.bf16.msra.mxu1 %v12302_v7  ;;  %v2220_v49 = vmax.f32 %v1960_v32, %v2188_v20  ;;  %v7916_v7 = vld [vmem:[%s15317_s2 + $0x124] sm:$0xf]  ;;  %v7312_v32 = vld [vmem:[%s15317_s2 + $0x128] sm:$0xf0]  ;;  %v16649_v35 = vrot.slane %v16630_v53, 1  ;;  %v8188_v20 = vunpack.i.h.bf16 %v12368_v10  ;;  %v16650_v18 = vld [vmem:[#allocation127_spill] sm:$0xff]  ;;  %v8183_v27 = vunpack.i.h.bf16 %v8181_v54 }
 0x448   :  { %16646 = vst [vmem:[#allocation9_spill] sm:$0xff] %v12439_v37  ;;  %3675 = vmatpush.bf16.msra.mxu2 %v12389_v38  ;;  %4065 = vmatpush.bf16.msra.mxu0 %v16650_v18  ;;  %v8182_v21 = vunpack.i.l.bf16 %v8181_v54  ;;  %v12492_v53 = vmax.f32 %v1983_v40, %v2195_v30  ;;  %v2232_v10 = vmax.f32 %v2216_v5, 0.0  ;;  %v8026_v4 = vld [vmem:[%s15317_s2 + $0x494] sm:$0xf]  ;;  %v7752_v54 = vld [vmem:[%s15317_s2 + $0x498] sm:$0xf0]  ;;  %v12514_v30 = vor.u32 %v7962_v43, %v7496_v51 }
 0x449   :  { %4030 = vmatmul.bf16.vlgmr.msrb.gmra.mxu1 %v16649_v35  ;;  %16651 = vst [vmem:[#allocation201_spill] sm:$0xff] %v12481_v56  ;;  %v7304_v35 = vld [vmem:[%s15317_s2 + $0x118] sm:$0xf0]  ;;  %v2236_v18 = vmax.f32 %v2220_v49, 0.0  ;;  %v2235_v52 = vmax.f32 %v2219_v14, 0.0  ;;  %v2234_v9 = vmax.f32 %v2218_v17, 0.0  ;;  %v1930_v46 = vsel %vm1918_vm5, %v8183_v27, %v8188_v20  ;;  %v8201_v26 = vpop.permute.xlu1 %8200 }
 0x44a   :  { %3634 = vmatpush.bf16.msra.mxu3 %v12408_v25  ;;  %v7760_v25 = vld [vmem:[%s15317_s2 + $0x4a8] sm:$0xf0]  ;;  %16652 = vst [vmem:[#allocation202_spill] sm:$0xff] %v12494_v23  ;;  %v1785_v40 = vsel %vm1773_vm6, %v8182_v21, %v8183_v27  ;;  %v7912_v5 = vld [vmem:[%s15317_s2 + $0x104] sm:$0xf]  ;;  %v16653_v14 = vld [vmem:[#allocation10_spill] sm:$0xff]  ;;  %v12516_v49 = vor.u32 %v7918_v6, %v7320_v63  ;;  %v12529_v43 = vor.u32 %v7960_v50, %v7488_v59 }
 0x44b   :  { %4075 = vmatpush.bf16.msra.mxu1 %v12333_v3  ;;  %v7296_v29 = vld [vmem:[%s15317_s2 + $0x108] sm:$0xf0]  ;;  %v1966_v55 = vmax.f32 %v16653_v14, %v1930_v46  ;;  %16654 = vst [vmem:[#allocation10_spill] sm:$0xff] %v12514_v30  ;;  %v8024_v21 = vld [vmem:[%s15317_s2 + $0x484] sm:$0xf]  ;;  %v12531_v51 = vor.u32 %v7916_v7, %v7312_v32  ;;  %v12533_v6 = vor.u32 %v8028_v33, %v7760_v25  ;;  %v16664_v32 = vmax.f32 %v12343_v11, 0.0 }
 0x44c   :  { %3676 = vmatpush.bf16.msra.mxu2 %v12437_v19  ;;  %16655 = vst [vmem:[#allocation203_spill] sm:$0xff] %v12516_v49  ;;  %v7744_v17 = vld [vmem:[%s15317_s2 + $0x488] sm:$0xf0]  ;;  %v7990_v27 = vld [vmem:[%s15317_s2 + $0x374] sm:$0xf]  ;;  %v12548_v7 = vpack.c.bf16 %v2236_v18, %v2235_v52  ;;  %v12550_v25 = vor.u32 %v7914_v34, %v7304_v35  ;;  %v12552_v59 = vor.u32 %v8026_v4, %v7752_v54  ;;  %v8203_v4 = vunpack.i.h.bf16 %v8201_v26 }
 0x44d   :  { %v16656_v20 = vld [vmem:[#allocation133_spill] sm:$0xff]  ;;  %16659 = vst [vmem:[#allocation204_spill] sm:$0xff] %v12531_v51  ;;  %v7608_v63 = vld [vmem:[%s15317_s2 + $0x378] sm:$0xf0]  ;;  %v7988_v14 = vld [vmem:[%s15317_s2 + $0x364] sm:$0xf]  ;;  %v2248_v33 = vpack.c.bf16 %v2234_v9, %v16664_v32  ;;  %v12557_v61 = vor.u32 %v7912_v5, %v7296_v29  ;;  %v12562_v34 = vor.u32 %v8024_v21, %v7744_v17  ;;  %v8202_v54 = vunpack.i.l.bf16 %v8201_v26 }
 0x44e   :  { %3635 = vmatpush.bf16.msra.mxu3 %v12439_v37  ;;  %4066 = vmatpush.bf16.msra.mxu0 %v16656_v20  ;;  %v16657_v3 = vld [vmem:[#allocation41_spill] sm:$0xff]  ;;  %16660 = vst [vmem:[#allocation205_spill] sm:$0xff] %v12533_v6  ;;  %v8196_v52 = vpop.permute.xlu0 %8195  ;;  %v12564_v18 = vor.u32 %v7990_v27, %v7608_v63  ;;  %v5023_v29 = vunpack.c.h.b16 %v12548_v7  ;;  %v16670_v26 = vld [vmem:[#allocation18_spill] sm:$0xff] }
 0x44f   :  { %v1965_v46 = vmax.f32 %v16657_v3, %v1785_v40  ;;  %16658 = vst [vmem:[#allocation41_spill] sm:$0xff] %v12529_v43  ;;  %v7600_v20 = vld [vmem:[%s15317_s2 + $0x368] sm:$0xf0]  ;;  %v16661_v3 = vmax.f32 %v12378_v62, 0.0  ;;  %4076 = vmatpush.bf16.msra.mxu1 %v12372_v28  ;;  %v2190_v40 = vrot.slane %v1966_v55, 1  ;;  %v8197_v32 = vunpack.i.l.bf16 %v8196_v52 }
 0x450   :  { %16662 = vst [vmem:[#allocation206_spill] sm:$0xff] %v12550_v25  ;;  %3677 = vmatpush.bf16.msra.mxu2 %v12481_v56  ;;  %v12566_v11 = vor.u32 %v7988_v14, %v7600_v20  ;;  %v5020_v62 = vunpack.c.l.b16 %v2248_v33  ;;  %v1791_v27 = vsel %vm1773_vm6, %v8202_v54, %v8203_v4  ;;  %v5021_v14 = vunpack.c.h.b16 %v2248_v33  ;;  %v16674_v54 = vld [vmem:[#allocation44_spill] sm:$0xff] }
 0x451   :  { %v12546_v50 = vpack.c.bf16 %v2232_v10, %v16661_v3  ;;  %16663 = vst [vmem:[#allocation207_spill] sm:$0xff] %v12552_v59  ;;  %v2189_v37 = vrot.slane %v1965_v46, 1  ;;  %v2222_v9 = vmax.f32 %v1966_v55, %v2190_v40  ;;  %v16669_v10 = vld [vmem:[#allocation137_spill] sm:$0xff]  ;;  %v8198_v3 = vunpack.i.h.bf16 %v8196_v52 }
 0x452   :  { %16665 = vst [vmem:[#allocation208_spill] sm:$0xff] %v12557_v61  ;;  %3636 = vmatpush.bf16.msra.mxu3 %v12494_v23  ;;  %4067 = vmatpush.bf16.msra.mxu0 %v16669_v10  ;;  %v16672_v52 = vld [vmem:[#allocation81_spill] sm:$0xff]  ;;  %v12593_v33 = vunpack.i.l.s16 %v5020_v62  ;;  %v16677_v10 = vrot.slane %v11809_v24, 1 }
 0x453   :  { %16666 = vst [vmem:[#allocation209_spill] sm:$0xff] %v12562_v34  ;;  %v2221_v35 = vmax.f32 %v1965_v46, %v2189_v37  ;;  %v5018_v5 = vunpack.c.l.b16 %v12546_v50  ;;  %4077 = vmatpush.bf16.msra.mxu1 %v12389_v38  ;;  %v2238_v21 = vmax.f32 %v2222_v9, 0.0  ;;  %v1977_v37 = vmax.f32 %v16670_v26, %v1791_v27  ;;  %v16673_v9 = vld [vmem:[#allocation42_spill] sm:$0xff] }
 0x454   :  { %16667 = vst [vmem:[#allocation210_spill] sm:$0xff] %v12564_v18  ;;  %3678 = vmatpush.bf16.msra.mxu2 %v12514_v30  ;;  %v1936_v20 = vsel %vm1918_vm5, %v8203_v4, %v8198_v3  ;;  %v16671_v46 = vunpack.i.h.bf16 %v12213_v0  ;;  %v5022_v27 = vunpack.c.l.b16 %v12548_v7  ;;  %v16675_v4 = vld [vmem:[#allocation38_spill] sm:$0xff]  ;;  %v12589_v0 = vpop.f32.mrf.mxu0  ;;  %v12591_v3 = vunpack.i.l.s16 %v5023_v29 }
 0x455   :  { %16668 = vst [vmem:[#allocation211_spill] sm:$0xff] %v12566_v11  ;;  %v2237_v17 = vmax.f32 %v2221_v35, 0.0  ;;  %v1978_v35 = vmax.f32 %v16673_v9, %v1936_v20  ;;  %v12585_v38 = vunpack.i.l.s16 %v5018_v5  ;;  %v2193_v26 = vrot.slane %v1977_v37, 1 }
 0x456   :  { %3637 = vmatpush.bf16.msra.mxu3 %v12516_v49  ;;  %v1933_v63 = vsel %vm1918_vm5, %v16671_v46, %v8197_v32  ;;  %4068 = vmatpush.bf16.msra.mxu0 %v16672_v52  ;;  %16676 = vst [vmem:[#allocation18_spill] sm:$0xff] %v12589_v0  ;;  %v12598_v9 = vunpack.i.l.s16 %v5021_v14  ;;  %v16678_v52 = vld [vmem:[#allocation139_spill] sm:$0xff] }
 0x457   :  { %v2250_v40 = vpack.c.bf16 %v2238_v21, %v2237_v17  ;;  %v1972_v55 = vmax.f32 %v16674_v54, %v1933_v63  ;;  %4078 = vmatpush.bf16.msra.mxu1 %v12437_v19  ;;  %v2194_v32 = vrot.slane %v1978_v35, 1  ;;  %v8216_v17 = vpop.permute.xlu1 %8215  ;;  %v2225_v7 = vmax.f32 %v1977_v37, %v2193_v26  ;;  %v8211_v63 = vpop.permute.xlu0 %8210 }
 0x458   :  { %3679 = vmatpush.bf16.msra.mxu2 %v12529_v43  ;;  %v8218_v5 = vunpack.i.h.bf16 %v8216_v17  ;;  %v8217_v46 = vunpack.i.l.bf16 %v8216_v17  ;;  %v8213_v19 = vunpack.i.h.bf16 %v8211_v63  ;;  %v8212_v37 = vunpack.i.l.bf16 %v8211_v63  ;;  %v16682_v63 = vld [vmem:[#allocation143_spill] sm:$0xff] }
 0x459   :  { %v2192_v21 = vrot.slane %v1972_v55, 1  ;;  %v5024_v20 = vunpack.c.l.b16 %v2250_v40  ;;  %v5025_v29 = vunpack.c.h.b16 %v2250_v40  ;;  %v2226_v62 = vmax.f32 %v1978_v35, %v2194_v32  ;;  %4069 = vmatmul.bf16.vlgmr.msra.gmra.mxu0 %v16677_v10 }
 0x45a   :  { %4113 = vmatpush.bf16.msrb.mxu0 %v16675_v4  ;;  %3638 = vmatpush.bf16.msra.mxu3 %v12531_v51  ;;  %v2241_v4 = vmax.f32 %v2225_v7, 0.0  ;;  %v1797_v0 = vsel %vm1773_vm6, %v8217_v46, %v8218_v5  ;;  %v12605_v26 = vunpack.i.l.s16 %v5022_v27  ;;  %v1942_v10 = vsel %vm1918_vm5, %v8218_v5, %v8213_v19  ;;  %v16702_v51 = vld [vmem:[#allocation11_spill] sm:$0xff] }
 0x45b   :  { %v2224_v54 = vmax.f32 %v1972_v55, %v2192_v21  ;;  %4079 = vmatpush.bf16.msra.mxu1 %v12481_v56  ;;  %v2242_v14 = vmax.f32 %v2226_v62, 0.0  ;;  %3680 = vmatmul.bf16.vlgmr.msra.gmra.mxu2 %v11799_v57  ;;  %v1989_v55 = vmax.f32 %v11476_v15, %v1797_v0  ;;  %v12610_v35 = vunpack.i.l.s16 %v5024_v20  ;;  %v16681_v20 = vld [vmem:[#allocation33_spill] sm:$0xff] }
 0x45c   :  { %3729 = vmatpush.bf16.msrb.mxu2 %v12533_v6  ;;  %v16679_v32 = vunpack.i.h.bf16 %v12300_v44  ;;  %v12618_v27 = vrot.slane %v12593_v33, 7  ;;  %v16680_v7 = vmax.f32 %v12429_v22, 0.0  ;;  %v1990_v57 = vmax.f32 %v11482_v60, %v1942_v10  ;;  %v7986_v60 = vld [vmem:[%s15317_s2 + $0x354] sm:$0xf]  ;;  %v7592_v10 = vld [vmem:[%s15317_s2 + $0x358] sm:$0xf0] }
 0x45d   :  { %v2240_v40 = vmax.f32 %v2224_v54, 0.0  ;;  %v2252_v17 = vpack.c.bf16 %v2242_v14, %v2241_v4  ;;  %v2197_v15 = vrot.slane %v1989_v55, 1  ;;  %v12625_v0 = vrot.slane %v12591_v3, 6  ;;  %v3657_v4 = vpop.f32.mrf.mxu0  ;;  %v16692_v6 = vld [vmem:[#allocation30_spill] sm:$0xff] }
 0x45e   :  { %4114 = vmatpush.bf16.msrb.mxu0 %v16678_v52  ;;  %3639 = vmatpush.bf16.msra.mxu3 %v12550_v25  ;;  %v1939_v21 = vsel %vm1918_vm5, %v16679_v32, %v8212_v37  ;;  %v12628_v19 = vrot.slane %v12598_v9, 7  ;;  %v12630_v44 = vunpack.i.l.s16 %v5025_v29  ;;  %v2198_v29 = vrot.slane %v1990_v57, 1 }
 0x45f   :  { %v2251_v46 = vpack.c.bf16 %v2240_v40, %v16680_v7  ;;  %v1984_v5 = vmax.f32 %v16681_v20, %v1939_v21  ;;  %v5028_v22 = vunpack.c.l.b16 %v2252_v17  ;;  %v5029_v62 = vunpack.c.h.b16 %v2252_v17  ;;  %4080 = vmatpush.bf16.msra.mxu1 %v12514_v30  ;;  %v16686_v20 = vld [vmem:[#allocation29_spill] sm:$0xff]  ;;  %v16693_v30 = vld [vmem:[#allocation64_spill] sm:$0xff] }
 0x460   :  { %3730 = vmatpush.bf16.msrb.mxu2 %v12552_v59  ;;  %v2229_v14 = vmax.f32 %v1989_v55, %v2197_v15  ;;  %v12643_v32 = vrot.slane %v12605_v26, 6  ;;  %v12652_v7 = vrot.slane %v12610_v35, 5  ;;  %v5452_v55 = vsel %vm2468_vm8, %v12618_v27, %v12585_v38 }
 0x461   :  { %v5026_v54 = vunpack.c.l.b16 %v2251_v46  ;;  %v5027_v37 = vunpack.c.h.b16 %v2251_v46  ;;  %v2196_v40 = vrot.slane %v1984_v5, 1  ;;  %v16685_v46 = vunpack.c.h.b16 %v12546_v50 }
 0x462   :  { %4115 = vmatpush.bf16.msrb.mxu0 %v16682_v63  ;;  %3640 = vmatpush.bf16.msra.mxu3 %v12557_v61  ;;  %16683 = vst [vmem:[#allocation42_spill] sm:$0xff] %v12643_v32  ;;  %v2245_v4 = vmax.f32 %v2229_v14, 0.0  ;;  %v16687_v63 = vld [vmem:[#allocation6_spill] sm:$0xff]  ;;  %v12663_v52 = vunpack.i.l.s16 %v5028_v22  ;;  %v12669_v59 = vor.u32 %v7986_v60, %v7592_v10  ;;  %v16701_v61 = vld [vmem:[#allocation13_spill] sm:$0xff]  ;;  %vm6553_vm5 = vcmask 883712  }
 0x463   :  { %v12645_v21 = vunpack.i.l.s16 %v5026_v54  ;;  %v12647_v17 = vunpack.i.l.s16 %v5027_v37  ;;  %16684 = vst [vmem:[#allocation44_spill] sm:$0xff] %v12652_v7  ;;  %v12659_v15 = vunpack.i.l.s16 %v16685_v46  ;;  %v2230_v54 = vmax.f32 %v1990_v57, %v2198_v29  ;;  %4081 = vmatpush.bf16.msra.mxu1 %v12529_v43  ;;  %v16689_v46 = vld [vmem:[#allocation86_spill] sm:$0xff]  ;;  %v7584_v43 = vld [vmem:[%s15317_s2 + $0x348] sm:$0xf0] }
 0x464   :  { %3731 = vmatpush.bf16.msrb.mxu2 %v12562_v34  ;;  %v2228_v37 = vmax.f32 %v1984_v5, %v2196_v40  ;;  %v12665_v34 = vunpack.i.l.s16 %v5029_v62  ;;  %16688 = vst [vmem:[#allocation33_spill] sm:$0xff] %v12669_v59  ;;  %v5453_v5 = vsel %vm2471_vm11, %v12643_v32, %v5452_v55  ;;  %v3499_v62 = vpop.f32.mrf.mxu3  ;;  %v12686_v40 = vrot.slane %v12630_v44, 5 }
 0x465   :  { %3641 = vmatmul.bf16.vlgmr.msra.gmra.mxu3 %v11510_v2  ;;  %v12672_v50 = vrot.slane %v12645_v21, 4  ;;  %v2246_v14 = vmax.f32 %v2230_v54, 0.0  ;;  %v5081_v22 = vsel %vm2462_vm7, %v12628_v19, %v12659_v15  ;;  %v3512_v2 = vpop.f32.mrf.mxu2  ;;  %v5454_v60 = vsel %vm2474_vm9, %v12652_v7, %v5453_v5 }
 0x466   :  { %3685 = vmatpush.bf16.msrb.mxu3 %v12564_v18  ;;  %4116 = vmatpush.bf16.msrb.mxu0 %v16687_v63  ;;  %v2244_v57 = vmax.f32 %v2228_v37, 0.0  ;;  %v5083_v29 = vsel %vm2465_vm10, %v12625_v0, %v5081_v22  ;;  %v12689_v10 = vrot.slane %v12647_v17, 4  ;;  %v16690_v55 = vrot.slane %v11883_v42, 1  ;;  %v7984_v22 = vld [vmem:[%s15317_s2 + $0x344] sm:$0xf] }
 0x467   :  { %4294 = vmatpush.bf16.msrb.mxu1 %v16689_v46  ;;  %v2254_v54 = vpack.c.bf16 %v2246_v14, %v2245_v4  ;;  %v16691_v37 = vmax.f32 %v12492_v53, 0.0  ;;  %v3500_v5 = vadd.f32 %v3499_v62, %v11674_v39  ;;  %v5455_v53 = vsel %vm2477_vm12, %v12672_v50, %v5454_v60  ;;  %v7576_v60 = vld [vmem:[%s15317_s2 + $0x338] sm:$0xf0] }
 0x468   :  { %3879 = vmatpush.bf16.msra.mxu2 %v16686_v20  ;;  %4082 = vmatmul.bf16.vlgmr.msra.gmra.mxu1 %v16690_v55  ;;  %v12705_v55 = vrot.slane %v12663_v52, 3  ;;  %v5085_v4 = vsel %vm2468_vm8, %v12686_v40, %v5083_v29  ;;  %v5067_v39 = vsel %vm2462_vm7, %v12618_v27, %v12585_v38  ;;  %v12724_v29 = vor.u32 %v7984_v22, %v7584_v43  ;;  %v16697_v43 = vld [vmem:[#allocation73_spill] sm:$0xff] }
 0x469   :  { %v2253_v63 = vpack.c.bf16 %v2244_v57, %v16691_v37  ;;  %v5032_v14 = vunpack.c.l.b16 %v2254_v54  ;;  %v5033_v57 = vunpack.c.h.b16 %v2254_v54  ;;  %v12721_v56 = vadd.f32 %v3512_v2, %v3500_v5  ;;  %v16696_v2 = vld [vmem:[#allocation25_spill] sm:$0xff] }
 0x46a   :  { %3686 = vmatpush.bf16.msrb.mxu3 %v12566_v11  ;;  %4117 = vmatpush.bf16.msrb.mxu0 %v16693_v30  ;;  %v7982_v30 = vld [vmem:[%s15317_s2 + $0x334] sm:$0xf]  ;;  %16695 = vst [vmem:[#allocation212_spill] sm:$0xff] %v12724_v29  ;;  %v5087_v54 = vsel %vm2471_vm11, %v12689_v10, %v5085_v4  ;;  %v5456_v22 = vsel %vm2480_vm13, %v12705_v55, %v5455_v53  ;;  %vm6886_vm6 = vcmask 80896  }
 0x46b   :  { %v5030_v62 = vunpack.c.l.b16 %v2253_v63  ;;  %v5031_v37 = vunpack.c.h.b16 %v2253_v63  ;;  %v12729_v63 = vrot.slane %v12665_v34, 3  ;;  %v12731_v20 = vunpack.i.l.s16 %v5032_v14  ;;  %7765 = vmatmul.msk.bf16.vlgmr.msrb.gmra.mxu2 %vm3473_vm2, %v11705_v47  ;;  %v16699_v14 = vld [vmem:[#allocation103_spill] sm:$0xff] }
 0x46c   :  { %3880 = vmatpush.bf16.msra.mxu2 %v16692_v6  ;;  %v16694_v6 = vld [vmem:[#allocation90_spill] sm:$0xff]  ;;  %v12733_v28 = vunpack.i.l.s16 %v5033_v57  ;;  %v12743_v5 = vor.u32 %v7982_v30, %v7576_v60  ;;  %v5069_v4 = vsel %vm2465_vm10, %v12643_v32, %v5067_v39  ;;  %v12750_v57 = vpop.f32.mrf.mxu1  ;;  %v3501_v39 = vpop.f32.mrf.mxu3  ;;  %v5400_v42 = vsel %vm2468_vm8, %v10501_v13, %v10541_v31  ;;  %v7976_v31 = vld [vmem:[%s15317_s2 + $0x304] sm:$0xf] }
 0x46d   :  { %4295 = vmatpush.bf16.msrb.mxu1 %v16694_v6  ;;  %v12735_v11 = vunpack.i.l.s16 %v5030_v62  ;;  %v12737_v18 = vunpack.i.l.s16 %v5031_v37  ;;  %16700 = vst [vmem:[#allocation214_spill] sm:$0xff] %v12750_v57  ;;  %v7980_v62 = vld [vmem:[%s15317_s2 + $0x324] sm:$0xf]  ;;  %v12759_v30 = vrot.slane %v12731_v20, 1  ;;  %v3514_v60 = vpop.f32.mrf.mxu2  ;;  %v7978_v57 = vld [vmem:[%s15317_s2 + $0x314] sm:$0xf]  ;;  %v5772_v39 = vsel %vm2474_vm9, %v10685_v36, %v10682_v8 }
 0x46e   :  { %3687 = vmatpush.bf16.msrb.mxu3 %v12669_v59  ;;  %4118 = vmatpush.bf16.msrb.mxu0 %v16697_v43  ;;  %16698 = vst [vmem:[#allocation213_spill] sm:$0xff] %v12743_v5  ;;  %v12765_v53 = vrot.slane %v12733_v28, 1  ;;  %v7568_v43 = vld [vmem:[%s15317_s2 + $0x328] sm:$0xf0]  ;;  %v5089_v59 = vsel %vm2474_vm9, %v12729_v63, %v5087_v54  ;;  %v5778_v60 = vsel %vm2462_vm7, %v10806_v16, %v10756_v1 }
 0x46f   :  { %v12756_v47 = vrot.slane %v12735_v11, 2  ;;  %v12762_v37 = vrot.slane %v12737_v18, 2  ;;  %v5779_v24 = vsel %vm2465_vm10, %v16509_v58, %v5778_v60 }
 0x470   :  { %3881 = vmatpush.bf16.msra.mxu2 %v16696_v2  ;;  %v7560_v2 = vld [vmem:[%s15317_s2 + $0x318] sm:$0xf0] }
 0x471   :  { %4296 = vmatpush.bf16.msrb.mxu1 %v16699_v14  ;;  %v5462_v25 = vsel %vm2462_vm7, %v12759_v30, %v12756_v47  ;;  %v5091_v54 = vsel %vm2477_vm12, %v12762_v37, %v5089_v59  ;;  %v16703_v59 = vld [vmem:[#allocation107_spill] sm:$0xff] }
 0x472   :  { %3688 = vmatpush.bf16.msrb.mxu3 %v12724_v29  ;;  %v5071_v29 = vsel %vm2468_vm8, %v12652_v7, %v5069_v4  ;;  %4119 = vmatpush.bf16.msrb.mxu0 %v16702_v51  ;;  %v5464_v49 = vpack.c.b16 %v5462_v25, %v5456_v22  ;;  %v12806_v7 = vor.u32 %v7980_v62, %v7568_v43  ;;  %v7552_v25 = vld [vmem:[%s15317_s2 + $0x308] sm:$0xf0]  ;;  %v16706_v22 = vld [vmem:[#allocation20_spill] sm:$0xff]  ;;  %v16707_v62 = vld [vmem:[#allocation62_spill] sm:$0xff]  ;;  %s8293_s2 = smov 108  }
 0x473   :  { %v5073_v4 = vsel %vm2471_vm11, %v12672_v50, %v5071_v29  ;;  %v12808_v29 = vor.u32 %v7978_v57, %v7560_v2  ;;  %v5773_v60 = vsel %vm2477_vm12, %v16707_v62, %v5772_v39  ;;  %v16714_v51 = vld [vmem:[#allocation132_spill] sm:$0xff] }
 0x474   :  { %3882 = vmatpush.bf16.msra.mxu2 %v16701_v61  ;;  %v5093_v61 = vsel %vm2480_vm13, %v12765_v53, %v5091_v54  ;;  %v5075_v23 = vsel %vm2474_vm9, %v12705_v55, %v5073_v4  ;;  %16704 = vst [vmem:[#allocation215_spill] sm:$0xff] %v12806_v7  ;;  %5466 = vrot.lane.b32.xlu1 %v5464_v49, %s8292_s10  ;;  %v16708_v49 = vld [vmem:[#allocation98_spill] sm:$0xff]  ;;  %v3670_v39 = vpop.f32.mrf.mxu1 }
 0x475   :  { %4297 = vmatpush.bf16.msrb.mxu1 %v16703_v59  ;;  %16705 = vst [vmem:[#allocation216_spill] sm:$0xff] %v12808_v29  ;;  %v5095_v32 = vpack.c.b16 %v5093_v61, %v5093_v61  ;;  %v5077_v13 = vsel %vm2477_vm12, %v12756_v47, %v5075_v23  ;;  %v5780_v61 = vsel %vm2468_vm8, %v16518_v41, %v5779_v24  ;;  %v16709_v4 = vld [vmem:[#allocation26_spill] sm:$0xff]  ;;  %v16711_v24 = vld [vmem:[#allocation113_spill] sm:$0xff] }
 0x476   :  { %3689 = vmatpush.bf16.msrb.mxu3 %v12743_v5  ;;  %v5079_v2 = vsel %vm2480_vm13, %v12759_v30, %v5077_v13  ;;  %v5401_v23 = vsel %vm2471_vm11, %v10504_v45, %v5400_v42  ;;  %4120 = vmatpush.bf16.msrb.mxu0 %v16709_v4  ;;  %v12834_v13 = vor.u32 %v7976_v31, %v7552_v25  ;;  %v16712_v42 = vld [vmem:[#allocation63_spill] sm:$0xff]  ;;  %v16716_v4 = vld [vmem:[#allocation101_spill] sm:$0xff]  ;;  %v12849_v25 = vrot.slane %v12585_v38, 6 }
 0x477   :  { %5098 = vrot.lane.b32.xlu0 %v5095_v32, %s8292_s10  ;;  %v5094_v57 = vpack.c.b16 %v5079_v2, %v5079_v2  ;;  %v5402_v54 = vsel %vm2474_vm9, %v16708_v49, %v5401_v23  ;;  %v5774_v45 = vsel %vm2480_vm13, %v16711_v24, %v5773_v60  ;;  %v5386_v32 = vsel %vm2468_vm8, %v10685_v36, %v10682_v8  ;;  %v16713_v2 = vld [vmem:[#allocation111_spill] sm:$0xff]  ;;  %v16715_v49 = vld [vmem:[#allocation100_spill] sm:$0xff]  ;;  %v3538_v8 = vpop.f32.mrf.mxu2 }
 0x478   :  { %3883 = vmatpush.bf16.msra.mxu2 %v16706_v22  ;;  %16710 = vst [vmem:[#allocation62_spill] sm:$0xff] %v12834_v13  ;;  %v5403_v43 = vsel %vm2477_vm12, %v16712_v42, %v5402_v54  ;;  %v5782_v23 = vpack.c.b16 %v5780_v61, %v5774_v45  ;;  %v5410_v31 = vsel %vm2462_vm7, %v16716_v4, %v16715_v49  ;;  %v12852_v60 = vrot.slane %v12593_v33, 5  ;;  %v3525_v54 = vpop.f32.mrf.mxu3  ;;  %v16721_v42 = vld [vmem:[#allocation23_spill] sm:$0xff] }
 0x479   :  { %4298 = vmatpush.bf16.msrb.mxu1 %v16713_v2  ;;  %16717 = vst [vmem:[#allocation98_spill] sm:$0xff] %v12849_v25  ;;  %5096 = vrot.lane.b32.xlu2 %v5094_v57, %s8292_s10  ;;  %v5387_v36 = vsel %vm2471_vm11, %v16707_v62, %v5386_v32  ;;  %v5392_v61 = vsel %vm2462_vm7, %v16518_v41, %v16509_v58  ;;  %v12862_v4 = vrot.slane %v12645_v21, 2  ;;  %v12865_v45 = vrot.slane %v12663_v52, 1  ;;  %v16723_v57 = vld [vmem:[#allocation99_spill] sm:$0xff]  ;;  %v12878_v41 = vpop.f32.mrf.mxu0 }
 0x47a   :  { %4320 = vmatpush.bf16.msra.mxu0 %v16714_v51  ;;  %16718 = vst [vmem:[#allocation113_spill] sm:$0xff] %v12852_v60  ;;  %3690 = vmatpush.bf16.msrb.mxu3 %v12806_v7  ;;  %v3526_v39 = vadd.f32 %v3525_v54, %v12721_v56  ;;  %v16722_v49 = vrot.slane %v11868_v12, 1  ;;  %v5404_v62 = vsel %vm2480_vm13, %v16723_v57, %v5403_v43  ;;  %v12876_v58 = vrot.slane %v12605_v26, 4  ;;  %v16734_v12 = vld [vmem:[#allocation53_spill] sm:$0xff] }
 0x47b   :  { %16719 = vst [vmem:[#allocation63_spill] sm:$0xff] %v12862_v4  ;;  %v5388_v32 = vsel %vm2474_vm9, %v16711_v24, %v5387_v36  ;;  %v5412_v51 = vpack.c.b16 %v5410_v31, %v5404_v62  ;;  %v12883_v56 = vrot.slane %v12610_v35, 3  ;;  %v12886_v54 = vrot.slane %v12659_v15, 6  ;;  %v16728_v24 = vld [vmem:[#allocation136_spill] sm:$0xff] }
 0x47c   :  { %16720 = vst [vmem:[#allocation100_spill] sm:$0xff] %v12865_v45  ;;  %3884 = vmatpush.bf16.msra.mxu2 %v16721_v42  ;;  %4121 = vmatmul.bf16.vlgmr.msrb.gmra.mxu0 %v16722_v49  ;;  %v5389_v42 = vsel %vm2477_vm12, %v10756_v1, %v5388_v32  ;;  %v16727_v49 = vld [vmem:[#allocation117_spill] sm:$0xff]  ;;  %v12889_v43 = vadd.f32 %v3538_v8, %v3526_v39  ;;  %v12893_v36 = vrot.slane %v12731_v20, 7  ;;  %v12899_v1 = vrot.slane %v12598_v9, 5  ;;  %v16730_v32 = vld [vmem:[#allocation51_spill] sm:$0xff] }
 0x47d   :  { %16724 = vst [vmem:[#allocation101_spill] sm:$0xff] %v12876_v58  ;;  %4299 = vmatpush.bf16.msrb.mxu1 %v16727_v49  ;;  %v5821_v31 = vsel %vm2474_vm9, %v12852_v60, %v12849_v25  ;;  %5785 = vrot.lane.b32.xlu1 %v5782_v23, %s8289_s6  ;;  %v5827_v8 = vsel %vm2462_vm7, %v12865_v45, %v12862_v4  ;;  %v12907_v39 = vrot.slane %v12591_v3, 4  ;;  %v12910_v57 = vrot.slane %v12630_v44, 3 }
 0x47e   :  { %16725 = vst [vmem:[#allocation99_spill] sm:$0xff] %v12878_v41  ;;  %4321 = vmatpush.bf16.msra.mxu0 %v16728_v24  ;;  %3691 = vmatpush.bf16.msrb.mxu3 %v12808_v29  ;;  %v12913_v62 = vrot.slane %v12647_v17, 2  ;;  %v5390_v23 = vsel %vm2480_vm13, %v10806_v16, %v5389_v42  ;;  %v5828_v24 = vsel %vm2465_vm10, %v12735_v11, %v5827_v8  ;;  %v12925_v22 = vrot.slane %v12733_v28, 7  ;;  %v16732_v16 = vld [vmem:[#allocation95_spill] sm:$0xff]  ;;  %v12934_v42 = vpop.f32.mrf.mxu1 }
 0x47f   :  { %16726 = vst [vmem:[#allocation217_spill] sm:$0xff] %v12883_v56  ;;  %5414 = vrot.lane.b32.xlu0 %v5412_v51, %s8290_s7  ;;  %v5432_v41 = vsel %vm2468_vm8, %v12899_v1, %v12886_v54  ;;  %v5394_v29 = vpack.c.b16 %v5392_v61, %v5390_v23  ;;  %v5421_v51 = vsel %vm2468_vm8, %v12852_v60, %v12849_v25  ;;  %v12941_v61 = vrot.slane %v12665_v34, 1  ;;  %v3540_v23 = vpop.f32.mrf.mxu2  ;;  %v16738_v60 = vld [vmem:[#allocation72_spill] sm:$0xff] }
 0x480   :  { %16729 = vst [vmem:[#allocation218_spill] sm:$0xff] %v12893_v36  ;;  %3885 = vmatpush.bf16.msra.mxu2 %v16730_v32  ;;  %v5434_v7 = vsel %vm2471_vm11, %v12907_v39, %v5432_v41  ;;  %v16731_v32 = vld [vmem:[#allocation125_spill] sm:$0xff]  ;;  %v5822_v8 = vsel %vm2477_vm12, %v12876_v58, %v5821_v31  ;;  %v3527_v41 = vpop.f32.mrf.mxu3  ;;  %v5423_v31 = vsel %vm2471_vm11, %v12876_v58, %v5421_v51  ;;  %v16755_v58 = vld [vmem:[#allocation120_spill] sm:$0xff] }
 0x481   :  { %4300 = vmatpush.bf16.msrb.mxu1 %v16731_v32  ;;  %16733 = vst [vmem:[#allocation219_spill] sm:$0xff] %v12934_v42  ;;  %v5436_v5 = vsel %vm2474_vm9, %v12910_v57, %v5434_v7  ;;  %5397 = vrot.lane.b32.xlu2 %v5394_v29, %s8289_s6  ;;  %v5444_v7 = vsel %vm2462_vm7, %v12925_v22, %v12737_v18  ;;  %v16735_v41 = vld [vmem:[#allocation134_spill] sm:$0xff] }
 0x482   :  { %4322 = vmatpush.bf16.msra.mxu0 %v16732_v16  ;;  %3692 = vmatpush.bf16.msrb.mxu3 %v12834_v13  ;;  %v5829_v16 = vsel %vm2468_vm8, %v12893_v36, %v5828_v24  ;;  %v5438_v42 = vsel %vm2477_vm12, %v12913_v62, %v5436_v5  ;;  %v5425_v29 = vsel %vm2474_vm9, %v12883_v56, %v5423_v31  ;;  %v3709_v5 = vpop.f32.mrf.mxu0 }
 0x483   :  { %v5843_v24 = vsel %vm2474_vm9, %v12628_v19, %v12659_v15  ;;  %v5823_v51 = vsel %vm2480_vm13, %v12883_v56, %v5822_v8  ;;  %v5427_v23 = vsel %vm2477_vm12, %v12862_v4, %v5425_v29  ;;  %v5440_v31 = vsel %vm2480_vm13, %v12941_v61, %v5438_v42  ;;  %v16739_v8 = vld [vmem:[#allocation197_spill] sm:$0xff]  ;;  %v16741_v5 = vld [vmem:[#allocation130_spill] sm:$0xff] }
 0x484   :  { %3886 = vmatpush.bf16.msra.mxu2 %v16734_v12  ;;  %v5833_v12 = vpack.c.b16 %v5829_v16, %v5823_v51  ;;  %v5442_v13 = vsel %vm2462_vm7, %v12893_v36, %v12735_v11  ;;  %v5446_v25 = vpack.c.b16 %v5444_v7, %v5440_v31  ;;  %v5844_v29 = vsel %vm2477_vm12, %v12625_v0, %v5843_v24  ;;  %v16740_v16 = vld [vmem:[#allocation76_spill] sm:$0xff]  ;;  %v16744_v36 = vld [vmem:[#allocation138_spill] sm:$0xff]  ;;  %v16750_v24 = vld [vmem:[#allocation141_spill] sm:$0xff] }
 0x485   :  { %3693 = vmatmul.bf16.vlgmr.msrb.gmra.mxu3 %v11817_v48  ;;  %v5849_v48 = vsel %vm2462_vm7, %v12729_v63, %v12689_v10  ;;  %v5429_v42 = vsel %vm2480_vm13, %v12865_v45, %v5427_v23  ;;  %v16745_v4 = vld [vmem:[#allocation122_spill] sm:$0xff]  ;;  %v5457_v23 = vsel %vm2468_vm8, %v12628_v19, %v12659_v15 }
 0x486   :  { %3892 = vmatpush.bf16.msra.mxu3 %v16689_v46  ;;  %v16736_v46 = vld [vmem:[#allocation129_spill] sm:$0xff]  ;;  %4323 = vmatpush.bf16.msra.mxu0 %v16740_v16  ;;  %v5850_v51 = vsel %vm2465_vm10, %v12762_v37, %v5849_v48  ;;  %v16746_v16 = vld [vmem:[#allocation123_spill] sm:$0xff]  ;;  %v3722_v48 = vpop.f32.mrf.mxu1 }
 0x487   :  { %4301 = vmatpush.bf16.msrb.mxu1 %v16736_v46  ;;  %3887 = vmatmul.bf16.vlgmr.msra.gmra.mxu2 %v16739_v8  ;;  %v16742_v8 = vld [vmem:[#allocation58_spill] sm:$0xff]  ;;  %v5775_v56 = vsel %vm2462_vm7, %v16746_v16, %v16745_v4  ;;  %v16749_v48 = vld [vmem:[#allocation57_spill] sm:$0xff] }
 0x488   :  { %3931 = vmatpush.bf16.msrb.mxu2 %v16735_v41  ;;  %v16737_v41 = vld [vmem:[#allocation28_spill] sm:$0xff]  ;;  %v5769_v7 = vsel %vm2474_vm9, %v16742_v8, %v16741_v5  ;;  %5835 = vrot.lane.b32.xlu1 %v5833_v12, %s8291_s9  ;;  %v5845_v5 = vsel %vm2480_vm13, %v12686_v40, %v5844_v29  ;;  %v16747_v8 = vld [vmem:[#allocation70_spill] sm:$0xff]  ;;  %v3551_v16 = vpop.f32.mrf.mxu3  ;;  %v5851_v12 = vsel %vm2468_vm8, %v12765_v53, %v5850_v51  ;;  %v5802_v51 = vrot.slane %v12663_v52, 7 }
 0x489   :  { %v16743_v31 = vrot.slane %v16737_v41, 2  ;;  %5449 = vrot.lane.b32.xlu0 %v5446_v25, %s8291_s9  ;;  %v16748_v4 = vld [vmem:[#allocation54_spill] sm:$0xff]  ;;  %v5770_v25 = vsel %vm2477_vm12, %v16749_v48, %v5769_v7  ;;  %v5458_v29 = vsel %vm2471_vm11, %v12625_v0, %v5457_v23  ;;  %v16751_v7 = vrot.slane %v12610_v35, 1  ;;  %v16752_v48 = vld [vmem:[#allocation97_spill] sm:$0xff] }
 0x48a   :  { %3893 = vmatpush.bf16.msra.mxu3 %v16694_v6  ;;  %v5445_v6 = vpack.c.b16 %v5442_v13, %v5429_v42  ;;  %v15812_v42 = vrot.slane %v12605_v26, 2  ;;  %v3564_v13 = vpop.f32.mrf.mxu2  ;;  %4324 = vmatpush.bf16.msra.mxu0 %v16750_v24  ;;  %v13038_v41 = vpop.f32.mrf.mxu0  ;;  %v5853_v45 = vpack.c.b16 %v5851_v12, %v5845_v5  ;;  %v16757_v5 = vld [vmem:[#allocation145_spill] sm:$0xff] }
 0x48b   :  { %4346 = vmatpush.bf16.msra.mxu1 %v16738_v60  ;;  %16754 = vst [vmem:[#allocation197_spill] sm:$0xff] %v13038_v41  ;;  %v16758_v41 = vld [vmem:[#allocation94_spill] sm:$0xff] }
 0x48c   :  { %4302 = vmatmul.bf16.vlgmr.msrb.gmra.mxu1 %v16743_v31  ;;  %3932 = vmatpush.bf16.msrb.mxu2 %v16744_v36  ;;  %v5776_v31 = vsel %vm2465_vm10, %v16747_v8, %v5775_v56  ;;  %v5789_v56 = vrot.slane %v12593_v33, 3  ;;  %v3552_v8 = vadd.f32 %v3551_v16, %v12889_v43  ;;  %v6192_v23 = vsel %vm2462_vm7, %v16751_v7, %v15812_v42  ;;  %v16753_v36 = vld [vmem:[#allocation69_spill] sm:$0xff] }
 0x48d   :  { %5447 = vrot.lane.b32.xlu2 %v5445_v6, %s8291_s9  ;;  %v5459_v6 = vsel %vm2474_vm9, %v12686_v40, %v5458_v29  ;;  %v5804_v16 = vrot.slane %v12735_v11, 6  ;;  %v6193_v29 = vsel %vm2465_vm10, %v12645_v21, %v6192_v23  ;;  %v5771_v7 = vsel %vm2480_vm13, %v16755_v58, %v5770_v25 }
 0x48e   :  { %3894 = vmatpush.bf16.msra.mxu3 %v16699_v14  ;;  %v5777_v14 = vsel %vm2468_vm8, %v16753_v36, %v5776_v31  ;;  %v5460_v43 = vsel %vm2477_vm12, %v12689_v10, %v5459_v6  ;;  %v13036_v24 = vadd.f32 %v3564_v13, %v3552_v8  ;;  %v5463_v36 = vsel %vm2462_vm7, %v12765_v53, %v12762_v37  ;;  %v16756_v31 = vld [vmem:[#allocation59_spill] sm:$0xff] }
 0x48f   :  { %4347 = vmatpush.bf16.msra.mxu1 %v16748_v4  ;;  %v15813_v23 = vrot.slane %v12665_v34, 7  ;;  %4325 = vmatpush.bf16.msra.mxu0 %v16757_v5  ;;  %v5781_v12 = vpack.c.b16 %v5777_v14, %v5771_v7  ;;  %v5461_v58 = vsel %vm2480_vm13, %v12729_v63, %v5460_v43  ;;  %v5806_v25 = vrot.slane %v12731_v20, 5  ;;  %v13063_v14 = vpop.f32.mrf.mxu1 }
 0x490   :  { %3933 = vmatpush.bf16.msrb.mxu2 %v16752_v48  ;;  %v6194_v8 = vsel %vm2468_vm8, %v5802_v51, %v6193_v29  ;;  %v5465_v6 = vpack.c.b16 %v5463_v36, %v5461_v58  ;;  %16759 = vst [vmem:[#allocation130_spill] sm:$0xff] %v13063_v14  ;;  %5856 = vrot.lane.b32.xlu1 %v5853_v45, %s8292_s10  ;;  %v16760_v29 = vrot.slane %v12737_v18, 6  ;;  %v16761_v36 = vld [vmem:[#allocation46_spill] sm:$0xff]  ;;  %v3553_v58 = vpop.f32.mrf.mxu3  ;;  %v16771_v14 = vrot.slane %v12630_v44, 1 }
 0x491   :  { %v6195_v42 = vsel %vm2471_vm11, %v5804_v16, %v6194_v8  ;;  %v5809_v13 = vsel %vm2462_vm7, %v15813_v23, %v12647_v17  ;;  %5783 = vrot.lane.b32.xlu0 %v5781_v12, %s8289_s6  ;;  %v16762_v8 = vrot.slane %v12659_v15, 4  ;;  %v16763_v23 = vrot.slane %v12598_v9, 3  ;;  %v16765_v58 = vld [vmem:[#allocation142_spill] sm:$0xff] }
 0x492   :  { %3895 = vmatpush.bf16.msra.mxu3 %v16703_v59  ;;  %v5811_v7 = vsel %vm2465_vm10, %v16760_v29, %v5809_v13  ;;  %v5803_v12 = vsel %vm2462_vm7, %v5802_v51, %v12645_v21  ;;  %v3566_v43 = vpop.f32.mrf.mxu2  ;;  %v16764_v13 = vld [vmem:[#allocation147_spill] sm:$0xff]  ;;  %v6196_v29 = vsel %vm2474_vm9, %v5806_v25, %v6195_v42  ;;  %v16766_v59 = vrot.slane %v12733_v28, 5  ;;  %v3916_v51 = vpop.f32.mrf.mxu0 }
 0x493   :  { %4348 = vmatpush.bf16.msra.mxu1 %v16756_v31  ;;  %v5797_v5 = vsel %vm2474_vm9, %v16763_v23, %v16762_v8  ;;  %4326 = vmatpush.bf16.msra.mxu0 %v16764_v13  ;;  %v16767_v8 = vrot.slane %v12585_v38, 4  ;;  %v16769_v13 = vrot.slane %v12591_v3, 2  ;;  %v16774_v51 = vld [vmem:[#allocation166_spill] sm:$0xff] }
 0x494   :  { %3934 = vmatpush.bf16.msrb.mxu2 %v16758_v41  ;;  %v5813_v23 = vsel %vm2468_vm8, %v16766_v59, %v5811_v7 }
 0x495   :  { %5468 = vrot.lane.b32.xlu2 %v5465_v6, %s8292_s10  ;;  %v5805_v6 = vsel %vm2465_vm10, %v5804_v16, %v5803_v12  ;;  %v5790_v45 = vsel %vm2474_vm9, %v5789_v56, %v16767_v8  ;;  %v5799_v42 = vsel %vm2477_vm12, %v16769_v13, %v5797_v5  ;;  %v16770_v16 = vld [vmem:[#allocation15_spill] sm:$0xff]  ;;  %v16773_v5 = vrot.slane %v12605_v26, 2 }
 0x496   :  { %3896 = vmatpush.bf16.msra.mxu3 %v16713_v2  ;;  %v16768_v2 = vmov %v16767_v8  ;;  %v5801_v59 = vsel %vm2480_vm13, %v16771_v14, %v5799_v42  ;;  %v5807_v7 = vsel %vm2468_vm8, %v5806_v25, %v5805_v6  ;;  %v6216_v8 = vsel %vm2462_vm7, %v12910_v57, %v12907_v39  ;;  %v16776_v25 = vld [vmem:[#allocation78_spill] sm:$0xff] }
 0x497   :  { %4349 = vmatpush.bf16.msra.mxu1 %v16761_v36  ;;  %v6190_v43 = vsel %vm2480_vm13, %v5789_v56, %v16768_v2  ;;  %v16772_v2 = vld [vmem:[#allocation17_spill] sm:$0xff]  ;;  %v5815_v56 = vpack.c.b16 %v5813_v23, %v5801_v59  ;;  %v5792_v13 = vsel %vm2477_vm12, %v16773_v5, %v5790_v45  ;;  %v15817_v14 = vrot.slane %v16774_v51, 2  ;;  %v16780_v5 = vld [vmem:[#allocation91_spill] sm:$0xff]  ;;  %v16788_v51 = vld [vmem:[#allocation68_spill] sm:$0xff] }
 0x498   :  { %3935 = vmatpush.bf16.msrb.mxu2 %v16765_v58  ;;  %v6202_v12 = vpack.c.b16 %v6196_v29, %v6190_v43  ;;  %4327 = vmatpush.bf16.msra.mxu0 %v16772_v2  ;;  %v6217_v29 = vsel %vm2465_vm10, %v12913_v62, %v6216_v8  ;;  %v16775_v43 = vld [vmem:[#allocation146_spill] sm:$0xff]  ;;  %v16777_v6 = vrot.slane %v12610_v35, 1  ;;  %v16778_v45 = vld [vmem:[#allocation121_spill] sm:$0xff]  ;;  %v5846_v8 = vsel %vm2462_vm7, %v12705_v55, %v12672_v50 }
 0x499   :  { %5818 = vrot.lane.b32.xlu0 %v5815_v56, %s8290_s7  ;;  %v6218_v59 = vsel %vm2468_vm8, %v12941_v61, %v6217_v29  ;;  %v16779_v56 = vld [vmem:[#allocation148_spill] sm:$0xff]  ;;  %v5824_v29 = vsel %vm2474_vm9, %v12899_v1, %v12886_v54 }
 0x49a   :  { %3897 = vmatpush.bf16.msra.mxu3 %v16727_v49  ;;  %v5794_v42 = vsel %vm2480_vm13, %v16777_v6, %v5792_v13  ;;  %v3929_v49 = vpop.f32.mrf.mxu1  ;;  %6204 = vrot.lane.b32.xlu1 %v6202_v12, %s8290_s7  ;;  %v5847_v12 = vsel %vm2465_vm10, %v12756_v47, %v5846_v8  ;;  %v5840_v13 = vsel %vm2474_vm9, %v12618_v27, %v12585_v38 }
 0x49b   :  { %4350 = vmatpush.bf16.msra.mxu1 %v16770_v16  ;;  %v5814_v23 = vpack.c.b16 %v5807_v7, %v5794_v42  ;;  %4328 = vmatmul.bf16.vlgmr.msra.gmra.mxu0 %v15817_v14  ;;  %v6219_v49 = vsel %vm2471_vm11, %v12737_v18, %v6218_v59  ;;  %v5830_v7 = vsel %vm2462_vm7, %v12941_v61, %v12913_v62  ;;  %v6173_v42 = vrot.slane %v12630_v44, 7  ;;  %v16782_v61 = vld [vmem:[#allocation85_spill] sm:$0xff] }
 0x49c   :  { %3936 = vmatpush.bf16.msrb.mxu2 %v16775_v43  ;;  %4372 = vmatpush.bf16.msrb.mxu0 %v16776_v25  ;;  %v5831_v6 = vsel %vm2465_vm10, %v12737_v18, %v5830_v7  ;;  %v6175_v62 = vrot.slane %v12647_v17, 6  ;;  %v6210_v8 = vsel %vm2480_vm13, %v12899_v1, %v12886_v54  ;;  %v6220_v14 = vsel %vm2474_vm9, %v12925_v22, %v6219_v49  ;;  %v16783_v25 = vld [vmem:[#allocation42_spill] sm:$0xff]  ;;  %v16784_v1 = vld [vmem:[#allocation67_spill] sm:$0xff]  ;;  %v16785_v49 = vld [vmem:[#allocation44_spill] sm:$0xff] }
 0x49d   :  { %5816 = vrot.lane.b32.xlu2 %v5814_v23, %s8290_s7  ;;  %v16781_v23 = vld [vmem:[#allocation163_spill] sm:$0xff]  ;;  %v6163_v7 = vrot.slane %v12610_v35, 7  ;;  %v5841_v59 = vsel %vm2477_vm12, %v16783_v25, %v5840_v13  ;;  %v5825_v2 = vsel %vm2477_vm12, %v12907_v39, %v5824_v29  ;;  %v6165_v54 = vrot.slane %v12645_v21, 6  ;;  %v13179_v21 = vpop.f32.mrf.mxu0 }
 0x49e   :  { %3898 = vmatpush.bf16.msra.mxu3 %v16731_v32  ;;  %v5832_v32 = vsel %vm2468_vm8, %v12925_v22, %v5831_v6  ;;  %v5842_v35 = vsel %vm2480_vm13, %v16785_v49, %v5841_v59  ;;  %v6174_v13 = vsel %vm2462_vm7, %v6173_v42, %v12591_v3  ;;  %v6177_v39 = vrot.slane %v12665_v34, 5  ;;  %v16786_v29 = vld [vmem:[#allocation79_spill] sm:$0xff]  ;;  %v16787_v22 = vld [vmem:[#allocation150_spill] sm:$0xff] }
 0x49f   :  { %4351 = vmatpush.bf16.msra.mxu1 %v16778_v45  ;;  %v6222_v6 = vpack.c.b16 %v6220_v14, %v6210_v8  ;;  %v6179_v59 = vrot.slane %v12737_v18, 4  ;;  %v13192_v14 = vsel %vm2480_vm13, %v12628_v19, %v12659_v15  ;;  %v6160_v19 = vrot.slane %v12659_v15, 2 }
 0x4a0   :  { %3937 = vmatpush.bf16.msrb.mxu2 %v16779_v56  ;;  %4373 = vmatpush.bf16.msrb.mxu0 %v16780_v5  ;;  %v5848_v5 = vsel %vm2468_vm8, %v12759_v30, %v5847_v12  ;;  %v5826_v12 = vsel %vm2480_vm13, %v12910_v57, %v5825_v2  ;;  %v16789_v57 = vld [vmem:[#allocation22_spill] sm:$0xff] }
 0x4a1   :  { %v16790_v2 = vrot.slane %v16789_v57, 1  ;;  %v5834_v42 = vpack.c.b16 %v5832_v32, %v5826_v12 }
 0x4a2   :  { %3899 = vmatpush.bf16.msra.mxu3 %v16736_v46  ;;  %v5852_v46 = vpack.c.b16 %v5848_v5, %v5842_v35  ;;  %v16791_v5 = vld [vmem:[#allocation169_spill] sm:$0xff]  ;;  %6225 = vrot.lane.b32.xlu1 %v6222_v6, %s8291_s9 }
 0x4a3   :  { %4352 = vmatpush.bf16.msra.mxu1 %v16782_v61 }
 0x4a4   :  { %3938 = vmatpush.bf16.msrb.mxu2 %v16784_v1  ;;  %4374 = vmatpush.bf16.msrb.mxu0 %v16787_v22  ;;  %v6164_v1 = vsel %vm2462_vm7, %v6163_v7, %v12605_v26  ;;  %v6235_v26 = vsel %vm2462_vm7, %v12686_v40, %v12625_v0  ;;  %v6230_v0 = vsel %vm2462_vm7, %v16785_v49, %v16783_v25  ;;  %v16794_v40 = vrot.slane %v16781_v23, 2  ;;  %v16890_v22 = vld [vmem:[#allocation176_spill] sm:$0xff] }
 0x4a5   :  { %3900 = vmatmul.bf16.vlgmr.msra.gmra.mxu3 %v16790_v2  ;;  %v6166_v35 = vsel %vm2465_vm10, %v6165_v54, %v6164_v1  ;;  %v6236_v7 = vsel %vm2465_vm10, %v12689_v10, %v6235_v26  ;;  %v6181_v1 = vrot.slane %v12733_v28, 3  ;;  %v16796_v10 = vld [vmem:[#allocation154_spill] sm:$0xff]  ;;  %5854 = vrot.lane.b32.xlu0 %v5852_v46, %s8292_s10  ;;  %v6171_v49 = vrot.slane %v12731_v20, 3 }
 0x4a6   :  { %3944 = vmatpush.bf16.msrb.mxu3 %v16738_v60  ;;  %v6176_v60 = vsel %vm2465_vm10, %v6175_v62, %v6174_v13  ;;  %v16792_v62 = vld [vmem:[#allocation149_spill] sm:$0xff]  ;;  %v6169_v13 = vrot.slane %v12735_v11, 4  ;;  %v6237_v12 = vsel %vm2468_vm8, %v12729_v63, %v6236_v7  ;;  %5837 = vrot.lane.b32.xlu2 %v5834_v42, %s8291_s9  ;;  %v3590_v42 = vpop.f32.mrf.mxu2  ;;  %v16801_v26 = vld [vmem:[#allocation66_spill] sm:$0xff]  ;;  %v16803_v7 = vrot.slane %v12591_v3, 2 }
 0x4a7   :  { %4353 = vmatpush.bf16.msra.mxu1 %v16788_v51  ;;  %v16793_v8 = vrot.slane %v16792_v62, 1  ;;  %v6178_v32 = vsel %vm2468_vm8, %v6177_v39, %v6176_v60  ;;  %v6231_v60 = vsel %vm2465_vm10, %v12672_v50, %v6230_v0  ;;  %v6238_v39 = vsel %vm2471_vm11, %v12762_v37, %v6237_v12  ;;  %v16798_v62 = vld [vmem:[#allocation151_spill] sm:$0xff]  ;;  %v16807_v3 = vld [vmem:[#allocation157_spill] sm:$0xff] }
 0x4a8   :  { %3983 = vmatpush.bf16.msra.mxu2 %v16786_v29  ;;  %v6167_v29 = vrot.slane %v12663_v52, 5  ;;  %v13205_v52 = vsel %vm2480_vm13, %v12618_v27, %v12585_v38  ;;  %v16795_v27 = vld [vmem:[#allocation71_spill] sm:$0xff]  ;;  %v6180_v54 = vsel %vm2471_vm11, %v6179_v59, %v6178_v32  ;;  %4375 = vmatpush.bf16.msrb.mxu0 %v16796_v10  ;;  %v6232_v6 = vsel %vm2468_vm8, %v12705_v55, %v6231_v60  ;;  %v16797_v59 = vld [vmem:[#allocation172_spill] sm:$0xff]  ;;  %v16886_v10 = vld [vmem:[#allocation62_spill] sm:$0xff] }
 0x4a9   :  { %3939 = vmatmul.bf16.vlgmr.msrb.gmra.mxu2 %v16793_v8  ;;  %v6161_v50 = vrot.slane %v12598_v9, 1  ;;  %v13239_v46 = vsel %vm2474_vm9, %v12765_v53, %v6238_v39  ;;  %v6233_v20 = vsel %vm2471_vm11, %v12756_v47, %v6232_v6  ;;  %v6157_v55 = vrot.slane %v12585_v38, 2  ;;  %v3968_v47 = vpop.f32.mrf.mxu0  ;;  %v16802_v32 = vld [vmem:[#allocation63_spill] sm:$0xff]  ;;  %v16808_v39 = vld [vmem:[#allocation100_spill] sm:$0xff] }
 0x4aa   :  { %3945 = vmatpush.bf16.msrb.mxu3 %v16748_v4  ;;  %4354 = vmatmul.bf16.vlgmr.msra.gmra.mxu1 %v16794_v40  ;;  %v6168_v25 = vsel %vm2468_vm8, %v6167_v29, %v6166_v35  ;;  %v3577_v29 = vpop.f32.mrf.mxu3  ;;  %v6158_v37 = vrot.slane %v12593_v33, 1  ;;  %v6241_v57 = vpack.c.b16 %v13239_v46, %v13192_v14  ;;  %v13250_v2 = vsel %vm2474_vm9, %v12759_v30, %v6233_v20  ;;  %v16799_v35 = vld [vmem:[#allocation101_spill] sm:$0xff]  ;;  %v16806_v60 = vld [vmem:[#allocation39_spill] sm:$0xff]  ;;  %v16809_v20 = vld [vmem:[#allocation158_spill] sm:$0xff] }
 0x4ab   :  { %4403 = vmatpush.bf16.msrb.mxu1 %v16791_v5  ;;  %v6170_v63 = vsel %vm2471_vm11, %v6169_v13, %v6168_v25  ;;  %v3578_v53 = vadd.f32 %v3577_v29, %v13036_v24  ;;  %v6182_v8 = vsel %vm2474_vm9, %v6181_v1, %v6180_v54  ;;  %v16800_v13 = vld [vmem:[#allocation217_spill] sm:$0xff]  ;;  %v6240_v33 = vpack.c.b16 %v13250_v2, %v13205_v52  ;;  %v16805_v54 = vld [vmem:[#allocation178_spill] sm:$0xff] }
 0x4ac   :  { %3984 = vmatpush.bf16.msra.mxu2 %v16795_v27  ;;  %v6211_v38 = vsel %vm2462_vm7, %v16800_v13, %v16799_v35  ;;  %4376 = vmatpush.bf16.msrb.mxu0 %v16801_v26  ;;  %v6172_v30 = vsel %vm2474_vm9, %v6171_v49, %v6170_v63  ;;  %v16804_v0 = vrot.slane %v12630_v44, 1  ;;  %v6162_v12 = vsel %vm2480_vm13, %v6161_v50, %v6160_v19  ;;  %v13279_v63 = vpop.f32.mrf.mxu1  ;;  %v16814_v47 = vld [vmem:[#allocation218_spill] sm:$0xff]  ;;  %v16879_v26 = vld [vmem:[#allocation199_spill] sm:$0xff] }
 0x4ad   :  { %v6212_v24 = vsel %vm2465_vm10, %v16802_v32, %v6211_v38  ;;  %v3591_v1 = vadd.f32 %v3590_v42, %v3578_v53  ;;  %v6184_v25 = vpack.c.b16 %v6182_v8, %v6162_v12  ;;  %v6159_v49 = vsel %vm2480_vm13, %v6158_v37, %v6157_v55  ;;  %v16812_v37 = vld [vmem:[#allocation36_spill] sm:$0xff]  ;;  %v16813_v42 = vld [vmem:[#allocation31_spill] sm:$0xff]  ;;  %v16818_v38 = vld [vmem:[#allocation98_spill] sm:$0xff] }
 0x4ae   :  { %3946 = vmatpush.bf16.msrb.mxu3 %v16756_v31  ;;  %v6197_v40 = vsel %vm2462_vm7, %v16804_v0, %v16803_v7  ;;  %v6183_v44 = vpack.c.b16 %v6172_v30, %v6159_v49  ;;  %v6213_v6 = vsel %vm2468_vm8, %v16808_v39, %v6212_v24  ;;  %v16810_v19 = vrot.slane %v12665_v34, 7  ;;  %v3592_v53 = vpop.f32.mrf.mxu2  ;;  %v16815_v34 = vld [vmem:[#allocation160_spill] sm:$0xff]  ;;  %v16819_v30 = vld [vmem:[#allocation113_spill] sm:$0xff]  ;;  %v16840_v14 = vld [vmem:[#allocation102_spill] sm:$0xff] }
 0x4af   :  { %4404 = vmatpush.bf16.msrb.mxu1 %v16797_v59  ;;  %v6198_v52 = vsel %vm2465_vm10, %v12647_v17, %v6197_v40  ;;  %6187 = vrot.lane.b32.xlu0 %v6184_v25, %s8289_s6  ;;  %v6214_v17 = vsel %vm2471_vm11, %v12735_v11, %v6213_v6  ;;  %v16811_v29 = vrot.slane %v12737_v18, 6  ;;  %v16816_v8 = vrot.slane %v12733_v28, 5  ;;  %v16817_v18 = vld [vmem:[#allocation87_spill] sm:$0xff]  ;;  %v16820_v24 = vld [vmem:[#allocation9_spill] sm:$0xff]  ;;  %v16824_v49 = vld [vmem:[#allocation164_spill] sm:$0xff] }
 0x4b0   :  { %3985 = vmatpush.bf16.msra.mxu2 %v16798_v62  ;;  %4377 = vmatpush.bf16.msrb.mxu0 %v16809_v20  ;;  %v6199_v50 = vsel %vm2468_vm8, %v16810_v19, %v6198_v52  ;;  %v6215_v11 = vsel %vm2474_vm9, %v16814_v47, %v6214_v17  ;;  %v15823_v13 = vrot.slane %v16817_v18, 2  ;;  %v6209_v32 = vsel %vm2480_vm13, %v16819_v30, %v16818_v38  ;;  %v16823_v28 = vld [vmem:[#allocation159_spill] sm:$0xff]  ;;  %v16826_v6 = vld [vmem:[#allocation170_spill] sm:$0xff]  ;;  %v16828_v19 = vld [vmem:[#allocation161_spill] sm:$0xff] }
 0x4b1   :  { %6185 = vrot.lane.b32.xlu2 %v6183_v44, %s8289_s6  ;;  %v6200_v55 = vsel %vm2471_vm11, %v16811_v29, %v6199_v50  ;;  %v6221_v7 = vpack.c.b16 %v6215_v11, %v6209_v32  ;;  %v16821_v0 = vrot.slane %v12659_v15, 4  ;;  %v16822_v40 = vrot.slane %v12598_v9, 3  ;;  %v16825_v44 = vld [vmem:[#allocation177_spill] sm:$0xff]  ;;  %v16827_v9 = vld [vmem:[#allocation202_spill] sm:$0xff]  ;;  %v16830_v29 = vld [vmem:[#allocation203_spill] sm:$0xff]  ;;  %v13346_v32 = vpop.permute.xlu2 %4960  ;;  %s8294_s6 = smov 12  }
 0x4b2   :  { %3947 = vmatpush.bf16.msrb.mxu3 %v16761_v36  ;;  %v3579_v2 = vpop.f32.mrf.mxu3  ;;  %v6201_v35 = vsel %vm2474_vm9, %v16816_v8, %v6200_v55  ;;  %v15822_v39 = vrot.slane %v16825_v44, 2  ;;  %v16829_v50 = vld [vmem:[#allocation173_spill] sm:$0xff]  ;;  %v16831_v55 = vld [vmem:[#allocation168_spill] sm:$0xff]  ;;  %v16833_v53 = vld [vmem:[#allocation179_spill] sm:$0xff]  ;;  %16839 = vst [vmem:[#allocation58_spill] sm:$0xff] %v13346_v32 }
 0x4b3   :  { %4405 = vmatpush.bf16.msrb.mxu1 %v16805_v54  ;;  %v6191_v12 = vsel %vm2480_vm13, %v16822_v40, %v16821_v0  ;;  %v16832_v2 = vld [vmem:[#allocation89_spill] sm:$0xff]  ;;  %v16834_v47 = vld [vmem:[#allocation204_spill] sm:$0xff]  ;;  %v16835_v11 = vld [vmem:[#allocation155_spill] sm:$0xff] }
 0x4b4   :  { %3986 = vmatpush.bf16.msra.mxu2 %v16807_v3  ;;  %4378 = vmatpush.bf16.msrb.mxu0 %v16815_v34  ;;  %v6203_v52 = vpack.c.b16 %v6201_v35, %v6191_v12  ;;  %v3981_v25 = vpop.f32.mrf.mxu1  ;;  %v16836_v8 = vrot.slane %v16835_v11, 1  ;;  %v16837_v38 = vld [vmem:[#allocation153_spill] sm:$0xff]  ;;  %v16841_v46 = vld [vmem:[#allocation182_spill] sm:$0xff]  ;;  %v16845_v12 = vld [vmem:[#allocation187_spill] sm:$0xff] }
 0x4b5   :  { %v16838_v30 = vrot.slane %v16837_v38, 1  ;;  %v16844_v0 = vld [vmem:[#allocation106_spill] sm:$0xff]  ;;  %v16847_v25 = vld [vmem:[#allocation24_spill] sm:$0xff]  ;;  %v16850_v38 = vld [vmem:[#allocation189_spill] sm:$0xff] }
 0x4b6   :  { %3948 = vmatpush.bf16.msrb.mxu3 %v16770_v16  ;;  %v16848_v11 = vld [vmem:[#allocation210_spill] sm:$0xff]  ;;  %v16860_v34 = vld [vmem:[#allocation196_spill] sm:$0xff]  ;;  %v16905_v16 = vld [vmem:[#allocation13_spill] sm:$0xff] }
 0x4b7   :  { %4437 = vmatpush.bf16.msra.mxu1 %v16806_v60  ;;  %6223 = vrot.lane.b32.xlu0 %v6221_v7, %s8291_s9  ;;  %v16919_v36 = vld [vmem:[#allocation56_spill] sm:$0xff]  ;;  %v16922_v32 = vld [vmem:[#allocation181_spill] sm:$0xff] }
 0x4b8   :  { %3987 = vmatpush.bf16.msra.mxu2 %v16813_v42  ;;  %4379 = vmatpush.bf16.msrb.mxu0 %v16824_v49  ;;  %v16855_v49 = vld [vmem:[#allocation194_spill] sm:$0xff]  ;;  %v16923_v44 = vrot.slane %v16922_v32, 1  ;;  %v16930_v32 = vld [vmem:[#allocation92_spill] sm:$0xff] }
 0x4b9   :  { %6206 = vrot.lane.b32.xlu2 %v6203_v52, %s8290_s7  ;;  %v16846_v52 = vld [vmem:[#allocation208_spill] sm:$0xff]  ;;  %s8295_s7 = smov [#allocation2]  }
 0x4ba   :  { %3949 = vmatpush.bf16.msrb.mxu3 %v16778_v45  ;;  %7768 = vmatmul.msk.bf16.vlgmr.msrb.gmra.mxu1 %vm3473_vm2, %v15823_v13  ;;  %v3603_v15 = vpop.f32.mrf.mxu3  ;;  %v16853_v13 = vld [vmem:[#allocation45_spill] sm:$0xff]  ;;  %s6905_s9 = sshll.u32 %s8295_s7, 4  ;;  %s6906_s9 = int_to_ptr.vmem [resolvable:$true] %s6905_s9 }
 0x4bb   :  { %4438 = vmatpush.bf16.msra.mxu1 %v16812_v37  ;;  %v13323_v17 = vadd.f32 %v3603_v15, %v3591_v1  ;;  %4380 = vmatmul.bf16.vlgmr.msrb.gmra.mxu0 %v15822_v39  ;;  %v4018_v1 = vpop.f32.mrf.mxu0  ;;  %v15824_v15 = vrot.slane %v16847_v25, 2  ;;  %v16852_v39 = vld [vmem:[#allocation211_spill] sm:$0xff]  ;;  %v16904_v45 = vld [vmem:[#allocation205_spill] sm:$0xff] }
 0x4bc   :  { %3988 = vmatpush.bf16.msra.mxu2 %v16823_v28  ;;  %4424 = vmatpush.bf16.msra.mxu0 %v16826_v6 }
 0x4be   :  { %3950 = vmatpush.bf16.msrb.mxu3 %v16782_v61  ;;  %v16900_v61 = vld [vmem:[#allocation18_spill] sm:$0xff] }
 0x4bf   :  { %4439 = vmatpush.bf16.msra.mxu1 %v16820_v24  ;;  %6244 = vrot.lane.b32.xlu0 %v6241_v57, %s8292_s10  ;;  %v16842_v57 = vld [vmem:[#allocation206_spill] sm:$0xff] }
 0x4c0   :  { %3989 = vmatpush.bf16.msra.mxu2 %v16828_v19  ;;  %4425 = vmatpush.bf16.msra.mxu0 %v16829_v50  ;;  %v3629_v7 = vpop.f32.mrf.mxu2 }
 0x4c1   :  { %6242 = vrot.lane.b32.xlu2 %v6240_v33, %s8292_s10  ;;  %v13351_v33 = vpop.permute.xlu1 %4982 }
 0x4c2   :  { %3951 = vmatpush.bf16.msrb.mxu3 %v16788_v51  ;;  %v3605_v35 = vpop.f32.mrf.mxu3  ;;  %16843 = vst [vmem:[#allocation122_spill] sm:$0xff] %v13351_v33  ;;  %v16898_v51 = vld [vmem:[#allocation10_spill] sm:$0xff] }
 0x4c3   :  { %4440 = vmatpush.bf16.msra.mxu1 %v16827_v9  ;;  %v4020_v40 = vpop.f32.mrf.mxu0 }
 0x4c4   :  { %3990 = vmatpush.bf16.msra.mxu2 %v16831_v55  ;;  %4426 = vmatpush.bf16.msra.mxu0 %v16833_v53  ;;  %v16854_v53 = vld [vmem:[#allocation115_spill] sm:$0xff] }
 0x4c5   :  { %3952 = vmatmul.bf16.vlgmr.msrb.gmra.mxu3 %v16836_v8  ;;  %v16849_v8 = vld [vmem:[#allocation110_spill] sm:$0xff] }
 0x4c6   :  { %4001 = vmatpush.bf16.msra.mxu3 %v16791_v5  ;;  %v4031_v35 = vpop.f32.mrf.mxu1 }
 0x4c7   :  { %4441 = vmatpush.bf16.msra.mxu1 %v16830_v29  ;;  %3991 = vmatmul.bf16.vlgmr.msra.gmra.mxu2 %v16838_v30  ;;  %v13365_v30 = vpop.permute.xlu2 %4984  ;;  %v13367_v40 = vadd.f32 %v4031_v35, %v4018_v1  ;;  %v16857_v1 = vld [vmem:[#allocation33_spill] sm:$0xff]  ;;  %v16858_v35 = vld [vmem:[#allocation124_spill] sm:$0xff] }
 0x4c8   :  { %4048 = vmatpush.bf16.msrb.mxu2 %v16832_v2  ;;  %4427 = vmatpush.bf16.msra.mxu0 %v16841_v46  ;;  %16851 = vst [vmem:[#allocation123_spill] sm:$0xff] %v13365_v30  ;;  %v3631_v46 = vpop.f32.mrf.mxu2  ;;  %v15851_v30 = vrot.slane %v16890_v22, 2 }
 0x4ca   :  { %4002 = vmatpush.bf16.msra.mxu3 %v16797_v59  ;;  %v3616_v50 = vpop.f32.mrf.mxu3 }
 0x4cb   :  { %4442 = vmatpush.bf16.msra.mxu1 %v16834_v47  ;;  %v3630_v6 = vadd.f32 %v3629_v7, %v3616_v50  ;;  %v16862_v7 = vld [vmem:[#allocation212_spill] sm:$0xff] }
 0x4cc   :  { %4049 = vmatpush.bf16.msrb.mxu2 %v16840_v14  ;;  %4428 = vmatpush.bf16.msra.mxu0 %v16845_v12  ;;  %v15826_v12 = vrot.slane %v16853_v13, 1 }
 0x4ce   :  { %4003 = vmatpush.bf16.msra.mxu3 %v16805_v54  ;;  %v4033_v46 = vpop.f32.mrf.mxu1  ;;  %v16882_v54 = vld [vmem:[#allocation75_spill] sm:$0xff] }
 0x4cf   :  { %4443 = vmatpush.bf16.msra.mxu1 %v16842_v57  ;;  %v16868_v46 = vld [vmem:[#allocation213_spill] sm:$0xff] }
 0x4d0   :  { %4050 = vmatpush.bf16.msrb.mxu2 %v16844_v0  ;;  %4429 = vmatpush.bf16.msra.mxu0 %v16850_v38  ;;  %v16859_v38 = vld [vmem:[#allocation19_spill] sm:$0xff] }
 0x4d2   :  { %4035 = vmatpush.bf16.msrb.mxu3 %v16806_v60  ;;  %v16881_v60 = vld [vmem:[#allocation216_spill] sm:$0xff] }
 0x4d3   :  { %4444 = vmatpush.bf16.msra.mxu1 %v16846_v52  ;;  %v13384_v50 = vpop.permute.xlu2 %5096 }
 0x4d4   :  { %4051 = vmatpush.bf16.msrb.mxu2 %v16849_v8  ;;  %4430 = vmatpush.bf16.msra.mxu0 %v16855_v49  ;;  %16861 = vst [vmem:[#allocation57_spill] sm:$0xff] %v13384_v50  ;;  %v16863_v49 = vld [vmem:[#allocation128_spill] sm:$0xff] }
 0x4d5   :  { %7766 = vmatmul.msk.bf16.vlgmr.msra.gmra.mxu3 %vm3473_vm2, %v15826_v12  ;;  %v13389_v12 = vpop.permute.xlu0 %4962  ;;  %v16871_v50 = vld [vmem:[#allocation80_spill] sm:$0xff] }
 0x4d6   :  { %4036 = vmatpush.bf16.msrb.mxu3 %v16812_v37  ;;  %4445 = vmatmul.bf16.vlgmr.msra.gmra.mxu1 %v15824_v15  ;;  %v13374_v15 = vpop.permute.xlu1 %5006  ;;  %16864 = vst [vmem:[#allocation69_spill] sm:$0xff] %v13389_v12 }
 0x4d7   :  { %4489 = vmatpush.bf16.msrb.mxu1 %v16848_v11  ;;  %16856 = vst [vmem:[#allocation70_spill] sm:$0xff] %v13374_v15  ;;  %v3618_v15 = vpop.f32.mrf.mxu3 }
 0x4d8   :  { %4052 = vmatpush.bf16.msrb.mxu2 %v16854_v53  ;;  %4431 = vmatpush.bf16.msra.mxu0 %v16859_v38  ;;  %v13400_v15 = vpop.f32.mrf.mxu0 }
 0x4d9   :  { %16872 = vst [vmem:[#allocation163_spill] sm:$0xff] %v13400_v15 }
 0x4da   :  { %4037 = vmatpush.bf16.msrb.mxu3 %v16820_v24  ;;  %v16865_v24 = vld [vmem:[#allocation28_spill] sm:$0xff] }
 0x4db   :  { %4490 = vmatpush.bf16.msrb.mxu1 %v16852_v39  ;;  %v16866_v20 = vrot.slane %v16865_v24, 2  ;;  %v13403_v37 = vpop.permute.xlu2 %5397  ;;  %v16875_v24 = vld [vmem:[#allocation215_spill] sm:$0xff] }
 0x4dc   :  { %4053 = vmatpush.bf16.msrb.mxu2 %v16858_v35  ;;  %4476 = vmatpush.bf16.msrb.mxu0 %v16860_v34  ;;  %v16870_v34 = vld [vmem:[#allocation135_spill] sm:$0xff]  ;;  %16874 = vst [vmem:[#allocation42_spill] sm:$0xff] %v13403_v37 }
 0x4dd   :  { %4432 = vmatmul.bf16.vlgmr.msra.gmra.mxu0 %v16866_v20  ;;  %v16876_v20 = vld [vmem:[#allocation156_spill] sm:$0xff] }
 0x4de   :  { %4038 = vmatpush.bf16.msrb.mxu3 %v16827_v9  ;;  %v16867_v9 = vld [vmem:[#allocation198_spill] sm:$0xff]  ;;  %v13395_v38 = vpop.permute.xlu1 %5395 }
 0x4df   :  { %4491 = vmatpush.bf16.msrb.mxu1 %v16857_v1  ;;  %16869 = vst [vmem:[#allocation120_spill] sm:$0xff] %v13395_v38  ;;  %v16878_v38 = vld [vmem:[#allocation37_spill] sm:$0xff] }
 0x4e0   :  { %4054 = vmatpush.bf16.msrb.mxu2 %v16863_v49  ;;  %4477 = vmatpush.bf16.msrb.mxu0 %v16867_v9  ;;  %v16877_v9 = vrot.slane %v16876_v20, 1  ;;  %v4072_v37 = vpop.f32.mrf.mxu0 }
 0x4e1   :  { %v16892_v37 = vld [vmem:[#allocation140_spill] sm:$0xff] }
 0x4e2   :  { %4039 = vmatpush.bf16.msrb.mxu3 %v16830_v29  ;;  %v16873_v29 = vld [vmem:[#allocation43_spill] sm:$0xff] }
 0x4e3   :  { %4492 = vmatpush.bf16.msrb.mxu1 %v16862_v7 }
 0x4e4   :  { %4055 = vmatpush.bf16.msrb.mxu2 %v16870_v34  ;;  %4478 = vmatpush.bf16.msrb.mxu0 %v16873_v29  ;;  %v3681_v29 = vpop.f32.mrf.mxu2 }
 0x4e6   :  { %4040 = vmatpush.bf16.msrb.mxu3 %v16834_v47  ;;  %v13411_v47 = vpop.permute.xlu0 %5004  ;;  %v13417_v20 = vpop.permute.xlu1 %5416 }
 0x4e7   :  { %4493 = vmatpush.bf16.msrb.mxu1 %v16868_v46  ;;  %4056 = vmatmul.bf16.vlgmr.msrb.gmra.mxu2 %v16877_v9  ;;  %16880 = vst [vmem:[#allocation44_spill] sm:$0xff] %v13411_v47  ;;  %v16884_v9 = vld [vmem:[#allocation40_spill] sm:$0xff]  ;;  %v16896_v47 = vld [vmem:[#allocation30_spill] sm:$0xff] }
 0x4e8   :  { %4100 = vmatpush.bf16.msra.mxu2 %v16871_v50  ;;  %4479 = vmatpush.bf16.msrb.mxu0 %v16879_v26  ;;  %16883 = vst [vmem:[#allocation22_spill] sm:$0xff] %v13417_v20  ;;  %v16887_v26 = vld [vmem:[#allocation152_spill] sm:$0xff] }
 0x4e9   :  { %v16888_v59 = vrot.slane %v16887_v26, 1  ;;  %v16894_v26 = vld [vmem:[#allocation201_spill] sm:$0xff] }
 0x4ea   :  { %4041 = vmatpush.bf16.msrb.mxu3 %v16842_v57  ;;  %v13420_v57 = vpop.permute.xlu2 %5447 }
 0x4eb   :  { %4494 = vmatpush.bf16.msrb.mxu1 %v16875_v24  ;;  %16885 = vst [vmem:[#allocation149_spill] sm:$0xff] %v13420_v57 }
 0x4ec   :  { %4101 = vmatpush.bf16.msra.mxu2 %v16878_v38  ;;  %4480 = vmatpush.bf16.msrb.mxu0 %v16884_v9  ;;  %v13434_v9 = vpop.f32.mrf.mxu1 }
 0x4ed   :  { %16893 = vst [vmem:[#allocation217_spill] sm:$0xff] %v13434_v9  ;;  %v16929_v9 = vld [vmem:[#allocation8_spill] sm:$0xff] }
 0x4ee   :  { %4042 = vmatpush.bf16.msrb.mxu3 %v16846_v52  ;;  %v13428_v52 = vsel %vm2607_vm1, %v13417_v20, %v13420_v57  ;;  %v16897_v57 = vld [vmem:[#allocation144_spill] sm:$0xff]  ;;  %v3642_v20 = vpop.f32.mrf.mxu3  ;;  %v13478_v4 = vpop.permute.xlu1 %5466 }
 0x4ef   :  { %4495 = vmatpush.bf16.msrb.mxu1 %v16881_v60  ;;  %16889 = vst [vmem:[#allocation101_spill] sm:$0xff] %v13428_v52  ;;  %v3683_v52 = vpop.f32.mrf.mxu2  ;;  %v3643_v5 = vadd.f32 %v3642_v20, %v3630_v6 }
 0x4f0   :  { %4102 = vmatpush.bf16.msra.mxu2 %v16882_v54  ;;  %4481 = vmatpush.bf16.msrb.mxu0 %v16894_v26  ;;  %v16903_v52 = vld [vmem:[#allocation214_spill] sm:$0xff]  ;;  %16920 = vst [vmem:[#allocation98_spill] sm:$0xff] %v13478_v4  ;;  %v16928_v4 = vld [vmem:[#allocation16_spill] sm:$0xff] }
 0x4f1   :  { %4043 = vmatmul.bf16.vlgmr.msrb.gmra.mxu3 %v16888_v59  ;;  %v13439_v59 = vpop.permute.xlu0 %5098  ;;  %v3656_v12 = vadd.f32 %v16900_v61, %v3643_v5  ;;  %v16909_v5 = vrot.slane %v16781_v23, 2  ;;  %v16917_v23 = vld [vmem:[#allocation49_spill] sm:$0xff]  ;;  %v4541_v15 = vsel %vm2480_vm13, %v16929_v9, %v16928_v4 }
 0x4f2   :  { %4087 = vmatpush.bf16.msra.mxu3 %v16848_v11  ;;  %v16891_v11 = vld [vmem:[#allocation29_spill] sm:$0xff]  ;;  %16895 = vst [vmem:[#allocation63_spill] sm:$0xff] %v13439_v59 }
 0x4f3   :  { %4496 = vmatpush.bf16.msrb.mxu1 %v16886_v10  ;;  %v16902_v59 = vld [vmem:[#allocation41_spill] sm:$0xff]  ;;  %v3669_v33 = vadd.f32 %v16903_v52, %v3656_v12  ;;  %v16912_v52 = vld [vmem:[#allocation207_spill] sm:$0xff] }
 0x4f4   :  { %4103 = vmatpush.bf16.msra.mxu2 %v16892_v37  ;;  %4482 = vmatpush.bf16.msrb.mxu0 %v16898_v51  ;;  %v4085_v26 = vpop.f32.mrf.mxu1 }
 0x4f5   :  { %v3682_v20 = vadd.f32 %v3681_v29, %v3669_v33  ;;  %v16910_v26 = vld [vmem:[#allocation5_spill] sm:$0xff]  ;;  %v16914_v29 = vld [vmem:[#allocation20_spill] sm:$0xff]  ;;  %v16915_v33 = vld [vmem:[#allocation7_spill] sm:$0xff] }
 0x4f6   :  { %4088 = vmatpush.bf16.msra.mxu3 %v16852_v39  ;;  %4497 = vmatmul.bf16.vlgmr.msrb.gmra.mxu1 %v15851_v30  ;;  %v16899_v39 = vld [vmem:[#allocation25_spill] sm:$0xff]  ;;  %v16901_v30 = vld [vmem:[#allocation27_spill] sm:$0xff]  ;;  %v3644_v61 = vpop.f32.mrf.mxu3 }
 0x4f7   :  { %4683 = vmatpush.bf16.msra.mxu1 %v16891_v11  ;;  %v13455_v51 = vpop.f32.mrf.mxu2 }
 0x4f8   :  { %4104 = vmatpush.bf16.msra.mxu2 %v16897_v57  ;;  %4483 = vmatpush.bf16.msrb.mxu0 %v16902_v59  ;;  %16907 = vst [vmem:[#allocation218_spill] sm:$0xff] %v13455_v51  ;;  %v16911_v59 = vld [vmem:[#allocation34_spill] sm:$0xff]  ;;  %v16924_v51 = vld [vmem:[#allocation88_spill] sm:$0xff] }
 0x4f9   :  { %v13453_v6 = vpop.permute.xlu0 %5414  ;;  %v4543_v12 = vsel %vm2462_vm7, %v16911_v59, %v16910_v26  ;;  %v13471_v61 = vpop.f32.mrf.mxu0 }
 0x4fa   :  { %4089 = vmatpush.bf16.msra.mxu3 %v16857_v1  ;;  %16906 = vst [vmem:[#allocation100_spill] sm:$0xff] %v13453_v6  ;;  %v16908_v1 = vld [vmem:[#allocation65_spill] sm:$0xff] }
 0x4fb   :  { %4684 = vmatpush.bf16.msra.mxu1 %v16896_v47  ;;  %4484 = vmatmul.bf16.vlgmr.msrb.gmra.mxu0 %v16909_v5  ;;  %16916 = vst [vmem:[#allocation87_spill] sm:$0xff] %v13471_v61 }
 0x4fc   :  { %4105 = vmatpush.bf16.msra.mxu2 %v16901_v30  ;;  %4533 = vmatpush.bf16.msra.mxu0 %v16904_v45 }
 0x4fe   :  { %4090 = vmatpush.bf16.msra.mxu3 %v16862_v7  ;;  %v16913_v7 = vld [vmem:[#allocation48_spill] sm:$0xff] }
 0x4ff   :  { %4685 = vmatpush.bf16.msra.mxu1 %v16899_v39  ;;  %v4544_v6 = vsel %vm2465_vm10, %v16913_v7, %v4543_v12  ;;  %v16921_v12 = vld [vmem:[#allocation23_spill] sm:$0xff] }
 0x500   :  { %4106 = vmatpush.bf16.msra.mxu2 %v16908_v1  ;;  %4534 = vmatpush.bf16.msra.mxu0 %v16912_v52  ;;  %v4545_v5 = vsel %vm2468_vm8, %v16917_v23, %v4544_v6  ;;  %v16925_v6 = vld [vmem:[#allocation60_spill] sm:$0xff] }
 0x501   :  { %v4546_v31 = vsel %vm2471_vm11, %v16919_v36, %v4545_v5  ;;  %v13488_v61 = vpop.permute.xlu0 %5449  ;;  %v16927_v5 = vld [vmem:[#allocation51_spill] sm:$0xff] }
 0x502   :  { %4091 = vmatpush.bf16.msra.mxu3 %v16868_v46  ;;  %v16918_v46 = vld [vmem:[#allocation209_spill] sm:$0xff]  ;;  %16926 = vst [vmem:[#allocation113_spill] sm:$0xff] %v13488_v61 }
 0x503   :  { %4686 = vmatpush.bf16.msra.mxu1 %v16905_v16  ;;  %v16932_v61 = vld [vmem:[#allocation53_spill] sm:$0xff] }
 0x504   :  { %4107 = vmatpush.bf16.msra.mxu2 %v16915_v33  ;;  %4535 = vmatpush.bf16.msra.mxu0 %v16918_v46  ;;  %v16935_v33 = vld [vmem:[#allocation134_spill] sm:$0xff] }
 0x506   :  { %4092 = vmatpush.bf16.msra.mxu3 %v16875_v24  ;;  %v3735_v24 = vpop.f32.mrf.mxu2 }
 0x507   :  { %4687 = vmatpush.bf16.msra.mxu1 %v16914_v29  ;;  %4108 = vmatmul.bf16.vlgmr.msra.gmra.mxu2 %v16923_v44  ;;  %v13496_v24 = vpop.permute.xlu2 %5468 }
 0x508   :  { %4131 = vmatpush.bf16.msrb.mxu2 %v16904_v45  ;;  %4709 = vmatpush.bf16.msrb.mxu0 %v16924_v51  ;;  %v4547_v45 = vsel %vm2474_vm9, %v16925_v6, %v4546_v31  ;;  %16931 = vst [vmem:[#allocation159_spill] sm:$0xff] %v13496_v24  ;;  %v4124_v31 = vpop.f32.mrf.mxu0 }
 0x509   :  { %v4553_v44 = vpack.c.b16 %v4547_v45, %v4541_v15  ;;  %v13508_v45 = vpop.permute.xlu1 %5785  ;;  %v16938_v15 = vrot.slane %v16817_v18, 2  ;;  %v13514_v31 = vpop.permute.xlu0 %5783 }
 0x50a   :  { %4093 = vmatpush.bf16.msra.mxu3 %v16881_v60  ;;  %16937 = vst [vmem:[#allocation161_spill] sm:$0xff] %v13508_v45  ;;  %v13516_v24 = vpop.f32.mrf.mxu1 }
 0x50b   :  { %4688 = vmatpush.bf16.msra.mxu1 %v16921_v12  ;;  %v13505_v1 = vrot.slane %v4553_v44, 3  ;;  %7769 = vmatmul.msk.bf16.vlgmr.msra.gmra.mxu0 %vm3473_vm2, %v16938_v15  ;;  %16939 = vst [vmem:[#allocation168_spill] sm:$0xff] %v13514_v31  ;;  %v3694_v44 = vpop.f32.mrf.mxu3  ;;  %v16943_v31 = vrot.slane %v16853_v13, 1  ;;  %v16948_v13 = vld [vmem:[#allocation118_spill] sm:$0xff] }
 0x50c   :  { %4132 = vmatpush.bf16.msrb.mxu2 %v16912_v52  ;;  %4710 = vmatpush.bf16.msrb.mxu0 %v16930_v32  ;;  %v16933_v52 = vld [vmem:[#allocation167_spill] sm:$0xff]  ;;  %v13523_v18 = vadd.f32 %v3694_v44, %v3682_v20 }
 0x50d   :  { %v16934_v60 = vrot.slane %v16933_v52, 1  ;;  %v16941_v52 = vld [vmem:[#allocation108_spill] sm:$0xff] }
 0x50e   :  { %4094 = vmatpush.bf16.msra.mxu3 %v16886_v10  ;;  %v16936_v10 = vld [vmem:[#allocation104_spill] sm:$0xff]  ;;  %v13525_v15 = vpop.f32.mrf.mxu2 }
 0x50f   :  { %4689 = vmatpush.bf16.msra.mxu1 %v16927_v5  ;;  %v13528_v45 = vpop.permute.xlu2 %5816 }
 0x510   :  { %4133 = vmatpush.bf16.msrb.mxu2 %v16918_v46  ;;  %4711 = vmatpush.bf16.msrb.mxu0 %v16936_v10  ;;  %16942 = vst [vmem:[#allocation155_spill] sm:$0xff] %v13528_v45 }
 0x511   :  { %4095 = vmatmul.bf16.vlgmr.msra.gmra.mxu3 %v16934_v60  ;;  %v16940_v60 = vld [vmem:[#allocation138_spill] sm:$0xff] }
 0x512   :  { %4281 = vmatpush.bf16.msrb.mxu3 %v16891_v11  ;;  %v4305_v20 = vpop.f32.mrf.mxu1 }
 0x513   :  { %4690 = vmatpush.bf16.msra.mxu1 %v16932_v61  ;;  %v4145_v20 = vsel %vm2462_vm7, %v16917_v23, %v16913_v7  ;;  %v16951_v23 = vld [vmem:[#allocation131_spill] sm:$0xff] }
 0x514   :  { %4307 = vmatpush.bf16.msra.mxu2 %v16924_v51  ;;  %4712 = vmatpush.bf16.msrb.mxu0 %v16941_v52  ;;  %v13536_v51 = vpop.permute.xlu0 %5818 }
 0x515   :  { %16945 = vst [vmem:[#allocation153_spill] sm:$0xff] %v13536_v51  ;;  %v13542_v44 = vsel %vm2570_vm14, %v13528_v45, %v13536_v51  ;;  %v16949_v51 = vld [vmem:[#allocation126_spill] sm:$0xff] }
 0x516   :  { %4282 = vmatpush.bf16.msrb.mxu3 %v16896_v47  ;;  %4691 = vmatmul.bf16.vlgmr.msra.gmra.mxu1 %v13505_v1  ;;  %16946 = vst [vmem:[#allocation24_spill] sm:$0xff] %v13542_v44  ;;  %v3890_v46 = vpop.f32.mrf.mxu2  ;;  %v4146_v44 = vsel %vm2465_vm10, %v16919_v36, %v4145_v20  ;;  %v16952_v20 = vld [vmem:[#allocation185_spill] sm:$0xff] }
 0x517   :  { %4735 = vmatpush.bf16.msrb.mxu1 %v16935_v33  ;;  %7767 = vmatmul.msk.bf16.vlgmr.msrb.gmra.mxu2 %vm3473_vm2, %v16943_v31  ;;  %v3696_v31 = vpop.f32.mrf.mxu3  ;;  %v4139_v46 = vsel %vm2474_vm9, %v16929_v9, %v16928_v4  ;;  %v4147_v7 = vsel %vm2468_vm8, %v16925_v6, %v4146_v44  ;;  %v16957_v44 = vld [vmem:[#allocation21_spill] sm:$0xff] }
 0x518   :  { %4308 = vmatpush.bf16.msra.mxu2 %v16930_v32  ;;  %v16944_v32 = vld [vmem:[#allocation112_spill] sm:$0xff]  ;;  %v13568_v31 = vpop.f32.mrf.mxu0  ;;  %v4140_v36 = vsel %vm2477_vm12, %v16910_v26, %v4139_v46 }
 0x519   :  { %4713 = vmatpush.bf16.msrb.mxu0 %v16944_v32  ;;  %v4141_v9 = vsel %vm2480_vm13, %v16911_v59, %v4140_v36 }
 0x51a   :  { %4283 = vmatpush.bf16.msrb.mxu3 %v16899_v39  ;;  %v4151_v26 = vpack.c.b16 %v4147_v7, %v4141_v9  ;;  %v16959_v7 = vld [vmem:[#allocation67_spill] sm:$0xff]  ;;  %v16960_v9 = vld [vmem:[#allocation192_spill] sm:$0xff] }
 0x51b   :  { %4736 = vmatpush.bf16.msrb.mxu1 %v16940_v60 }
 0x51c   :  { %4309 = vmatpush.bf16.msra.mxu2 %v16936_v10  ;;  %v13544_v10 = vpop.permute.xlu1 %5835  ;;  %v13577_v4 = vpop.permute.xlu0 %5854  ;;  %v13594_v59 = vrot.slane %v4151_v26, 2  ;;  %v16964_v26 = vld [vmem:[#allocation12_spill] sm:$0xff] }
 0x51d   :  { %16947 = vst [vmem:[#allocation45_spill] sm:$0xff] %v13544_v10  ;;  %4714 = vmatpush.bf16.msrb.mxu0 %v16948_v13  ;;  %v13557_v10 = vpop.permute.xlu2 %5837 }
 0x51e   :  { %4284 = vmatpush.bf16.msrb.mxu3 %v16905_v16  ;;  %16950 = vst [vmem:[#allocation28_spill] sm:$0xff] %v13557_v10  ;;  %v15885_v10 = vrot.slane %v16952_v20, 3 }
 0x51f   :  { %4737 = vmatpush.bf16.msrb.mxu1 %v16752_v48  ;;  %16955 = vst [vmem:[#allocation152_spill] sm:$0xff] %v13577_v4 }
 0x520   :  { %4310 = vmatpush.bf16.msra.mxu2 %v16941_v52  ;;  %v4331_v36 = vpop.f32.mrf.mxu0 }
 0x521   :  { %4715 = vmatpush.bf16.msrb.mxu0 %v16949_v51  ;;  %v16965_v36 = vld [vmem:[#allocation14_spill] sm:$0xff] }
 0x522   :  { %4285 = vmatpush.bf16.msrb.mxu3 %v16914_v29 }
 0x523   :  { %4738 = vmatpush.bf16.msrb.mxu1 %v16758_v41 }
 0x524   :  { %4311 = vmatpush.bf16.msra.mxu2 %v16944_v32  ;;  %v13573_v45 = vpop.permute.xlu1 %5856 }
 0x525   :  { %4716 = vmatpush.bf16.msrb.mxu0 %v16951_v23  ;;  %16953 = vst [vmem:[#allocation156_spill] sm:$0xff] %v13573_v45  ;;  %v13585_v6 = vsel %vm2700_vm0, %v13577_v4, %v13573_v45  ;;  %v13596_v46 = vpop.permute.xlu2 %6185  ;;  %v16962_v4 = vrot.slane %v16847_v25, 2  ;;  %v13605_v45 = vpop.permute.xlu0 %6187 }
 0x526   :  { %4286 = vmatpush.bf16.msrb.mxu3 %v16921_v12  ;;  %16956 = vst [vmem:[#allocation176_spill] sm:$0xff] %v13585_v6  ;;  %v16961_v6 = vld [vmem:[#allocation79_spill] sm:$0xff] }
 0x527   :  { %4739 = vmatpush.bf16.msrb.mxu1 %v16765_v58  ;;  %16958 = vst [vmem:[#allocation29_spill] sm:$0xff] %v13596_v46  ;;  %v13609_v46 = vpop.f32.mrf.mxu1 }
 0x528   :  { %4312 = vmatpush.bf16.msra.mxu2 %v16948_v13  ;;  %v16954_v13 = vld [vmem:[#allocation55_spill] sm:$0xff]  ;;  %4717 = vmatmul.bf16.vlgmr.msrb.gmra.mxu0 %v15885_v10  ;;  %v15894_v10 = vrot.slane %v16960_v9, 3  ;;  %16963 = vst [vmem:[#allocation25_spill] sm:$0xff] %v13605_v45 }
 0x529   :  { %4761 = vmatpush.bf16.msra.mxu0 %v16954_v13 }
 0x52a   :  { %4287 = vmatpush.bf16.msrb.mxu3 %v16927_v5 }
 0x52b   :  { %4740 = vmatpush.bf16.msrb.mxu1 %v16775_v43 }
 0x52c   :  { %4313 = vmatpush.bf16.msra.mxu2 %v16949_v51 }
 0x52d   :  { %4762 = vmatpush.bf16.msra.mxu0 %v16957_v44  ;;  %v13619_v45 = vpop.permute.xlu2 %6206  ;;  %v13623_v51 = vpop.permute.xlu0 %6223 }
 0x52e   :  { %4288 = vmatpush.bf16.msrb.mxu3 %v16932_v61  ;;  %16966 = vst [vmem:[#allocation18_spill] sm:$0xff] %v13619_v45  ;;  %v13629_v32 = vsel %vm2607_vm1, %v13619_v45, %v13623_v51 }
 0x52f   :  { %4741 = vmatpush.bf16.msrb.mxu1 %v16779_v56  ;;  %16968 = vst [vmem:[#allocation214_spill] sm:$0xff] %v13623_v51 }
 0x530   :  { %4314 = vmatpush.bf16.msra.mxu2 %v16951_v23  ;;  %v16967_v23 = vld [vmem:[#allocation197_spill] sm:$0xff]  ;;  %16970 = vst [vmem:[#allocation5_spill] sm:$0xff] %v13629_v32 }
 0x531   :  { %4289 = vmatmul.bf16.vlgmr.msrb.gmra.mxu3 %v13594_v59  ;;  %4763 = vmatpush.bf16.msra.mxu0 %v16964_v26  ;;  %v16973_v32 = vld [vmem:[#allocation77_spill] sm:$0xff] }
 0x532   :  { %4333 = vmatpush.bf16.msra.mxu3 %v16935_v33 }
 0x533   :  { %4742 = vmatpush.bf16.msrb.mxu1 %v16959_v7  ;;  %4315 = vmatmul.bf16.vlgmr.msra.gmra.mxu2 %v16962_v4  ;;  %v3940_v4 = vpop.f32.mrf.mxu2 }
 0x534   :  { %4359 = vmatpush.bf16.msrb.mxu2 %v16954_v13  ;;  %v3901_v13 = vpop.f32.mrf.mxu3 }
 0x535   :  { %4764 = vmatpush.bf16.msra.mxu0 %v16965_v36  ;;  %v3902_v25 = vadd.f32 %v3901_v13, %v13525_v15  ;;  %v16971_v15 = vld [vmem:[#allocation130_spill] sm:$0xff] }
 0x536   :  { %4334 = vmatpush.bf16.msra.mxu3 %v16940_v60  ;;  %4743 = vmatmul.bf16.vlgmr.msrb.gmra.mxu1 %v15894_v10 }
 0x537   :  { %4787 = vmatpush.bf16.msra.mxu1 %v16961_v6  ;;  %v3915_v10 = vadd.f32 %v16967_v23, %v3902_v25  ;;  %v16972_v23 = vld [vmem:[#allocation84_spill] sm:$0xff] }
 0x538   :  { %4360 = vmatpush.bf16.msrb.mxu2 %v16957_v44  ;;  %v16969_v44 = vld [vmem:[#allocation83_spill] sm:$0xff] }
 0x539   :  { %4765 = vmatpush.bf16.msra.mxu0 %v16969_v44  ;;  %v3928_v13 = vadd.f32 %v16971_v15, %v3915_v10  ;;  %v16977_v15 = vld [vmem:[#allocation162_spill] sm:$0xff] }
 0x53a   :  { %4335 = vmatpush.bf16.msra.mxu3 %v16752_v48 }
 0x53b   :  { %4788 = vmatpush.bf16.msra.mxu1 %v16795_v27  ;;  %v3941_v48 = vadd.f32 %v3940_v4, %v3928_v13  ;;  %v3942_v52 = vpop.f32.mrf.mxu2  ;;  %v16976_v4 = vld [vmem:[#allocation191_spill] sm:$0xff]  ;;  %v13650_v13 = vpop.f32.mrf.mxu0 }
 0x53c   :  { %4361 = vmatpush.bf16.msrb.mxu2 %v16964_v26  ;;  %v4357_v26 = vpop.f32.mrf.mxu1  ;;  %v3903_v25 = vpop.f32.mrf.mxu3  ;;  %v15904_v52 = vrot.slane %v16976_v4, 3 }
 0x53d   :  { %4766 = vmatpush.bf16.msra.mxu0 %v16972_v23  ;;  %v16975_v26 = vld [vmem:[#allocation50_spill] sm:$0xff]  ;;  %v16978_v25 = vld [vmem:[#allocation165_spill] sm:$0xff] }
 0x53e   :  { %4336 = vmatpush.bf16.msra.mxu3 %v16758_v41  ;;  %v15907_v51 = vrot.slane %v16978_v25, 2 }
 0x53f   :  { %4789 = vmatpush.bf16.msra.mxu1 %v16798_v62 }
 0x540   :  { %4362 = vmatpush.bf16.msrb.mxu2 %v16965_v36 }
 0x541   :  { %4767 = vmatpush.bf16.msra.mxu0 %v16973_v32 }
 0x542   :  { %4337 = vmatpush.bf16.msra.mxu3 %v16765_v58 }
 0x543   :  { %4790 = vmatpush.bf16.msra.mxu1 %v16807_v3 }
 0x544   :  { %4363 = vmatpush.bf16.msrb.mxu2 %v16969_v44  ;;  %v13641_v10 = vpop.f32.mrf.mxu1  ;;  %v4383_v44 = vpop.f32.mrf.mxu0 }
 0x545   :  { %16974 = vst [vmem:[#allocation34_spill] sm:$0xff] %v13641_v10  ;;  %4768 = vmatpush.bf16.msra.mxu0 %v16975_v26  ;;  %v16979_v10 = vld [vmem:[#allocation171_spill] sm:$0xff] }
 0x546   :  { %4338 = vmatpush.bf16.msra.mxu3 %v16775_v43 }
 0x547   :  { %4791 = vmatpush.bf16.msra.mxu1 %v16813_v42 }
 0x548   :  { %4364 = vmatpush.bf16.msrb.mxu2 %v16972_v23  ;;  %4769 = vmatmul.bf16.vlgmr.msra.gmra.mxu0 %v15904_v52  ;;  %v16981_v23 = vrot.slane %v16890_v22, 2 }
 0x549   :  { %4813 = vmatpush.bf16.msrb.mxu0 %v16977_v15 }
 0x54a   :  { %4339 = vmatpush.bf16.msra.mxu3 %v16779_v56  ;;  %v3992_v22 = vpop.f32.mrf.mxu2 }
 0x54b   :  { %4792 = vmatpush.bf16.msra.mxu1 %v16823_v28 }
 0x54c   :  { %4365 = vmatpush.bf16.msrb.mxu2 %v16973_v32  ;;  %v4409_v45 = vpop.f32.mrf.mxu1  ;;  %v16980_v32 = vld [vmem:[#allocation200_spill] sm:$0xff] }
 0x54d   :  { %4814 = vmatpush.bf16.msrb.mxu0 %v16979_v10  ;;  %v15910_v52 = vrot.slane %v16980_v32, 3  ;;  %v16982_v45 = vld [vmem:[#allocation174_spill] sm:$0xff] }
 0x54e   :  { %4340 = vmatpush.bf16.msra.mxu3 %v16959_v7 }
 0x54f   :  { %4793 = vmatpush.bf16.msra.mxu1 %v16828_v19 }
 0x550   :  { %4366 = vmatpush.bf16.msrb.mxu2 %v16975_v26 }
 0x551   :  { %4341 = vmatmul.bf16.vlgmr.msra.gmra.mxu3 %v15907_v51  ;;  %4815 = vmatpush.bf16.msrb.mxu0 %v16982_v45  ;;  %v16983_v51 = vld [vmem:[#allocation180_spill] sm:$0xff] }
 0x552   :  { %4385 = vmatpush.bf16.msrb.mxu3 %v16961_v6 }
 0x553   :  { %4794 = vmatpush.bf16.msra.mxu1 %v16831_v55  ;;  %4367 = vmatmul.bf16.vlgmr.msrb.gmra.mxu2 %v16981_v23  ;;  %v16984_v23 = vld [vmem:[#allocation183_spill] sm:$0xff] }
 0x554   :  { %4411 = vmatpush.bf16.msra.mxu2 %v16977_v15  ;;  %v3953_v15 = vpop.f32.mrf.mxu3 }
 0x555   :  { %4816 = vmatpush.bf16.msrb.mxu0 %v16983_v51  ;;  %v3954_v26 = vadd.f32 %v3953_v15, %v3941_v48  ;;  %v16985_v15 = vld [vmem:[#allocation188_spill] sm:$0xff] }
 0x556   :  { %4795 = vmatmul.bf16.vlgmr.msra.gmra.mxu1 %v15910_v52  ;;  %4386 = vmatpush.bf16.msrb.mxu3 %v16795_v27 }
 0x557   :  { %4852 = vmatpush.bf16.msrb.mxu1 %v16832_v2  ;;  %v3967_v44 = vadd.f32 %v13179_v21, %v3954_v26  ;;  %v16986_v21 = vld [vmem:[#allocation190_spill] sm:$0xff]  ;;  %v16987_v26 = vld [vmem:[#allocation195_spill] sm:$0xff] }
 0x558   :  { %4412 = vmatpush.bf16.msra.mxu2 %v16979_v10  ;;  %v13682_v10 = vpop.f32.mrf.mxu1 }
 0x559   :  { %4817 = vmatpush.bf16.msrb.mxu0 %v16984_v23  ;;  %v3980_v52 = vadd.f32 %v13279_v63, %v3967_v44 }
 0x55a   :  { %4387 = vmatpush.bf16.msrb.mxu3 %v16798_v62  ;;  %v3994_v62 = vpop.f32.mrf.mxu2 }
 0x55b   :  { %4853 = vmatpush.bf16.msrb.mxu1 %v16840_v14  ;;  %v3993_v48 = vadd.f32 %v3992_v22, %v3980_v52  ;;  %v16988_v52 = vld [vmem:[#allocation105_spill] sm:$0xff]  ;;  %v13698_v22 = vpop.f32.mrf.mxu0 }
 0x55c   :  { %4413 = vmatpush.bf16.msra.mxu2 %v16982_v45  ;;  %v3955_v45 = vpop.f32.mrf.mxu3 }
 0x55d   :  { %4818 = vmatpush.bf16.msrb.mxu0 %v16985_v15 }
 0x55e   :  { %4388 = vmatpush.bf16.msrb.mxu3 %v16807_v3 }
 0x55f   :  { %4854 = vmatpush.bf16.msrb.mxu1 %v16844_v0 }
 0x560   :  { %4414 = vmatpush.bf16.msra.mxu2 %v16983_v51  ;;  %v4448_v63 = vpop.f32.mrf.mxu1 }
 0x561   :  { %4819 = vmatpush.bf16.msrb.mxu0 %v16986_v21  ;;  %v16990_v63 = vld [vmem:[#allocation109_spill] sm:$0xff] }
 0x562   :  { %4389 = vmatpush.bf16.msrb.mxu3 %v16813_v42 }
 0x563   :  { %4855 = vmatpush.bf16.msrb.mxu1 %v16849_v8 }
 0x564   :  { %4415 = vmatpush.bf16.msra.mxu2 %v16984_v23  ;;  %v4005_v45 = vpop.f32.mrf.mxu3 }
 0x565   :  { %4820 = vmatpush.bf16.msrb.mxu0 %v16987_v26  ;;  %v4006_v62 = vadd.f32 %v4005_v45, %v3993_v48  ;;  %v16992_v48 = vld [vmem:[#allocation184_spill] sm:$0xff] }
 0x566   :  { %4390 = vmatpush.bf16.msrb.mxu3 %v16823_v28  ;;  %v15918_v45 = vrot.slane %v16992_v48, 3 }
 0x567   :  { %4856 = vmatpush.bf16.msrb.mxu1 %v16854_v53  ;;  %v13703_v44 = vmax.f32 %v13323_v17, %v4006_v62  ;;  %v16993_v17 = vld [vmem:[#allocation114_spill] sm:$0xff]  ;;  %v4435_v62 = vpop.f32.mrf.mxu0 }
 0x568   :  { %4416 = vmatpush.bf16.msra.mxu2 %v16985_v15  ;;  %4821 = vmatmul.bf16.vlgmr.msrb.gmra.mxu0 %v13505_v1  ;;  %v16991_v15 = vld [vmem:[#allocation175_spill] sm:$0xff]  ;;  %v16996_v62 = vld [vmem:[#allocation133_spill] sm:$0xff] }
 0x569   :  { %4865 = vmatpush.bf16.msra.mxu0 %v16988_v52  ;;  %16989 = vst [vmem:[#allocation48_spill] sm:$0xff] %v13703_v44  ;;  %v15919_v23 = vrot.slane %v16991_v15, 2  ;;  %v16994_v44 = vld [vmem:[#allocation119_spill] sm:$0xff] }
 0x56a   :  { %4391 = vmatpush.bf16.msrb.mxu3 %v16828_v19 }
 0x56b   :  { %4857 = vmatpush.bf16.msrb.mxu1 %v16858_v35 }
 0x56c   :  { %4417 = vmatpush.bf16.msra.mxu2 %v16986_v21  ;;  %v4007_v1 = vpop.f32.mrf.mxu3  ;;  %v16999_v21 = vld [vmem:[#allocation38_spill] sm:$0xff] }
 0x56d   :  { %4866 = vmatpush.bf16.msra.mxu0 %v16990_v63 }
 0x56e   :  { %4392 = vmatpush.bf16.msrb.mxu3 %v16831_v55 }
 0x56f   :  { %4858 = vmatpush.bf16.msrb.mxu1 %v16863_v49 }
 0x570   :  { %4418 = vmatpush.bf16.msra.mxu2 %v16987_v26  ;;  %v16997_v26 = vld [vmem:[#allocation137_spill] sm:$0xff] }
 0x571   :  { %4393 = vmatmul.bf16.vlgmr.msrb.gmra.mxu3 %v15919_v23  ;;  %4867 = vmatpush.bf16.msra.mxu0 %v16993_v17 }
 0x572   :  { %4450 = vmatpush.bf16.msra.mxu3 %v16832_v2  ;;  %v17024_v2 = vld [vmem:[#allocation117_spill] sm:$0xff] }
 0x573   :  { %4859 = vmatpush.bf16.msrb.mxu1 %v16870_v34  ;;  %4419 = vmatmul.bf16.vlgmr.msra.gmra.mxu2 %v13594_v59  ;;  %v16995_v59 = vld [vmem:[#allocation127_spill] sm:$0xff]  ;;  %v13729_v1 = vpop.f32.mrf.mxu1 }
 0x574   :  { %4463 = vmatpush.bf16.msrb.mxu2 %v16988_v52  ;;  %v4057_v52 = vpop.f32.mrf.mxu2  ;;  %v4044_v23 = vpop.f32.mrf.mxu3 }
 0x575   :  { %4868 = vmatpush.bf16.msra.mxu0 %v16994_v44 }
 0x576   :  { %4860 = vmatmul.bf16.vlgmr.msrb.gmra.mxu1 %v15918_v45  ;;  %4451 = vmatpush.bf16.msra.mxu3 %v16840_v14  ;;  %v17022_v14 = vld [vmem:[#allocation219_spill] sm:$0xff] }
 0x577   :  { %4904 = vmatpush.bf16.msra.mxu1 %v16871_v50 }
 0x578   :  { %4464 = vmatpush.bf16.msrb.mxu2 %v16990_v63 }
 0x579   :  { %4869 = vmatpush.bf16.msra.mxu0 %v16995_v59 }
 0x57a   :  { %4452 = vmatpush.bf16.msra.mxu3 %v16844_v0 }
 0x57b   :  { %4905 = vmatpush.bf16.msra.mxu1 %v16878_v38 }
 0x57c   :  { %4465 = vmatpush.bf16.msrb.mxu2 %v16993_v17  ;;  %v4059_v45 = vpop.f32.mrf.mxu2  ;;  %v4045_v17 = vadd.f32 %v4044_v23, %v13367_v40  ;;  %v13746_v40 = vpop.f32.mrf.mxu0  ;;  %v17000_v23 = vld [vmem:[#allocation65_spill] sm:$0xff] }
 0x57d   :  { %4870 = vmatpush.bf16.msra.mxu0 %v16996_v62  ;;  %v16998_v45 = vld [vmem:[#allocation81_spill] sm:$0xff] }
 0x57e   :  { %4453 = vmatpush.bf16.msra.mxu3 %v16849_v8  ;;  %v4058_v63 = vadd.f32 %v4057_v52, %v4045_v17  ;;  %v17001_v52 = vrot.slane %v16960_v9, 3  ;;  %v17003_v17 = vld [vmem:[#allocation7_spill] sm:$0xff]  ;;  %v17008_v9 = vrot.slane %v16978_v25, 2 }
 0x57f   :  { %4906 = vmatpush.bf16.msra.mxu1 %v16882_v54  ;;  %v17014_v25 = vld [vmem:[#allocation163_spill] sm:$0xff] }
 0x580   :  { %4466 = vmatpush.bf16.msrb.mxu2 %v16994_v44  ;;  %v4500_v44 = vpop.f32.mrf.mxu1 }
 0x581   :  { %4871 = vmatpush.bf16.msra.mxu0 %v16997_v26  ;;  %v17002_v44 = vld [vmem:[#allocation139_spill] sm:$0xff] }
 0x582   :  { %4454 = vmatpush.bf16.msra.mxu3 %v16854_v53 }
 0x583   :  { %4907 = vmatpush.bf16.msra.mxu1 %v16892_v37 }
 0x584   :  { %4467 = vmatpush.bf16.msrb.mxu2 %v16995_v59  ;;  %v4046_v59 = vpop.f32.mrf.mxu3 }
 0x585   :  { %4872 = vmatpush.bf16.msra.mxu0 %v16998_v45  ;;  %v17004_v59 = vld [vmem:[#allocation35_spill] sm:$0xff] }
 0x586   :  { %4455 = vmatpush.bf16.msra.mxu3 %v16858_v35 }
 0x587   :  { %4908 = vmatpush.bf16.msra.mxu1 %v16897_v57 }
 0x588   :  { %4468 = vmatpush.bf16.msrb.mxu2 %v16996_v62  ;;  %4873 = vmatmul.bf16.vlgmr.msra.gmra.mxu0 %v17001_v52  ;;  %v17005_v62 = vld [vmem:[#allocation86_spill] sm:$0xff]  ;;  %v17009_v52 = vld [vmem:[#allocation143_spill] sm:$0xff] }
 0x589   :  { %4917 = vmatpush.bf16.msrb.mxu0 %v16999_v21 }
 0x58a   :  { %4456 = vmatpush.bf16.msra.mxu3 %v16863_v49  ;;  %v17006_v49 = vld [vmem:[#allocation166_spill] sm:$0xff] }
 0x58b   :  { %4909 = vmatpush.bf16.msra.mxu1 %v16901_v30  ;;  %v17007_v35 = vrot.slane %v17006_v49, 2  ;;  %v17012_v49 = vld [vmem:[#allocation103_spill] sm:$0xff] }
 0x58c   :  { %4469 = vmatpush.bf16.msrb.mxu2 %v16997_v26  ;;  %v15934_v26 = vrot.slane %v17004_v59, 3 }
 0x58d   :  { %4918 = vmatpush.bf16.msrb.mxu0 %v17002_v44 }
 0x58e   :  { %4457 = vmatpush.bf16.msra.mxu3 %v16870_v34  ;;  %v4109_v34 = vpop.f32.mrf.mxu2 }
 0x58f   :  { %4910 = vmatpush.bf16.msra.mxu1 %v17000_v23 }
 0x590   :  { %4470 = vmatpush.bf16.msrb.mxu2 %v16998_v45  ;;  %v4487_v45 = vpop.f32.mrf.mxu0 }
 0x591   :  { %4458 = vmatmul.bf16.vlgmr.msra.gmra.mxu3 %v17007_v35  ;;  %4919 = vmatpush.bf16.msrb.mxu0 %v17009_v52  ;;  %v17013_v35 = vld [vmem:[#allocation64_spill] sm:$0xff] }
 0x592   :  { %4502 = vmatpush.bf16.msrb.mxu3 %v16871_v50  ;;  %v17011_v50 = vld [vmem:[#allocation6_spill] sm:$0xff] }
 0x593   :  { %4911 = vmatpush.bf16.msra.mxu1 %v17003_v17  ;;  %4471 = vmatmul.bf16.vlgmr.msrb.gmra.mxu2 %v17008_v9  ;;  %v4071_v9 = vadd.f32 %v17014_v25, %v4058_v63  ;;  %v17019_v63 = vld [vmem:[#allocation99_spill] sm:$0xff] }
 0x594   :  { %4515 = vmatpush.bf16.msra.mxu2 %v16999_v21  ;;  %v17010_v21 = vld [vmem:[#allocation90_spill] sm:$0xff]  ;;  %v4096_v8 = vpop.f32.mrf.mxu3  ;;  %v3708_v25 = vadd.f32 %v17019_v63, %v13523_v18 }
 0x595   :  { %4920 = vmatpush.bf16.msrb.mxu0 %v17011_v50  ;;  %v17025_v18 = vld [vmem:[#allocation26_spill] sm:$0xff] }
 0x596   :  { %4912 = vmatmul.bf16.vlgmr.msra.gmra.mxu1 %v15934_v26  ;;  %4503 = vmatpush.bf16.msrb.mxu3 %v16878_v38  ;;  %v13778_v26 = vpop.f32.mrf.mxu1  ;;  %v17017_v38 = vld [vmem:[#allocation73_spill] sm:$0xff]  ;;  %v4111_v53 = vpop.f32.mrf.mxu2 }
 0x597   :  { %5134 = vmatpush.bf16.msrb.mxu1 %v17005_v62 }
 0x598   :  { %4516 = vmatpush.bf16.msra.mxu2 %v17002_v44  ;;  %v13776_v45 = vpop.f32.mrf.mxu0  ;;  %v17016_v44 = vld [vmem:[#allocation107_spill] sm:$0xff] }
 0x599   :  { %4921 = vmatpush.bf16.msrb.mxu0 %v17013_v35  ;;  %17015 = vst [vmem:[#allocation49_spill] sm:$0xff] %v13776_v45 }
 0x59a   :  { %4504 = vmatpush.bf16.msrb.mxu3 %v16882_v54  ;;  %v17018_v54 = vld [vmem:[#allocation217_spill] sm:$0xff] }
 0x59b   :  { %5135 = vmatpush.bf16.msrb.mxu1 %v17010_v21 }
 0x59c   :  { %4517 = vmatpush.bf16.msra.mxu2 %v17009_v52  ;;  %v4084_v52 = vadd.f32 %v17018_v54, %v4071_v9  ;;  %v3721_v54 = vadd.f32 %v17022_v14, %v3708_v25  ;;  %v17023_v9 = vld [vmem:[#allocation87_spill] sm:$0xff]  ;;  %v17028_v14 = vld [vmem:[#allocation125_spill] sm:$0xff]  ;;  %v17029_v25 = vrot.slane %v16980_v32, 3  ;;  %v17036_v32 = vld [vmem:[#allocation58_spill] sm:$0xff] }
 0x59d   :  { %4922 = vmatpush.bf16.msrb.mxu0 %v17017_v38 }
 0x59e   :  { %4505 = vmatpush.bf16.msrb.mxu3 %v16892_v37  ;;  %v4097_v45 = vadd.f32 %v4096_v8, %v4084_v52  ;;  %v17020_v37 = vld [vmem:[#allocation111_spill] sm:$0xff]  ;;  %v4694_v53 = vpop.f32.mrf.mxu1  ;;  %v17026_v8 = vld [vmem:[#allocation132_spill] sm:$0xff]  ;;  %v4135_v52 = vpop.f32.mrf.mxu2 }
 0x59f   :  { %5136 = vmatpush.bf16.msrb.mxu1 %v17012_v49  ;;  %v17031_v53 = vld [vmem:[#allocation136_spill] sm:$0xff] }
 0x5a0   :  { %4518 = vmatpush.bf16.msra.mxu2 %v17011_v50  ;;  %v4110_v0 = vadd.f32 %v4109_v34, %v4097_v45  ;;  %v17021_v50 = vld [vmem:[#allocation11_spill] sm:$0xff]  ;;  %v4539_v51 = vpop.f32.mrf.mxu0  ;;  %v4098_v34 = vpop.f32.mrf.mxu3  ;;  %v17027_v45 = vld [vmem:[#allocation218_spill] sm:$0xff] }
 0x5a1   :  { %4923 = vmatpush.bf16.msrb.mxu0 %v17021_v50  ;;  %v3734_v63 = vadd.f32 %v17027_v45, %v3721_v54  ;;  %v17034_v54 = vld [vmem:[#allocation177_spill] sm:$0xff]  ;;  %v17037_v34 = vld [vmem:[#allocation74_spill] sm:$0xff] }
 0x5a2   :  { %4506 = vmatpush.bf16.msrb.mxu3 %v16897_v57  ;;  %v4123_v57 = vadd.f32 %v17023_v9, %v4110_v0  ;;  %v17032_v9 = vld [vmem:[#allocation129_spill] sm:$0xff]  ;;  %v13817_v45 = vsel %vm2533_vm15, %v17037_v34, %v17036_v32 }
 0x5a3   :  { %5137 = vmatpush.bf16.msrb.mxu1 %v17016_v44  ;;  %v17043_v34 = vld [vmem:[#allocation141_spill] sm:$0xff] }
 0x5a4   :  { %4519 = vmatpush.bf16.msra.mxu2 %v17013_v35  ;;  %v4136_v51 = vadd.f32 %v4135_v52, %v4123_v57  ;;  %v17033_v57 = vld [vmem:[#allocation72_spill] sm:$0xff]  ;;  %v17035_v52 = vrot.slane %v17034_v54, 2  ;;  %v17040_v54 = vld [vmem:[#allocation54_spill] sm:$0xff]  ;;  %v17048_v35 = vld [vmem:[#allocation147_spill] sm:$0xff] }
 0x5a5   :  { %4924 = vmatpush.bf16.msrb.mxu0 %v17025_v18 }
 0x5a6   :  { %4507 = vmatpush.bf16.msrb.mxu3 %v16901_v30  ;;  %v13803_v0 = vmax.f32 %v3734_v63, %v4136_v51  ;;  %v17038_v63 = vrot.slane %v16991_v15, 2  ;;  %v17039_v51 = vld [vmem:[#allocation95_spill] sm:$0xff] }
 0x5a7   :  { %5138 = vmatpush.bf16.msrb.mxu1 %v17020_v37  ;;  %v17042_v15 = vld [vmem:[#allocation59_spill] sm:$0xff] }
 0x5a8   :  { %4520 = vmatpush.bf16.msra.mxu2 %v17017_v38  ;;  %4925 = vmatmul.bf16.vlgmr.msrb.gmra.mxu0 %v17029_v25  ;;  %17030 = vst [vmem:[#allocation56_spill] sm:$0xff] %v13803_v0  ;;  %v4137_v25 = vpop.f32.mrf.mxu2  ;;  %v13825_v0 = vpop.f32.mrf.mxu0  ;;  %v17047_v38 = vld [vmem:[#allocation15_spill] sm:$0xff] }
 0x5a9   :  { %5160 = vmatpush.bf16.msra.mxu0 %v17026_v8 }
 0x5aa   :  { %4508 = vmatpush.bf16.msrb.mxu3 %v17000_v23  ;;  %v17072_v23 = vld [vmem:[#allocation158_spill] sm:$0xff] }
 0x5ab   :  { %5139 = vmatpush.bf16.msrb.mxu1 %v17024_v2 }
 0x5ac   :  { %4521 = vmatpush.bf16.msra.mxu2 %v17021_v50 }
 0x5ad   :  { %5161 = vmatpush.bf16.msra.mxu0 %v17031_v53 }
 0x5ae   :  { %4509 = vmatpush.bf16.msrb.mxu3 %v17003_v17  ;;  %v17071_v17 = vld [vmem:[#allocation36_spill] sm:$0xff] }
 0x5af   :  { %5140 = vmatpush.bf16.msrb.mxu1 %v17028_v14 }
 0x5b0   :  { %4522 = vmatpush.bf16.msra.mxu2 %v17025_v18  ;;  %v4720_v25 = vpop.f32.mrf.mxu0 }
 0x5b1   :  { %4510 = vmatmul.bf16.vlgmr.msrb.gmra.mxu3 %v17035_v52  ;;  %5162 = vmatpush.bf16.msra.mxu0 %v17039_v51  ;;  %v17041_v52 = vld [vmem:[#allocation76_spill] sm:$0xff] }
 0x5b2   :  { %4696 = vmatpush.bf16.msra.mxu3 %v17005_v62  ;;  %v17069_v62 = vld [vmem:[#allocation66_spill] sm:$0xff] }
 0x5b3   :  { %5141 = vmatpush.bf16.msrb.mxu1 %v17032_v9  ;;  %4523 = vmatmul.bf16.vlgmr.msra.gmra.mxu2 %v17038_v63  ;;  %v13834_v63 = vpop.f32.mrf.mxu1 }
 0x5b4   :  { %4722 = vmatpush.bf16.msrb.mxu2 %v17026_v8  ;;  %17044 = vst [vmem:[#allocation181_spill] sm:$0xff] %v13834_v63  ;;  %v17046_v8 = vld [vmem:[#allocation145_spill] sm:$0xff]  ;;  %v4290_v18 = vpop.f32.mrf.mxu3 }
 0x5b5   :  { %5163 = vmatpush.bf16.msra.mxu0 %v17041_v52  ;;  %v17073_v63 = vld [vmem:[#allocation9_spill] sm:$0xff] }
 0x5b6   :  { %5142 = vmatmul.bf16.vlgmr.msrb.gmra.mxu1 %v13817_v45  ;;  %4697 = vmatpush.bf16.msra.mxu3 %v17010_v21  ;;  %v4316_v50 = vpop.f32.mrf.mxu2 }
 0x5b7   :  { %5186 = vmatpush.bf16.msra.mxu1 %v17033_v57 }
 0x5b8   :  { %4723 = vmatpush.bf16.msrb.mxu2 %v17031_v53  ;;  %v17045_v53 = vld [vmem:[#allocation46_spill] sm:$0xff] }
 0x5b9   :  { %5164 = vmatpush.bf16.msra.mxu0 %v17043_v34 }
 0x5ba   :  { %4698 = vmatpush.bf16.msra.mxu3 %v17012_v49  ;;  %v17050_v49 = vld [vmem:[#allocation17_spill] sm:$0xff] }
 0x5bb   :  { %5187 = vmatpush.bf16.msra.mxu1 %v17040_v54  ;;  %v4746_v25 = vpop.f32.mrf.mxu1 }
 0x5bc   :  { %4724 = vmatpush.bf16.msrb.mxu2 %v17039_v51  ;;  %v4304_v51 = vadd.f32 %v13516_v24, %v4290_v18  ;;  %v4292_v24 = vpop.f32.mrf.mxu3  ;;  %v17052_v18 = vld [vmem:[#allocation122_spill] sm:$0xff]  ;;  %v17055_v25 = vld [vmem:[#allocation85_spill] sm:$0xff] }
 0x5bd   :  { %5165 = vmatpush.bf16.msra.mxu0 %v17046_v8  ;;  %v17058_v24 = vld [vmem:[#allocation68_spill] sm:$0xff] }
 0x5be   :  { %4699 = vmatpush.bf16.msra.mxu3 %v17016_v44  ;;  %v4317_v44 = vadd.f32 %v4316_v50, %v4304_v51  ;;  %v4318_v51 = vpop.f32.mrf.mxu2 }
 0x5bf   :  { %5188 = vmatpush.bf16.msra.mxu1 %v17042_v15  ;;  %v17060_v51 = vld [vmem:[#allocation44_spill] sm:$0xff] }
 0x5c0   :  { %4725 = vmatpush.bf16.msrb.mxu2 %v17041_v52  ;;  %v17049_v52 = vld [vmem:[#allocation121_spill] sm:$0xff] }
 0x5c1   :  { %5166 = vmatpush.bf16.msra.mxu0 %v17048_v35 }
 0x5c2   :  { %4700 = vmatpush.bf16.msra.mxu3 %v17020_v37  ;;  %v17051_v37 = vld [vmem:[#allocation78_spill] sm:$0xff] }
 0x5c3   :  { %5189 = vmatpush.bf16.msra.mxu1 %v17045_v53 }
 0x5c4   :  { %4726 = vmatpush.bf16.msrb.mxu2 %v17043_v34  ;;  %v17053_v34 = vld [vmem:[#allocation69_spill] sm:$0xff] }
 0x5c5   :  { %5167 = vmatpush.bf16.msra.mxu0 %v17050_v49  ;;  %v13853_v50 = vsel %vm2570_vm14, %v17053_v34, %v17052_v18 }
 0x5c6   :  { %4701 = vmatpush.bf16.msra.mxu3 %v17024_v2  ;;  %17054 = vst [vmem:[#allocation60_spill] sm:$0xff] %v13853_v50  ;;  %v17057_v2 = vld [vmem:[#allocation186_spill] sm:$0xff] }
 0x5c7   :  { %5190 = vmatpush.bf16.msra.mxu1 %v17047_v38  ;;  %v15971_v21 = vrot.slane %v17057_v2, 3 }
 0x5c8   :  { %4727 = vmatpush.bf16.msrb.mxu2 %v17046_v8  ;;  %5168 = vmatmul.bf16.vlgmr.msra.gmra.mxu0 %v13853_v50  ;;  %v17056_v8 = vld [vmem:[#allocation91_spill] sm:$0xff] }
 0x5c9   :  { %5212 = vmatpush.bf16.msrb.mxu0 %v17051_v37 }
 0x5ca   :  { %4702 = vmatpush.bf16.msra.mxu3 %v17028_v14  ;;  %v17061_v14 = vld [vmem:[#allocation123_spill] sm:$0xff] }
 0x5cb   :  { %5191 = vmatpush.bf16.msra.mxu1 %v17049_v52  ;;  %v13871_v50 = vsel %vm2607_vm1, %v17061_v14, %v17060_v51 }
 0x5cc   :  { %4728 = vmatpush.bf16.msrb.mxu2 %v17048_v35  ;;  %v17059_v35 = vld [vmem:[#allocation169_spill] sm:$0xff] }
 0x5cd   :  { %5213 = vmatpush.bf16.msrb.mxu0 %v17056_v8 }
 0x5ce   :  { %4703 = vmatpush.bf16.msra.mxu3 %v17032_v9  ;;  %v17062_v9 = vrot.slane %v16992_v48, 3  ;;  %v17067_v48 = vld [vmem:[#allocation178_spill] sm:$0xff] }
 0x5cf   :  { %5192 = vmatpush.bf16.msra.mxu1 %v17055_v25 }
 0x5d0   :  { %4729 = vmatpush.bf16.msrb.mxu2 %v17050_v49  ;;  %v17063_v49 = vld [vmem:[#allocation150_spill] sm:$0xff] }
 0x5d1   :  { %4704 = vmatmul.bf16.vlgmr.msra.gmra.mxu3 %v15971_v21  ;;  %5214 = vmatpush.bf16.msrb.mxu0 %v17063_v49  ;;  %v17066_v21 = vld [vmem:[#allocation154_spill] sm:$0xff] }
 0x5d2   :  { %4748 = vmatpush.bf16.msrb.mxu3 %v17033_v57  ;;  %v13880_v57 = vpop.f32.mrf.mxu0 }
 0x5d3   :  { %5193 = vmatpush.bf16.msra.mxu1 %v17058_v24  ;;  %4730 = vmatmul.bf16.vlgmr.msrb.gmra.mxu2 %v17062_v9  ;;  %17065 = vst [vmem:[#allocation16_spill] sm:$0xff] %v13880_v57  ;;  %v17068_v9 = vld [vmem:[#allocation39_spill] sm:$0xff] }
 0x5d4   :  { %4774 = vmatpush.bf16.msra.mxu2 %v17051_v37  ;;  %v17064_v37 = vld [vmem:[#allocation172_spill] sm:$0xff] }
 0x5d5   :  { %5215 = vmatpush.bf16.msrb.mxu0 %v17066_v21 }
 0x5d6   :  { %5194 = vmatmul.bf16.vlgmr.msra.gmra.mxu1 %v13871_v50  ;;  %4749 = vmatpush.bf16.msrb.mxu3 %v17040_v54  ;;  %v13889_v54 = vpop.f32.mrf.mxu1  ;;  %v4368_v57 = vpop.f32.mrf.mxu2 }
 0x5d7   :  { %5243 = vmatpush.bf16.msrb.mxu1 %v17059_v35  ;;  %17070 = vst [vmem:[#allocation8_spill] sm:$0xff] %v13889_v54  ;;  %v17074_v54 = vld [vmem:[#allocation160_spill] sm:$0xff] }
 0x5d8   :  { %4775 = vmatpush.bf16.msra.mxu2 %v17056_v8 }
 0x5d9   :  { %5216 = vmatpush.bf16.msrb.mxu0 %v17069_v62 }
 0x5da   :  { %4750 = vmatpush.bf16.msrb.mxu3 %v17042_v15  ;;  %v4772_v8 = vpop.f32.mrf.mxu0  ;;  %v4330_v15 = vadd.f32 %v13568_v31, %v4317_v44  ;;  %v17076_v44 = vld [vmem:[#allocation202_spill] sm:$0xff] }
 0x5db   :  { %5244 = vmatpush.bf16.msrb.mxu1 %v17064_v37  ;;  %v17075_v8 = vld [vmem:[#allocation63_spill] sm:$0xff] }
 0x5dc   :  { %4776 = vmatpush.bf16.msra.mxu2 %v17063_v49  ;;  %v4342_v49 = vpop.f32.mrf.mxu3 }
 0x5dd   :  { %5217 = vmatpush.bf16.msrb.mxu0 %v17072_v23  ;;  %v4343_v30 = vadd.f32 %v4342_v49, %v4330_v15  ;;  %v17078_v49 = vld [vmem:[#allocation170_spill] sm:$0xff] }
 0x5de   :  { %4751 = vmatpush.bf16.msrb.mxu3 %v17045_v53  ;;  %v4798_v31 = vpop.f32.mrf.mxu1  ;;  %v17080_v15 = vld [vmem:[#allocation70_spill] sm:$0xff] }
 0x5df   :  { %5245 = vmatpush.bf16.msrb.mxu1 %v17067_v48  ;;  %v4356_v53 = vadd.f32 %v13609_v46, %v4343_v30  ;;  %v17079_v46 = vld [vmem:[#allocation57_spill] sm:$0xff] }
 0x5e0   :  { %4777 = vmatpush.bf16.msra.mxu2 %v17066_v21  ;;  %v17083_v31 = vld [vmem:[#allocation173_spill] sm:$0xff] }
 0x5e1   :  { %5218 = vmatpush.bf16.msrb.mxu0 %v17074_v54  ;;  %v4369_v21 = vadd.f32 %v4368_v57, %v4356_v53  ;;  %v4370_v53 = vpop.f32.mrf.mxu2  ;;  %v17082_v57 = vld [vmem:[#allocation203_spill] sm:$0xff] }
 0x5e2   :  { %4752 = vmatpush.bf16.msrb.mxu3 %v17047_v38  ;;  %v13911_v38 = vsel %vm2700_vm0, %v17080_v15, %v17079_v46  ;;  %v17086_v53 = vrot.slane %v17004_v59, 3  ;;  %v17090_v59 = vld [vmem:[#allocation208_spill] sm:$0xff] }
 0x5e3   :  { %5277 = vmatpush.bf16.msra.mxu1 %v17068_v9  ;;  %17081 = vst [vmem:[#allocation167_spill] sm:$0xff] %v13911_v38 }
 0x5e4   :  { %4778 = vmatpush.bf16.msra.mxu2 %v17069_v62  ;;  %v17077_v62 = vld [vmem:[#allocation164_spill] sm:$0xff]  ;;  %v4344_v30 = vpop.f32.mrf.mxu3 }
 0x5e5   :  { %5219 = vmatpush.bf16.msrb.mxu0 %v17077_v62  ;;  %v17085_v30 = vld [vmem:[#allocation204_spill] sm:$0xff] }
 0x5e6   :  { %7788 = vmatmul.msk.bf16.vlgmr.msrb.gmra.mxu1 %vm3473_vm2, %v17075_v8  ;;  %4753 = vmatpush.bf16.msrb.mxu3 %v17049_v52 }
 0x5e7   :  { %5278 = vmatpush.bf16.msra.mxu1 %v17071_v17 }
 0x5e8   :  { %4779 = vmatpush.bf16.msra.mxu2 %v17072_v23  ;;  %5220 = vmatmul.bf16.vlgmr.msrb.gmra.mxu0 %v13911_v38  ;;  %v17084_v23 = vld [vmem:[#allocation193_spill] sm:$0xff] }
 0x5e9   :  { %5264 = vmatpush.bf16.msra.mxu0 %v17078_v49  ;;  %v15990_v52 = vrot.slane %v17084_v23, 3 }
 0x5ea   :  { %4754 = vmatpush.bf16.msrb.mxu3 %v17055_v25  ;;  %v17096_v25 = vld [vmem:[#allocation61_spill] sm:$0xff] }
 0x5eb   :  { %5279 = vmatpush.bf16.msra.mxu1 %v17073_v63  ;;  %v16002_v38 = vrot.slane %v17096_v25, 3 }
 0x5ec   :  { %4780 = vmatpush.bf16.msra.mxu2 %v17074_v54  ;;  %v17087_v54 = vld [vmem:[#allocation179_spill] sm:$0xff] }
 0x5ed   :  { %5265 = vmatpush.bf16.msra.mxu0 %v17083_v31 }
 0x5ee   :  { %4755 = vmatpush.bf16.msrb.mxu3 %v17058_v24  ;;  %v17088_v24 = vld [vmem:[#allocation206_spill] sm:$0xff] }
 0x5ef   :  { %5280 = vmatpush.bf16.msra.mxu1 %v17076_v44 }
 0x5f0   :  { %4781 = vmatpush.bf16.msra.mxu2 %v17077_v62  ;;  %v13931_v62 = vpop.f32.mrf.mxu0 }
 0x5f1   :  { %4756 = vmatmul.bf16.vlgmr.msrb.gmra.mxu3 %v15990_v52  ;;  %5266 = vmatpush.bf16.msra.mxu0 %v17087_v54  ;;  %v17092_v52 = vld [vmem:[#allocation187_spill] sm:$0xff] }
 0x5f2   :  { %4805 = vmatpush.bf16.msra.mxu3 %v17059_v35  ;;  %v17089_v35 = vld [vmem:[#allocation182_spill] sm:$0xff] }
 0x5f3   :  { %5281 = vmatpush.bf16.msra.mxu1 %v17082_v57  ;;  %4782 = vmatmul.bf16.vlgmr.msra.gmra.mxu2 %v17086_v53  ;;  %v17091_v53 = vld [vmem:[#allocation210_spill] sm:$0xff] }
 0x5f4   :  { %4826 = vmatpush.bf16.msrb.mxu2 %v17078_v49  ;;  %v13945_v49 = vpop.f32.mrf.mxu1 }
 0x5f5   :  { %5267 = vmatpush.bf16.msra.mxu0 %v17089_v35  ;;  %17093 = vst [vmem:[#allocation185_spill] sm:$0xff] %v13945_v49 }
 0x5f6   :  { %4806 = vmatpush.bf16.msra.mxu3 %v17064_v37  ;;  %v4382_v37 = vadd.f32 %v13650_v13, %v4369_v21  ;;  %v4420_v49 = vpop.f32.mrf.mxu2  ;;  %v17099_v13 = vld [vmem:[#allocation212_spill] sm:$0xff] }
 0x5f7   :  { %5282 = vmatpush.bf16.msra.mxu1 %v17085_v30  ;;  %v17101_v21 = vld [vmem:[#allocation196_spill] sm:$0xff] }
 0x5f8   :  { %4827 = vmatpush.bf16.msrb.mxu2 %v17083_v31  ;;  %v13943_v31 = vsel %vm2533_vm15, %v17036_v32, %v17053_v34  ;;  %v4394_v32 = vpop.f32.mrf.mxu3 }
 0x5f9   :  { %5268 = vmatpush.bf16.msra.mxu0 %v17092_v52  ;;  %v13955_v34 = vadd.f32 %v4394_v32, %v4382_v37  ;;  %v17100_v37 = vld [vmem:[#allocation19_spill] sm:$0xff] }
 0x5fa   :  { %4807 = vmatpush.bf16.msra.mxu3 %v17067_v48  ;;  %v17095_v48 = vld [vmem:[#allocation189_spill] sm:$0xff] }
 0x5fb   :  { %5283 = vmatpush.bf16.msra.mxu1 %v17088_v24 }
 0x5fc   :  { %4828 = vmatpush.bf16.msrb.mxu2 %v17087_v54  ;;  %v4824_v54 = vpop.f32.mrf.mxu0 }
 0x5fd   :  { %5269 = vmatpush.bf16.msra.mxu0 %v17095_v48  ;;  %v17098_v54 = vld [vmem:[#allocation194_spill] sm:$0xff] }
 0x5fe   :  { %4839 = vmatpush.bf16.msrb.mxu3 %v17068_v9  ;;  %v17094_v9 = vld [vmem:[#allocation211_spill] sm:$0xff] }
 0x5ff   :  { %5284 = vmatpush.bf16.msra.mxu1 %v17090_v59 }
 0x600   :  { %4829 = vmatpush.bf16.msrb.mxu2 %v17089_v35  ;;  %v17097_v35 = vld [vmem:[#allocation33_spill] sm:$0xff]  ;;  %v4396_v32 = vpop.f32.mrf.mxu3 }
 0x601   :  { %7770 = vmatmul.msk.bf16.vlgmr.msra.gmra.mxu3 %vm3473_vm2, %v16002_v38  ;;  %5270 = vmatpush.bf16.msra.mxu0 %v17098_v54  ;;  %v17102_v38 = vld [vmem:[#allocation213_spill] sm:$0xff] }
 0x602   :  { %5285 = vmatmul.bf16.vlgmr.msra.gmra.mxu1 %v13943_v31  ;;  %4840 = vmatpush.bf16.msrb.mxu3 %v17071_v17  ;;  %v4863_v17 = vpop.f32.mrf.mxu1 }
 0x603   :  { %5329 = vmatpush.bf16.msrb.mxu1 %v17091_v53  ;;  %v17103_v17 = vld [vmem:[#allocation198_spill] sm:$0xff] }
 0x604   :  { %4830 = vmatpush.bf16.msrb.mxu2 %v17092_v52  ;;  %v4422_v52 = vpop.f32.mrf.mxu2 }
 0x605   :  { %5271 = vmatpush.bf16.msra.mxu0 %v17100_v37  ;;  %v17106_v52 = vld [vmem:[#allocation43_spill] sm:$0xff]  ;;  %v13983_v32 = vpop.f32.mrf.mxu0 }
 0x606   :  { %4841 = vmatpush.bf16.msrb.mxu3 %v17073_v63 }
 0x607   :  { %5330 = vmatpush.bf16.msrb.mxu1 %v17094_v9 }
 0x608   :  { %4831 = vmatpush.bf16.msrb.mxu2 %v17095_v48  ;;  %5272 = vmatmul.bf16.vlgmr.msra.gmra.mxu0 %v13817_v45  ;;  %v17104_v48 = vld [vmem:[#allocation215_spill] sm:$0xff]  ;;  %v17107_v45 = vld [vmem:[#allocation216_spill] sm:$0xff] }
 0x609   :  { %5316 = vmatpush.bf16.msrb.mxu0 %v17101_v21 }
 0x60a   :  { %4842 = vmatpush.bf16.msrb.mxu3 %v17076_v44 }
 0x60b   :  { %5331 = vmatpush.bf16.msrb.mxu1 %v17097_v35 }
 0x60c   :  { %4832 = vmatpush.bf16.msrb.mxu2 %v17098_v54  ;;  %v17105_v54 = vrot.slane %v17057_v2, 3  ;;  %v13994_v2 = vsel %vm2607_vm1, %v17060_v51, %v17080_v15  ;;  %v17112_v51 = vld [vmem:[#allocation201_spill] sm:$0xff] }
 0x60d   :  { %5317 = vmatpush.bf16.msrb.mxu0 %v17103_v17 }
 0x60e   :  { %4843 = vmatpush.bf16.msrb.mxu3 %v17082_v57 }
 0x60f   :  { %5332 = vmatpush.bf16.msrb.mxu1 %v17099_v13 }
 0x610   :  { %4833 = vmatpush.bf16.msrb.mxu2 %v17100_v37  ;;  %v17108_v37 = vld [vmem:[#allocation199_spill] sm:$0xff] }
 0x611   :  { %5318 = vmatpush.bf16.msrb.mxu0 %v17106_v52 }
 0x612   :  { %4844 = vmatpush.bf16.msrb.mxu3 %v17085_v30 }
 0x613   :  { %5333 = vmatpush.bf16.msrb.mxu1 %v17102_v38  ;;  %4834 = vmatmul.bf16.vlgmr.msrb.gmra.mxu2 %v17105_v54  ;;  %v4434_v54 = vadd.f32 %v13698_v22, %v4420_v49 }
 0x614   :  { %4878 = vmatpush.bf16.msra.mxu2 %v17101_v21  ;;  %v17109_v21 = vld [vmem:[#allocation62_spill] sm:$0xff]  ;;  %v4459_v49 = vpop.f32.mrf.mxu3 }
 0x615   :  { %5319 = vmatpush.bf16.msrb.mxu0 %v17108_v37  ;;  %v4447_v22 = vadd.f32 %v13682_v10, %v4434_v54  ;;  %v17114_v10 = vld [vmem:[#allocation41_spill] sm:$0xff] }
 0x616   :  { %4845 = vmatpush.bf16.msrb.mxu3 %v17088_v24  ;;  %v17111_v24 = vrot.slane %v16952_v20, 3  ;;  %v17115_v54 = vld [vmem:[#allocation205_spill] sm:$0xff] }
 0x617   :  { %5334 = vmatpush.bf16.msrb.mxu1 %v17104_v48  ;;  %v4460_v20 = vadd.f32 %v4459_v49, %v4447_v22 }
 0x618   :  { %4879 = vmatpush.bf16.msra.mxu2 %v17103_v17  ;;  %v17110_v17 = vld [vmem:[#allocation40_spill] sm:$0xff] }
 0x619   :  { %5320 = vmatpush.bf16.msrb.mxu0 %v17110_v17 }
 0x61a   :  { %4846 = vmatpush.bf16.msrb.mxu3 %v17090_v59  ;;  %v14000_v59 = vpop.f32.mrf.mxu1 }
 0x61b   :  { %5335 = vmatpush.bf16.msrb.mxu1 %v17107_v45 }
 0x61c   :  { %4880 = vmatpush.bf16.msra.mxu2 %v17106_v52  ;;  %v4876_v52 = vpop.f32.mrf.mxu0  ;;  %v4461_v22 = vpop.f32.mrf.mxu3 }
 0x61d   :  { %4847 = vmatmul.bf16.vlgmr.msrb.gmra.mxu3 %v17111_v24  ;;  %5321 = vmatpush.bf16.msrb.mxu0 %v17112_v51  ;;  %v4472_v24 = vpop.f32.mrf.mxu2  ;;  %v17119_v22 = vld [vmem:[#allocation88_spill] sm:$0xff] }
 0x61e   :  { %4891 = vmatpush.bf16.msra.mxu3 %v17091_v53  ;;  %v4473_v15 = vadd.f32 %v4472_v24, %v4460_v20  ;;  %v17116_v20 = vld [vmem:[#allocation207_spill] sm:$0xff]  ;;  %v17117_v24 = vrot.slane %v17084_v23, 3 }
 0x61f   :  { %5336 = vmatpush.bf16.msrb.mxu1 %v17109_v21  ;;  %v17121_v23 = vld [vmem:[#allocation47_spill] sm:$0xff] }
 0x620   :  { %4881 = vmatpush.bf16.msra.mxu2 %v17108_v37  ;;  %v17113_v37 = vld [vmem:[#allocation10_spill] sm:$0xff] }
 0x621   :  { %5322 = vmatpush.bf16.msrb.mxu0 %v17113_v37 }
 0x622   :  { %5337 = vmatmul.bf16.vlgmr.msrb.gmra.mxu1 %v13994_v2  ;;  %4892 = vmatpush.bf16.msra.mxu3 %v17094_v9  ;;  %v4915_v52 = vpop.f32.mrf.mxu1 }
 0x623   :  { %5509 = vmatpush.bf16.msra.mxu1 %v16891_v11  ;;  %v17118_v52 = vld [vmem:[#allocation209_spill] sm:$0xff] }
 0x624   :  { %4882 = vmatpush.bf16.msra.mxu2 %v17110_v17 }
 0x625   :  { %5323 = vmatpush.bf16.msrb.mxu0 %v17114_v10  ;;  %v4474_v49 = vpop.f32.mrf.mxu2 }
 0x626   :  { %4893 = vmatpush.bf16.msra.mxu3 %v17097_v35  ;;  %v17120_v49 = vld [vmem:[#allocation92_spill] sm:$0xff] }
 0x627   :  { %5510 = vmatpush.bf16.msra.mxu1 %v16896_v47 }
 0x628   :  { %4883 = vmatpush.bf16.msra.mxu2 %v17112_v51  ;;  %5324 = vmatmul.bf16.vlgmr.msrb.gmra.mxu0 %v13871_v50  ;;  %v14033_v50 = vpop.f32.mrf.mxu0 }
 0x629   :  { %5373 = vmatpush.bf16.msra.mxu0 %v17115_v54 }
 0x62a   :  { %4894 = vmatpush.bf16.msra.mxu3 %v17099_v13 }
 0x62b   :  { %5511 = vmatpush.bf16.msra.mxu1 %v16899_v39 }
 0x62c   :  { %4884 = vmatpush.bf16.msra.mxu2 %v17113_v37  ;;  %v17123_v37 = vld [vmem:[#allocation104_spill] sm:$0xff] }
 0x62d   :  { %5374 = vmatpush.bf16.msra.mxu0 %v17116_v20 }
 0x62e   :  { %4895 = vmatpush.bf16.msra.mxu3 %v17102_v38 }
 0x62f   :  { %5512 = vmatpush.bf16.msra.mxu1 %v16905_v16 }
 0x630   :  { %4885 = vmatpush.bf16.msra.mxu2 %v17114_v10 }
 0x631   :  { %5375 = vmatpush.bf16.msra.mxu0 %v17118_v52 }
 0x632   :  { %4896 = vmatpush.bf16.msra.mxu3 %v17104_v48 }
 0x633   :  { %5513 = vmatpush.bf16.msra.mxu1 %v16914_v29  ;;  %4886 = vmatmul.bf16.vlgmr.msra.gmra.mxu2 %v17117_v24  ;;  %v16018_v24 = vrot.slane %v17121_v23, 1  ;;  %v14046_v10 = vpop.f32.mrf.mxu1 }
 0x634   :  { %4935 = vmatpush.bf16.msrb.mxu2 %v17115_v54  ;;  %v4486_v54 = vadd.f32 %v13746_v40, %v4473_v15  ;;  %v17124_v40 = vld [vmem:[#allocation108_spill] sm:$0xff]  ;;  %v4511_v15 = vpop.f32.mrf.mxu3 }
 0x635   :  { %5535 = vmatpush.bf16.msrb.mxu0 %v17119_v22 }
 0x636   :  { %4897 = vmatpush.bf16.msra.mxu3 %v17107_v45 }
 0x637   :  { %5514 = vmatpush.bf16.msra.mxu1 %v16921_v12 }
 0x638   :  { %4936 = vmatpush.bf16.msrb.mxu2 %v17116_v20  ;;  %v17122_v20 = vrot.slane %v16976_v4, 3  ;;  %7789 = vmatmul.msk.bf16.vlgmr.msra.gmra.mxu0 %vm3473_vm2, %v17075_v8  ;;  %v4499_v4 = vadd.f32 %v13729_v1, %v4486_v54  ;;  %v17128_v1 = vld [vmem:[#allocation118_spill] sm:$0xff] }
 0x639   :  { %5536 = vmatpush.bf16.msrb.mxu0 %v17120_v49 }
 0x63a   :  { %4898 = vmatpush.bf16.msra.mxu3 %v17109_v21 }
 0x63b   :  { %5515 = vmatpush.bf16.msra.mxu1 %v16927_v5 }
 0x63c   :  { %4937 = vmatpush.bf16.msrb.mxu2 %v17118_v52  ;;  %v4928_v52 = vpop.f32.mrf.mxu0  ;;  %v4513_v54 = vpop.f32.mrf.mxu3 }
 0x63d   :  { %4899 = vmatmul.bf16.vlgmr.msra.gmra.mxu3 %v17122_v20  ;;  %5537 = vmatpush.bf16.msrb.mxu0 %v17123_v37  ;;  %v4512_v20 = vadd.f32 %v4511_v15, %v4499_v4  ;;  %v17126_v52 = vrot.slane %v17096_v25, 3  ;;  %v17129_v25 = vld [vmem:[#allocation126_spill] sm:$0xff]  ;;  %v17131_v4 = vld [vmem:[#allocation120_spill] sm:$0xff]  ;;  %v17133_v54 = vld [vmem:[#allocation55_spill] sm:$0xff] }
 0x63e   :  { %5121 = vmatpush.bf16.msrb.mxu3 %v16891_v11 }
 0x63f   :  { %5516 = vmatpush.bf16.msra.mxu1 %v16932_v61 }
 0x640   :  { %5147 = vmatpush.bf16.msra.mxu2 %v17119_v22  ;;  %v4524_v22 = vpop.f32.mrf.mxu2 }
 0x641   :  { %5538 = vmatpush.bf16.msrb.mxu0 %v17124_v40  ;;  %v14060_v51 = vadd.f32 %v4524_v22, %v4512_v20  ;;  %v17132_v20 = vld [vmem:[#allocation131_spill] sm:$0xff] }
 0x642   :  { %5517 = vmatmul.bf16.vlgmr.msra.gmra.mxu1 %v16018_v24  ;;  %5122 = vmatpush.bf16.msrb.mxu3 %v16896_v47  ;;  %v17125_v24 = vld [vmem:[#allocation97_spill] sm:$0xff]  ;;  %v17127_v47 = vld [vmem:[#allocation112_spill] sm:$0xff] }
 0x643   :  { %5561 = vmatpush.bf16.msrb.mxu1 %v16935_v33  ;;  %7771 = vmatmul.msk.bf16.vlgmr.msrb.gmra.mxu2 %vm3473_vm2, %v17126_v52 }
 0x644   :  { %5148 = vmatpush.bf16.msra.mxu2 %v17120_v49  ;;  %v5145_v49 = vpop.f32.mrf.mxu1 }
 0x645   :  { %5539 = vmatpush.bf16.msrb.mxu0 %v17127_v47  ;;  %v17130_v49 = vld [vmem:[#allocation42_spill] sm:$0xff] }
 0x646   :  { %5123 = vmatpush.bf16.msrb.mxu3 %v16899_v39  ;;  %v14078_v15 = vsel %vm2533_vm15, %v17131_v4, %v17130_v49 }
 0x647   :  { %5562 = vmatpush.bf16.msrb.mxu1 %v16940_v60  ;;  %v16027_v52 = vrot.slane %v14078_v15, 1 }
 0x648   :  { %5149 = vmatpush.bf16.msra.mxu2 %v17123_v37  ;;  %v4526_v22 = vpop.f32.mrf.mxu2  ;;  %v17136_v37 = vld [vmem:[#allocation21_spill] sm:$0xff] }
 0x649   :  { %5540 = vmatpush.bf16.msrb.mxu0 %v17128_v1  ;;  %v14088_v22 = vpop.f32.mrf.mxu0 }
 0x64a   :  { %5124 = vmatpush.bf16.msrb.mxu3 %v16905_v16 }
 0x64b   :  { %5563 = vmatpush.bf16.msrb.mxu1 %v17125_v24 }
 0x64c   :  { %5150 = vmatpush.bf16.msra.mxu2 %v17124_v40  ;;  %v17135_v40 = vld [vmem:[#allocation100_spill] sm:$0xff] }
 0x64d   :  { %5541 = vmatpush.bf16.msrb.mxu0 %v17129_v25 }
 0x64e   :  { %5125 = vmatpush.bf16.msrb.mxu3 %v16914_v29  ;;  %v17150_v29 = vld [vmem:[#allocation171_spill] sm:$0xff] }
 0x64f   :  { %5564 = vmatpush.bf16.msrb.mxu1 %v16758_v41 }
 0x650   :  { %5151 = vmatpush.bf16.msra.mxu2 %v17127_v47  ;;  %v17134_v47 = vld [vmem:[#allocation22_spill] sm:$0xff] }
 0x651   :  { %5542 = vmatpush.bf16.msrb.mxu0 %v17132_v20 }
 0x652   :  { %5126 = vmatpush.bf16.msrb.mxu3 %v16921_v12 }
 0x653   :  { %5565 = vmatpush.bf16.msrb.mxu1 %v16765_v58 }
 0x654   :  { %5152 = vmatpush.bf16.msra.mxu2 %v17128_v1  ;;  %5543 = vmatmul.bf16.vlgmr.msrb.gmra.mxu0 %v16027_v52  ;;  %v14096_v1 = vsel %vm2570_vm14, %v17135_v40, %v17134_v47  ;;  %v14106_v52 = vpop.f32.mrf.mxu1  ;;  %v17137_v47 = vld [vmem:[#allocation52_spill] sm:$0xff] }
 0x655   :  { %5587 = vmatpush.bf16.msra.mxu0 %v17133_v54 }
 0x656   :  { %5127 = vmatpush.bf16.msrb.mxu3 %v16927_v5  ;;  %v16033_v5 = vrot.slane %v14096_v1, 1 }
 0x657   :  { %5566 = vmatpush.bf16.msrb.mxu1 %v16775_v43 }
 0x658   :  { %5153 = vmatpush.bf16.msra.mxu2 %v17129_v25  ;;  %v17138_v25 = vld [vmem:[#allocation12_spill] sm:$0xff] }
 0x659   :  { %5588 = vmatpush.bf16.msra.mxu0 %v17136_v37 }
 0x65a   :  { %5128 = vmatpush.bf16.msrb.mxu3 %v16932_v61  ;;  %v5171_v61 = vpop.f32.mrf.mxu0 }
 0x65b   :  { %5567 = vmatpush.bf16.msrb.mxu1 %v16779_v56 }
 0x65c   :  { %5154 = vmatpush.bf16.msra.mxu2 %v17132_v20  ;;  %v4705_v20 = vpop.f32.mrf.mxu3 }
 0x65d   :  { %5129 = vmatmul.bf16.vlgmr.msrb.gmra.mxu3 %v17137_v47  ;;  %5589 = vmatpush.bf16.msra.mxu0 %v17138_v25 }
 0x65e   :  { %5173 = vmatpush.bf16.msra.mxu3 %v16935_v33  ;;  %v17139_v33 = vld [vmem:[#allocation151_spill] sm:$0xff] }
 0x65f   :  { %5568 = vmatpush.bf16.msrb.mxu1 %v16959_v7  ;;  %5155 = vmatmul.bf16.vlgmr.msra.gmra.mxu2 %v13943_v31  ;;  %v5197_v31 = vpop.f32.mrf.mxu1 }
 0x660   :  { %5199 = vmatpush.bf16.msrb.mxu2 %v17133_v54  ;;  %v4731_v54 = vpop.f32.mrf.mxu2  ;;  %v17143_v31 = vld [vmem:[#allocation77_spill] sm:$0xff] }
 0x661   :  { %5590 = vmatpush.bf16.msra.mxu0 %v16965_v36 }
 0x662   :  { %5569 = vmatmul.bf16.vlgmr.msrb.gmra.mxu1 %v16033_v5  ;;  %5174 = vmatpush.bf16.msra.mxu3 %v16940_v60  ;;  %v17140_v5 = vld [vmem:[#allocation83_spill] sm:$0xff] }
 0x663   :  { %5613 = vmatpush.bf16.msra.mxu1 %v16961_v6 }
 0x664   :  { %5200 = vmatpush.bf16.msrb.mxu2 %v17136_v37  ;;  %v4707_v61 = vpop.f32.mrf.mxu3  ;;  %v17141_v37 = vld [vmem:[#allocation84_spill] sm:$0xff] }
 0x665   :  { %5591 = vmatpush.bf16.msra.mxu0 %v17140_v5 }
 0x666   :  { %5175 = vmatpush.bf16.msra.mxu3 %v17125_v24  ;;  %v17144_v24 = vld [vmem:[#allocation113_spill] sm:$0xff] }
 0x667   :  { %5614 = vmatpush.bf16.msra.mxu1 %v16795_v27 }
 0x668   :  { %5201 = vmatpush.bf16.msrb.mxu2 %v17138_v25  ;;  %v4733_v60 = vpop.f32.mrf.mxu2  ;;  %v14128_v25 = vpop.f32.mrf.mxu1 }
 0x669   :  { %5592 = vmatpush.bf16.msra.mxu0 %v17141_v37  ;;  %17142 = vst [vmem:[#allocation192_spill] sm:$0xff] %v14128_v25  ;;  %v17146_v60 = vld [vmem:[#allocation50_spill] sm:$0xff] }
 0x66a   :  { %5176 = vmatpush.bf16.msra.mxu3 %v16758_v41  ;;  %v17145_v41 = vld [vmem:[#allocation149_spill] sm:$0xff]  ;;  %v17147_v25 = vld [vmem:[#allocation162_spill] sm:$0xff] }
 0x66b   :  { %5615 = vmatpush.bf16.msra.mxu1 %v17139_v33 }
 0x66c   :  { %5202 = vmatpush.bf16.msrb.mxu2 %v16965_v36  ;;  %v14135_v36 = vsel %vm2607_vm1, %v17145_v41, %v17144_v24  ;;  %v17148_v41 = vld [vmem:[#allocation159_spill] sm:$0xff] }
 0x66d   :  { %5593 = vmatpush.bf16.msra.mxu0 %v17143_v31  ;;  %v16047_v61 = vrot.slane %v14135_v36, 1 }
 0x66e   :  { %5177 = vmatpush.bf16.msra.mxu3 %v16765_v58  ;;  %v4706_v58 = vadd.f32 %v4705_v20, %v13778_v26  ;;  %v17151_v20 = vld [vmem:[#allocation89_spill] sm:$0xff] }
 0x66f   :  { %5616 = vmatpush.bf16.msra.mxu1 %v16807_v3 }
 0x670   :  { %5203 = vmatpush.bf16.msrb.mxu2 %v17140_v5  ;;  %v14143_v5 = vpop.f32.mrf.mxu0  ;;  %v5249_v12 = vpop.f32.mrf.mxu1  ;;  %v4719_v26 = vadd.f32 %v13825_v0, %v4706_v58 }
 0x671   :  { %5594 = vmatpush.bf16.msra.mxu0 %v17146_v60  ;;  %v14166_v12 = vsel %vm2570_vm14, %v17052_v18, %v17061_v14 }
 0x672   :  { %5178 = vmatpush.bf16.msra.mxu3 %v16775_v43  ;;  %v17149_v43 = vld [vmem:[#allocation98_spill] sm:$0xff]  ;;  %v4732_v0 = vadd.f32 %v4731_v54, %v4719_v26  ;;  %v17157_v26 = vld [vmem:[#allocation183_spill] sm:$0xff] }
 0x673   :  { %5617 = vmatpush.bf16.msra.mxu1 %v16813_v42 }
 0x674   :  { %5204 = vmatpush.bf16.msrb.mxu2 %v17141_v37  ;;  %v14151_v37 = vsel %vm2700_vm0, %v17149_v43, %v17148_v41  ;;  %5595 = vmatmul.bf16.vlgmr.msra.gmra.mxu0 %v16047_v61  ;;  %v17152_v61 = vld [vmem:[#allocation174_spill] sm:$0xff]  ;;  %v4757_v14 = vpop.f32.mrf.mxu3 }
 0x675   :  { %5639 = vmatpush.bf16.msrb.mxu0 %v17147_v25  ;;  %v16051_v16 = vrot.slane %v14151_v37, 1 }
 0x676   :  { %5179 = vmatpush.bf16.msra.mxu3 %v16779_v56  ;;  %v4783_v18 = vpop.f32.mrf.mxu2  ;;  %v17163_v56 = vld [vmem:[#allocation124_spill] sm:$0xff] }
 0x677   :  { %5618 = vmatpush.bf16.msra.mxu1 %v16823_v28 }
 0x678   :  { %5205 = vmatpush.bf16.msrb.mxu2 %v17143_v31  ;;  %v5223_v58 = vpop.f32.mrf.mxu0  ;;  %v17155_v31 = vld [vmem:[#allocation181_spill] sm:$0xff] }
 0x679   :  { %5640 = vmatpush.bf16.msrb.mxu0 %v17150_v29  ;;  %v17158_v58 = vld [vmem:[#allocation110_spill] sm:$0xff] }
 0x67a   :  { %5180 = vmatpush.bf16.msra.mxu3 %v16959_v7  ;;  %v17160_v7 = vld [vmem:[#allocation188_spill] sm:$0xff] }
 0x67b   :  { %5619 = vmatpush.bf16.msra.mxu1 %v16828_v19 }
 0x67c   :  { %5206 = vmatpush.bf16.msrb.mxu2 %v17146_v60  ;;  %v17153_v60 = vld [vmem:[#allocation102_spill] sm:$0xff] }
 0x67d   :  { %5181 = vmatmul.bf16.vlgmr.msra.gmra.mxu3 %v14166_v12  ;;  %5641 = vmatpush.bf16.msrb.mxu0 %v17152_v61 }
 0x67e   :  { %5225 = vmatpush.bf16.msrb.mxu3 %v16961_v6  ;;  %v17156_v6 = vld [vmem:[#allocation106_spill] sm:$0xff] }
 0x67f   :  { %5620 = vmatpush.bf16.msra.mxu1 %v16831_v55  ;;  %5207 = vmatmul.bf16.vlgmr.msrb.gmra.mxu2 %v13994_v2  ;;  %v14182_v54 = vpop.f32.mrf.mxu1 }
 0x680   :  { %5251 = vmatpush.bf16.msra.mxu2 %v17147_v25  ;;  %v17154_v25 = vld [vmem:[#allocation180_spill] sm:$0xff] }
 0x681   :  { %5642 = vmatpush.bf16.msrb.mxu0 %v17154_v25 }
 0x682   :  { %5621 = vmatmul.bf16.vlgmr.msra.gmra.mxu1 %v16051_v16  ;;  %5226 = vmatpush.bf16.msrb.mxu3 %v16795_v27  ;;  %v4745_v16 = vadd.f32 %v17155_v31, %v4732_v0  ;;  %v4759_v31 = vpop.f32.mrf.mxu3  ;;  %v4785_v0 = vpop.f32.mrf.mxu2 }
 0x683   :  { %5678 = vmatpush.bf16.msrb.mxu1 %v17151_v20  ;;  %v17165_v0 = vld [vmem:[#allocation34_spill] sm:$0xff] }
 0x684   :  { %5252 = vmatpush.bf16.msra.mxu2 %v17150_v29  ;;  %v4758_v2 = vadd.f32 %v4757_v14, %v4745_v16  ;;  %v17159_v29 = vld [vmem:[#allocation16_spill] sm:$0xff] }
 0x685   :  { %5643 = vmatpush.bf16.msrb.mxu0 %v17157_v26 }
 0x686   :  { %5227 = vmatpush.bf16.msrb.mxu3 %v17139_v33  ;;  %v4771_v27 = vadd.f32 %v17159_v29, %v4758_v2  ;;  %v17161_v33 = vld [vmem:[#allocation115_spill] sm:$0xff]  ;;  %v17164_v29 = vld [vmem:[#allocation8_spill] sm:$0xff] }
 0x687   :  { %5679 = vmatpush.bf16.msrb.mxu1 %v17153_v60  ;;  %v5288_v14 = vpop.f32.mrf.mxu1 }
 0x688   :  { %5253 = vmatpush.bf16.msra.mxu2 %v17152_v61  ;;  %v4784_v16 = vadd.f32 %v4783_v18, %v4771_v27  ;;  %v17162_v61 = vld [vmem:[#allocation190_spill] sm:$0xff]  ;;  %v17167_v18 = vld [vmem:[#allocation128_spill] sm:$0xff]  ;;  %v17168_v14 = vld [vmem:[#allocation105_spill] sm:$0xff] }
 0x689   :  { %5644 = vmatpush.bf16.msrb.mxu0 %v17160_v7 }
 0x68a   :  { %5228 = vmatpush.bf16.msrb.mxu3 %v16807_v3  ;;  %v4797_v2 = vadd.f32 %v17164_v29, %v4784_v16  ;;  %v4809_v31 = vpop.f32.mrf.mxu3  ;;  %v17166_v3 = vld [vmem:[#allocation195_spill] sm:$0xff]  ;;  %v14212_v16 = vsel %vm2570_vm14, %v17130_v49, %v17135_v40  ;;  %v17172_v29 = vld [vmem:[#allocation109_spill] sm:$0xff]  ;;  %v14230_v49 = vsel %vm2700_vm0, %v17079_v46, %v17075_v8  ;;  %v17176_v46 = vld [vmem:[#allocation48_spill] sm:$0xff] }
 0x68b   :  { %5680 = vmatpush.bf16.msrb.mxu1 %v17156_v6 }
 0x68c   :  { %5254 = vmatpush.bf16.msra.mxu2 %v17154_v25  ;;  %v4408_v25 = vadd.f32 %v17165_v0, %v13955_v34  ;;  %v4810_v27 = vadd.f32 %v4809_v31, %v4797_v2  ;;  %v17170_v34 = vrot.slane %v17121_v23, 1  ;;  %v16063_v2 = vrot.slane %v14212_v16, 1  ;;  %v17173_v23 = vld [vmem:[#allocation80_spill] sm:$0xff]  ;;  %v17174_v0 = vld [vmem:[#allocation114_spill] sm:$0xff] }
 0x68d   :  { %5645 = vmatpush.bf16.msrb.mxu0 %v17162_v61 }
 0x68e   :  { %5229 = vmatpush.bf16.msrb.mxu3 %v16813_v42  ;;  %v14205_v42 = vmax.f32 %v4408_v25, %v4810_v27  ;;  %v17171_v25 = vld [vmem:[#allocation135_spill] sm:$0xff]  ;;  %v17175_v27 = vld [vmem:[#allocation37_spill] sm:$0xff] }
 0x68f   :  { %5681 = vmatpush.bf16.msrb.mxu1 %v17158_v58 }
 0x690   :  { %5255 = vmatpush.bf16.msra.mxu2 %v17157_v26  ;;  %v14203_v26 = vpop.f32.mrf.mxu0  ;;  %17169 = vst [vmem:[#allocation197_spill] sm:$0xff] %v14205_v42  ;;  %6590 = vrot.lane.b32.xlu0 %v14205_v42, %s8293_s2 }
 0x691   :  { %5646 = vmatpush.bf16.msrb.mxu0 %v17166_v3  ;;  %6597 = vrot.lane.b32.xlu2 %v14205_v42, %s8294_s6 }
 0x692   :  { %5230 = vmatpush.bf16.msrb.mxu3 %v16823_v28  ;;  %v4811_v40 = vpop.f32.mrf.mxu3 }
 0x693   :  { %5682 = vmatpush.bf16.msrb.mxu1 %v17161_v33  ;;  %v17178_v40 = vld [vmem:[#allocation75_spill] sm:$0xff] }
 0x694   :  { %5256 = vmatpush.bf16.msra.mxu2 %v17160_v7  ;;  %5647 = vmatmul.bf16.vlgmr.msrb.gmra.mxu0 %v17170_v34  ;;  %v17177_v34 = vld [vmem:[#allocation119_spill] sm:$0xff] }
 0x695   :  { %5691 = vmatpush.bf16.msra.mxu0 %v17168_v14 }
 0x696   :  { %5231 = vmatpush.bf16.msrb.mxu3 %v16828_v19  ;;  %v4835_v8 = vpop.f32.mrf.mxu2 }
 0x697   :  { %5683 = vmatpush.bf16.msrb.mxu1 %v17163_v56 }
 0x698   :  { %5257 = vmatpush.bf16.msra.mxu2 %v17162_v61  ;;  %v5275_v31 = vpop.f32.mrf.mxu0  ;;  %6549 = vrot.lane.b32.xlu0 %v17176_v46, %s8293_s2  ;;  %v17184_v61 = vld [vmem:[#allocation27_spill] sm:$0xff] }
 0x699   :  { %5692 = vmatpush.bf16.msra.mxu0 %v17172_v29  ;;  %v17179_v31 = vld [vmem:[#allocation127_spill] sm:$0xff] }
 0x69a   :  { %5232 = vmatpush.bf16.msrb.mxu3 %v16831_v55 }
 0x69b   :  { %5684 = vmatpush.bf16.msrb.mxu1 %v17167_v18 }
 0x69c   :  { %5258 = vmatpush.bf16.msra.mxu2 %v17166_v3  ;;  %v17183_v3 = vld [vmem:[#allocation137_spill] sm:$0xff] }
 0x69d   :  { %5233 = vmatmul.bf16.vlgmr.msrb.gmra.mxu3 %v14230_v49  ;;  %5693 = vmatpush.bf16.msra.mxu0 %v17174_v0 }
 0x69e   :  { %5290 = vmatpush.bf16.msra.mxu3 %v17151_v20  ;;  %v4837_v42 = vpop.f32.mrf.mxu2 }
 0x69f   :  { %5685 = vmatpush.bf16.msrb.mxu1 %v17171_v25  ;;  %5259 = vmatmul.bf16.vlgmr.msra.gmra.mxu2 %v17137_v47  ;;  %v14247_v47 = vpop.f32.mrf.mxu1  ;;  %v17185_v42 = vld [vmem:[#allocation81_spill] sm:$0xff] }
 0x6a0   :  { %5303 = vmatpush.bf16.msrb.mxu2 %v17168_v14  ;;  %v4848_v46 = vpop.f32.mrf.mxu3  ;;  %v17182_v14 = vld [vmem:[#allocation144_spill] sm:$0xff] }
 0x6a1   :  { %5694 = vmatpush.bf16.msra.mxu0 %v17177_v34 }
 0x6a2   :  { %5686 = vmatmul.bf16.vlgmr.msrb.gmra.mxu1 %v16063_v2  ;;  %5291 = vmatpush.bf16.msra.mxu3 %v17153_v60  ;;  %v17180_v2 = vld [vmem:[#allocation140_spill] sm:$0xff] }
 0x6a3   :  { %5730 = vmatpush.bf16.msra.mxu1 %v17173_v23 }
 0x6a4   :  { %5304 = vmatpush.bf16.msrb.mxu2 %v17172_v29  ;;  %v17181_v29 = vld [vmem:[#allocation133_spill] sm:$0xff] }
 0x6a5   :  { %5695 = vmatpush.bf16.msra.mxu0 %v17179_v31  ;;  %v14262_v7 = vpop.f32.mrf.mxu0 }
 0x6a6   :  { %5292 = vmatpush.bf16.msra.mxu3 %v17156_v6  ;;  %v17187_v6 = vld [vmem:[#allocation38_spill] sm:$0xff] }
 0x6a7   :  { %5731 = vmatpush.bf16.msra.mxu1 %v17175_v27 }
 0x6a8   :  { %5305 = vmatpush.bf16.msrb.mxu2 %v17174_v0  ;;  %v5340_v0 = vpop.f32.mrf.mxu1 }
 0x6a9   :  { %5696 = vmatpush.bf16.msra.mxu0 %v17181_v29  ;;  %v14271_v0 = vsel %vm2700_vm0, %v17144_v24, %v17149_v43 }
 0x6aa   :  { %5293 = vmatpush.bf16.msra.mxu3 %v17158_v58  ;;  %v17186_v58 = vld [vmem:[#allocation65_spill] sm:$0xff] }
 0x6ab   :  { %5732 = vmatpush.bf16.msra.mxu1 %v17178_v40 }
 0x6ac   :  { %5306 = vmatpush.bf16.msrb.mxu2 %v17177_v34  ;;  %v4850_v34 = vpop.f32.mrf.mxu3 }
 0x6ad   :  { %5697 = vmatpush.bf16.msra.mxu0 %v17183_v3  ;;  %v17189_v34 = vld [vmem:[#allocation7_spill] sm:$0xff]  ;;  %v5327_v43 = vpop.f32.mrf.mxu0 }
 0x6ae   :  { %5294 = vmatpush.bf16.msra.mxu3 %v17161_v33  ;;  %v17199_v43 = vld [vmem:[#allocation64_spill] sm:$0xff] }
 0x6af   :  { %5733 = vmatpush.bf16.msra.mxu1 %v17180_v2 }
 0x6b0   :  { %5307 = vmatpush.bf16.msrb.mxu2 %v17179_v31  ;;  %v17190_v31 = vld [vmem:[#allocation139_spill] sm:$0xff] }
 0x6b1   :  { %5698 = vmatpush.bf16.msra.mxu0 %v17185_v42 }
 0x6b2   :  { %5295 = vmatpush.bf16.msra.mxu3 %v17163_v56  ;;  %v16082_v56 = vrot.slane %v14271_v0, 1 }
 0x6b3   :  { %5734 = vmatpush.bf16.msra.mxu1 %v17182_v14 }
 0x6b4   :  { %5308 = vmatpush.bf16.msrb.mxu2 %v17181_v29  ;;  %v17188_v29 = vrot.slane %v14096_v1, 1  ;;  %v17192_v1 = vld [vmem:[#allocation60_spill] sm:$0xff] }
 0x6b5   :  { %5743 = vmatpush.bf16.msrb.mxu0 %v17187_v6 }
 0x6b6   :  { %5296 = vmatpush.bf16.msra.mxu3 %v17167_v18  ;;  %5699 = vmatmul.bf16.vlgmr.msra.gmra.mxu0 %v17188_v29  ;;  %v17191_v18 = vld [vmem:[#allocation86_spill] sm:$0xff]  ;;  %v17193_v29 = vld [vmem:[#allocation143_spill] sm:$0xff] }
 0x6b7   :  { %5735 = vmatpush.bf16.msra.mxu1 %v17184_v61 }
 0x6b8   :  { %5309 = vmatpush.bf16.msrb.mxu2 %v17183_v3  ;;  %v4836_v3 = vadd.f32 %v4835_v8, %v13931_v62  ;;  %v4887_v62 = vpop.f32.mrf.mxu2  ;;  %v17195_v8 = vld [vmem:[#allocation185_spill] sm:$0xff] }
 0x6b9   :  { %5744 = vmatpush.bf16.msrb.mxu0 %v17190_v31 }
 0x6ba   :  { %5297 = vmatpush.bf16.msra.mxu3 %v17171_v25  ;;  %v4849_v24 = vadd.f32 %v4848_v46, %v4836_v3  ;;  %v17202_v25 = vld [vmem:[#allocation111_spill] sm:$0xff] }
 0x6bb   :  { %5736 = vmatpush.bf16.msra.mxu1 %v17186_v58 }
 0x6bc   :  { %5310 = vmatpush.bf16.msrb.mxu2 %v17185_v42  ;;  %v17194_v42 = vld [vmem:[#allocation90_spill] sm:$0xff] }
 0x6bd   :  { %5298 = vmatmul.bf16.vlgmr.msra.gmra.mxu3 %v17192_v1  ;;  %5745 = vmatpush.bf16.msrb.mxu0 %v17193_v29 }
 0x6be   :  { %5342 = vmatpush.bf16.msrb.mxu3 %v17173_v23  ;;  %v17196_v23 = vld [vmem:[#allocation6_spill] sm:$0xff] }
 0x6bf   :  { %5737 = vmatpush.bf16.msra.mxu1 %v17189_v34  ;;  %5311 = vmatmul.bf16.vlgmr.msrb.gmra.mxu2 %v14166_v12  ;;  %v14296_v3 = vpop.f32.mrf.mxu1  ;;  %v14299_v12 = vpop.f32.mrf.mxu0 }
 0x6c0   :  { %5355 = vmatpush.bf16.msra.mxu2 %v17187_v6  ;;  %v4862_v6 = vadd.f32 %v17195_v8, %v4849_v24  ;;  %17198 = vst [vmem:[#allocation130_spill] sm:$0xff] %v14299_v12  ;;  %v4889_v24 = vpop.f32.mrf.mxu2  ;;  %v4900_v8 = vpop.f32.mrf.mxu3  ;;  %v17204_v12 = vld [vmem:[#allocation117_spill] sm:$0xff] }
 0x6c1   :  { %5746 = vmatpush.bf16.msrb.mxu0 %v17196_v23 }
 0x6c2   :  { %5738 = vmatmul.bf16.vlgmr.msra.gmra.mxu1 %v16082_v56  ;;  %5343 = vmatpush.bf16.msrb.mxu3 %v17175_v27  ;;  %v17197_v56 = vld [vmem:[#allocation103_spill] sm:$0xff]  ;;  %v4875_v46 = vadd.f32 %v13983_v32, %v4862_v6  ;;  %v17201_v27 = vld [vmem:[#allocation73_spill] sm:$0xff] }
 0x6c3   :  { %5910 = vmatpush.bf16.msrb.mxu1 %v17191_v18 }
 0x6c4   :  { %5356 = vmatpush.bf16.msra.mxu2 %v17190_v31  ;;  %v4888_v1 = vadd.f32 %v4887_v62, %v4875_v46  ;;  %v17200_v31 = vld [vmem:[#allocation107_spill] sm:$0xff] }
 0x6c5   :  { %5747 = vmatpush.bf16.msrb.mxu0 %v17199_v43  ;;  %v17203_v46 = vld [vmem:[#allocation11_spill] sm:$0xff] }
 0x6c6   :  { %5344 = vmatpush.bf16.msrb.mxu3 %v17178_v40  ;;  %v4901_v40 = vadd.f32 %v4900_v8, %v4888_v1 }
 0x6c7   :  { %5911 = vmatpush.bf16.msrb.mxu1 %v17194_v42  ;;  %v5520_v32 = vpop.f32.mrf.mxu1  ;;  %v5379_v62 = vpop.f32.mrf.mxu0 }
 0x6c8   :  { %5357 = vmatpush.bf16.msra.mxu2 %v17193_v29  ;;  %v4914_v6 = vadd.f32 %v14000_v59, %v4901_v40  ;;  %v4902_v1 = vpop.f32.mrf.mxu3  ;;  %v4939_v8 = vpop.f32.mrf.mxu2  ;;  %v17206_v59 = vld [vmem:[#allocation26_spill] sm:$0xff]  ;;  %v17207_v32 = vld [vmem:[#allocation125_spill] sm:$0xff]  ;;  %v17208_v62 = vld [vmem:[#allocation132_spill] sm:$0xff] }
 0x6c9   :  { %5748 = vmatpush.bf16.msrb.mxu0 %v17201_v27 }
 0x6ca   :  { %5345 = vmatpush.bf16.msrb.mxu3 %v17180_v2  ;;  %v4927_v24 = vadd.f32 %v14033_v50, %v4914_v6  ;;  %v17210_v50 = vld [vmem:[#allocation168_spill] sm:$0xff]  ;;  %v17211_v6 = vld [vmem:[#allocation93_spill] sm:$0xff] }
 0x6cb   :  { %5912 = vmatpush.bf16.msrb.mxu1 %v17197_v56  ;;  %v14328_v1 = vsel %vm2533_vm15, %v17211_v6, %v17210_v50  ;;  %v17216_v6 = vld [vmem:[#allocation167_spill] sm:$0xff] }
 0x6cc   :  { %5358 = vmatpush.bf16.msra.mxu2 %v17196_v23  ;;  %v17205_v23 = vld [vmem:[#allocation49_spill] sm:$0xff]  ;;  %v4940_v40 = vadd.f32 %v4939_v8, %v4927_v24  ;;  %v17214_v24 = vld [vmem:[#allocation136_spill] sm:$0xff] }
 0x6cd   :  { %5749 = vmatpush.bf16.msrb.mxu0 %v17203_v46  ;;  %v4538_v29 = vadd.f32 %v17205_v23, %v14060_v51  ;;  %v17212_v51 = vrot.slane %v14151_v37, 1  ;;  %v17213_v23 = vld [vmem:[#allocation129_spill] sm:$0xff]  ;;  %v17215_v8 = vld [vmem:[#allocation72_spill] sm:$0xff] }
 0x6ce   :  { %5346 = vmatpush.bf16.msrb.mxu3 %v17182_v14 }
 0x6cf   :  { %5913 = vmatpush.bf16.msrb.mxu1 %v17200_v31 }
 0x6d0   :  { %5359 = vmatpush.bf16.msra.mxu2 %v17199_v43  ;;  %v14321_v43 = vmax.f32 %v4538_v29, %v4940_v40  ;;  %v16092_v29 = vrot.slane %v14328_v1, 2  ;;  %v4941_v40 = vpop.f32.mrf.mxu2 }
 0x6d1   :  { %5750 = vmatpush.bf16.msrb.mxu0 %v17206_v59  ;;  %v14344_v37 = vpop.f32.mrf.mxu0  ;;  %v17219_v40 = vld [vmem:[#allocation56_spill] sm:$0xff] }
 0x6d2   :  { %5347 = vmatpush.bf16.msrb.mxu3 %v17184_v61  ;;  %17209 = vst [vmem:[#allocation191_spill] sm:$0xff] %v14321_v43  ;;  %6592 = vrot.lane.b32.xlu1 %v14321_v43, %s8293_s2  ;;  %v17238_v61 = vld [vmem:[#allocation91_spill] sm:$0xff] }
 0x6d3   :  { %5914 = vmatpush.bf16.msrb.mxu1 %v17202_v25 }
 0x6d4   :  { %5360 = vmatpush.bf16.msra.mxu2 %v17201_v27  ;;  %5751 = vmatmul.bf16.vlgmr.msrb.gmra.mxu0 %v17212_v51  ;;  %v17217_v51 = vld [vmem:[#allocation95_spill] sm:$0xff]  ;;  %v17224_v27 = vld [vmem:[#allocation145_spill] sm:$0xff] }
 0x6d5   :  { %5936 = vmatpush.bf16.msra.mxu0 %v17208_v62 }
 0x6d6   :  { %5348 = vmatpush.bf16.msrb.mxu3 %v17186_v58  ;;  %v17231_v58 = vld [vmem:[#allocation17_spill] sm:$0xff] }
 0x6d7   :  { %5915 = vmatpush.bf16.msrb.mxu1 %v17204_v12 }
 0x6d8   :  { %5361 = vmatpush.bf16.msra.mxu2 %v17203_v46  ;;  %v17218_v46 = vld [vmem:[#allocation54_spill] sm:$0xff] }
 0x6d9   :  { %5937 = vmatpush.bf16.msra.mxu0 %v17214_v24 }
 0x6da   :  { %5349 = vmatpush.bf16.msrb.mxu3 %v17189_v34  ;;  %6551 = vrot.lane.b32.xlu1 %v17219_v40, %s8293_s2  ;;  %v17225_v34 = vld [vmem:[#allocation15_spill] sm:$0xff] }
 0x6db   :  { %5916 = vmatpush.bf16.msrb.mxu1 %v17207_v32 }
 0x6dc   :  { %5362 = vmatpush.bf16.msra.mxu2 %v17206_v59  ;;  %v17223_v59 = vld [vmem:[#allocation46_spill] sm:$0xff] }
 0x6dd   :  { %5350 = vmatmul.bf16.vlgmr.msrb.gmra.mxu3 %v17216_v6  ;;  %5938 = vmatpush.bf16.msra.mxu0 %v17217_v51  ;;  %v17222_v6 = vld [vmem:[#allocation141_spill] sm:$0xff] }
 0x6de   :  { %5522 = vmatpush.bf16.msra.mxu3 %v17191_v18  ;;  %v17221_v18 = vld [vmem:[#allocation59_spill] sm:$0xff] }
 0x6df   :  { %5917 = vmatpush.bf16.msrb.mxu1 %v17213_v23  ;;  %5363 = vmatmul.bf16.vlgmr.msra.gmra.mxu2 %v14230_v49  ;;  %v5546_v49 = vpop.f32.mrf.mxu0 }
 0x6e0   :  { %5548 = vmatpush.bf16.msrb.mxu2 %v17208_v62  ;;  %v17220_v62 = vld [vmem:[#allocation76_spill] sm:$0xff]  ;;  %v5130_v40 = vpop.f32.mrf.mxu3 }
 0x6e1   :  { %5939 = vmatpush.bf16.msra.mxu0 %v17220_v62 }
 0x6e2   :  { %5918 = vmatmul.bf16.vlgmr.msrb.gmra.mxu1 %v16092_v29  ;;  %5523 = vmatpush.bf16.msra.mxu3 %v17194_v42  ;;  %v14355_v29 = vpop.f32.mrf.mxu1  ;;  %v5156_v42 = vpop.f32.mrf.mxu2 }
 0x6e3   :  { %5962 = vmatpush.bf16.msra.mxu1 %v17215_v8 }
 0x6e4   :  { %5549 = vmatpush.bf16.msrb.mxu2 %v17214_v24  ;;  %v5144_v24 = vadd.f32 %v14046_v10, %v5130_v40 }
 0x6e5   :  { %5940 = vmatpush.bf16.msra.mxu0 %v17222_v6 }
 0x6e6   :  { %5524 = vmatpush.bf16.msra.mxu3 %v17197_v56  ;;  %v5157_v49 = vadd.f32 %v5156_v42, %v5144_v24  ;;  %v17227_v56 = vld [vmem:[#allocation121_spill] sm:$0xff] }
 0x6e7   :  { %5963 = vmatpush.bf16.msra.mxu1 %v17218_v46  ;;  %v17232_v24 = vld [vmem:[#allocation85_spill] sm:$0xff] }
 0x6e8   :  { %5550 = vmatpush.bf16.msrb.mxu2 %v17217_v51  ;;  %v17226_v51 = vld [vmem:[#allocation147_spill] sm:$0xff] }
 0x6e9   :  { %5941 = vmatpush.bf16.msra.mxu0 %v17224_v27 }
 0x6ea   :  { %5525 = vmatpush.bf16.msra.mxu3 %v17200_v31  ;;  %v5572_v43 = vpop.f32.mrf.mxu1  ;;  %v17229_v31 = vld [vmem:[#allocation161_spill] sm:$0xff]  ;;  %v5158_v40 = vpop.f32.mrf.mxu2 }
 0x6eb   :  { %5964 = vmatpush.bf16.msra.mxu1 %v17221_v18  ;;  %v5132_v43 = vpop.f32.mrf.mxu3 }
 0x6ec   :  { %5551 = vmatpush.bf16.msrb.mxu2 %v17220_v62  ;;  %v17228_v62 = vld [vmem:[#allocation155_spill] sm:$0xff]  ;;  %v17236_v43 = vld [vmem:[#allocation82_spill] sm:$0xff] }
 0x6ed   :  { %5942 = vmatpush.bf16.msra.mxu0 %v17226_v51  ;;  %v14375_v10 = vsel %vm2570_vm14, %v17229_v31, %v17228_v62  ;;  %v14394_v40 = vsel %vm2533_vm15, %v17236_v43, %v17131_v4  ;;  %v17240_v43 = vrot.slane %v14212_v16, 1  ;;  %v17246_v16 = vld [vmem:[#allocation39_spill] sm:$0xff] }
 0x6ee   :  { %5526 = vmatpush.bf16.msra.mxu3 %v17202_v25  ;;  %17230 = vst [vmem:[#allocation165_spill] sm:$0xff] %v14375_v10  ;;  %v16112_v42 = vrot.slane %v14375_v10, 2  ;;  %v17235_v25 = vld [vmem:[#allocation153_spill] sm:$0xff] }
 0x6ef   :  { %5965 = vmatpush.bf16.msra.mxu1 %v17223_v59 }
 0x6f0   :  { %5552 = vmatpush.bf16.msrb.mxu2 %v17222_v6  ;;  %v17233_v6 = vld [vmem:[#allocation78_spill] sm:$0xff] }
 0x6f1   :  { %5943 = vmatpush.bf16.msra.mxu0 %v17231_v58  ;;  %v14407_v4 = vpop.f32.mrf.mxu0 }
 0x6f2   :  { %5527 = vmatpush.bf16.msra.mxu3 %v17204_v12  ;;  %v17234_v12 = vld [vmem:[#allocation45_spill] sm:$0xff] }
 0x6f3   :  { %5966 = vmatpush.bf16.msra.mxu1 %v17225_v34  ;;  %v14387_v62 = vsel %vm2607_vm1, %v17235_v25, %v17234_v12  ;;  %v16117_v25 = vrot.slane %v14394_v40, 1 }
 0x6f4   :  { %5553 = vmatpush.bf16.msrb.mxu2 %v17224_v27  ;;  %5944 = vmatmul.bf16.vlgmr.msra.gmra.mxu0 %v16112_v42  ;;  %v17237_v27 = vld [vmem:[#allocation68_spill] sm:$0xff]  ;;  %v17241_v42 = vld [vmem:[#allocation150_spill] sm:$0xff] }
 0x6f5   :  { %5988 = vmatpush.bf16.msrb.mxu0 %v17233_v6 }
 0x6f6   :  { %5528 = vmatpush.bf16.msra.mxu3 %v17207_v32  ;;  %v16116_v32 = vrot.slane %v14387_v62, 2 }
 0x6f7   :  { %5967 = vmatpush.bf16.msra.mxu1 %v17227_v56 }
 0x6f8   :  { %5554 = vmatpush.bf16.msrb.mxu2 %v17226_v51  ;;  %v17239_v51 = vld [vmem:[#allocation169_spill] sm:$0xff] }
 0x6f9   :  { %5989 = vmatpush.bf16.msrb.mxu0 %v17238_v61 }
 0x6fa   :  { %5529 = vmatpush.bf16.msra.mxu3 %v17213_v23 }
 0x6fb   :  { %5968 = vmatpush.bf16.msra.mxu1 %v17232_v24 }
 0x6fc   :  { %5555 = vmatpush.bf16.msrb.mxu2 %v17231_v58  ;;  %v17242_v58 = vld [vmem:[#allocation172_spill] sm:$0xff] }
 0x6fd   :  { %5530 = vmatmul.bf16.vlgmr.msra.gmra.mxu3 %v16117_v25  ;;  %5990 = vmatpush.bf16.msrb.mxu0 %v17241_v42  ;;  %v17247_v25 = vld [vmem:[#allocation66_spill] sm:$0xff] }
 0x6fe   :  { %5574 = vmatpush.bf16.msrb.mxu3 %v17215_v8  ;;  %v17244_v8 = vld [vmem:[#allocation154_spill] sm:$0xff] }
 0x6ff   :  { %5969 = vmatpush.bf16.msra.mxu1 %v17237_v27  ;;  %5556 = vmatmul.bf16.vlgmr.msrb.gmra.mxu2 %v17240_v43  ;;  %v5598_v43 = vpop.f32.mrf.mxu0 }
 0x700   :  { %5600 = vmatpush.bf16.msra.mxu2 %v17233_v6  ;;  %v14417_v6 = vpop.f32.mrf.mxu1  ;;  %v5182_v23 = vpop.f32.mrf.mxu3 }
 0x701   :  { %17243 = vst [vmem:[#allocation200_spill] sm:$0xff] %v14417_v6  ;;  %5991 = vmatpush.bf16.msrb.mxu0 %v17244_v8 }
 0x702   :  { %5970 = vmatmul.bf16.vlgmr.msra.gmra.mxu1 %v16116_v32  ;;  %5575 = vmatpush.bf16.msrb.mxu3 %v17218_v46  ;;  %v17245_v32 = vld [vmem:[#allocation178_spill] sm:$0xff]  ;;  %v5170_v46 = vadd.f32 %v14088_v22, %v5157_v49  ;;  %v5208_v10 = vpop.f32.mrf.mxu2  ;;  %v17251_v49 = vld [vmem:[#allocation160_spill] sm:$0xff] }
 0x703   :  { %6019 = vmatpush.bf16.msrb.mxu1 %v17239_v51 }
 0x704   :  { %5601 = vmatpush.bf16.msra.mxu2 %v17238_v61  ;;  %v17248_v61 = vld [vmem:[#allocation36_spill] sm:$0xff]  ;;  %v5183_v14 = vadd.f32 %v5182_v23, %v5170_v46 }
 0x705   :  { %5992 = vmatpush.bf16.msrb.mxu0 %v17247_v25  ;;  %v17253_v46 = vld [vmem:[#allocation28_spill] sm:$0xff] }
 0x706   :  { %5576 = vmatpush.bf16.msrb.mxu3 %v17221_v18  ;;  %v17249_v18 = vld [vmem:[#allocation158_spill] sm:$0xff]  ;;  %v5196_v43 = vadd.f32 %v14106_v52, %v5183_v14 }
 0x707   :  { %6020 = vmatpush.bf16.msrb.mxu1 %v17242_v58 }
 0x708   :  { %5602 = vmatpush.bf16.msra.mxu2 %v17241_v42  ;;  %v5624_v2 = vpop.f32.mrf.mxu1  ;;  %v17250_v42 = vld [vmem:[#allocation156_spill] sm:$0xff]  ;;  %v5209_v22 = vadd.f32 %v5208_v10, %v5196_v43  ;;  %v5184_v52 = vpop.f32.mrf.mxu3 }
 0x709   :  { %5993 = vmatpush.bf16.msrb.mxu0 %v17249_v18  ;;  %v16126_v6 = vrot.slane %v17250_v42, 2  ;;  %v17252_v2 = vld [vmem:[#allocation152_spill] sm:$0xff]  ;;  %v17257_v52 = vld [vmem:[#allocation101_spill] sm:$0xff] }
 0x70a   :  { %5577 = vmatpush.bf16.msrb.mxu3 %v17223_v59  ;;  %v14443_v23 = vsel %vm2700_vm0, %v17253_v46, %v17252_v2  ;;  %v5210_v14 = vpop.f32.mrf.mxu2  ;;  %v17254_v10 = vld [vmem:[#allocation164_spill] sm:$0xff]  ;;  %v17256_v2 = vld [vmem:[#allocation173_spill] sm:$0xff] }
 0x70b   :  { %6021 = vmatpush.bf16.msrb.mxu1 %v17245_v32  ;;  %v16128_v43 = vrot.slane %v14443_v23, 2  ;;  %v16133_v14 = vrot.slane %v17257_v52, 1 }
 0x70c   :  { %5603 = vmatpush.bf16.msra.mxu2 %v17244_v8 }
 0x70d   :  { %5994 = vmatpush.bf16.msrb.mxu0 %v17251_v49 }
 0x70e   :  { %5578 = vmatpush.bf16.msrb.mxu3 %v17225_v34 }
 0x70f   :  { %6053 = vmatpush.bf16.msra.mxu1 %v17246_v16 }
 0x710   :  { %5604 = vmatpush.bf16.msra.mxu2 %v17247_v25 }
 0x711   :  { %5995 = vmatpush.bf16.msrb.mxu0 %v17254_v10 }
 0x712   :  { %7792 = vmatmul.msk.bf16.vlgmr.msrb.gmra.mxu1 %vm3473_vm2, %v16126_v6  ;;  %5579 = vmatpush.bf16.msrb.mxu3 %v17227_v56  ;;  %v17255_v6 = vld [vmem:[#allocation170_spill] sm:$0xff] }
 0x713   :  { %6054 = vmatpush.bf16.msra.mxu1 %v17248_v61 }
 0x714   :  { %5605 = vmatpush.bf16.msra.mxu2 %v17249_v18  ;;  %5996 = vmatmul.bf16.vlgmr.msrb.gmra.mxu0 %v16128_v43  ;;  %v17258_v43 = vrot.slane %v14271_v0, 1 }
 0x715   :  { %6040 = vmatpush.bf16.msra.mxu0 %v17255_v6 }
 0x716   :  { %5580 = vmatpush.bf16.msrb.mxu3 %v17232_v24  ;;  %v17259_v24 = vld [vmem:[#allocation179_spill] sm:$0xff] }
 0x717   :  { %6055 = vmatpush.bf16.msra.mxu1 %v17073_v63 }
 0x718   :  { %5606 = vmatpush.bf16.msra.mxu2 %v17251_v49  ;;  %v14464_v49 = vpop.f32.mrf.mxu0 }
 0x719   :  { %6041 = vmatpush.bf16.msra.mxu0 %v17256_v2 }
 0x71a   :  { %5581 = vmatpush.bf16.msrb.mxu3 %v17237_v27  ;;  %v17260_v27 = vld [vmem:[#allocation206_spill] sm:$0xff] }
 0x71b   :  { %6056 = vmatpush.bf16.msra.mxu1 %v17076_v44 }
 0x71c   :  { %5607 = vmatpush.bf16.msra.mxu2 %v17254_v10  ;;  %v17262_v10 = vld [vmem:[#allocation208_spill] sm:$0xff] }
 0x71d   :  { %5582 = vmatmul.bf16.vlgmr.msrb.gmra.mxu3 %v16133_v14  ;;  %6042 = vmatpush.bf16.msra.mxu0 %v17259_v24 }
 0x71e   :  { %5631 = vmatpush.bf16.msra.mxu3 %v17239_v51  ;;  %v17261_v51 = vld [vmem:[#allocation182_spill] sm:$0xff] }
 0x71f   :  { %6057 = vmatpush.bf16.msra.mxu1 %v17082_v57  ;;  %5608 = vmatmul.bf16.vlgmr.msra.gmra.mxu2 %v17258_v43  ;;  %v14478_v14 = vpop.f32.mrf.mxu1 }
 0x720   :  { %5652 = vmatpush.bf16.msrb.mxu2 %v17255_v6  ;;  %v14475_v6 = vsel %vm2533_vm15, %v17210_v50, %v17229_v31  ;;  %v5650_v43 = vpop.f32.mrf.mxu0  ;;  %v5222_v31 = vadd.f32 %v14143_v5, %v5209_v22  ;;  %v5234_v50 = vpop.f32.mrf.mxu3  ;;  %v17265_v5 = vld [vmem:[#allocation194_spill] sm:$0xff] }
 0x721   :  { %6043 = vmatpush.bf16.msra.mxu0 %v17261_v51  ;;  %v16140_v0 = vrot.slane %v14475_v6, 2 }
 0x722   :  { %5632 = vmatpush.bf16.msra.mxu3 %v17242_v58  ;;  %v14494_v58 = vadd.f32 %v5234_v50, %v5222_v31  ;;  %v17266_v50 = vld [vmem:[#allocation19_spill] sm:$0xff] }
 0x723   :  { %6058 = vmatpush.bf16.msra.mxu1 %v17085_v30 }
 0x724   :  { %5653 = vmatpush.bf16.msrb.mxu2 %v17256_v2  ;;  %v17263_v2 = vld [vmem:[#allocation187_spill] sm:$0xff] }
 0x725   :  { %6044 = vmatpush.bf16.msra.mxu0 %v17263_v2 }
 0x726   :  { %5633 = vmatpush.bf16.msra.mxu3 %v17245_v32  ;;  %v17264_v32 = vld [vmem:[#allocation189_spill] sm:$0xff] }
 0x727   :  { %6059 = vmatpush.bf16.msra.mxu1 %v17260_v27  ;;  %v5689_v43 = vpop.f32.mrf.mxu1 }
 0x728   :  { %5654 = vmatpush.bf16.msrb.mxu2 %v17259_v24  ;;  %v5260_v24 = vpop.f32.mrf.mxu2  ;;  %v5236_v22 = vpop.f32.mrf.mxu3  ;;  %v17267_v43 = vld [vmem:[#allocation196_spill] sm:$0xff] }
 0x729   :  { %6045 = vmatpush.bf16.msra.mxu0 %v17264_v32  ;;  %v17270_v22 = vrot.slane %v14394_v40, 1 }
 0x72a   :  { %5665 = vmatpush.bf16.msrb.mxu3 %v17246_v16  ;;  %v16141_v16 = vrot.slane %v17148_v41, 1 }
 0x72b   :  { %6060 = vmatpush.bf16.msra.mxu1 %v17262_v10 }
 0x72c   :  { %5655 = vmatpush.bf16.msrb.mxu2 %v17261_v51 }
 0x72d   :  { %7790 = vmatmul.msk.bf16.vlgmr.msra.gmra.mxu3 %vm3473_vm2, %v16141_v16  ;;  %6046 = vmatpush.bf16.msra.mxu0 %v17265_v5  ;;  %v17269_v16 = vld [vmem:[#allocation198_spill] sm:$0xff] }
 0x72e   :  { %6061 = vmatmul.bf16.vlgmr.msra.gmra.mxu1 %v16140_v0  ;;  %5666 = vmatpush.bf16.msrb.mxu3 %v17248_v61  ;;  %v17268_v0 = vrot.slane %v14328_v1, 2  ;;  %v14530_v1 = vsel %vm2607_vm1, %v17234_v12, %v17253_v46  ;;  %v17273_v46 = vrot.slane %v14078_v15, 1 }
 0x72f   :  { %6105 = vmatpush.bf16.msrb.mxu1 %v17091_v53  ;;  %v16148_v40 = vrot.slane %v14530_v1, 2 }
 0x730   :  { %5656 = vmatpush.bf16.msrb.mxu2 %v17263_v2  ;;  %v5262_v31 = vpop.f32.mrf.mxu2 }
 0x731   :  { %6047 = vmatpush.bf16.msra.mxu0 %v17266_v50  ;;  %v17271_v31 = vld [vmem:[#allocation43_spill] sm:$0xff] }
 0x732   :  { %5667 = vmatpush.bf16.msrb.mxu3 %v17073_v63 }
 0x733   :  { %6106 = vmatpush.bf16.msrb.mxu1 %v17094_v9 }
 0x734   :  { %5657 = vmatpush.bf16.msrb.mxu2 %v17264_v32  ;;  %6048 = vmatmul.bf16.vlgmr.msra.gmra.mxu0 %v17268_v0  ;;  %v17272_v0 = vld [vmem:[#allocation199_spill] sm:$0xff] }
 0x735   :  { %6092 = vmatpush.bf16.msrb.mxu0 %v17267_v43 }
 0x736   :  { %5668 = vmatpush.bf16.msrb.mxu3 %v17076_v44 }
 0x737   :  { %6107 = vmatpush.bf16.msrb.mxu1 %v17097_v35 }
 0x738   :  { %5658 = vmatpush.bf16.msrb.mxu2 %v17265_v5  ;;  %v14522_v5 = vpop.f32.mrf.mxu0 }
 0x739   :  { %6093 = vmatpush.bf16.msrb.mxu0 %v17269_v16 }
 0x73a   :  { %5669 = vmatpush.bf16.msrb.mxu3 %v17082_v57 }
 0x73b   :  { %6108 = vmatpush.bf16.msrb.mxu1 %v17099_v13 }
 0x73c   :  { %5659 = vmatpush.bf16.msrb.mxu2 %v17266_v50 }
 0x73d   :  { %6094 = vmatpush.bf16.msrb.mxu0 %v17271_v31 }
 0x73e   :  { %5670 = vmatpush.bf16.msrb.mxu3 %v17085_v30  ;;  %v14700_v30 = vpop.permute.xlu2 %6242 }
 0x73f   :  { %6109 = vmatpush.bf16.msrb.mxu1 %v17102_v38  ;;  %5660 = vmatmul.bf16.vlgmr.msrb.gmra.mxu2 %v17270_v22  ;;  %v5274_v22 = vadd.f32 %v14203_v26, %v5260_v24  ;;  %v17275_v24 = vld [vmem:[#allocation201_spill] sm:$0xff] }
 0x740   :  { %5704 = vmatpush.bf16.msra.mxu2 %v17267_v43  ;;  %v14533_v43 = vpop.f32.mrf.mxu1  ;;  %v5702_v12 = vpop.f32.mrf.mxu0 }
 0x741   :  { %6095 = vmatpush.bf16.msrb.mxu0 %v17272_v0  ;;  %v5287_v26 = vadd.f32 %v14182_v54, %v5274_v22  ;;  %v17277_v54 = vld [vmem:[#allocation13_spill] sm:$0xff] }
 0x742   :  { %5671 = vmatpush.bf16.msrb.mxu3 %v17260_v27  ;;  %v17278_v22 = vld [vmem:[#allocation41_spill] sm:$0xff] }
 0x743   :  { %6110 = vmatpush.bf16.msrb.mxu1 %v17104_v48 }
 0x744   :  { %5705 = vmatpush.bf16.msra.mxu2 %v17269_v16 }
 0x745   :  { %6096 = vmatpush.bf16.msrb.mxu0 %v17110_v17 }
 0x746   :  { %5672 = vmatpush.bf16.msrb.mxu3 %v17262_v10  ;;  %v17274_v10 = vld [vmem:[#allocation30_spill] sm:$0xff] }
 0x747   :  { %6111 = vmatpush.bf16.msrb.mxu1 %v17107_v45 }
 0x748   :  { %5706 = vmatpush.bf16.msra.mxu2 %v17271_v31  ;;  %v5312_v31 = vpop.f32.mrf.mxu2  ;;  %v5741_v12 = vpop.f32.mrf.mxu1 }
 0x749   :  { %5673 = vmatmul.bf16.vlgmr.msrb.gmra.mxu3 %v17273_v46  ;;  %6097 = vmatpush.bf16.msrb.mxu0 %v17275_v24  ;;  %v17276_v46 = vld [vmem:[#allocation10_spill] sm:$0xff]  ;;  %v17280_v12 = vld [vmem:[#allocation20_spill] sm:$0xff] }
 0x74a   :  { %5717 = vmatpush.bf16.msra.mxu3 %v17091_v53  ;;  %v5299_v53 = vpop.f32.mrf.mxu3 }
 0x74b   :  { %6112 = vmatpush.bf16.msrb.mxu1 %v17109_v21  ;;  %v5300_v16 = vadd.f32 %v5299_v53, %v5287_v26  ;;  %v17279_v26 = vld [vmem:[#allocation205_spill] sm:$0xff] }
 0x74c   :  { %5707 = vmatpush.bf16.msra.mxu2 %v17272_v0  ;;  %v17318_v0 = vld [vmem:[#allocation71_spill] sm:$0xff] }
 0x74d   :  { %v5313_v15 = vadd.f32 %v5312_v31, %v5300_v16  ;;  %6098 = vmatpush.bf16.msrb.mxu0 %v17276_v46  ;;  %v17281_v16 = vrot.slane %v14387_v62, 2  ;;  %v17282_v31 = vld [vmem:[#allocation207_spill] sm:$0xff] }
 0x74e   :  { %6113 = vmatmul.bf16.vlgmr.msrb.gmra.mxu1 %v16148_v40  ;;  %5718 = vmatpush.bf16.msra.mxu3 %v17094_v9  ;;  %v17287_v62 = vld [vmem:[#allocation51_spill] sm:$0xff]  ;;  %v17317_v9 = vld [vmem:[#allocation12_spill] sm:$0xff] }
 0x74f   :  { %6285 = vmatpush.bf16.msra.mxu1 %v16891_v11 }
 0x750   :  { %5708 = vmatpush.bf16.msra.mxu2 %v17110_v17  ;;  %v5314_v53 = vpop.f32.mrf.mxu2  ;;  %v17314_v17 = vld [vmem:[#allocation116_spill] sm:$0xff] }
 0x751   :  { %6099 = vmatpush.bf16.msrb.mxu0 %v17278_v22  ;;  %v17285_v53 = vrot.slane %v17257_v52, 1  ;;  %v5326_v52 = vadd.f32 %v14262_v7, %v5313_v15  ;;  %v17295_v7 = vld [vmem:[#allocation138_spill] sm:$0xff] }
 0x752   :  { %5719 = vmatpush.bf16.msra.mxu3 %v17097_v35  ;;  %v5301_v40 = vpop.f32.mrf.mxu3  ;;  %v17293_v35 = vld [vmem:[#allocation104_spill] sm:$0xff] }
 0x753   :  { %6286 = vmatpush.bf16.msra.mxu1 %v17274_v10  ;;  %v17284_v40 = vld [vmem:[#allocation209_spill] sm:$0xff] }
 0x754   :  { %5709 = vmatpush.bf16.msra.mxu2 %v17275_v24  ;;  %6100 = vmatmul.bf16.vlgmr.msrb.gmra.mxu0 %v17281_v16  ;;  %v17288_v16 = vld [vmem:[#allocation92_spill] sm:$0xff] }
 0x755   :  { %6149 = vmatpush.bf16.msra.mxu0 %v17279_v26 }
 0x756   :  { %5720 = vmatpush.bf16.msra.mxu3 %v17099_v13  ;;  %v17283_v13 = vld [vmem:[#allocation23_spill] sm:$0xff] }
 0x757   :  { %6287 = vmatpush.bf16.msra.mxu1 %v16899_v39 }
 0x758   :  { %5710 = vmatpush.bf16.msra.mxu2 %v17276_v46  ;;  %v17286_v46 = vld [vmem:[#allocation88_spill] sm:$0xff] }
 0x759   :  { %6150 = vmatpush.bf16.msra.mxu0 %v17282_v31 }
 0x75a   :  { %5721 = vmatpush.bf16.msra.mxu3 %v17102_v38  ;;  %v14575_v38 = vpop.f32.mrf.mxu0 }
 0x75b   :  { %6288 = vmatpush.bf16.msra.mxu1 %v17277_v54 }
 0x75c   :  { %5711 = vmatpush.bf16.msra.mxu2 %v17278_v22  ;;  %v17290_v22 = vld [vmem:[#allocation96_spill] sm:$0xff] }
 0x75d   :  { %6151 = vmatpush.bf16.msra.mxu0 %v17284_v40  ;;  %v16160_v24 = vrot.slane %v17290_v22, 3 }
 0x75e   :  { %5722 = vmatpush.bf16.msra.mxu3 %v17104_v48  ;;  %v17289_v48 = vld [vmem:[#allocation53_spill] sm:$0xff] }
 0x75f   :  { %6289 = vmatpush.bf16.msra.mxu1 %v17280_v12  ;;  %5712 = vmatmul.bf16.vlgmr.msra.gmra.mxu2 %v17285_v53  ;;  %v17291_v53 = vld [vmem:[#allocation134_spill] sm:$0xff] }
 0x760   :  { %5761 = vmatpush.bf16.msrb.mxu2 %v17279_v26  ;;  %v14582_v26 = vpop.f32.mrf.mxu1  ;;  %v5351_v15 = vpop.f32.mrf.mxu3 }
 0x761   :  { %6311 = vmatpush.bf16.msrb.mxu0 %v17286_v46 }
 0x762   :  { %5723 = vmatpush.bf16.msra.mxu3 %v17107_v45  ;;  %v17292_v45 = vrot.slane %v14135_v36, 1 }
 0x763   :  { %6290 = vmatpush.bf16.msra.mxu1 %v17283_v13 }
 0x764   :  { %5762 = vmatpush.bf16.msrb.mxu2 %v17282_v31  ;;  %v5754_v31 = vpop.f32.mrf.mxu0 }
 0x765   :  { %6312 = vmatpush.bf16.msrb.mxu0 %v17288_v16  ;;  %v17296_v31 = vld [vmem:[#allocation108_spill] sm:$0xff] }
 0x766   :  { %5724 = vmatpush.bf16.msra.mxu3 %v17109_v21  ;;  %v17294_v21 = vrot.slane %v17250_v42, 2  ;;  %v17300_v42 = vld [vmem:[#allocation94_spill] sm:$0xff] }
 0x767   :  { %6291 = vmatpush.bf16.msra.mxu1 %v17287_v62 }
 0x768   :  { %5763 = vmatpush.bf16.msrb.mxu2 %v17284_v40  ;;  %7793 = vmatmul.msk.bf16.vlgmr.msra.gmra.mxu0 %vm3473_vm2, %v17294_v21  ;;  %v17298_v21 = vrot.slane %v17148_v41, 1  ;;  %v17305_v41 = vld [vmem:[#allocation29_spill] sm:$0xff] }
 0x769   :  { %5725 = vmatmul.bf16.vlgmr.msra.gmra.mxu3 %v17292_v45  ;;  %6313 = vmatpush.bf16.msrb.mxu0 %v17293_v35  ;;  %v5921_v45 = vpop.f32.mrf.mxu1 }
 0x76a   :  { %5897 = vmatpush.bf16.msrb.mxu3 %v16891_v11  ;;  %v5339_v11 = vadd.f32 %v14247_v47, %v5326_v52  ;;  %v17299_v47 = vld [vmem:[#allocation112_spill] sm:$0xff]  ;;  %v17301_v52 = vld [vmem:[#allocation118_spill] sm:$0xff] }
 0x76b   :  { %6292 = vmatpush.bf16.msra.mxu1 %v17289_v48 }
 0x76c   :  { %5923 = vmatpush.bf16.msra.mxu2 %v17286_v46  ;;  %v5364_v46 = vpop.f32.mrf.mxu2  ;;  %v5352_v36 = vadd.f32 %v5351_v15, %v5339_v11  ;;  %v17302_v11 = vld [vmem:[#allocation142_spill] sm:$0xff] }
 0x76d   :  { %6314 = vmatpush.bf16.msrb.mxu0 %v17296_v31 }
 0x76e   :  { %6293 = vmatmul.bf16.vlgmr.msra.gmra.mxu1 %v16160_v24  ;;  %5898 = vmatpush.bf16.msrb.mxu3 %v17274_v10  ;;  %v17297_v24 = vld [vmem:[#allocation97_spill] sm:$0xff]  ;;  %v14605_v40 = vadd.f32 %v5364_v46, %v5352_v36  ;;  %v5353_v10 = vpop.f32.mrf.mxu3  ;;  %v17308_v46 = vld [vmem:[#allocation131_spill] sm:$0xff] }
 0x76f   :  { %6337 = vmatpush.bf16.msrb.mxu1 %v17291_v53  ;;  %7791 = vmatmul.msk.bf16.vlgmr.msrb.gmra.mxu2 %vm3473_vm2, %v17298_v21  ;;  %v17309_v36 = vld [vmem:[#allocation55_spill] sm:$0xff]  ;;  %v17310_v21 = vld [vmem:[#allocation148_spill] sm:$0xff]  ;;  %v17312_v10 = vld [vmem:[#allocation21_spill] sm:$0xff] }
 0x770   :  { %5924 = vmatpush.bf16.msra.mxu2 %v17288_v16 }
 0x771   :  { %6315 = vmatpush.bf16.msrb.mxu0 %v17299_v47  ;;  %v14634_v45 = vpop.f32.mrf.mxu0 }
 0x772   :  { %5899 = vmatpush.bf16.msrb.mxu3 %v16899_v39  ;;  %v17303_v39 = vld [vmem:[#allocation126_spill] sm:$0xff] }
 0x773   :  { %6338 = vmatpush.bf16.msrb.mxu1 %v17295_v7 }
 0x774   :  { %5925 = vmatpush.bf16.msra.mxu2 %v17293_v35  ;;  %v5366_v16 = vpop.f32.mrf.mxu2  ;;  %v17304_v35 = vld [vmem:[#allocation25_spill] sm:$0xff] }
 0x775   :  { %6316 = vmatpush.bf16.msrb.mxu0 %v17301_v52  ;;  %v14624_v15 = vsel %vm2533_vm15, %v17305_v41, %v17304_v35  ;;  %v17313_v16 = vld [vmem:[#allocation67_spill] sm:$0xff] }
 0x776   :  { %5900 = vmatpush.bf16.msrb.mxu3 %v17277_v54  ;;  %17306 = vst [vmem:[#allocation175_spill] sm:$0xff] %v14624_v15  ;;  %v17307_v54 = vld [vmem:[#allocation146_spill] sm:$0xff] }
 0x777   :  { %6339 = vmatpush.bf16.msrb.mxu1 %v17297_v24 }
 0x778   :  { %5926 = vmatpush.bf16.msra.mxu2 %v17296_v31  ;;  %v14630_v31 = vpop.permute.xlu1 %6204 }
 0x779   :  { %6317 = vmatpush.bf16.msrb.mxu0 %v17303_v39 }
 0x77a   :  { %5901 = vmatpush.bf16.msrb.mxu3 %v17280_v12  ;;  %v16163_v12 = vrot.slane %v14624_v15, 3  ;;  %v17320_v15 = vld [vmem:[#allocation151_spill] sm:$0xff] }
 0x77b   :  { %6340 = vmatpush.bf16.msrb.mxu1 %v17300_v42 }
 0x77c   :  { %5927 = vmatpush.bf16.msra.mxu2 %v17299_v47 }
 0x77d   :  { %6318 = vmatpush.bf16.msrb.mxu0 %v17308_v46 }
 0x77e   :  { %5902 = vmatpush.bf16.msrb.mxu3 %v17283_v13  ;;  %v17311_v13 = vld [vmem:[#allocation18_spill] sm:$0xff] }
 0x77f   :  { %6341 = vmatpush.bf16.msrb.mxu1 %v17302_v11  ;;  %v14644_v47 = vsel %vm2570_vm14, %v14630_v31, %v17311_v13  ;;  %v17316_v13 = vrot.slane %v14475_v6, 2  ;;  %v17321_v6 = vld [vmem:[#allocation83_spill] sm:$0xff] }
 0x780   :  { %5928 = vmatpush.bf16.msra.mxu2 %v17301_v52  ;;  %6319 = vmatmul.bf16.vlgmr.msrb.gmra.mxu0 %v16163_v12  ;;  %v14649_v52 = vpop.f32.mrf.mxu1  ;;  %v17315_v12 = vld [vmem:[#allocation79_spill] sm:$0xff] }
 0x781   :  { %6363 = vmatpush.bf16.msra.mxu0 %v17309_v36 }
 0x782   :  { %5903 = vmatpush.bf16.msrb.mxu3 %v17287_v62  ;;  %v16168_v62 = vrot.slane %v17314_v17, 2 }
 0x783   :  { %6342 = vmatpush.bf16.msrb.mxu1 %v17307_v54 }
 0x784   :  { %5929 = vmatpush.bf16.msra.mxu2 %v17303_v39  ;;  %v16166_v39 = vrot.slane %v14644_v47, 3 }
 0x785   :  { %6364 = vmatpush.bf16.msra.mxu0 %v17312_v10 }
 0x786   :  { %5904 = vmatpush.bf16.msrb.mxu3 %v17289_v48  ;;  %v5947_v48 = vpop.f32.mrf.mxu0 }
 0x787   :  { %6343 = vmatpush.bf16.msrb.mxu1 %v17310_v21  ;;  %v17322_v48 = vld [vmem:[#allocation157_spill] sm:$0xff] }
 0x788   :  { %5930 = vmatpush.bf16.msra.mxu2 %v17308_v46  ;;  %v5557_v46 = vpop.f32.mrf.mxu2 }
 0x789   :  { %5905 = vmatmul.bf16.vlgmr.msrb.gmra.mxu3 %v16168_v62  ;;  %6365 = vmatpush.bf16.msra.mxu0 %v17317_v9  ;;  %v17324_v62 = vld [vmem:[#allocation31_spill] sm:$0xff] }
 0x78a   :  { %5949 = vmatpush.bf16.msra.mxu3 %v17291_v53  ;;  %v5531_v53 = vpop.f32.mrf.mxu3 }
 0x78b   :  { %6344 = vmatpush.bf16.msrb.mxu1 %v17313_v16  ;;  %5931 = vmatmul.bf16.vlgmr.msra.gmra.mxu2 %v17316_v13  ;;  %v17323_v13 = vld [vmem:[#allocation84_spill] sm:$0xff] }
 0x78c   :  { %5975 = vmatpush.bf16.msrb.mxu2 %v17309_v36  ;;  %v17319_v36 = vld [vmem:[#allocation14_spill] sm:$0xff] }
 0x78d   :  { %6366 = vmatpush.bf16.msra.mxu0 %v17319_v36 }
 0x78e   :  { %6345 = vmatmul.bf16.vlgmr.msrb.gmra.mxu1 %v16166_v39  ;;  %5950 = vmatpush.bf16.msra.mxu3 %v17295_v7  ;;  %v5973_v39 = vpop.f32.mrf.mxu1 }
 0x78f   :  { %6389 = vmatpush.bf16.msra.mxu1 %v17315_v12 }
 0x790   :  { %5976 = vmatpush.bf16.msrb.mxu2 %v17312_v10  ;;  %v5559_v10 = vpop.f32.mrf.mxu2 }
 0x791   :  { %6367 = vmatpush.bf16.msra.mxu0 %v17321_v6  ;;  %v17329_v10 = vld [vmem:[#allocation162_spill] sm:$0xff] }
 0x792   :  { %5951 = vmatpush.bf16.msra.mxu3 %v17297_v24  ;;  %v5533_v7 = vpop.f32.mrf.mxu3  ;;  %v14682_v24 = vpop.permute.xlu1 %6225 }
 0x793   :  { %6390 = vmatpush.bf16.msra.mxu1 %v17318_v0  ;;  %v14692_v7 = vpop.permute.xlu0 %6244 }
 0x794   :  { %5977 = vmatpush.bf16.msrb.mxu2 %v17317_v9  ;;  %v17326_v9 = vld [vmem:[#allocation77_spill] sm:$0xff] }
 0x795   :  { %6368 = vmatpush.bf16.msra.mxu0 %v17323_v13 }
 0x796   :  { %5952 = vmatpush.bf16.msra.mxu3 %v17300_v42  ;;  %v14677_v39 = vpop.f32.mrf.mxu1  ;;  %v17327_v42 = vld [vmem:[#allocation214_spill] sm:$0xff] }
 0x797   :  { %6391 = vmatpush.bf16.msra.mxu1 %v17320_v15  ;;  %17325 = vst [vmem:[#allocation184_spill] sm:$0xff] %v14677_v39  ;;  %v14698_v39 = vpop.f32.mrf.mxu0 }
 0x798   :  { %5978 = vmatpush.bf16.msrb.mxu2 %v17319_v36  ;;  %v14688_v36 = vsel %vm2607_vm1, %v17327_v42, %v14682_v24  ;;  %v5532_v42 = vadd.f32 %v5531_v53, %v14296_v3 }
 0x799   :  { %6369 = vmatpush.bf16.msra.mxu0 %v17326_v9 }
 0x79a   :  { %5953 = vmatpush.bf16.msra.mxu3 %v17302_v11  ;;  %v17328_v11 = vld [vmem:[#allocation50_spill] sm:$0xff]  ;;  %v5545_v3 = vadd.f32 %v14344_v37, %v5532_v42  ;;  %v17332_v37 = vrot.slane %v14530_v1, 2  ;;  %v17334_v42 = vld [vmem:[#allocation180_spill] sm:$0xff] }
 0x79b   :  { %6392 = vmatpush.bf16.msra.mxu1 %v17322_v48 }
 0x79c   :  { %5979 = vmatpush.bf16.msrb.mxu2 %v17321_v6  ;;  %v16171_v6 = vrot.slane %v14688_v36, 3 }
 0x79d   :  { %6370 = vmatpush.bf16.msra.mxu0 %v17328_v11 }
 0x79e   :  { %5954 = vmatpush.bf16.msra.mxu3 %v17307_v54  ;;  %v6025_v27 = vpop.f32.mrf.mxu1  ;;  %v14708_v54 = vsel %vm2700_vm0, %v14700_v30, %v14692_v7 }
 0x79f   :  { %6393 = vmatpush.bf16.msra.mxu1 %v17324_v62  ;;  %v16172_v27 = vrot.slane %v14708_v54, 3 }
 0x7a0   :  { %5980 = vmatpush.bf16.msrb.mxu2 %v17323_v13  ;;  %6371 = vmatmul.bf16.vlgmr.msra.gmra.mxu0 %v16171_v6  ;;  %v17330_v13 = vld [vmem:[#allocation171_spill] sm:$0xff] }
 0x7a1   :  { %6415 = vmatpush.bf16.msrb.mxu0 %v17329_v10 }
 0x7a2   :  { %5955 = vmatpush.bf16.msra.mxu3 %v17310_v21  ;;  %v17331_v21 = vld [vmem:[#allocation24_spill] sm:$0xff] }
 0x7a3   :  { %6394 = vmatpush.bf16.msra.mxu1 %v16823_v28  ;;  %v5879_v53 = vrot.slane %v17331_v21, 2 }
 0x7a4   :  { %5981 = vmatpush.bf16.msrb.mxu2 %v17326_v9  ;;  %v5558_v9 = vadd.f32 %v5557_v46, %v5545_v3  ;;  %v17336_v3 = vld [vmem:[#allocation183_spill] sm:$0xff] }
 0x7a5   :  { %6416 = vmatpush.bf16.msrb.mxu0 %v17330_v13 }
 0x7a6   :  { %5956 = vmatpush.bf16.msra.mxu3 %v17313_v16  ;;  %v5999_v16 = vpop.f32.mrf.mxu0  ;;  %v5571_v6 = vadd.f32 %v14355_v29, %v5558_v9  ;;  %v17339_v9 = vld [vmem:[#allocation190_spill] sm:$0xff] }
 0x7a7   :  { %6395 = vmatpush.bf16.msra.mxu1 %v16828_v19  ;;  %v17338_v16 = vld [vmem:[#allocation188_spill] sm:$0xff] }
 0x7a8   :  { %5982 = vmatpush.bf16.msrb.mxu2 %v17328_v11  ;;  %v17333_v11 = vld [vmem:[#allocation174_spill] sm:$0xff] }
 0x7a9   :  { %5957 = vmatmul.bf16.vlgmr.msra.gmra.mxu3 %v5879_v53  ;;  %6417 = vmatpush.bf16.msrb.mxu0 %v17333_v11 }
 0x7aa   :  { %6001 = vmatpush.bf16.msrb.mxu3 %v17315_v12  ;;  %v5583_v12 = vpop.f32.mrf.mxu3 }
 0x7ab   :  { %6396 = vmatpush.bf16.msra.mxu1 %v16831_v55  ;;  %5983 = vmatmul.bf16.vlgmr.msrb.gmra.mxu2 %v17332_v37  ;;  %v14736_v1 = vpop.f32.mrf.mxu1  ;;  %v5584_v46 = vadd.f32 %v5583_v12, %v5571_v6 }
 0x7ac   :  { %6027 = vmatpush.bf16.msra.mxu2 %v17329_v10  ;;  %v5609_v10 = vpop.f32.mrf.mxu2 }
 0x7ad   :  { %6418 = vmatpush.bf16.msrb.mxu0 %v17334_v42 }
 0x7ae   :  { %6397 = vmatmul.bf16.vlgmr.msra.gmra.mxu1 %v16172_v27  ;;  %6002 = vmatpush.bf16.msrb.mxu3 %v17318_v0  ;;  %v17335_v27 = vld [vmem:[#allocation106_spill] sm:$0xff] }
 0x7af   :  { %6454 = vmatpush.bf16.msrb.mxu1 %v17151_v20  ;;  %v17337_v0 = vld [vmem:[#allocation110_spill] sm:$0xff] }
 0x7b0   :  { %6028 = vmatpush.bf16.msra.mxu2 %v17330_v13  ;;  %v5597_v13 = vadd.f32 %v14407_v4, %v5584_v46  ;;  %v17341_v4 = vld [vmem:[#allocation200_spill] sm:$0xff] }
 0x7b1   :  { %6419 = vmatpush.bf16.msrb.mxu0 %v17336_v3 }
 0x7b2   :  { %6003 = vmatpush.bf16.msrb.mxu3 %v17320_v15  ;;  %v5585_v29 = vpop.f32.mrf.mxu3  ;;  %v5610_v6 = vadd.f32 %v5609_v10, %v5597_v13  ;;  %v17344_v10 = vld [vmem:[#allocation128_spill] sm:$0xff]  ;;  %v14758_v13 = vpop.f32.mrf.mxu0 }
 0x7b3   :  { %6455 = vmatpush.bf16.msrb.mxu1 %v17153_v60  ;;  %v6064_v15 = vpop.f32.mrf.mxu1  ;;  %v17343_v29 = vld [vmem:[#allocation195_spill] sm:$0xff] }
 0x7b4   :  { %6029 = vmatpush.bf16.msra.mxu2 %v17333_v11  ;;  %v5611_v37 = vpop.f32.mrf.mxu2  ;;  %v17340_v11 = vld [vmem:[#allocation124_spill] sm:$0xff]  ;;  %v17348_v15 = vld [vmem:[#allocation109_spill] sm:$0xff] }
 0x7b5   :  { %6420 = vmatpush.bf16.msrb.mxu0 %v17338_v16 }
 0x7b6   :  { %6004 = vmatpush.bf16.msrb.mxu3 %v17322_v48  ;;  %v5623_v48 = vadd.f32 %v17341_v4, %v5610_v6  ;;  %v17352_v4 = vld [vmem:[#allocation114_spill] sm:$0xff] }
 0x7b7   :  { %6456 = vmatpush.bf16.msrb.mxu1 %v17335_v27 }
 0x7b8   :  { %6030 = vmatpush.bf16.msra.mxu2 %v17334_v42  ;;  %v17342_v42 = vld [vmem:[#allocation192_spill] sm:$0xff] }
 0x7b9   :  { %6421 = vmatpush.bf16.msrb.mxu0 %v17339_v9  ;;  %v5248_v46 = vadd.f32 %v17342_v42, %v14494_v58  ;;  %v17346_v58 = vrot.slane %v17290_v22, 3  ;;  %v17355_v42 = vld [vmem:[#allocation119_spill] sm:$0xff] }
 0x7ba   :  { %6005 = vmatpush.bf16.msrb.mxu3 %v17324_v62  ;;  %v5635_v12 = vpop.f32.mrf.mxu3 }
 0x7bb   :  { %6457 = vmatpush.bf16.msrb.mxu1 %v17337_v0  ;;  %v5636_v62 = vadd.f32 %v5635_v12, %v5623_v48  ;;  %v17353_v48 = vld [vmem:[#allocation37_spill] sm:$0xff]  ;;  %v17354_v12 = vld [vmem:[#allocation48_spill] sm:$0xff] }
 0x7bc   :  { %6031 = vmatpush.bf16.msra.mxu2 %v17336_v3  ;;  %v17345_v3 = vld [vmem:[#allocation105_spill] sm:$0xff] }
 0x7bd   :  { %6422 = vmatpush.bf16.msrb.mxu0 %v17343_v29  ;;  %v14760_v37 = vmax.f32 %v5248_v46, %v5636_v62  ;;  %v17356_v46 = vld [vmem:[#allocation75_spill] sm:$0xff]  ;;  %v17358_v62 = vld [vmem:[#allocation140_spill] sm:$0xff] }
 0x7be   :  { %6006 = vmatpush.bf16.msrb.mxu3 %v16823_v28  ;;  %v14767_v28 = vsel %vm2570_vm14, %v17304_v35, %v14630_v31  ;;  %v17350_v35 = vld [vmem:[#allocation80_spill] sm:$0xff]  ;;  %v17351_v31 = vrot.slane %v17314_v17, 2 }
 0x7bf   :  { %6458 = vmatpush.bf16.msrb.mxu1 %v17161_v33  ;;  %6724 = vrot.lane.b32.xlu2 %v14760_v37, %s8294_s6  ;;  %v6266_v6 = vrot.slane %v14767_v28, 3  ;;  %v17404_v28 = vld [vmem:[#allocation56_spill] sm:$0xff] }
 0x7c0   :  { %6032 = vmatpush.bf16.msra.mxu2 %v17338_v16  ;;  %6423 = vmatmul.bf16.vlgmr.msrb.gmra.mxu0 %v17346_v58  ;;  %v17347_v16 = vld [vmem:[#allocation135_spill] sm:$0xff]  ;;  %v17359_v58 = vld [vmem:[#allocation133_spill] sm:$0xff] }
 0x7c1   :  { %6467 = vmatpush.bf16.msra.mxu0 %v17345_v3 }
 0x7c2   :  { %6007 = vmatpush.bf16.msrb.mxu3 %v16828_v19  ;;  %v17349_v19 = vld [vmem:[#allocation176_spill] sm:$0xff]  ;;  %v5637_v22 = vpop.f32.mrf.mxu3 }
 0x7c3   :  { %6459 = vmatpush.bf16.msrb.mxu1 %v17340_v11  ;;  %v17361_v22 = vld [vmem:[#allocation137_spill] sm:$0xff] }
 0x7c4   :  { %6033 = vmatpush.bf16.msra.mxu2 %v17339_v9  ;;  %v5883_v9 = vrot.slane %v17349_v19, 2  ;;  %v6584_v19 = vld [vmem:[%s15318_s3 + $0x90] sm:$0xff] }
 0x7c5   :  { %6468 = vmatpush.bf16.msra.mxu0 %v17348_v15 }
 0x7c6   :  { %6008 = vmatpush.bf16.msrb.mxu3 %v16831_v55  ;;  %v6051_v55 = vpop.f32.mrf.mxu0 }
 0x7c7   :  { %6460 = vmatpush.bf16.msrb.mxu1 %v17344_v10  ;;  %6557 = vrot.lane.b32.xlu2 %v17354_v12, %s8294_s6  ;;  %v17363_v55 = vld [vmem:[#allocation81_spill] sm:$0xff] }
 0x7c8   :  { %6034 = vmatpush.bf16.msra.mxu2 %v17343_v29  ;;  %v17357_v29 = vld [vmem:[#allocation127_spill] sm:$0xff] }
 0x7c9   :  { %6009 = vmatmul.bf16.vlgmr.msrb.gmra.mxu3 %v5883_v9  ;;  %6469 = vmatpush.bf16.msra.mxu0 %v17352_v4 }
 0x7ca   :  { %6066 = vmatpush.bf16.msra.mxu3 %v17151_v20  ;;  %v5661_v20 = vpop.f32.mrf.mxu2 }
 0x7cb   :  { %6461 = vmatpush.bf16.msrb.mxu1 %v17347_v16  ;;  %6035 = vmatmul.bf16.vlgmr.msra.gmra.mxu2 %v17351_v31  ;;  %v14797_v17 = vpop.f32.mrf.mxu1  ;;  %v17362_v31 = vld [vmem:[#allocation27_spill] sm:$0xff] }
 0x7cc   :  { %6079 = vmatpush.bf16.msrb.mxu2 %v17345_v3  ;;  %v5674_v3 = vpop.f32.mrf.mxu3 }
 0x7cd   :  { %6470 = vmatpush.bf16.msra.mxu0 %v17355_v42 }
 0x7ce   :  { %6462 = vmatmul.bf16.vlgmr.msrb.gmra.mxu1 %v6266_v6  ;;  %6067 = vmatpush.bf16.msra.mxu3 %v17153_v60 }
 0x7cf   :  { %6506 = vmatpush.bf16.msra.mxu1 %v17350_v35 }
 0x7d0   :  { %6080 = vmatpush.bf16.msrb.mxu2 %v17348_v15  ;;  %v17360_v15 = vld [vmem:[#allocation144_spill] sm:$0xff] }
 0x7d1   :  { %6471 = vmatpush.bf16.msra.mxu0 %v17357_v29 }
 0x7d2   :  { %6068 = vmatpush.bf16.msra.mxu3 %v17335_v27  ;;  %v5663_v60 = vpop.f32.mrf.mxu2 }
 0x7d3   :  { %6507 = vmatpush.bf16.msra.mxu1 %v17353_v48  ;;  %v6116_v27 = vpop.f32.mrf.mxu1  ;;  %v17365_v60 = vld [vmem:[#allocation38_spill] sm:$0xff] }
 0x7d4   :  { %6081 = vmatpush.bf16.msrb.mxu2 %v17352_v4  ;;  %v14813_v4 = vpop.f32.mrf.mxu0 }
 0x7d5   :  { %6472 = vmatpush.bf16.msra.mxu0 %v17359_v58 }
 0x7d6   :  { %6069 = vmatpush.bf16.msra.mxu3 %v17337_v0  ;;  %v5676_v0 = vpop.f32.mrf.mxu3 }
 0x7d7   :  { %6508 = vmatpush.bf16.msra.mxu1 %v17356_v46  ;;  %v17371_v0 = vld [vmem:[#allocation143_spill] sm:$0xff] }
 0x7d8   :  { %6082 = vmatpush.bf16.msrb.mxu2 %v17355_v42  ;;  %v17364_v42 = vld [vmem:[#allocation65_spill] sm:$0xff] }
 0x7d9   :  { %6473 = vmatpush.bf16.msra.mxu0 %v17361_v22 }
 0x7da   :  { %6070 = vmatpush.bf16.msra.mxu3 %v17161_v33  ;;  %v14822_v33 = vsel %vm2700_vm0, %v14682_v24, %v14700_v30  ;;  %v7815_v30 = vld [vmem:[%s15318_s3 + $0x138] sm:$0xff] }
 0x7db   :  { %6509 = vmatpush.bf16.msra.mxu1 %v17358_v62  ;;  %v6270_v27 = vrot.slane %v14822_v33, 3 }
 0x7dc   :  { %6083 = vmatpush.bf16.msrb.mxu2 %v17357_v29  ;;  %v17367_v29 = vld [vmem:[#allocation7_spill] sm:$0xff]  ;;  %v6103_v24 = vpop.f32.mrf.mxu0 }
 0x7dd   :  { %6474 = vmatpush.bf16.msra.mxu0 %v17363_v55 }
 0x7de   :  { %6071 = vmatpush.bf16.msra.mxu3 %v17340_v11  ;;  %v17366_v11 = vrot.slane %v14644_v47, 3  ;;  %v5662_v47 = vadd.f32 %v5661_v20, %v14464_v49  ;;  %v7813_v49 = vld [vmem:[%s15318_s3 + $0x128] sm:$0xff]  ;;  %v14852_v20 = vpop.permute.xlu1 %6592 }
 0x7df   :  { %6510 = vmatpush.bf16.msra.mxu1 %v17360_v15 }
 0x7e0   :  { %6084 = vmatpush.bf16.msrb.mxu2 %v17359_v58  ;;  %6475 = vmatmul.bf16.vlgmr.msra.gmra.mxu0 %v17366_v11  ;;  %v17368_v58 = vld [vmem:[#allocation139_spill] sm:$0xff] }
 0x7e1   :  { %6519 = vmatpush.bf16.msrb.mxu0 %v17365_v60 }
 0x7e2   :  { %6072 = vmatpush.bf16.msra.mxu3 %v17344_v10  ;;  %v17369_v10 = vld [vmem:[#allocation165_spill] sm:$0xff]  ;;  %v5713_v21 = vpop.f32.mrf.mxu2 }
 0x7e3   :  { %6511 = vmatpush.bf16.msra.mxu1 %v17362_v31 }
 0x7e4   :  { %6085 = vmatpush.bf16.msrb.mxu2 %v17361_v22  ;;  %v17370_v22 = vrot.slane %v17369_v10, 2 }
 0x7e5   :  { %6520 = vmatpush.bf16.msrb.mxu0 %v17368_v58 }
 0x7e6   :  { %6073 = vmatpush.bf16.msra.mxu3 %v17347_v16  ;;  %v7814_v16 = vld [vmem:[%s15318_s3 + $0x130] sm:$0xff] }
 0x7e7   :  { %6512 = vmatpush.bf16.msra.mxu1 %v17364_v42 }
 0x7e8   :  { %6086 = vmatpush.bf16.msrb.mxu2 %v17363_v55 }
 0x7e9   :  { %6074 = vmatmul.bf16.vlgmr.msra.gmra.mxu3 %v17370_v22  ;;  %6521 = vmatpush.bf16.msrb.mxu0 %v17371_v0 }
 0x7ea   :  { %6118 = vmatpush.bf16.msrb.mxu3 %v17350_v35  ;;  %v5675_v35 = vadd.f32 %v5674_v3, %v5662_v47  ;;  %v6598_v3 = vpop.permute.xlu2 %6597  ;;  %v5715_v22 = vpop.f32.mrf.mxu2 }
 0x7eb   :  { %6513 = vmatpush.bf16.msra.mxu1 %v17367_v29  ;;  %6087 = vmatmul.bf16.vlgmr.msrb.gmra.mxu2 %v5879_v53  ;;  %v7812_v53 = vld [vmem:[%s15318_s3 + $0x120] sm:$0xff]  ;;  %v6600_v11 = vsel %vm6560_vm3, %v14852_v20, %v6598_v3  ;;  %v17386_v22 = vld [vmem:[#allocation95_spill] sm:$0xff] }
 0x7ec   :  { %6131 = vmatpush.bf16.msra.mxu2 %v17365_v60  ;;  %v5688_v55 = vadd.f32 %v14478_v14, %v5675_v35  ;;  %v17372_v60 = vld [vmem:[#allocation6_spill] sm:$0xff]  ;;  %v17374_v14 = vld [vmem:[#allocation64_spill] sm:$0xff]  ;;  %v17375_v35 = vld [vmem:[#allocation73_spill] sm:$0xff] }
 0x7ed   :  { %6522 = vmatpush.bf16.msrb.mxu0 %v17372_v60 }
 0x7ee   :  { %6514 = vmatmul.bf16.vlgmr.msra.gmra.mxu1 %v6270_v27  ;;  %6119 = vmatpush.bf16.msrb.mxu3 %v17353_v48  ;;  %v14859_v48 = vpop.f32.mrf.mxu1  ;;  %v5701_v24 = vadd.f32 %v14522_v5, %v5688_v55 }
 0x7ef   :  { %6662 = vmatpush.msrb.mxu1 %v7815_v30  ;;  %v17373_v30 = vld [vmem:[#allocation191_spill] sm:$0xff] }
 0x7f0   :  { %6132 = vmatpush.bf16.msra.mxu2 %v17368_v58  ;;  %v14865_v58 = vpop.f32.mrf.mxu0  ;;  %v6602_v47 = vmax.f32 %v17373_v30, %v6600_v11  ;;  %v5714_v10 = vadd.f32 %v5713_v21, %v5701_v24  ;;  %v17378_v11 = vld [vmem:[#allocation26_spill] sm:$0xff] }
 0x7f1   :  { %6663 = vmatpush.msrb.mxu1 %v7814_v16  ;;  %6523 = vmatpush.bf16.msrb.mxu0 %v17374_v14  ;;  %v5726_v16 = vpop.f32.mrf.mxu3  ;;  %v17383_v24 = vld [vmem:[#allocation90_spill] sm:$0xff] }
 0x7f2   :  { %6120 = vmatpush.bf16.msrb.mxu3 %v17356_v46  ;;  %v6604_v46 = vmax.f32 %v6602_v47, 0.0  ;;  %v5765_v3 = vpop.f32.mrf.mxu2 }
 0x7f3   :  { %6664 = vmatpush.msrb.mxu1 %v7813_v49 }
 0x7f4   :  { %6133 = vmatpush.bf16.msra.mxu2 %v17371_v0  ;;  %v5727_v0 = vadd.f32 %v5726_v16, %v5714_v10  ;;  %v17385_v10 = vld [vmem:[#allocation103_spill] sm:$0xff]  ;;  %v6583_v16 = vld [vmem:[%s15318_s3 + $0x88] sm:$0xff] }
 0x7f5   :  { %6665 = vmatpush.msrb.mxu1 %v7812_v53  ;;  %6524 = vmatpush.bf16.msrb.mxu0 %v17375_v35  ;;  %v17376_v53 = vld [vmem:[#allocation11_spill] sm:$0xff] }
 0x7f6   :  { %6121 = vmatpush.bf16.msrb.mxu3 %v17358_v62  ;;  %v6296_v49 = vpop.f32.mrf.mxu1  ;;  %v5740_v5 = vadd.f32 %v14533_v43, %v5727_v0  ;;  %v6582_v0 = vld [vmem:[%s15318_s3 + $0x80] sm:$0xff] }
 0x7f8   :  { %6134 = vmatpush.bf16.msra.mxu2 %v17372_v60  ;;  %v6155_v62 = vpop.f32.mrf.mxu0  ;;  %v5753_v21 = vadd.f32 %v14575_v38, %v5740_v5  ;;  %v17377_v60 = vld [vmem:[#allocation130_spill] sm:$0xff]  ;;  %v17379_v38 = vrot.slane %v14708_v54, 3 }
 0x7f9   :  { %6525 = vmatpush.bf16.msrb.mxu0 %v17376_v53  ;;  %v5728_v55 = vpop.f32.mrf.mxu3 }
 0x7fa   :  { %6122 = vmatpush.bf16.msrb.mxu3 %v17360_v15  ;;  %v5378_v15 = vadd.f32 %v17377_v60, %v14605_v40  ;;  %v5766_v30 = vadd.f32 %v5765_v3, %v5753_v21  ;;  %v17380_v40 = vld [vmem:[#allocation86_spill] sm:$0xff]  ;;  %v5767_v47 = vpop.f32.mrf.mxu2  ;;  %v17390_v21 = vld [vmem:[#allocation141_spill] sm:$0xff] }
 0x7fb   :  { %v17391_v60 = vld [vmem:[#allocation117_spill] sm:$0xff] }
 0x7fc   :  { %6135 = vmatpush.bf16.msra.mxu2 %v17374_v14  ;;  %v14886_v43 = vmax.f32 %v5378_v15, %v5766_v30  ;;  %v17384_v14 = vld [vmem:[#allocation136_spill] sm:$0xff]  ;;  %v17392_v15 = vld [vmem:[#allocation145_spill] sm:$0xff] }
 0x7fd   :  { %6526 = vmatpush.bf16.msrb.mxu0 %v17378_v11  ;;  %v17396_v47 = vld [vmem:[#allocation129_spill] sm:$0xff] }
 0x7fe   :  { %7816 = vmatmul.msk.f32.vlgmr.msrb.gmra.mxu1 %vm6626_vm4, %v6604_v46  ;;  %6123 = vmatpush.bf16.msrb.mxu3 %v17362_v31  ;;  %v17381_v31 = vld [vmem:[#allocation132_spill] sm:$0xff]  ;;  %v17387_v46 = vld [vmem:[#allocation107_spill] sm:$0xff] }
 0x7ff   :  { %6719 = vrot.lane.b32.xlu1 %v14886_v43, %s8293_s2 }
 0x800   :  { %6136 = vmatpush.bf16.msra.mxu2 %v17375_v35  ;;  %6527 = vmatmul.bf16.vlgmr.msrb.gmra.mxu0 %v17379_v38  ;;  %v14900_v54 = vpop.f32.mrf.mxu0  ;;  %v17388_v35 = vld [vmem:[#allocation76_spill] sm:$0xff]  ;;  %v17393_v38 = vld [vmem:[#allocation125_spill] sm:$0xff] }
 0x802   :  { %6124 = vmatpush.bf16.msrb.mxu3 %v17364_v42  ;;  %v17382_v42 = vrot.slane %v14443_v23, 2 }
 0x804   :  { %6137 = vmatpush.bf16.msra.mxu2 %v17376_v53  ;;  %v17389_v53 = vld [vmem:[#allocation111_spill] sm:$0xff] }
 0x806   :  { %6125 = vmatpush.bf16.msrb.mxu3 %v17367_v29  ;;  %v6585_v29 = vld [vmem:[%s15318_s3 + $0x98] sm:$0xff] }
 0x807   :  { %6705 = vmatpush.msra.mxu1 %v6585_v29  ;;  %v17398_v29 = vld [vmem:[#allocation72_spill] sm:$0xff] }
 0x808   :  { %6138 = vmatpush.bf16.msra.mxu2 %v17378_v11 }
 0x809   :  { %6126 = vmatmul.bf16.vlgmr.msrb.gmra.mxu3 %v17382_v42  ;;  %6706 = vmatpush.msra.mxu1 %v6584_v19  ;;  %v17397_v42 = vld [vmem:[#allocation17_spill] sm:$0xff]  ;;  %v17401_v19 = vld [vmem:[#allocation91_spill] sm:$0xff] }
 0x80a   :  { %6298 = vmatpush.bf16.msra.mxu3 %v17380_v40  ;;  %v17394_v40 = vld [vmem:[#allocation147_spill] sm:$0xff] }
 0x80b   :  { %6139 = vmatmul.bf16.vlgmr.msra.gmra.mxu2 %v5883_v9  ;;  %v14909_v23 = vpop.f32.mrf.mxu1  ;;  %v6322_v9 = vpop.f32.mrf.mxu0  ;;  %6707 = vmatpush.msra.mxu1 %v6583_v16 }
 0x80c   :  { %6324 = vmatpush.bf16.msrb.mxu2 %v17381_v31  ;;  %v5906_v49 = vpop.f32.mrf.mxu3  ;;  %v14949_v9 = vpop.permute.xlu1 %6551 }
 0x80d   :  { %v5920_v5 = vadd.f32 %v14582_v26, %v5906_v49  ;;  %6708 = vmatpush.msra.mxu1 %v6582_v0  ;;  %v17395_v26 = vld [vmem:[#allocation32_spill] sm:$0xff] }
 0x80e   :  { %6299 = vmatpush.bf16.msra.mxu3 %v17383_v24  ;;  %v5932_v62 = vpop.f32.mrf.mxu2  ;;  %v14932_v31 = vsel %vm2533_vm15, %v17395_v26, %v17305_v41  ;;  %v17410_v26 = vld [vmem:[#allocation169_spill] sm:$0xff] }
 0x80f   :  { %v5933_v55 = vadd.f32 %v5932_v62, %v5920_v5 }
 0x810   :  { %6325 = vmatpush.bf16.msrb.mxu2 %v17384_v14  ;;  %v6264_v14 = vrot.slane %v14932_v31, 3 }
 0x812   :  { %6300 = vmatpush.bf16.msra.mxu3 %v17385_v10  ;;  %v17399_v10 = vld [vmem:[#allocation78_spill] sm:$0xff] }
 0x813   :  { %v6348_v3 = vpop.f32.mrf.mxu1 }
 0x814   :  { %6326 = vmatpush.bf16.msrb.mxu2 %v17386_v22  ;;  %v5908_v11 = vpop.f32.mrf.mxu3  ;;  %v17400_v22 = vld [vmem:[#allocation54_spill] sm:$0xff] }
 0x816   :  { %6301 = vmatpush.bf16.msra.mxu3 %v17387_v46  ;;  %v5934_v30 = vpop.f32.mrf.mxu2  ;;  %v17402_v46 = vld [vmem:[#allocation59_spill] sm:$0xff] }
 0x818   :  { %6327 = vmatpush.bf16.msrb.mxu2 %v17388_v35  ;;  %v17403_v35 = vld [vmem:[#allocation150_spill] sm:$0xff] }
 0x819   :  { %v14936_v24 = vpop.permute.xlu2 %6724 }
 0x81a   :  { %6302 = vmatpush.bf16.msra.mxu3 %v17389_v53  ;;  %v5946_v53 = vadd.f32 %v14634_v45, %v5933_v55  ;;  %v17406_v45 = vld [vmem:[#allocation160_spill] sm:$0xff] }
 0x81b   :  { %v17407_v55 = vld [vmem:[#allocation68_spill] sm:$0xff] }
 0x81c   :  { %6328 = vmatpush.bf16.msrb.mxu2 %v17390_v21 }
 0x81d   :  { %v14945_v41 = vpop.f32.mrf.mxu0 }
 0x81e   :  { %6303 = vmatpush.bf16.msra.mxu3 %v17391_v60 }
 0x820   :  { %6329 = vmatpush.bf16.msrb.mxu2 %v17392_v15 }
 0x821   :  { %v6558_v16 = vpop.permute.xlu2 %6557 }
 0x822   :  { %6304 = vmatpush.bf16.msra.mxu3 %v17393_v38  ;;  %v6561_v49 = vsel %vm6560_vm3, %v14949_v9, %v6558_v16  ;;  %v17405_v38 = vld [vmem:[#allocation85_spill] sm:$0xff] }
 0x824   :  { %6330 = vmatpush.bf16.msrb.mxu2 %v17394_v40 }
 0x825   :  { %v6374_v62 = vpop.f32.mrf.mxu0 }
 0x826   :  { %6305 = vmatpush.bf16.msra.mxu3 %v17396_v47  ;;  %v17425_v62 = vld [vmem:[#allocation175_spill] sm:$0xff] }
 0x828   :  { %6331 = vmatpush.bf16.msrb.mxu2 %v17397_v42  ;;  %v17414_v42 = vld [vmem:[#allocation178_spill] sm:$0xff] }
 0x829   :  { %6306 = vmatmul.bf16.vlgmr.msra.gmra.mxu3 %v6264_v14 }
 0x82a   :  { %6350 = vmatpush.bf16.msrb.mxu3 %v17398_v29  ;;  %v17415_v29 = vld [vmem:[#allocation179_spill] sm:$0xff] }
 0x82b   :  { %6332 = vmatmul.bf16.vlgmr.msrb.gmra.mxu2 %v6266_v6  ;;  %v14953_v0 = vpop.f32.mrf.mxu1  ;;  %v6563_v6 = vmax.f32 %v17404_v28, %v6561_v49  ;;  %v17420_v28 = vld [vmem:[#allocation206_spill] sm:$0xff] }
 0x82c   :  { %6376 = vmatpush.bf16.msra.mxu2 %v17399_v10  ;;  %v5958_v21 = vpop.f32.mrf.mxu3  ;;  %v17416_v10 = vld [vmem:[#allocation39_spill] sm:$0xff] }
 0x82d   :  { %v6565_v5 = vmax.f32 %v6563_v6, 0.0  ;;  %v5959_v60 = vadd.f32 %v5958_v21, %v5946_v53  ;;  %v17422_v6 = vld [vmem:[#allocation208_spill] sm:$0xff]  ;;  %v17426_v53 = vrot.slane %v17425_v62, 3 }
 0x82e   :  { %6351 = vmatpush.bf16.msrb.mxu3 %v17400_v22  ;;  %v5984_v3 = vpop.f32.mrf.mxu2 }
 0x82f   :  { %7817 = vmatmul.msk.f32.vlgmr.msra.gmra.mxu1 %vm6626_vm4, %v6565_v5  ;;  %v5972_v11 = vadd.f32 %v14649_v52, %v5959_v60  ;;  %v17411_v52 = vld [vmem:[#allocation170_spill] sm:$0xff]  ;;  %v17423_v5 = vld [vmem:[#allocation43_spill] sm:$0xff]  ;;  %v17429_v60 = vld [vmem:[#allocation40_spill] sm:$0xff] }
 0x830   :  { %6377 = vmatpush.bf16.msra.mxu2 %v17401_v19 }
 0x831   :  { %v5985_v30 = vadd.f32 %v5984_v3, %v5972_v11  ;;  %v17428_v3 = vld [vmem:[#allocation211_spill] sm:$0xff] }
 0x832   :  { %6352 = vmatpush.bf16.msrb.mxu3 %v17402_v46 }
 0x833   :  { %v6400_v15 = vpop.f32.mrf.mxu1  ;;  %v5998_v33 = vadd.f32 %v14698_v39, %v5985_v30 }
 0x834   :  { %6378 = vmatpush.bf16.msra.mxu2 %v17403_v35 }
 0x836   :  { %6353 = vmatpush.bf16.msrb.mxu3 %v17223_v59  ;;  %v5960_v59 = vpop.f32.mrf.mxu3 }
 0x837   :  { %v17430_v59 = vld [vmem:[#allocation33_spill] sm:$0xff] }
 0x838   :  { %6379 = vmatpush.bf16.msra.mxu2 %v17244_v8  ;;  %v5986_v8 = vpop.f32.mrf.mxu2 }
 0x83a   :  { %6354 = vmatpush.bf16.msrb.mxu3 %v17225_v34  ;;  %v17408_v34 = vld [vmem:[#allocation164_spill] sm:$0xff] }
 0x83c   :  { %6380 = vmatpush.bf16.msra.mxu2 %v17247_v25  ;;  %v17409_v25 = vld [vmem:[#allocation5_spill] sm:$0xff] }
 0x83d   :  { %v6268_v40 = vrot.slane %v17409_v25, 3  ;;  %v14978_v47 = vpop.f32.mrf.mxu0 }
 0x83e   :  { %6355 = vmatpush.bf16.msrb.mxu3 %v17227_v56  ;;  %v17412_v56 = vld [vmem:[#allocation172_spill] sm:$0xff] }
 0x840   :  { %6381 = vmatpush.bf16.msra.mxu2 %v17249_v18  ;;  %v17413_v18 = vld [vmem:[#allocation173_spill] sm:$0xff] }
 0x842   :  { %6356 = vmatpush.bf16.msrb.mxu3 %v17405_v38 }
 0x844   :  { %6382 = vmatpush.bf16.msra.mxu2 %v17406_v45 }
 0x845   :  { %v6426_v19 = vpop.f32.mrf.mxu0 }
 0x846   :  { %6357 = vmatpush.bf16.msrb.mxu3 %v17407_v55  ;;  %v17431_v55 = vld [vmem:[#allocation201_spill] sm:$0xff]  ;;  %v7811_v19 = vld [vmem:[%s15318_s3 + $0x118] sm:$0xff] }
 0x848   :  { %6383 = vmatpush.bf16.msra.mxu2 %v17408_v34  ;;  %v17432_v34 = vld [vmem:[#allocation212_spill] sm:$0xff] }
 0x849   :  { %6358 = vmatmul.bf16.vlgmr.msrb.gmra.mxu3 %v6268_v40 }
 0x84a   :  { %6407 = vmatpush.bf16.msra.mxu3 %v17410_v26 }
 0x84b   :  { %6384 = vmatmul.bf16.vlgmr.msra.gmra.mxu2 %v6270_v27  ;;  %v14983_v22 = vpop.f32.mrf.mxu1  ;;  %v6272_v27 = vrot.slane %v14692_v7, 3  ;;  %v7804_v7 = vld [vmem:[%s15318_s3 + $0xe0] sm:$0xff] }
 0x84c   :  { %6428 = vmatpush.bf16.msrb.mxu2 %v17411_v52  ;;  %v6010_v16 = vpop.f32.mrf.mxu3  ;;  %v17434_v52 = vld [vmem:[#allocation213_spill] sm:$0xff] }
 0x84d   :  { %v14990_v35 = vadd.f32 %v6010_v16, %v5998_v33  ;;  %v6581_v33 = vld [vmem:[%s15318_s3 + $0x78] sm:$0xff]  ;;  %v17440_v16 = vld [vmem:[#allocation62_spill] sm:$0xff] }
 0x84e   :  { %6408 = vmatpush.bf16.msra.mxu3 %v17412_v56  ;;  %v6036_v46 = vpop.f32.mrf.mxu2  ;;  %v17435_v56 = vld [vmem:[#allocation41_spill] sm:$0xff] }
 0x84f   :  { %v6050_v31 = vadd.f32 %v14758_v13, %v6036_v46  ;;  %v17433_v13 = vld [vmem:[#allocation10_spill] sm:$0xff]  ;;  %v17441_v46 = vld [vmem:[#allocation209_spill] sm:$0xff] }
 0x850   :  { %6429 = vmatpush.bf16.msrb.mxu2 %v17413_v18  ;;  %v17437_v18 = vld [vmem:[#allocation205_spill] sm:$0xff] }
 0x851   :  { %v6063_v15 = vadd.f32 %v14736_v1, %v6050_v31  ;;  %v17436_v1 = vld [vmem:[#allocation215_spill] sm:$0xff] }
 0x852   :  { %6409 = vmatpush.bf16.msra.mxu3 %v17414_v42  ;;  %v17438_v42 = vld [vmem:[#allocation216_spill] sm:$0xff] }
 0x853   :  { %v6465_v49 = vpop.f32.mrf.mxu1 }
 0x854   :  { %6430 = vmatpush.bf16.msrb.mxu2 %v17415_v29  ;;  %v17439_v29 = vld [vmem:[#allocation207_spill] sm:$0xff]  ;;  %v7810_v49 = vld [vmem:[%s15318_s3 + $0x110] sm:$0xff] }
 0x856   :  { %6441 = vmatpush.bf16.msrb.mxu3 %v17416_v10  ;;  %v6038_v39 = vpop.f32.mrf.mxu2 }
 0x857   :  { %v7809_v39 = vld [vmem:[%s15318_s3 + $0x108] sm:$0xff] }
 0x858   :  { %6431 = vmatpush.bf16.msrb.mxu2 %v17261_v51  ;;  %v6012_v51 = vpop.f32.mrf.mxu3 }
 0x859   :  { %7794 = vmatmul.msk.bf16.vlgmr.msra.gmra.mxu3 %vm3473_vm2, %v6272_v27  ;;  %v17442_v51 = vrot.slane %v14688_v36, 3  ;;  %v6577_v36 = vld [vmem:[%s15318_s3 + $0x58] sm:$0xff] }
 0x85a   :  { %6442 = vmatpush.bf16.msrb.mxu3 %v17248_v61  ;;  %v17417_v61 = vld [vmem:[#allocation194_spill] sm:$0xff] }
 0x85c   :  { %6432 = vmatpush.bf16.msrb.mxu2 %v17263_v2  ;;  %v17418_v2 = vld [vmem:[#allocation204_spill] sm:$0xff] }
 0x85e   :  { %6443 = vmatpush.bf16.msrb.mxu3 %v17073_v63  ;;  %v17419_v63 = vld [vmem:[#allocation196_spill] sm:$0xff] }
 0x860   :  { %6433 = vmatpush.bf16.msrb.mxu2 %v17264_v32  ;;  %v17421_v32 = vld [vmem:[#allocation198_spill] sm:$0xff] }
 0x862   :  { %6444 = vmatpush.bf16.msrb.mxu3 %v17076_v44  ;;  %v15007_v44 = vpop.f32.mrf.mxu0 }
 0x864   :  { %6434 = vmatpush.bf16.msrb.mxu2 %v17417_v61  ;;  %v6579_v61 = vld [vmem:[%s15318_s3 + $0x68] sm:$0xff] }
 0x866   :  { %6445 = vmatpush.bf16.msrb.mxu3 %v17082_v57  ;;  %v17424_v57 = vld [vmem:[#allocation210_spill] sm:$0xff] }
 0x868   :  { %6435 = vmatpush.bf16.msrb.mxu2 %v17266_v50 }
 0x86a   :  { %6446 = vmatpush.bf16.msrb.mxu3 %v17418_v2  ;;  %v6478_v21 = vpop.f32.mrf.mxu0 }
 0x86b   :  { %6436 = vmatmul.bf16.vlgmr.msrb.gmra.mxu2 %v6264_v14  ;;  %v15012_v50 = vpop.f32.mrf.mxu1  ;;  %v17427_v14 = vld [vmem:[#allocation199_spill] sm:$0xff]  ;;  %v6591_v21 = vpop.permute.xlu0 %6590 }
 0x86c   :  { %6480 = vmatpush.bf16.msra.mxu2 %v17419_v63  ;;  %v6075_v11 = vpop.f32.mrf.mxu3  ;;  %v6578_v63 = vld [vmem:[%s15318_s3 + $0x60] sm:$0xff] }
 0x86d   :  { %v6076_v8 = vadd.f32 %v6075_v11, %v6063_v15  ;;  %v7803_v15 = vld [vmem:[%s15318_s3 + $0xd8] sm:$0xff]  ;;  %v6572_v11 = vld [vmem:[%s15318_s3 + $0x30] sm:$0xff] }
 0x86e   :  { %6447 = vmatpush.bf16.msrb.mxu3 %v17420_v28  ;;  %v6088_v30 = vpop.f32.mrf.mxu2  ;;  %v7808_v28 = vld [vmem:[%s15318_s3 + $0x100] sm:$0xff] }
 0x86f   :  { %v6089_v45 = vadd.f32 %v6088_v30, %v6076_v8  ;;  %v7802_v8 = vld [vmem:[%s15318_s3 + $0xd0] sm:$0xff] }
 0x870   :  { %6481 = vmatpush.bf16.msra.mxu2 %v17421_v32 }
 0x871   :  { %v6102_v2 = vadd.f32 %v14813_v4, %v6089_v45  ;;  %v7807_v4 = vld [vmem:[%s15318_s3 + $0xf8] sm:$0xff]  ;;  %v7801_v45 = vld [vmem:[%s15318_s3 + $0xc8] sm:$0xff] }
 0x872   :  { %6448 = vmatpush.bf16.msrb.mxu3 %v17422_v6 }
 0x873   :  { %v6517_v38 = vpop.f32.mrf.mxu1  ;;  %v6115_v6 = vadd.f32 %v14797_v17, %v6102_v2  ;;  %v6575_v17 = vld [vmem:[%s15318_s3 + $0x48] sm:$0xff] }
 0x874   :  { %6482 = vmatpush.bf16.msra.mxu2 %v17423_v5  ;;  %v6077_v25 = vpop.f32.mrf.mxu3  ;;  %v6576_v5 = vld [vmem:[%s15318_s3 + $0x50] sm:$0xff]  ;;  %v6571_v38 = vld [vmem:[%s15318_s3 + $0x28] sm:$0xff] }
 0x875   :  { %6449 = vmatmul.bf16.vlgmr.msrb.gmra.mxu3 %v17426_v53  ;;  %v7806_v53 = vld [vmem:[%s15318_s3 + $0xf0] sm:$0xff]  ;;  %v6569_v25 = vld [vmem:[%s15318_s3 + $0x18] sm:$0xff]  ;;  %v7835_v2 = vld [vmem:[%s15318_s3 + $0x1c8] sm:$0xff] }
 0x876   :  { %6493 = vmatpush.bf16.msra.mxu3 %v17424_v57  ;;  %v6090_v26 = vpop.f32.mrf.mxu2 }
 0x878   :  { %6483 = vmatpush.bf16.msra.mxu2 %v17427_v14  ;;  %v7805_v14 = vld [vmem:[%s15318_s3 + $0xe8] sm:$0xff] }
 0x87a   :  { %6494 = vmatpush.bf16.msra.mxu3 %v17428_v3 }
 0x87c   :  { %6484 = vmatpush.bf16.msra.mxu2 %v17429_v60  ;;  %v6574_v60 = vld [vmem:[%s15318_s3 + $0x40] sm:$0xff] }
 0x87d   :  { %v15031_v10 = vpop.f32.mrf.mxu0 }
 0x87e   :  { %6495 = vmatpush.bf16.msra.mxu3 %v17430_v59 }
 0x880   :  { %6485 = vmatpush.bf16.msra.mxu2 %v17431_v55  ;;  %v6570_v55 = vld [vmem:[%s15318_s3 + $0x20] sm:$0xff] }
 0x882   :  { %6496 = vmatpush.bf16.msra.mxu3 %v17432_v34  ;;  %v7800_v34 = vld [vmem:[%s15318_s3 + $0xc0] sm:$0xff] }
 0x884   :  { %6486 = vmatpush.bf16.msra.mxu2 %v17433_v13  ;;  %v6550_v13 = vpop.permute.xlu0 %6549 }
 0x885   :  { %v6530_v32 = vpop.f32.mrf.mxu0  ;;  %v6554_v26 = vsel %vm6553_vm5, %v6550_v13, %v14949_v9 }
 0x886   :  { %6497 = vmatpush.bf16.msra.mxu3 %v17434_v52  ;;  %v7799_v52 = vld [vmem:[%s15318_s3 + $0xb8] sm:$0xff]  ;;  %v6562_v9 = vmax.f32 %v17354_v12, %v6554_v26  ;;  %v7796_v12 = vld [vmem:[%s15318_s3 + $0xa0] sm:$0xff] }
 0x888   :  { %6487 = vmatpush.bf16.msra.mxu2 %v17435_v56  ;;  %v6594_v56 = vsel %vm6553_vm5, %v6591_v21, %v14852_v20  ;;  %v7797_v20 = vld [vmem:[%s15318_s3 + $0xa8] sm:$0xff] }
 0x88a   :  { %6498 = vmatpush.bf16.msra.mxu3 %v17436_v1  ;;  %v6568_v1 = vld [vmem:[%s15318_s3 + $0x10] sm:$0xff] }
 0x88b   :  { %6488 = vmatmul.bf16.vlgmr.msra.gmra.mxu2 %v6268_v40  ;;  %v6580_v40 = vld [vmem:[%s15318_s3 + $0x70] sm:$0xff] }
 0x88c   :  { %6537 = vmatpush.bf16.msrb.mxu2 %v17437_v18  ;;  %v6127_v57 = vpop.f32.mrf.mxu3  ;;  %v7798_v18 = vld [vmem:[%s15318_s3 + $0xb0] sm:$0xff] }
 0x88d   :  { %v6128_v31 = vadd.f32 %v6127_v57, %v6115_v6 }
 0x88e   :  { %6499 = vmatpush.bf16.msra.mxu3 %v17438_v42  ;;  %v6140_v62 = vpop.f32.mrf.mxu2  ;;  %v6567_v42 = vld [vmem:[%s15318_s3 + $0x8] sm:$0xff] }
 0x88f   :  { %v15084_v3 = vadd.f32 %v6140_v62, %v6128_v31 }
 0x890   :  { %6538 = vmatpush.bf16.msrb.mxu2 %v17439_v29  ;;  %v17443_v29 = vld [vmem:[#allocation197_spill] sm:$0xff] }
 0x892   :  { %6500 = vmatpush.bf16.msra.mxu3 %v17440_v16  ;;  %v15143_v16 = vpop.permute.xlu1 %6719 }
 0x894   :  { %6539 = vmatpush.bf16.msrb.mxu2 %v17441_v46  ;;  %v6129_v30 = vpop.f32.mrf.mxu3  ;;  %v6564_v46 = vmax.f32 %v6562_v9, 0.0 }
 0x895   :  { %6501 = vmatmul.bf16.vlgmr.msra.gmra.mxu3 %v17442_v51  ;;  %v7836_v51 = vld [vmem:[%s15318_s3 + $0x1d0] sm:$0xff] }
 0x896   :  { %6630 = vmatpush.msrb.mxu3 %v7811_v19  ;;  %v6142_v59 = vpop.f32.mrf.mxu2  ;;  %v6601_v19 = vmax.f32 %v17443_v29, %v6594_v56 }
 0x898   :  { %6673 = vmatpush.msra.mxu2 %v6581_v33  ;;  %6631 = vmatpush.msrb.mxu3 %v7810_v49  ;;  %v6566_v33 = vld [vmem:[%s15318_s3] sm:$0xff]  ;;  %v7837_v49 = vld [vmem:[%s15318_s3 + $0x1d8] sm:$0xff] }
 0x89a   :  { %6674 = vmatpush.msra.mxu2 %v6580_v40  ;;  %6632 = vmatpush.msrb.mxu3 %v7809_v39  ;;  %v6603_v40 = vmax.f32 %v6601_v19, 0.0  ;;  %v6154_v19 = vadd.f32 %v14865_v58, %v15084_v3  ;;  %v7824_v58 = vld [vmem:[%s15318_s3 + $0x170] sm:$0xff] }
 0x89b   :  { %7795 = vmatmul.msk.bf16.vlgmr.msrb.gmra.mxu2 %vm3473_vm2, %v6272_v27  ;;  %v6573_v27 = vld [vmem:[%s15318_s3 + $0x38] sm:$0xff] }
 0x89c   :  { %6675 = vmatpush.msra.mxu2 %v6579_v61  ;;  %6633 = vmatpush.msrb.mxu3 %v7808_v28  ;;  %v6727_v61 = vsel %vm6560_vm3, %v15143_v16, %v14936_v24 }
 0x89d   :  { %v6729_v39 = vmax.f32 %v14886_v43, %v6727_v61  ;;  %v7821_v61 = vld [vmem:[%s15318_s3 + $0x158] sm:$0xff] }
 0x89e   :  { %6676 = vmatpush.msra.mxu2 %v6578_v63  ;;  %6634 = vmatpush.msrb.mxu3 %v7807_v4  ;;  %v7834_v63 = vld [vmem:[%s15318_s3 + $0x1c0] sm:$0xff] }
 0x89f   :  { %v6731_v32 = vmax.f32 %v6729_v39, 0.0  ;;  %v7819_v39 = vld [vmem:[%s15318_s3 + $0x148] sm:$0xff] }
 0x8a0   :  { %6677 = vmatpush.msra.mxu2 %v6577_v36  ;;  %6635 = vmatpush.msrb.mxu3 %v7806_v53 }
 0x8a2   :  { %6678 = vmatpush.msra.mxu2 %v6576_v5  ;;  %6636 = vmatpush.msrb.mxu3 %v7805_v14 }
 0x8a4   :  { %6679 = vmatpush.msra.mxu2 %v6575_v17  ;;  %6637 = vmatpush.msrb.mxu3 %v7804_v7 }
 0x8a6   :  { %6680 = vmatpush.msra.mxu2 %v6574_v60  ;;  %6638 = vmatpush.msrb.mxu3 %v7803_v15  ;;  %v17444_v15 = vld [vmem:[#allocation184_spill] sm:$0xff] }
 0x8a8   :  { %6681 = vmatpush.msra.mxu2 %v6573_v27  ;;  %6639 = vmatpush.msrb.mxu3 %v7802_v8 }
 0x8aa   :  { %6682 = vmatpush.msra.mxu2 %v6572_v11  ;;  %6640 = vmatpush.msrb.mxu3 %v7801_v45  ;;  %v6024_v11 = vadd.f32 %v17444_v15, %v14990_v35  ;;  %v7833_v35 = vld [vmem:[%s15318_s3 + $0x1b8] sm:$0xff]  ;;  %v7831_v45 = vld [vmem:[%s15318_s3 + $0x1a8] sm:$0xff] }
 0x8ab   :  { %6756 = vmatpush.msra.mxu0 %v7833_v35  ;;  %v7856_v15 = vld [vmem:[%s15318_s3 + $0x268] sm:$0xff] }
 0x8ac   :  { %6683 = vmatpush.msra.mxu2 %v6571_v38  ;;  %6641 = vmatpush.msrb.mxu3 %v7800_v34  ;;  %v6307_v24 = vpop.f32.mrf.mxu3  ;;  %v7832_v38 = vld [vmem:[%s15318_s3 + $0x1b0] sm:$0xff] }
 0x8ad   :  { %v6308_v43 = vadd.f32 %v6307_v24, %v14859_v48  ;;  %6757 = vmatpush.msra.mxu0 %v7832_v38  ;;  %v7853_v24 = vld [vmem:[%s15318_s3 + $0x250] sm:$0xff] }
 0x8ae   :  { %6684 = vmatpush.msra.mxu2 %v6570_v55  ;;  %6642 = vmatpush.msrb.mxu3 %v7799_v52  ;;  %v6333_v28 = vpop.f32.mrf.mxu2 }
 0x8af   :  { %v6321_v6 = vadd.f32 %v14900_v54, %v6308_v43  ;;  %6758 = vmatpush.msra.mxu0 %v7831_v45  ;;  %v7850_v43 = vld [vmem:[%s15318_s3 + $0x238] sm:$0xff] }
 0x8b0   :  { %6685 = vmatpush.msra.mxu2 %v6569_v25  ;;  %6643 = vmatpush.msrb.mxu3 %v7798_v18 }
 0x8b1   :  { %v6334_v5 = vadd.f32 %v6333_v28, %v6321_v6  ;;  %v7852_v28 = vld [vmem:[%s15318_s3 + $0x248] sm:$0xff]  ;;  %v7849_v6 = vld [vmem:[%s15318_s3 + $0x230] sm:$0xff] }
 0x8b2   :  { %6686 = vmatpush.msra.mxu2 %v6568_v1  ;;  %6644 = vmatpush.msrb.mxu3 %v7797_v20 }
 0x8b3   :  { %v6347_v53 = vadd.f32 %v14909_v23, %v6334_v5 }
 0x8b4   :  { %6687 = vmatpush.msra.mxu2 %v6567_v42  ;;  %6645 = vmatpush.msrb.mxu3 %v7796_v12  ;;  %v6309_v36 = vpop.f32.mrf.mxu3  ;;  %v7830_v42 = vld [vmem:[%s15318_s3 + $0x1a0] sm:$0xff] }
 0x8b5   :  { %6646 = vmatmul.f32.vlgmr.msrb.gmra.mxu3 %v6603_v40  ;;  %6759 = vmatpush.msra.mxu0 %v7830_v42  ;;  %v7823_v40 = vld [vmem:[%s15318_s3 + $0x168] sm:$0xff]  ;;  %v7858_v36 = vld [vmem:[%s15318_s3 + $0x278] sm:$0xff] }
 0x8b6   :  { %6688 = vmatpush.msra.mxu2 %v6566_v33  ;;  %6788 = vmatpush.msra.mxu3 %v7837_v49  ;;  %v6335_v4 = vpop.f32.mrf.mxu2  ;;  %v7822_v49 = vld [vmem:[%s15318_s3 + $0x160] sm:$0xff] }
 0x8b7   :  { %6689 = vmatmul.f32.vlgmr.msra.gmra.mxu2 %v6564_v46  ;;  %v7825_v46 = vld [vmem:[%s15318_s3 + $0x178] sm:$0xff]  ;;  %v7857_v4 = vld [vmem:[%s15318_s3 + $0x270] sm:$0xff] }
 0x8b8   :  { %6789 = vmatpush.msra.mxu3 %v7836_v51  ;;  %v7820_v51 = vld [vmem:[%s15318_s3 + $0x150] sm:$0xff] }
 0x8ba   :  { %6790 = vmatpush.msra.mxu3 %v7835_v2  ;;  %v7818_v2 = vld [vmem:[%s15318_s3 + $0x140] sm:$0xff] }
 0x8bc   :  { %6791 = vmatpush.msra.mxu3 %v7834_v63  ;;  %v7854_v63 = vld [vmem:[%s15318_s3 + $0x258] sm:$0xff] }
 0x8bd   :  { %7838 = vmatmul.msk.f32.vlgmr.msra.gmra.mxu3 %vm6626_vm4, %v6731_v32  ;;  %6840 = vmatpush.msrb.mxu1 %v7854_v63  ;;  %v7851_v32 = vld [vmem:[%s15318_s3 + $0x240] sm:$0xff] }
 0x8be   :  { %6872 = vmatpush.msrb.mxu3 %v7858_v36 }
 0x8bf   :  { %6841 = vmatpush.msrb.mxu1 %v7853_v24 }
 0x8c0   :  { %6873 = vmatpush.msrb.mxu3 %v7857_v4 }
 0x8c1   :  { %6842 = vmatpush.msrb.mxu1 %v7852_v28 }
 0x8c2   :  { %6874 = vmatpush.msrb.mxu3 %v7856_v15 }
 0x8c3   :  { %6843 = vmatpush.msrb.mxu1 %v7851_v32 }
 0x8c5   :  { %6844 = vmatpush.msrb.mxu1 %v7850_v43 }
 0x8c7   :  { %6845 = vmatpush.msrb.mxu1 %v7849_v6 }
 0x8cc   :  { %v6359_v57 = vpop.f32.mrf.mxu3 }
 0x8cd   :  { %v6360_v31 = vadd.f32 %v6359_v57, %v6347_v53  ;;  %v7848_v57 = vld [vmem:[%s15318_s3 + $0x228] sm:$0xff]  ;;  %v7847_v53 = vld [vmem:[%s15318_s3 + $0x220] sm:$0xff] }
 0x8ce   :  { %v6385_v62 = vpop.f32.mrf.mxu2  ;;  %6846 = vmatpush.msrb.mxu1 %v7848_v57 }
 0x8cf   :  { %v6373_v17 = vadd.f32 %v14945_v41, %v6360_v31 }
 0x8d0   :  { %6847 = vmatpush.msrb.mxu1 %v7847_v53 }
 0x8d1   :  { %v6386_v60 = vadd.f32 %v6385_v62, %v6373_v17 }
 0x8d3   :  { %v6399_v7 = vadd.f32 %v14953_v0, %v6386_v60  ;;  %v7845_v60 = vld [vmem:[%s15318_s3 + $0x210] sm:$0xff] }
 0x8d4   :  { %v6361_v14 = vpop.f32.mrf.mxu3 }
 0x8d5   :  { %v7846_v14 = vld [vmem:[%s15318_s3 + $0x218] sm:$0xff] }
 0x8d6   :  { %v6387_v21 = vpop.f32.mrf.mxu2  ;;  %6848 = vmatpush.msrb.mxu1 %v7846_v14 }
 0x8d8   :  { %6849 = vmatpush.msrb.mxu1 %v7845_v60 }
 0x8dc   :  { %v6411_v27 = vpop.f32.mrf.mxu3 }
 0x8dd   :  { %v6412_v48 = vadd.f32 %v6411_v27, %v6399_v7  ;;  %v7844_v7 = vld [vmem:[%s15318_s3 + $0x208] sm:$0xff]  ;;  %v7841_v27 = vld [vmem:[%s15318_s3 + $0x1f0] sm:$0xff] }
 0x8de   :  { %6850 = vmatpush.msrb.mxu1 %v7844_v7 }
 0x8df   :  { %v15172_v30 = vmax.f32 %v6024_v11, %v6412_v48  ;;  %v7840_v11 = vld [vmem:[%s15318_s3 + $0x1e8] sm:$0xff]  ;;  %v7855_v48 = vld [vmem:[%s15318_s3 + $0x260] sm:$0xff] }
 0x8e0   :  { %6875 = vmatpush.msrb.mxu3 %v7855_v48 }
 0x8e1   :  { %6808 = vrot.lane.b32.xlu1 %v15172_v30, %s8294_s6  ;;  %v8219_v54 = vpack.i.bf16 %v15172_v30, %v14760_v37 }
 0x8e3   :  { %8220 = vrot.lane.b32.xlu2 %v8219_v54, %s8293_s2  ;;  %v7839_v54 = vld [vmem:[%s15318_s3 + $0x1e0] sm:$0xff] }
 0x8e4   :  { %v6413_v23 = vpop.f32.mrf.mxu3 }
 0x8ee   :  { %v6437_v41 = vpop.f32.mrf.mxu2 }
 0x8ef   :  { %v6438_v55 = vadd.f32 %v6437_v41, %v14978_v47  ;;  %v7829_v47 = vld [vmem:[%s15318_s3 + $0x198] sm:$0xff] }
 0x8f0   :  { %6760 = vmatpush.msra.mxu0 %v7829_v47 }
 0x8f6   :  { %v6439_v59 = vpop.f32.mrf.mxu2 }
 0x8f8   :  { %v6450_v8 = vpop.f32.mrf.mxu3 }
 0x8f9   :  { %v6451_v34 = vadd.f32 %v6450_v8, %v6438_v55 }
 0x8fb   :  { %v6464_v25 = vadd.f32 %v14983_v22, %v6451_v34  ;;  %v7828_v22 = vld [vmem:[%s15318_s3 + $0x190] sm:$0xff] }
 0x8fc   :  { %6761 = vmatpush.msra.mxu0 %v7828_v22 }
 0x8fd   :  { %v6477_v26 = vadd.f32 %v15007_v44, %v6464_v25 }
 0x900   :  { %v6452_v0 = vpop.f32.mrf.mxu3 }
 0x90e   :  { %v6489_v13 = vpop.f32.mrf.mxu2 }
 0x90f   :  { %v6490_v52 = vadd.f32 %v6489_v13, %v6477_v26  ;;  %v6667_v13 = vpop.f32.mrf.mxu1 }
 0x916   :  { %v6491_v56 = vpop.f32.mrf.mxu2 }
 0x917   :  { %v6710_v26 = vpop.f32.mrf.mxu1 }
 0x918   :  { %v6502_v1 = vpop.f32.mrf.mxu3 }
 0x919   :  { %v6503_v18 = vadd.f32 %v6502_v1, %v6490_v52 }
 0x91b   :  { %v6516_v9 = vadd.f32 %v15012_v50, %v6503_v18  ;;  %v7827_v50 = vld [vmem:[%s15318_s3 + $0x188] sm:$0xff] }
 0x91c   :  { %6762 = vmatpush.msra.mxu0 %v7827_v50 }
 0x91d   :  { %v6529_v29 = vadd.f32 %v15031_v10, %v6516_v9  ;;  %v7826_v10 = vld [vmem:[%s15318_s3 + $0x180] sm:$0xff] }
 0x91e   :  { %v6541_v44 = vpop.f32.mrf.mxu2  ;;  %6763 = vmatpush.msra.mxu0 %v7826_v10 }
 0x91f   :  { %v6542_v20 = vadd.f32 %v6541_v44, %v6529_v29  ;;  %v8224_v44 = vld [vmem:[%s15319_s4] ss:$0 sm:$0xff] }
 0x920   :  { %v6504_v33 = vpop.f32.mrf.mxu3  ;;  %6764 = vmatpush.msra.mxu0 %v7825_v46 }
 0x921   :  { %v15210_v12 = vmax.f32 %v6154_v19, %v6542_v20 }
 0x922   :  { %6765 = vmatpush.msra.mxu0 %v7824_v58 }
 0x923   :  { %6803 = vrot.lane.b32.xlu0 %v15210_v12, %s8293_s2 }
 0x924   :  { %6766 = vmatpush.msra.mxu0 %v7823_v40 }
 0x926   :  { %v6543_v3 = vpop.f32.mrf.mxu2  ;;  %6767 = vmatpush.msra.mxu0 %v7822_v49 }
 0x928   :  { %6768 = vmatpush.msra.mxu0 %v7821_v61 }
 0x92a   :  { %6769 = vmatpush.msra.mxu0 %v7820_v51 }
 0x92c   :  { %6770 = vmatpush.msra.mxu0 %v7819_v39 }
 0x92e   :  { %6771 = vmatpush.msra.mxu0 %v7818_v2 }
 0x938   :  { %v6647_v34 = vpop.f32.mrf.mxu3 }
 0x939   :  { %v6668_v25 = vadd.f32 %v6667_v13, %v6647_v34 }
 0x93a   :  { %v6690_v56 = vpop.f32.mrf.mxu2 }
 0x93b   :  { %v6691_v18 = vadd.f32 %v6690_v56, %v6668_v25 }
 0x93d   :  { %v8221_v5 = vpop.permute.xlu2 %8220  ;;  %v6711_v42 = vadd.f32 %v6710_v26, %v6691_v18 }
 0x93e   :  { %v8222_v62 = vunpack.i.l.bf16 %v8221_v5  ;;  %v8223_v23 = vunpack.i.h.bf16 %v8221_v5 }
 0x940   :  { %v6721_v31 = vsel %vm6553_vm5, %v8222_v62, %v15143_v16  ;;  %v7842_v16 = vld [vmem:[%s15318_s3 + $0x1f8] sm:$0xff]  ;;  %v6793_v52 = vpop.f32.mrf.mxu3 }
 0x941   :  { %v6728_v17 = vmax.f32 %v14760_v37, %v6721_v31  ;;  %v7843_v37 = vld [vmem:[%s15318_s3 + $0x200] sm:$0xff] }
 0x942   :  { %6851 = vmatpush.msrb.mxu1 %v7843_v37 }
 0x943   :  { %v6730_v21 = vmax.f32 %v6728_v17, 0.0 }
 0x944   :  { %6852 = vmatpush.msrb.mxu1 %v7842_v16 }
 0x945   :  { %6772 = vmatmul.f32.vlgmr.msra.gmra.mxu0 %v6730_v21 }
 0x946   :  { %6853 = vmatpush.msrb.mxu1 %v7841_v27 }
 0x948   :  { %6854 = vmatpush.msrb.mxu1 %v7840_v11 }
 0x94a   :  { %6855 = vmatpush.msrb.mxu1 %v7839_v54 }
 0x953   :  { %v6809_v41 = vpop.permute.xlu1 %6808 }
 0x995   :  { %v6804_v59 = vpop.permute.xlu0 %6803 }
 0x996   :  { %v6805_v8 = vsel %vm6553_vm5, %v8223_v23, %v6804_v59  ;;  %v6811_v0 = vsel %vm6560_vm3, %v6804_v59, %v6809_v41 }
 0x997   :  { %v6812_v35 = vmax.f32 %v15172_v30, %v6805_v8  ;;  %v6813_v38 = vmax.f32 %v15210_v12, %v6811_v0 }
 0x999   :  { %v6814_v45 = vmax.f32 %v6812_v35, 0.0  ;;  %v6815_v55 = vmax.f32 %v6813_v38, 0.0 }
 0x99b   :  { %6856 = vmatmul.f32.vlgmr.msrb.gmra.mxu1 %v6814_v45  ;;  %7859 = vmatmul.msk.f32.vlgmr.msrb.gmra.mxu3 %vm6626_vm4, %v6815_v55 }
 0x9c2   :  { %v6773_v1 = vpop.f32.mrf.mxu0 }
 0x9c3   :  { %v6794_v9 = vadd.f32 %v6793_v52, %v6773_v1 }
 0x9c5   :  { %v6796_v30 = vadd.f32 %v6794_v9, %v6711_v42 }
 0xa18   :  { %v6857_v47 = vpop.f32.mrf.mxu1 }
 0xa1e   :  { %v6877_v29 = vpop.f32.mrf.mxu3 }
 0xa1f   :  { %v6878_v22 = vadd.f32 %v6877_v29, %v6857_v47 }
 0xa21   :  { %v6880_v50 = vadd.f32 %v6878_v22, %v6796_v30 }
 0xa23   :  { %v6885_v19 = vadd.f32 %v8224_v44, %v6880_v50 }
 0xa25   :  { %v6887_v20 = vsel %vm6886_vm6, %v6885_v19, -inf }
 0xa26   :  { %6888 = vmax.xlane.f32.xlu0 %v6887_v20 }
 0xa99   :  { %v6889_v33 = vpop.xlane.xlu0 %6888 }
 0xa9a   :  { %v6890_v10 = vsub.f32 %v6885_v19, %v6889_v33 }
 0xa9c   :  { %v6891_v12 = vmul.f32 1.442695, %v6890_v10 }
 0xa9e   :  { %8225 = vpow2.f32 %v6891_v12 }
 0xaa4   :  { %v8226_v46 = vpop.eup %8225 }
 0xaa5   :  { %v6893_v58 = vsel %vm6886_vm6, %v8226_v46, 0.0 }
 0xaa6   :  { %6894 = vadd.xlane.f32.xlu1 %v6893_v58 }
 0xb19   :  { %v6895_v3 = vpop.xlane.xlu1 %6894 }
 0xb1a   :  { %8227 = vlog2.f32 %v6895_v3 }
 0xb20   :  { %v8228_v40 = vpop.eup %8227 }
 0xb21   :  { %v6897_v49 = vmul.f32 0.6931472, %v8228_v40 }
 0xb23   :  { %v6898_v61 = vsub.f32 %v6890_v10, %v6897_v49 }
 0xb25   :  { %6899 = vst.msk [vmem:[#allocation2] sm:$0xff] %vm6886_vm6, %v6898_v61 }
 0xb26   :  { %6910 = dma.vmem_to_hbm [thread:$0]  %s6906_s9, 128, %s6908_s27, [#allocation3]  }
 0xb27   :  { %8285 = dma.done.wait [#allocation3], 128  }
 0xb28   :  { %8286 = vsyncadd [#allocation3], 4294967168 }
 0xb29   :  { %6915 = vsyncpa [#allocation3], 1 }

</bundles_post_ra>
